<compile_context>
chip_gen: v7x
topology: tpu7x:2x2x1
jax: 0.10.0
libtpu: 0.0.40
codegen_flags: <defaults>
</compile_context>

<pallas_src>
import functools

import jax
import jax.numpy as jnp
from jax import lax
from jax.experimental import pallas as pl
from jax.experimental.pallas import tpu as pltpu

BN_EPS = 1e-5
ACT_DTYPE = jnp.bfloat16          # activation / MXU-input dtype (f32 accumulate)
MAX_TILE_M = 256                  # output positions per grid step
LANE = 128                        # channel padding target (lane-dense stores)
VMEM_LIMIT = 32 * 1024 * 1024     # safe scoped-VMEM request on v5e/v6e/v7x


def _round_up(x, m):
    return ((x + m - 1) // m) * m


# ---------------------------------------------------------------------------
# Pallas kernels
# ---------------------------------------------------------------------------
def _conv_matmul_kernel(*refs, add_bias, compute_stats):
    """One M-tile: patches @ W on the MXU (bf16 in, f32 acc) [+ bias].
    Optionally emits per-tile per-channel (sum, sum-of-squares) BN partials."""
    idx = 2
    p_ref, w_ref = refs[0], refs[1]
    b_ref = None
    if add_bias:
        b_ref = refs[idx]
        idx += 1
    y_ref = refs[idx]
    idx += 1
    stats_ref = refs[idx] if compute_stats else None

    y = jnp.dot(p_ref[...], w_ref[...], preferred_element_type=jnp.float32)
    if add_bias:
        y = y + b_ref[...]                      # (tile_m, Cp) + (1, Cp)
    y_ref[...] = y.astype(y_ref.dtype)

    if compute_stats:
        s1 = jnp.sum(y, axis=0, keepdims=True)      # (1, Cp)
        s2 = jnp.sum(y * y, axis=0, keepdims=True)  # (1, Cp)
        stats_ref[...] = jnp.concatenate([s1, s2], axis=0).reshape(1, 2, -1)


def _bn_act_kernel(*refs, apply_relu, has_residual):
    """One M-tile: y*scale + shift (folded BN), optional ReLU, optional residual."""
    if has_residual:
        y_ref, sc_ref, sh_ref, r_ref, o_ref = refs
    else:
        y_ref, sc_ref, sh_ref, o_ref = refs
        r_ref = None
    y = y_ref[...].astype(jnp.float32) * sc_ref[...] + sh_ref[...]
    if apply_relu:
        y = jnp.maximum(y, 0.0)
    if r_ref is not None:
        y = y + r_ref[...].astype(jnp.float32)
    o_ref[...] = y.astype(o_ref.dtype)


# ---------------------------------------------------------------------------
# pallas_call wrappers (tiled over M, "parallel" grid axis)
# ---------------------------------------------------------------------------
def conv_matmul(patches, w, b, *, tile_m, compute_stats, out_dtype):
    """patches: (Mp, K) bf16, w: (K, Cp) bf16 -> y (Mp, Cp) [+ stats (T, 2, Cp)]."""
    mp, kdim = patches.shape
    cp = w.shape[1]
    grid = (mp // tile_m,)
    add_bias = b is not None

    inputs = [patches, w]
    in_specs = [pl.BlockSpec((tile_m, kdim), lambda i: (i, 0)),
                pl.BlockSpec((kdim, cp), lambda i: (0, 0))]
    if add_bias:
        inputs.append(b.reshape(1, cp).astype(jnp.float32))
        in_specs.append(pl.BlockSpec((1, cp), lambda i: (0, 0)))

    out_shape = [jax.ShapeDtypeStruct((mp, cp), out_dtype)]
    out_specs = [pl.BlockSpec((tile_m, cp), lambda i: (i, 0))]
    if compute_stats:
        out_shape.append(jax.ShapeDtypeStruct((grid[0], 2, cp), jnp.float32))
        out_specs.append(pl.BlockSpec((1, 2, cp), lambda i: (i, 0, 0)))

    kernel = functools.partial(_conv_matmul_kernel,
                               add_bias=add_bias, compute_stats=compute_stats)
    bytes_accessed = (patches.size * patches.dtype.itemsize
                      + w.size * w.dtype.itemsize
                      + mp * cp * jnp.dtype(out_dtype).itemsize)
    cost = pl.CostEstimate(flops=2 * mp * kdim * cp, transcendentals=0,
                           bytes_accessed=int(bytes_accessed))

    out = pl.pallas_call(
        kernel,
        out_shape=tuple(out_shape),
        grid=grid,
        in_specs=in_specs,
        out_specs=tuple(out_specs),
        compiler_params=pltpu.CompilerParams(
            dimension_semantics=("parallel",),
            vmem_limit_bytes=VMEM_LIMIT),
        cost_estimate=cost,
    )(*inputs)
    return out if compute_stats else out[0]


def bn_act(y, scale, shift, residual, *, tile_m, apply_relu, out_dtype):
    """Folded-BN + ReLU + residual, tiled over M."""
    mp, cp = y.shape
    grid = (mp // tile_m,)
    inputs = [y, scale.reshape(1, cp).astype(jnp.float32),
              shift.reshape(1, cp).astype(jnp.float32)]
    in_specs = [pl.BlockSpec((tile_m, cp), lambda i: (i, 0)),
                pl.BlockSpec((1, cp), lambda i: (0, 0)),
                pl.BlockSpec((1, cp), lambda i: (0, 0))]
    if residual is not None:
        inputs.append(residual)
        in_specs.append(pl.BlockSpec((tile_m, cp), lambda i: (i, 0)))

    kernel = functools.partial(_bn_act_kernel, apply_relu=apply_relu,
                               has_residual=residual is not None)
    return pl.pallas_call(
        kernel,
        out_shape=jax.ShapeDtypeStruct((mp, cp), out_dtype),
        grid=grid,
        in_specs=in_specs,
        out_specs=pl.BlockSpec((tile_m, cp), lambda i: (i, 0)),
        compiler_params=pltpu.CompilerParams(
            dimension_semantics=("parallel",),
            vmem_limit_bytes=VMEM_LIMIT),
    )(*inputs)


# ---------------------------------------------------------------------------
# Plain-JAX glue: im2col (with fused nearest-upsample), layer wrapper, init
# ---------------------------------------------------------------------------
def im2col(x, ksize, stride, upsample=1):
    """NHWC im2col with conv 'same'-style padding (pad = ksize//2) applied after
    a nearest-neighbour `upsample`; the upsampled tensor is never materialized.
    Returns (N*Ho*Wo, ksize*ksize*C) patches and output geometry.
    # TODO(synk): fold this HBM im2col into the conv kernel via manual halo DMA
    # (memory_space=pl.ANY + make_async_copy) to remove the k*k traffic blow-up.
    """
    n, h, w, c = x.shape
    pad = ksize // 2
    hu, wu = h * upsample, w * upsample
    ho = (hu + 2 * pad - ksize) // stride + 1
    wo = (wu + 2 * pad - ksize) // stride + 1

    cols = []
    if upsample == 1:
        xp = jnp.pad(x, ((0, 0), (pad, pad), (pad, pad), (0, 0)))
        for kh in range(ksize):
            for kw in range(ksize):
                sl = xp[:, kh:kh + (ho - 1) * stride + 1:stride,
                        kw:kw + (wo - 1) * stride + 1:stride, :]
                cols.append(sl)
    else:
        pad_o = -(-pad // upsample)  # ceil(pad / upsample)
        xp = jnp.pad(x, ((0, 0), (pad_o, pad_o), (pad_o, pad_o), (0, 0)))
        for kh in range(ksize):
            ridx = jnp.asarray(
                [(r * stride + kh - pad) // upsample + pad_o for r in range(ho)],
                dtype=jnp.int32)
            rows = jnp.take(xp, ridx, axis=1)
            for kw in range(ksize):
                cidx = jnp.asarray(
                    [(q * stride + kw - pad) // upsample + pad_o for q in range(wo)],
                    dtype=jnp.int32)
                cols.append(jnp.take(rows, cidx, axis=2))

    patches = jnp.concatenate(cols, axis=-1)      # (N, Ho, Wo, k*k*C)
    return patches.reshape(n * ho * wo, ksize * ksize * c), (n, ho, wo)


def conv_layer(x, p, ksize, stride, *, upsample=1, apply_bn=True,
               apply_relu=True, residual=None, out_dtype=ACT_DTYPE):
    patches, (n, ho, wo) = im2col(x, ksize, stride, upsample)
    m, _ = patches.shape
    cout = p['w'].shape[1]
    cp = _round_up(cout, LANE)                       # lane-dense output channels
    tile_m = min(MAX_TILE_M, _round_up(m, 16))
    m_pad = _round_up(m, tile_m)

    patches = jnp.pad(patches, ((0, m_pad - m), (0, 0))).astype(ACT_DTYPE)
    w = jnp.pad(p['w'], ((0, 0), (0, cp - cout))).astype(ACT_DTYPE)

    if apply_bn:
        # Conv bias is exactly cancelled by training-mode BN mean subtraction ->
        # skip it (saves a VPU pass + an operand DMA per step). Zero-padded rows
        # then contribute exactly 0 to both sum and sum^2, so dividing by the
        # true M keeps the statistics exact.
        y, stats = conv_matmul(patches, w, None, tile_m=tile_m,
                               compute_stats=True, out_dtype=ACT_DTYPE)
        tot = jnp.sum(stats, axis=0)                        # (2, Cp) f32
        mean = tot[0] / m
        var = jnp.maximum(tot[1] / m - mean * mean, 0.0)    # biased variance
        gamma = jnp.pad(p['gamma'], (0, cp - cout))
        beta = jnp.pad(p['beta'], (0, cp - cout))
        scale = gamma * lax.rsqrt(var + BN_EPS)
        shift = beta - mean * scale
        res_p = None
        if residual is not None:
            res_flat = residual.reshape(-1, residual.shape[-1])
            res_p = jnp.pad(
                res_flat, ((0, m_pad - m), (0, cp - res_flat.shape[-1]))
            ).astype(ACT_DTYPE)
        out = bn_act(y, scale, shift, res_p, tile_m=tile_m,
                     apply_relu=apply_relu, out_dtype=out_dtype)
    else:
        # Plain conv + bias (output layer): single fused pass, f32 output.
        b = jnp.pad(p['b'], (0, cp - cout)).astype(jnp.float32)
        out = conv_matmul(patches, w, b, tile_m=tile_m,
                          compute_stats=False, out_dtype=out_dtype)

    return out[:m, :cout].reshape(n, ho, wo, cout)


def init_conv_params(key, k, cin, cout):
    kw_key, kb_key = jax.random.split(key)
    fan_in = cin * k * k
    bound = 1.0 / (fan_in ** 0.5)
    # Weight layout: (k*k*cin, cout) with row order [kh, kw, cin] — must match
    # the im2col concatenation order (it does).
    w = jax.random.uniform(kw_key, (k * k * cin, cout), jnp.float32, -bound, bound)
    b = jax.random.uniform(kb_key, (cout,), jnp.float32, -bound, bound)
    gamma = jnp.ones((cout,), jnp.float32)   # BatchNorm2d affine default init
    beta = jnp.zeros((cout,), jnp.float32)
    return dict(w=w, b=b, gamma=gamma, beta=beta)


def init_transformer_params(key):
    keys = jax.random.split(key, 16)
    params = {
        'conv1': init_conv_params(keys[0], 9, 3, 32),
        'conv2': init_conv_params(keys[1], 3, 32, 64),
        'conv3': init_conv_params(keys[2], 3, 64, 128),
        'up1': init_conv_params(keys[3], 3, 128, 64),
        'up2': init_conv_params(keys[4], 3, 64, 32),
        'last': init_conv_params(keys[5], 9, 32, 3),
    }
    for i in range(5):
        k1, k2 = jax.random.split(keys[6 + i])
        params[f'res{i + 1}'] = {
            'c1': init_conv_params(k1, 3, 128, 128),
            'c2': init_conv_params(k2, 3, 128, 128),
        }
    return params


# ---------------------------------------------------------------------------
# Full forward pass (mirrors Transformer.forward)
# ---------------------------------------------------------------------------
def transformer_forward(params, x_nchw):
    x = jnp.transpose(x_nchw, (0, 2, 3, 1)).astype(ACT_DTYPE)  # NCHW -> NHWC

    # Downsampling
    x = conv_layer(x, params['conv1'], 9, 1)
    x = conv_layer(x, params['conv2'], 3, 2)
    x = conv_layer(x, params['conv3'], 3, 2)

    # Residual blocks: conv+BN+ReLU, conv+BN, + residual (add fused in kernel 2)
    for i in range(5):
        p = params[f'res{i + 1}']
        h = conv_layer(x, p['c1'], 3, 1)
        x = conv_layer(h, p['c2'], 3, 1, apply_relu=False, residual=x)

    # Upsampling: nearest x2 folded into the conv's im2col gather
    x = conv_layer(x, params['up1'], 3, 1, upsample=2)
    x = conv_layer(x, params['up2'], 3, 1, upsample=2)

    # Output conv: bias, no BN, no activation (the module applies no tanh)
    x = conv_layer(x, params['last'], 9, 1, apply_bn=False, apply_relu=False,
                   out_dtype=jnp.float32)

    return jnp.transpose(x, (0, 3, 1, 2))  # NHWC -> NCHW, float32


if __name__ == "__main__":
    key = jax.random.PRNGKey(0)
    pkey, xkey = jax.random.split(key)
    params = init_transformer_params(pkey)

    # Small image batch: (N=2, C=3, H=16, W=16), NCHW like PyTorch.
    x = jax.random.normal(xkey, (2, 3, 16, 16), dtype=jnp.float32)

    fwd = jax.jit(transformer_forward)
    out = fwd(params, x)
    out = jax.block_until_ready(out)

    assert out.shape == (2, 3, 16, 16), out.shape
    assert out.dtype == jnp.float32
    assert bool(jnp.all(jnp.isfinite(out)))
    print("KERNEL_OK")
</pallas_src>

<mosaic_0001>
module attributes {stable_mosaic.version = 11 : i64} {
  func.func @_conv_matmul_kernel(%arg0: i32, %arg1: memref<256x243xbf16, #tpu.memory_space<vmem>>, %arg2: memref<243x128xbf16, #tpu.memory_space<vmem>>, %arg3: memref<256x128xbf16, #tpu.memory_space<vmem>>, %arg4: memref<1x2x128xf32, #tpu.memory_space<vmem>>) attributes {dimension_semantics = [#tpu.dimension_semantics<parallel>], iteration_bounds = array<i64: 2>, scalar_prefetch = 0 : i64, scratch_operands = 0 : i64, tpu.core_type = #tpu.core_type<tc>, window_params = [{transform_indices = @transform_0, window_bounds = array<i64: 256, 243>}, {pipeline_mode = #tpu.pipeline_mode<synchronous>, transform_indices = @transform_1, window_bounds = array<i64: 243, 128>}, {transform_indices = @transform_2, window_bounds = array<i64: 256, 128>}, {transform_indices = @transform_3, window_bounds = array<i64: 1, 2, 128>}]} {
    %c0 = arith.constant 0 : index
    %c0_0 = arith.constant 0 : index
    %0 = vector.load %arg1[%c0, %c0_0] : memref<256x243xbf16, #tpu.memory_space<vmem>>, vector<256x243xbf16>
    %c0_1 = arith.constant 0 : index
    %c0_2 = arith.constant 0 : index
    %1 = vector.load %arg2[%c0_1, %c0_2] : memref<243x128xbf16, #tpu.memory_space<vmem>>, vector<243x128xbf16>
    %cst = arith.constant dense<0.000000e+00> : vector<256x128xf32>
    %2 = tpu.matmul %0, %1, %cst {dimension_numbers = #tpu.dot_dimension_numbers<[1], [0], [0], [1], [0, 0, 1, 1], [], []>} : vector<256x243xbf16>, vector<243x128xbf16>, vector<256x128xf32> -> vector<256x128xf32>
    %3 = arith.truncf %2 : vector<256x128xf32> to vector<256x128xbf16>
    %c0_3 = arith.constant 0 : index
    %c0_4 = arith.constant 0 : index
    %4 = vector.load %arg3[%c0_3, %c0_4] : memref<256x128xbf16, #tpu.memory_space<vmem>>, vector<256x128xbf16>
    tpu.vector_store %arg3[%c0_3, %c0_4], %3 {strides = array<i32>} : memref<256x128xbf16, #tpu.memory_space<vmem>>, vector<256x128xbf16>,
    %cst_5 = arith.constant dense<0.000000e+00> : vector<128xf32>
    %5 = vector.multi_reduction <add>, %2, %cst_5 [0] : vector<256x128xf32> to vector<128xf32>
    %6 = vector.shape_cast %5 : vector<128xf32> to vector<1x128xf32>
    %7 = arith.mulf %2, %2 : vector<256x128xf32>
    %cst_6 = arith.constant dense<0.000000e+00> : vector<128xf32>
    %8 = vector.multi_reduction <add>, %7, %cst_6 [0] : vector<256x128xf32> to vector<128xf32>
    %9 = vector.shape_cast %8 : vector<128xf32> to vector<1x128xf32>
    %10 = tpu.concatenate %6, %9 in 0 : vector<1x128xf32>, vector<1x128xf32> -> vector<2x128xf32>
    %11 = vector.shape_cast %10 : vector<2x128xf32> to vector<1x2x128xf32>
    %c0_7 = arith.constant 0 : index
    %c0_8 = arith.constant 0 : index
    %c0_9 = arith.constant 0 : index
    %12 = vector.load %arg4[%c0_7, %c0_8, %c0_9] : memref<1x2x128xf32, #tpu.memory_space<vmem>>, vector<1x2x128xf32>
    tpu.vector_store %arg4[%c0_7, %c0_8, %c0_9], %11 {strides = array<i32>} : memref<1x2x128xf32, #tpu.memory_space<vmem>>, vector<1x2x128xf32>,
    return
  }
  func.func @transform_0(%arg0: i32) -> (i32, i32) {
    %c0_i32 = arith.constant 0 : i32
    %c0_i32_0 = arith.constant 0 : i32
    return %arg0, %c0_i32 : i32, i32
  }
  func.func @transform_1(%arg0: i32) -> (i32, i32) {
    %c0_i32 = arith.constant 0 : i32
    %c0_i32_0 = arith.constant 0 : i32
    %c0_i32_1 = arith.constant 0 : i32
    return %c0_i32, %c0_i32_0 : i32, i32
  }
  func.func @transform_2(%arg0: i32) -> (i32, i32) {
    %c0_i32 = arith.constant 0 : i32
    %c0_i32_0 = arith.constant 0 : i32
    return %arg0, %c0_i32 : i32, i32
  }
  func.func @transform_3(%arg0: i32) -> (i32, i32, i32) {
    %c0_i32 = arith.constant 0 : i32
    %c0_i32_0 = arith.constant 0 : i32
    %c0_i32_1 = arith.constant 0 : i32
    return %arg0, %c0_i32, %c0_i32_0 : i32, i32, i32
  }
}

module attributes {stable_mosaic.version = 11 : i64} {
  func.func @_bn_act_kernel(%arg0: i32, %arg1: memref<256x128xbf16, #tpu.memory_space<vmem>>, %arg2: memref<1x128xf32, #tpu.memory_space<vmem>>, %arg3: memref<1x128xf32, #tpu.memory_space<vmem>>, %arg4: memref<256x128xbf16, #tpu.memory_space<vmem>>) attributes {dimension_semantics = [#tpu.dimension_semantics<parallel>], iteration_bounds = array<i64: 2>, scalar_prefetch = 0 : i64, scratch_operands = 0 : i64, tpu.core_type = #tpu.core_type<tc>, window_params = [{transform_indices = @transform_0, window_bounds = array<i64: 256, 128>}, {pipeline_mode = #tpu.pipeline_mode<synchronous>, transform_indices = @transform_1, window_bounds = array<i64: 1, 128>}, {pipeline_mode = #tpu.pipeline_mode<synchronous>, transform_indices = @transform_2, window_bounds = array<i64: 1, 128>}, {transform_indices = @transform_3, window_bounds = array<i64: 256, 128>}]} {
    %c0 = arith.constant 0 : index
    %c0_0 = arith.constant 0 : index
    %0 = vector.load %arg1[%c0, %c0_0] : memref<256x128xbf16, #tpu.memory_space<vmem>>, vector<256x128xbf16>
    %1 = arith.extf %0 : vector<256x128xbf16> to vector<256x128xf32>
    %c0_1 = arith.constant 0 : index
    %c0_2 = arith.constant 0 : index
    %2 = vector.load %arg2[%c0_1, %c0_2] : memref<1x128xf32, #tpu.memory_space<vmem>>, vector<1x128xf32>
    %3 = vector.broadcast %2 : vector<1x128xf32> to vector<256x128xf32>
    %4 = arith.mulf %1, %3 : vector<256x128xf32>
    %c0_3 = arith.constant 0 : index
    %c0_4 = arith.constant 0 : index
    %5 = vector.load %arg3[%c0_3, %c0_4] : memref<1x128xf32, #tpu.memory_space<vmem>>, vector<1x128xf32>
    %6 = vector.broadcast %5 : vector<1x128xf32> to vector<256x128xf32>
    %7 = arith.addf %4, %6 : vector<256x128xf32>
    %cst = arith.constant 0.000000e+00 : f32
    %8 = vector.broadcast %cst : f32 to vector<256x128xf32>
    %9 = arith.maximumf %7, %8 : vector<256x128xf32>
    %10 = arith.truncf %9 : vector<256x128xf32> to vector<256x128xbf16>
    %c0_5 = arith.constant 0 : index
    %c0_6 = arith.constant 0 : index
    %11 = vector.load %arg4[%c0_5, %c0_6] : memref<256x128xbf16, #tpu.memory_space<vmem>>, vector<256x128xbf16>
    tpu.vector_store %arg4[%c0_5, %c0_6], %10 {strides = array<i32>} : memref<256x128xbf16, #tpu.memory_space<vmem>>, vector<256x128xbf16>,
    return
  }
  func.func @transform_0(%arg0: i32) -> (i32, i32) {
    %c0_i32 = arith.constant 0 : i32
    %c0_i32_0 = arith.constant 0 : i32
    return %arg0, %c0_i32 : i32, i32
  }
  func.func @transform_1(%arg0: i32) -> (i32, i32) {
    %c0_i32 = arith.constant 0 : i32
    %c0_i32_0 = arith.constant 0 : i32
    %c0_i32_1 = arith.constant 0 : i32
    return %c0_i32, %c0_i32_0 : i32, i32
  }
  func.func @transform_2(%arg0: i32) -> (i32, i32) {
    %c0_i32 = arith.constant 0 : i32
    %c0_i32_0 = arith.constant 0 : i32
    %c0_i32_1 = arith.constant 0 : i32
    return %c0_i32, %c0_i32_0 : i32, i32
  }
  func.func @transform_3(%arg0: i32) -> (i32, i32) {
    %c0_i32 = arith.constant 0 : i32
    %c0_i32_0 = arith.constant 0 : i32
    return %arg0, %c0_i32 : i32, i32
  }
}

module attributes {stable_mosaic.version = 11 : i64} {
  func.func @_conv_matmul_kernel(%arg0: i32, %arg1: memref<128x288xbf16, #tpu.memory_space<vmem>>, %arg2: memref<288x128xbf16, #tpu.memory_space<vmem>>, %arg3: memref<128x128xbf16, #tpu.memory_space<vmem>>, %arg4: memref<1x2x128xf32, #tpu.memory_space<vmem>>) attributes {dimension_semantics = [#tpu.dimension_semantics<parallel>], iteration_bounds = array<i64: 1>, scalar_prefetch = 0 : i64, scratch_operands = 0 : i64, tpu.core_type = #tpu.core_type<tc>, window_params = [{transform_indices = @transform_0, window_bounds = array<i64: 128, 288>}, {pipeline_mode = #tpu.pipeline_mode<synchronous>, transform_indices = @transform_1, window_bounds = array<i64: 288, 128>}, {transform_indices = @transform_2, window_bounds = array<i64: 128, 128>}, {transform_indices = @transform_3, window_bounds = array<i64: 1, 2, 128>}]} {
    %c0 = arith.constant 0 : index
    %c0_0 = arith.constant 0 : index
    %0 = vector.load %arg1[%c0, %c0_0] : memref<128x288xbf16, #tpu.memory_space<vmem>>, vector<128x288xbf16>
    %c0_1 = arith.constant 0 : index
    %c0_2 = arith.constant 0 : index
    %1 = vector.load %arg2[%c0_1, %c0_2] : memref<288x128xbf16, #tpu.memory_space<vmem>>, vector<288x128xbf16>
    %cst = arith.constant dense<0.000000e+00> : vector<128x128xf32>
    %2 = tpu.matmul %0, %1, %cst {dimension_numbers = #tpu.dot_dimension_numbers<[1], [0], [0], [1], [0, 0, 1, 1], [], []>} : vector<128x288xbf16>, vector<288x128xbf16>, vector<128x128xf32> -> vector<128x128xf32>
    %3 = arith.truncf %2 : vector<128x128xf32> to vector<128x128xbf16>
    %c0_3 = arith.constant 0 : index
    %c0_4 = arith.constant 0 : index
    %4 = vector.load %arg3[%c0_3, %c0_4] : memref<128x128xbf16, #tpu.memory_space<vmem>>, vector<128x128xbf16>
    tpu.vector_store %arg3[%c0_3, %c0_4], %3 {strides = array<i32>} : memref<128x128xbf16, #tpu.memory_space<vmem>>, vector<128x128xbf16>,
    %cst_5 = arith.constant dense<0.000000e+00> : vector<128xf32>
    %5 = vector.multi_reduction <add>, %2, %cst_5 [0] : vector<128x128xf32> to vector<128xf32>
    %6 = vector.shape_cast %5 : vector<128xf32> to vector<1x128xf32>
    %7 = arith.mulf %2, %2 : vector<128x128xf32>
    %cst_6 = arith.constant dense<0.000000e+00> : vector<128xf32>
    %8 = vector.multi_reduction <add>, %7, %cst_6 [0] : vector<128x128xf32> to vector<128xf32>
    %9 = vector.shape_cast %8 : vector<128xf32> to vector<1x128xf32>
    %10 = tpu.concatenate %6, %9 in 0 : vector<1x128xf32>, vector<1x128xf32> -> vector<2x128xf32>
    %11 = vector.shape_cast %10 : vector<2x128xf32> to vector<1x2x128xf32>
    %c0_7 = arith.constant 0 : index
    %c0_8 = arith.constant 0 : index
    %c0_9 = arith.constant 0 : index
    %12 = vector.load %arg4[%c0_7, %c0_8, %c0_9] : memref<1x2x128xf32, #tpu.memory_space<vmem>>, vector<1x2x128xf32>
    tpu.vector_store %arg4[%c0_7, %c0_8, %c0_9], %11 {strides = array<i32>} : memref<1x2x128xf32, #tpu.memory_space<vmem>>, vector<1x2x128xf32>,
    return
  }
  func.func @transform_0(%arg0: i32) -> (i32, i32) {
    %c0_i32 = arith.constant 0 : i32
    %c0_i32_0 = arith.constant 0 : i32
    return %arg0, %c0_i32 : i32, i32
  }
  func.func @transform_1(%arg0: i32) -> (i32, i32) {
    %c0_i32 = arith.constant 0 : i32
    %c0_i32_0 = arith.constant 0 : i32
    %c0_i32_1 = arith.constant 0 : i32
    return %c0_i32, %c0_i32_0 : i32, i32
  }
  func.func @transform_2(%arg0: i32) -> (i32, i32) {
    %c0_i32 = arith.constant 0 : i32
    %c0_i32_0 = arith.constant 0 : i32
    return %arg0, %c0_i32 : i32, i32
  }
  func.func @transform_3(%arg0: i32) -> (i32, i32, i32) {
    %c0_i32 = arith.constant 0 : i32
    %c0_i32_0 = arith.constant 0 : i32
    %c0_i32_1 = arith.constant 0 : i32
    return %arg0, %c0_i32, %c0_i32_0 : i32, i32, i32
  }
}

module attributes {stable_mosaic.version = 11 : i64} {
  func.func @_bn_act_kernel(%arg0: i32, %arg1: memref<128x128xbf16, #tpu.memory_space<vmem>>, %arg2: memref<1x128xf32, #tpu.memory_space<vmem>>, %arg3: memref<1x128xf32, #tpu.memory_space<vmem>>, %arg4: memref<128x128xbf16, #tpu.memory_space<vmem>>) attributes {dimension_semantics = [#tpu.dimension_semantics<parallel>], iteration_bounds = array<i64: 1>, scalar_prefetch = 0 : i64, scratch_operands = 0 : i64, tpu.core_type = #tpu.core_type<tc>, window_params = [{transform_indices = @transform_0, window_bounds = array<i64: 128, 128>}, {pipeline_mode = #tpu.pipeline_mode<synchronous>, transform_indices = @transform_1, window_bounds = array<i64: 1, 128>}, {pipeline_mode = #tpu.pipeline_mode<synchronous>, transform_indices = @transform_2, window_bounds = array<i64: 1, 128>}, {transform_indices = @transform_3, window_bounds = array<i64: 128, 128>}]} {
    %c0 = arith.constant 0 : index
    %c0_0 = arith.constant 0 : index
    %0 = vector.load %arg1[%c0, %c0_0] : memref<128x128xbf16, #tpu.memory_space<vmem>>, vector<128x128xbf16>
    %1 = arith.extf %0 : vector<128x128xbf16> to vector<128x128xf32>
    %c0_1 = arith.constant 0 : index
    %c0_2 = arith.constant 0 : index
    %2 = vector.load %arg2[%c0_1, %c0_2] : memref<1x128xf32, #tpu.memory_space<vmem>>, vector<1x128xf32>
    %3 = vector.broadcast %2 : vector<1x128xf32> to vector<128x128xf32>
    %4 = arith.mulf %1, %3 : vector<128x128xf32>
    %c0_3 = arith.constant 0 : index
    %c0_4 = arith.constant 0 : index
    %5 = vector.load %arg3[%c0_3, %c0_4] : memref<1x128xf32, #tpu.memory_space<vmem>>, vector<1x128xf32>
    %6 = vector.broadcast %5 : vector<1x128xf32> to vector<128x128xf32>
    %7 = arith.addf %4, %6 : vector<128x128xf32>
    %cst = arith.constant 0.000000e+00 : f32
    %8 = vector.broadcast %cst : f32 to vector<128x128xf32>
    %9 = arith.maximumf %7, %8 : vector<128x128xf32>
    %10 = arith.truncf %9 : vector<128x128xf32> to vector<128x128xbf16>
    %c0_5 = arith.constant 0 : index
    %c0_6 = arith.constant 0 : index
    %11 = vector.load %arg4[%c0_5, %c0_6] : memref<128x128xbf16, #tpu.memory_space<vmem>>, vector<128x128xbf16>
    tpu.vector_store %arg4[%c0_5, %c0_6], %10 {strides = array<i32>} : memref<128x128xbf16, #tpu.memory_space<vmem>>, vector<128x128xbf16>,
    return
  }
  func.func @transform_0(%arg0: i32) -> (i32, i32) {
    %c0_i32 = arith.constant 0 : i32
    %c0_i32_0 = arith.constant 0 : i32
    return %arg0, %c0_i32 : i32, i32
  }
  func.func @transform_1(%arg0: i32) -> (i32, i32) {
    %c0_i32 = arith.constant 0 : i32
    %c0_i32_0 = arith.constant 0 : i32
    %c0_i32_1 = arith.constant 0 : i32
    return %c0_i32, %c0_i32_0 : i32, i32
  }
  func.func @transform_2(%arg0: i32) -> (i32, i32) {
    %c0_i32 = arith.constant 0 : i32
    %c0_i32_0 = arith.constant 0 : i32
    %c0_i32_1 = arith.constant 0 : i32
    return %c0_i32, %c0_i32_0 : i32, i32
  }
  func.func @transform_3(%arg0: i32) -> (i32, i32) {
    %c0_i32 = arith.constant 0 : i32
    %c0_i32_0 = arith.constant 0 : i32
    return %arg0, %c0_i32 : i32, i32
  }
}

module attributes {stable_mosaic.version = 11 : i64} {
  func.func @_conv_matmul_kernel(%arg0: i32, %arg1: memref<32x576xbf16, #tpu.memory_space<vmem>>, %arg2: memref<576x128xbf16, #tpu.memory_space<vmem>>, %arg3: memref<32x128xbf16, #tpu.memory_space<vmem>>, %arg4: memref<1x2x128xf32, #tpu.memory_space<vmem>>) attributes {dimension_semantics = [#tpu.dimension_semantics<parallel>], iteration_bounds = array<i64: 1>, scalar_prefetch = 0 : i64, scratch_operands = 0 : i64, tpu.core_type = #tpu.core_type<tc>, window_params = [{transform_indices = @transform_0, window_bounds = array<i64: 32, 576>}, {pipeline_mode = #tpu.pipeline_mode<synchronous>, transform_indices = @transform_1, window_bounds = array<i64: 576, 128>}, {transform_indices = @transform_2, window_bounds = array<i64: 32, 128>}, {transform_indices = @transform_3, window_bounds = array<i64: 1, 2, 128>}]} {
    %c0 = arith.constant 0 : index
    %c0_0 = arith.constant 0 : index
    %0 = vector.load %arg1[%c0, %c0_0] : memref<32x576xbf16, #tpu.memory_space<vmem>>, vector<32x576xbf16>
    %c0_1 = arith.constant 0 : index
    %c0_2 = arith.constant 0 : index
    %1 = vector.load %arg2[%c0_1, %c0_2] : memref<576x128xbf16, #tpu.memory_space<vmem>>, vector<576x128xbf16>
    %cst = arith.constant dense<0.000000e+00> : vector<32x128xf32>
    %2 = tpu.matmul %0, %1, %cst {dimension_numbers = #tpu.dot_dimension_numbers<[1], [0], [0], [1], [0, 0, 1, 1], [], []>} : vector<32x576xbf16>, vector<576x128xbf16>, vector<32x128xf32> -> vector<32x128xf32>
    %3 = arith.truncf %2 : vector<32x128xf32> to vector<32x128xbf16>
    %c0_3 = arith.constant 0 : index
    %c0_4 = arith.constant 0 : index
    %4 = vector.load %arg3[%c0_3, %c0_4] : memref<32x128xbf16, #tpu.memory_space<vmem>>, vector<32x128xbf16>
    tpu.vector_store %arg3[%c0_3, %c0_4], %3 {strides = array<i32>} : memref<32x128xbf16, #tpu.memory_space<vmem>>, vector<32x128xbf16>,
    %cst_5 = arith.constant dense<0.000000e+00> : vector<128xf32>
    %5 = vector.multi_reduction <add>, %2, %cst_5 [0] : vector<32x128xf32> to vector<128xf32>
    %6 = vector.shape_cast %5 : vector<128xf32> to vector<1x128xf32>
    %7 = arith.mulf %2, %2 : vector<32x128xf32>
    %cst_6 = arith.constant dense<0.000000e+00> : vector<128xf32>
    %8 = vector.multi_reduction <add>, %7, %cst_6 [0] : vector<32x128xf32> to vector<128xf32>
    %9 = vector.shape_cast %8 : vector<128xf32> to vector<1x128xf32>
    %10 = tpu.concatenate %6, %9 in 0 : vector<1x128xf32>, vector<1x128xf32> -> vector<2x128xf32>
    %11 = vector.shape_cast %10 : vector<2x128xf32> to vector<1x2x128xf32>
    %c0_7 = arith.constant 0 : index
    %c0_8 = arith.constant 0 : index
    %c0_9 = arith.constant 0 : index
    %12 = vector.load %arg4[%c0_7, %c0_8, %c0_9] : memref<1x2x128xf32, #tpu.memory_space<vmem>>, vector<1x2x128xf32>
    tpu.vector_store %arg4[%c0_7, %c0_8, %c0_9], %11 {strides = array<i32>} : memref<1x2x128xf32, #tpu.memory_space<vmem>>, vector<1x2x128xf32>,
    return
  }
  func.func @transform_0(%arg0: i32) -> (i32, i32) {
    %c0_i32 = arith.constant 0 : i32
    %c0_i32_0 = arith.constant 0 : i32
    return %arg0, %c0_i32 : i32, i32
  }
  func.func @transform_1(%arg0: i32) -> (i32, i32) {
    %c0_i32 = arith.constant 0 : i32
    %c0_i32_0 = arith.constant 0 : i32
    %c0_i32_1 = arith.constant 0 : i32
    return %c0_i32, %c0_i32_0 : i32, i32
  }
  func.func @transform_2(%arg0: i32) -> (i32, i32) {
    %c0_i32 = arith.constant 0 : i32
    %c0_i32_0 = arith.constant 0 : i32
    return %arg0, %c0_i32 : i32, i32
  }
  func.func @transform_3(%arg0: i32) -> (i32, i32, i32) {
    %c0_i32 = arith.constant 0 : i32
    %c0_i32_0 = arith.constant 0 : i32
    %c0_i32_1 = arith.constant 0 : i32
    return %arg0, %c0_i32, %c0_i32_0 : i32, i32, i32
  }
}

module attributes {stable_mosaic.version = 11 : i64} {
  func.func @_bn_act_kernel(%arg0: i32, %arg1: memref<32x128xbf16, #tpu.memory_space<vmem>>, %arg2: memref<1x128xf32, #tpu.memory_space<vmem>>, %arg3: memref<1x128xf32, #tpu.memory_space<vmem>>, %arg4: memref<32x128xbf16, #tpu.memory_space<vmem>>) attributes {dimension_semantics = [#tpu.dimension_semantics<parallel>], iteration_bounds = array<i64: 1>, scalar_prefetch = 0 : i64, scratch_operands = 0 : i64, tpu.core_type = #tpu.core_type<tc>, window_params = [{transform_indices = @transform_0, window_bounds = array<i64: 32, 128>}, {pipeline_mode = #tpu.pipeline_mode<synchronous>, transform_indices = @transform_1, window_bounds = array<i64: 1, 128>}, {pipeline_mode = #tpu.pipeline_mode<synchronous>, transform_indices = @transform_2, window_bounds = array<i64: 1, 128>}, {transform_indices = @transform_3, window_bounds = array<i64: 32, 128>}]} {
    %c0 = arith.constant 0 : index
    %c0_0 = arith.constant 0 : index
    %0 = vector.load %arg1[%c0, %c0_0] : memref<32x128xbf16, #tpu.memory_space<vmem>>, vector<32x128xbf16>
    %1 = arith.extf %0 : vector<32x128xbf16> to vector<32x128xf32>
    %c0_1 = arith.constant 0 : index
    %c0_2 = arith.constant 0 : index
    %2 = vector.load %arg2[%c0_1, %c0_2] : memref<1x128xf32, #tpu.memory_space<vmem>>, vector<1x128xf32>
    %3 = vector.broadcast %2 : vector<1x128xf32> to vector<32x128xf32>
    %4 = arith.mulf %1, %3 : vector<32x128xf32>
    %c0_3 = arith.constant 0 : index
    %c0_4 = arith.constant 0 : index
    %5 = vector.load %arg3[%c0_3, %c0_4] : memref<1x128xf32, #tpu.memory_space<vmem>>, vector<1x128xf32>
    %6 = vector.broadcast %5 : vector<1x128xf32> to vector<32x128xf32>
    %7 = arith.addf %4, %6 : vector<32x128xf32>
    %cst = arith.constant 0.000000e+00 : f32
    %8 = vector.broadcast %cst : f32 to vector<32x128xf32>
    %9 = arith.maximumf %7, %8 : vector<32x128xf32>
    %10 = arith.truncf %9 : vector<32x128xf32> to vector<32x128xbf16>
    %c0_5 = arith.constant 0 : index
    %c0_6 = arith.constant 0 : index
    %11 = vector.load %arg4[%c0_5, %c0_6] : memref<32x128xbf16, #tpu.memory_space<vmem>>, vector<32x128xbf16>
    tpu.vector_store %arg4[%c0_5, %c0_6], %10 {strides = array<i32>} : memref<32x128xbf16, #tpu.memory_space<vmem>>, vector<32x128xbf16>,
    return
  }
  func.func @transform_0(%arg0: i32) -> (i32, i32) {
    %c0_i32 = arith.constant 0 : i32
    %c0_i32_0 = arith.constant 0 : i32
    return %arg0, %c0_i32 : i32, i32
  }
  func.func @transform_1(%arg0: i32) -> (i32, i32) {
    %c0_i32 = arith.constant 0 : i32
    %c0_i32_0 = arith.constant 0 : i32
    %c0_i32_1 = arith.constant 0 : i32
    return %c0_i32, %c0_i32_0 : i32, i32
  }
  func.func @transform_2(%arg0: i32) -> (i32, i32) {
    %c0_i32 = arith.constant 0 : i32
    %c0_i32_0 = arith.constant 0 : i32
    %c0_i32_1 = arith.constant 0 : i32
    return %c0_i32, %c0_i32_0 : i32, i32
  }
  func.func @transform_3(%arg0: i32) -> (i32, i32) {
    %c0_i32 = arith.constant 0 : i32
    %c0_i32_0 = arith.constant 0 : i32
    return %arg0, %c0_i32 : i32, i32
  }
}

module attributes {stable_mosaic.version = 11 : i64} {
  func.func @_conv_matmul_kernel(%arg0: i32, %arg1: memref<32x1152xbf16, #tpu.memory_space<vmem>>, %arg2: memref<1152x128xbf16, #tpu.memory_space<vmem>>, %arg3: memref<32x128xbf16, #tpu.memory_space<vmem>>, %arg4: memref<1x2x128xf32, #tpu.memory_space<vmem>>) attributes {dimension_semantics = [#tpu.dimension_semantics<parallel>], iteration_bounds = array<i64: 1>, scalar_prefetch = 0 : i64, scratch_operands = 0 : i64, tpu.core_type = #tpu.core_type<tc>, window_params = [{transform_indices = @transform_0, window_bounds = array<i64: 32, 1152>}, {pipeline_mode = #tpu.pipeline_mode<synchronous>, transform_indices = @transform_1, window_bounds = array<i64: 1152, 128>}, {transform_indices = @transform_2, window_bounds = array<i64: 32, 128>}, {transform_indices = @transform_3, window_bounds = array<i64: 1, 2, 128>}]} {
    %c0 = arith.constant 0 : index
    %c0_0 = arith.constant 0 : index
    %0 = vector.load %arg1[%c0, %c0_0] : memref<32x1152xbf16, #tpu.memory_space<vmem>>, vector<32x1152xbf16>
    %c0_1 = arith.constant 0 : index
    %c0_2 = arith.constant 0 : index
    %1 = vector.load %arg2[%c0_1, %c0_2] : memref<1152x128xbf16, #tpu.memory_space<vmem>>, vector<1152x128xbf16>
    %cst = arith.constant dense<0.000000e+00> : vector<32x128xf32>
    %2 = tpu.matmul %0, %1, %cst {dimension_numbers = #tpu.dot_dimension_numbers<[1], [0], [0], [1], [0, 0, 1, 1], [], []>} : vector<32x1152xbf16>, vector<1152x128xbf16>, vector<32x128xf32> -> vector<32x128xf32>
    %3 = arith.truncf %2 : vector<32x128xf32> to vector<32x128xbf16>
    %c0_3 = arith.constant 0 : index
    %c0_4 = arith.constant 0 : index
    %4 = vector.load %arg3[%c0_3, %c0_4] : memref<32x128xbf16, #tpu.memory_space<vmem>>, vector<32x128xbf16>
    tpu.vector_store %arg3[%c0_3, %c0_4], %3 {strides = array<i32>} : memref<32x128xbf16, #tpu.memory_space<vmem>>, vector<32x128xbf16>,
    %cst_5 = arith.constant dense<0.000000e+00> : vector<128xf32>
    %5 = vector.multi_reduction <add>, %2, %cst_5 [0] : vector<32x128xf32> to vector<128xf32>
    %6 = vector.shape_cast %5 : vector<128xf32> to vector<1x128xf32>
    %7 = arith.mulf %2, %2 : vector<32x128xf32>
    %cst_6 = arith.constant dense<0.000000e+00> : vector<128xf32>
    %8 = vector.multi_reduction <add>, %7, %cst_6 [0] : vector<32x128xf32> to vector<128xf32>
    %9 = vector.shape_cast %8 : vector<128xf32> to vector<1x128xf32>
    %10 = tpu.concatenate %6, %9 in 0 : vector<1x128xf32>, vector<1x128xf32> -> vector<2x128xf32>
    %11 = vector.shape_cast %10 : vector<2x128xf32> to vector<1x2x128xf32>
    %c0_7 = arith.constant 0 : index
    %c0_8 = arith.constant 0 : index
    %c0_9 = arith.constant 0 : index
    %12 = vector.load %arg4[%c0_7, %c0_8, %c0_9] : memref<1x2x128xf32, #tpu.memory_space<vmem>>, vector<1x2x128xf32>
    tpu.vector_store %arg4[%c0_7, %c0_8, %c0_9], %11 {strides = array<i32>} : memref<1x2x128xf32, #tpu.memory_space<vmem>>, vector<1x2x128xf32>,
    return
  }
  func.func @transform_0(%arg0: i32) -> (i32, i32) {
    %c0_i32 = arith.constant 0 : i32
    %c0_i32_0 = arith.constant 0 : i32
    return %arg0, %c0_i32 : i32, i32
  }
  func.func @transform_1(%arg0: i32) -> (i32, i32) {
    %c0_i32 = arith.constant 0 : i32
    %c0_i32_0 = arith.constant 0 : i32
    %c0_i32_1 = arith.constant 0 : i32
    return %c0_i32, %c0_i32_0 : i32, i32
  }
  func.func @transform_2(%arg0: i32) -> (i32, i32) {
    %c0_i32 = arith.constant 0 : i32
    %c0_i32_0 = arith.constant 0 : i32
    return %arg0, %c0_i32 : i32, i32
  }
  func.func @transform_3(%arg0: i32) -> (i32, i32, i32) {
    %c0_i32 = arith.constant 0 : i32
    %c0_i32_0 = arith.constant 0 : i32
    %c0_i32_1 = arith.constant 0 : i32
    return %arg0, %c0_i32, %c0_i32_0 : i32, i32, i32
  }
}

module attributes {stable_mosaic.version = 11 : i64} {
  func.func @_bn_act_kernel(%arg0: i32, %arg1: memref<32x128xbf16, #tpu.memory_space<vmem>>, %arg2: memref<1x128xf32, #tpu.memory_space<vmem>>, %arg3: memref<1x128xf32, #tpu.memory_space<vmem>>, %arg4: memref<32x128xbf16, #tpu.memory_space<vmem>>, %arg5: memref<32x128xbf16, #tpu.memory_space<vmem>>) attributes {dimension_semantics = [#tpu.dimension_semantics<parallel>], iteration_bounds = array<i64: 1>, scalar_prefetch = 0 : i64, scratch_operands = 0 : i64, tpu.core_type = #tpu.core_type<tc>, window_params = [{transform_indices = @transform_0, window_bounds = array<i64: 32, 128>}, {pipeline_mode = #tpu.pipeline_mode<synchronous>, transform_indices = @transform_1, window_bounds = array<i64: 1, 128>}, {pipeline_mode = #tpu.pipeline_mode<synchronous>, transform_indices = @transform_2, window_bounds = array<i64: 1, 128>}, {transform_indices = @transform_3, window_bounds = array<i64: 32, 128>}, {transform_indices = @transform_4, window_bounds = array<i64: 32, 128>}]} {
    %c0 = arith.constant 0 : index
    %c0_0 = arith.constant 0 : index
    %0 = vector.load %arg1[%c0, %c0_0] : memref<32x128xbf16, #tpu.memory_space<vmem>>, vector<32x128xbf16>
    %1 = arith.extf %0 : vector<32x128xbf16> to vector<32x128xf32>
    %c0_1 = arith.constant 0 : index
    %c0_2 = arith.constant 0 : index
    %2 = vector.load %arg2[%c0_1, %c0_2] : memref<1x128xf32, #tpu.memory_space<vmem>>, vector<1x128xf32>
    %3 = vector.broadcast %2 : vector<1x128xf32> to vector<32x128xf32>
    %4 = arith.mulf %1, %3 : vector<32x128xf32>
    %c0_3 = arith.constant 0 : index
    %c0_4 = arith.constant 0 : index
    %5 = vector.load %arg3[%c0_3, %c0_4] : memref<1x128xf32, #tpu.memory_space<vmem>>, vector<1x128xf32>
    %6 = vector.broadcast %5 : vector<1x128xf32> to vector<32x128xf32>
    %7 = arith.addf %4, %6 : vector<32x128xf32>
    %c0_5 = arith.constant 0 : index
    %c0_6 = arith.constant 0 : index
    %8 = vector.load %arg4[%c0_5, %c0_6] : memref<32x128xbf16, #tpu.memory_space<vmem>>, vector<32x128xbf16>
    %9 = arith.extf %8 : vector<32x128xbf16> to vector<32x128xf32>
    %10 = arith.addf %7, %9 : vector<32x128xf32>
    %11 = arith.truncf %10 : vector<32x128xf32> to vector<32x128xbf16>
    %c0_7 = arith.constant 0 : index
    %c0_8 = arith.constant 0 : index
    %12 = vector.load %arg5[%c0_7, %c0_8] : memref<32x128xbf16, #tpu.memory_space<vmem>>, vector<32x128xbf16>
    tpu.vector_store %arg5[%c0_7, %c0_8], %11 {strides = array<i32>} : memref<32x128xbf16, #tpu.memory_space<vmem>>, vector<32x128xbf16>,
    return
  }
  func.func @transform_0(%arg0: i32) -> (i32, i32) {
    %c0_i32 = arith.constant 0 : i32
    %c0_i32_0 = arith.constant 0 : i32
    return %arg0, %c0_i32 : i32, i32
  }
  func.func @transform_1(%arg0: i32) -> (i32, i32) {
    %c0_i32 = arith.constant 0 : i32
    %c0_i32_0 = arith.constant 0 : i32
    %c0_i32_1 = arith.constant 0 : i32
    return %c0_i32, %c0_i32_0 : i32, i32
  }
  func.func @transform_2(%arg0: i32) -> (i32, i32) {
    %c0_i32 = arith.constant 0 : i32
    %c0_i32_0 = arith.constant 0 : i32
    %c0_i32_1 = arith.constant 0 : i32
    return %c0_i32, %c0_i32_0 : i32, i32
  }
  func.func @transform_3(%arg0: i32) -> (i32, i32) {
    %c0_i32 = arith.constant 0 : i32
    %c0_i32_0 = arith.constant 0 : i32
    return %arg0, %c0_i32 : i32, i32
  }
  func.func @transform_4(%arg0: i32) -> (i32, i32) {
    %c0_i32 = arith.constant 0 : i32
    %c0_i32_0 = arith.constant 0 : i32
    return %arg0, %c0_i32 : i32, i32
  }
}

module attributes {stable_mosaic.version = 11 : i64} {
  func.func @_conv_matmul_kernel(%arg0: i32, %arg1: memref<128x1152xbf16, #tpu.memory_space<vmem>>, %arg2: memref<1152x128xbf16, #tpu.memory_space<vmem>>, %arg3: memref<128x128xbf16, #tpu.memory_space<vmem>>, %arg4: memref<1x2x128xf32, #tpu.memory_space<vmem>>) attributes {dimension_semantics = [#tpu.dimension_semantics<parallel>], iteration_bounds = array<i64: 1>, scalar_prefetch = 0 : i64, scratch_operands = 0 : i64, tpu.core_type = #tpu.core_type<tc>, window_params = [{transform_indices = @transform_0, window_bounds = array<i64: 128, 1152>}, {pipeline_mode = #tpu.pipeline_mode<synchronous>, transform_indices = @transform_1, window_bounds = array<i64: 1152, 128>}, {transform_indices = @transform_2, window_bounds = array<i64: 128, 128>}, {transform_indices = @transform_3, window_bounds = array<i64: 1, 2, 128>}]} {
    %c0 = arith.constant 0 : index
    %c0_0 = arith.constant 0 : index
    %0 = vector.load %arg1[%c0, %c0_0] : memref<128x1152xbf16, #tpu.memory_space<vmem>>, vector<128x1152xbf16>
    %c0_1 = arith.constant 0 : index
    %c0_2 = arith.constant 0 : index
    %1 = vector.load %arg2[%c0_1, %c0_2] : memref<1152x128xbf16, #tpu.memory_space<vmem>>, vector<1152x128xbf16>
    %cst = arith.constant dense<0.000000e+00> : vector<128x128xf32>
    %2 = tpu.matmul %0, %1, %cst {dimension_numbers = #tpu.dot_dimension_numbers<[1], [0], [0], [1], [0, 0, 1, 1], [], []>} : vector<128x1152xbf16>, vector<1152x128xbf16>, vector<128x128xf32> -> vector<128x128xf32>
    %3 = arith.truncf %2 : vector<128x128xf32> to vector<128x128xbf16>
    %c0_3 = arith.constant 0 : index
    %c0_4 = arith.constant 0 : index
    %4 = vector.load %arg3[%c0_3, %c0_4] : memref<128x128xbf16, #tpu.memory_space<vmem>>, vector<128x128xbf16>
    tpu.vector_store %arg3[%c0_3, %c0_4], %3 {strides = array<i32>} : memref<128x128xbf16, #tpu.memory_space<vmem>>, vector<128x128xbf16>,
    %cst_5 = arith.constant dense<0.000000e+00> : vector<128xf32>
    %5 = vector.multi_reduction <add>, %2, %cst_5 [0] : vector<128x128xf32> to vector<128xf32>
    %6 = vector.shape_cast %5 : vector<128xf32> to vector<1x128xf32>
    %7 = arith.mulf %2, %2 : vector<128x128xf32>
    %cst_6 = arith.constant dense<0.000000e+00> : vector<128xf32>
    %8 = vector.multi_reduction <add>, %7, %cst_6 [0] : vector<128x128xf32> to vector<128xf32>
    %9 = vector.shape_cast %8 : vector<128xf32> to vector<1x128xf32>
    %10 = tpu.concatenate %6, %9 in 0 : vector<1x128xf32>, vector<1x128xf32> -> vector<2x128xf32>
    %11 = vector.shape_cast %10 : vector<2x128xf32> to vector<1x2x128xf32>
    %c0_7 = arith.constant 0 : index
    %c0_8 = arith.constant 0 : index
    %c0_9 = arith.constant 0 : index
    %12 = vector.load %arg4[%c0_7, %c0_8, %c0_9] : memref<1x2x128xf32, #tpu.memory_space<vmem>>, vector<1x2x128xf32>
    tpu.vector_store %arg4[%c0_7, %c0_8, %c0_9], %11 {strides = array<i32>} : memref<1x2x128xf32, #tpu.memory_space<vmem>>, vector<1x2x128xf32>,
    return
  }
  func.func @transform_0(%arg0: i32) -> (i32, i32) {
    %c0_i32 = arith.constant 0 : i32
    %c0_i32_0 = arith.constant 0 : i32
    return %arg0, %c0_i32 : i32, i32
  }
  func.func @transform_1(%arg0: i32) -> (i32, i32) {
    %c0_i32 = arith.constant 0 : i32
    %c0_i32_0 = arith.constant 0 : i32
    %c0_i32_1 = arith.constant 0 : i32
    return %c0_i32, %c0_i32_0 : i32, i32
  }
  func.func @transform_2(%arg0: i32) -> (i32, i32) {
    %c0_i32 = arith.constant 0 : i32
    %c0_i32_0 = arith.constant 0 : i32
    return %arg0, %c0_i32 : i32, i32
  }
  func.func @transform_3(%arg0: i32) -> (i32, i32, i32) {
    %c0_i32 = arith.constant 0 : i32
    %c0_i32_0 = arith.constant 0 : i32
    %c0_i32_1 = arith.constant 0 : i32
    return %arg0, %c0_i32, %c0_i32_0 : i32, i32, i32
  }
}

module attributes {stable_mosaic.version = 11 : i64} {
  func.func @_conv_matmul_kernel(%arg0: i32, %arg1: memref<256x576xbf16, #tpu.memory_space<vmem>>, %arg2: memref<576x128xbf16, #tpu.memory_space<vmem>>, %arg3: memref<256x128xbf16, #tpu.memory_space<vmem>>, %arg4: memref<1x2x128xf32, #tpu.memory_space<vmem>>) attributes {dimension_semantics = [#tpu.dimension_semantics<parallel>], iteration_bounds = array<i64: 2>, scalar_prefetch = 0 : i64, scratch_operands = 0 : i64, tpu.core_type = #tpu.core_type<tc>, window_params = [{transform_indices = @transform_0, window_bounds = array<i64: 256, 576>}, {pipeline_mode = #tpu.pipeline_mode<synchronous>, transform_indices = @transform_1, window_bounds = array<i64: 576, 128>}, {transform_indices = @transform_2, window_bounds = array<i64: 256, 128>}, {transform_indices = @transform_3, window_bounds = array<i64: 1, 2, 128>}]} {
    %c0 = arith.constant 0 : index
    %c0_0 = arith.constant 0 : index
    %0 = vector.load %arg1[%c0, %c0_0] : memref<256x576xbf16, #tpu.memory_space<vmem>>, vector<256x576xbf16>
    %c0_1 = arith.constant 0 : index
    %c0_2 = arith.constant 0 : index
    %1 = vector.load %arg2[%c0_1, %c0_2] : memref<576x128xbf16, #tpu.memory_space<vmem>>, vector<576x128xbf16>
    %cst = arith.constant dense<0.000000e+00> : vector<256x128xf32>
    %2 = tpu.matmul %0, %1, %cst {dimension_numbers = #tpu.dot_dimension_numbers<[1], [0], [0], [1], [0, 0, 1, 1], [], []>} : vector<256x576xbf16>, vector<576x128xbf16>, vector<256x128xf32> -> vector<256x128xf32>
    %3 = arith.truncf %2 : vector<256x128xf32> to vector<256x128xbf16>
    %c0_3 = arith.constant 0 : index
    %c0_4 = arith.constant 0 : index
    %4 = vector.load %arg3[%c0_3, %c0_4] : memref<256x128xbf16, #tpu.memory_space<vmem>>, vector<256x128xbf16>
    tpu.vector_store %arg3[%c0_3, %c0_4], %3 {strides = array<i32>} : memref<256x128xbf16, #tpu.memory_space<vmem>>, vector<256x128xbf16>,
    %cst_5 = arith.constant dense<0.000000e+00> : vector<128xf32>
    %5 = vector.multi_reduction <add>, %2, %cst_5 [0] : vector<256x128xf32> to vector<128xf32>
    %6 = vector.shape_cast %5 : vector<128xf32> to vector<1x128xf32>
    %7 = arith.mulf %2, %2 : vector<256x128xf32>
    %cst_6 = arith.constant dense<0.000000e+00> : vector<128xf32>
    %8 = vector.multi_reduction <add>, %7, %cst_6 [0] : vector<256x128xf32> to vector<128xf32>
    %9 = vector.shape_cast %8 : vector<128xf32> to vector<1x128xf32>
    %10 = tpu.concatenate %6, %9 in 0 : vector<1x128xf32>, vector<1x128xf32> -> vector<2x128xf32>
    %11 = vector.shape_cast %10 : vector<2x128xf32> to vector<1x2x128xf32>
    %c0_7 = arith.constant 0 : index
    %c0_8 = arith.constant 0 : index
    %c0_9 = arith.constant 0 : index
    %12 = vector.load %arg4[%c0_7, %c0_8, %c0_9] : memref<1x2x128xf32, #tpu.memory_space<vmem>>, vector<1x2x128xf32>
    tpu.vector_store %arg4[%c0_7, %c0_8, %c0_9], %11 {strides = array<i32>} : memref<1x2x128xf32, #tpu.memory_space<vmem>>, vector<1x2x128xf32>,
    return
  }
  func.func @transform_0(%arg0: i32) -> (i32, i32) {
    %c0_i32 = arith.constant 0 : i32
    %c0_i32_0 = arith.constant 0 : i32
    return %arg0, %c0_i32 : i32, i32
  }
  func.func @transform_1(%arg0: i32) -> (i32, i32) {
    %c0_i32 = arith.constant 0 : i32
    %c0_i32_0 = arith.constant 0 : i32
    %c0_i32_1 = arith.constant 0 : i32
    return %c0_i32, %c0_i32_0 : i32, i32
  }
  func.func @transform_2(%arg0: i32) -> (i32, i32) {
    %c0_i32 = arith.constant 0 : i32
    %c0_i32_0 = arith.constant 0 : i32
    return %arg0, %c0_i32 : i32, i32
  }
  func.func @transform_3(%arg0: i32) -> (i32, i32, i32) {
    %c0_i32 = arith.constant 0 : i32
    %c0_i32_0 = arith.constant 0 : i32
    %c0_i32_1 = arith.constant 0 : i32
    return %arg0, %c0_i32, %c0_i32_0 : i32, i32, i32
  }
}

module attributes {stable_mosaic.version = 11 : i64} {
  func.func @_conv_matmul_kernel(%arg0: i32, %arg1: memref<256x2592xbf16, #tpu.memory_space<vmem>>, %arg2: memref<2592x128xbf16, #tpu.memory_space<vmem>>, %arg3: memref<1x128xf32, #tpu.memory_space<vmem>>, %arg4: memref<256x128xf32, #tpu.memory_space<vmem>>) attributes {dimension_semantics = [#tpu.dimension_semantics<parallel>], iteration_bounds = array<i64: 2>, scalar_prefetch = 0 : i64, scratch_operands = 0 : i64, tpu.core_type = #tpu.core_type<tc>, window_params = [{transform_indices = @transform_0, window_bounds = array<i64: 256, 2592>}, {pipeline_mode = #tpu.pipeline_mode<synchronous>, transform_indices = @transform_1, window_bounds = array<i64: 2592, 128>}, {pipeline_mode = #tpu.pipeline_mode<synchronous>, transform_indices = @transform_2, window_bounds = array<i64: 1, 128>}, {transform_indices = @transform_3, window_bounds = array<i64: 256, 128>}]} {
    %c0 = arith.constant 0 : index
    %c0_0 = arith.constant 0 : index
    %0 = vector.load %arg1[%c0, %c0_0] : memref<256x2592xbf16, #tpu.memory_space<vmem>>, vector<256x2592xbf16>
    %c0_1 = arith.constant 0 : index
    %c0_2 = arith.constant 0 : index
    %1 = vector.load %arg2[%c0_1, %c0_2] : memref<2592x128xbf16, #tpu.memory_space<vmem>>, vector<2592x128xbf16>
    %cst = arith.constant dense<0.000000e+00> : vector<256x128xf32>
    %2 = tpu.matmul %0, %1, %cst {dimension_numbers = #tpu.dot_dimension_numbers<[1], [0], [0], [1], [0, 0, 1, 1], [], []>} : vector<256x2592xbf16>, vector<2592x128xbf16>, vector<256x128xf32> -> vector<256x128xf32>
    %c0_3 = arith.constant 0 : index
    %c0_4 = arith.constant 0 : index
    %3 = vector.load %arg3[%c0_3, %c0_4] : memref<1x128xf32, #tpu.memory_space<vmem>>, vector<1x128xf32>
    %4 = vector.broadcast %3 : vector<1x128xf32> to vector<256x128xf32>
    %5 = arith.addf %2, %4 : vector<256x128xf32>
    %c0_5 = arith.constant 0 : index
    %c0_6 = arith.constant 0 : index
    %6 = vector.load %arg4[%c0_5, %c0_6] : memref<256x128xf32, #tpu.memory_space<vmem>>, vector<256x128xf32>
    tpu.vector_store %arg4[%c0_5, %c0_6], %5 {strides = array<i32>} : memref<256x128xf32, #tpu.memory_space<vmem>>, vector<256x128xf32>,
    return
  }
  func.func @transform_0(%arg0: i32) -> (i32, i32) {
    %c0_i32 = arith.constant 0 : i32
    %c0_i32_0 = arith.constant 0 : i32
    return %arg0, %c0_i32 : i32, i32
  }
  func.func @transform_1(%arg0: i32) -> (i32, i32) {
    %c0_i32 = arith.constant 0 : i32
    %c0_i32_0 = arith.constant 0 : i32
    %c0_i32_1 = arith.constant 0 : i32
    return %c0_i32, %c0_i32_0 : i32, i32
  }
  func.func @transform_2(%arg0: i32) -> (i32, i32) {
    %c0_i32 = arith.constant 0 : i32
    %c0_i32_0 = arith.constant 0 : i32
    %c0_i32_1 = arith.constant 0 : i32
    return %c0_i32, %c0_i32_0 : i32, i32
  }
  func.func @transform_3(%arg0: i32) -> (i32, i32) {
    %c0_i32 = arith.constant 0 : i32
    %c0_i32_0 = arith.constant 0 : i32
    return %arg0, %c0_i32 : i32, i32
  }
}

</mosaic_0001>

<bundles_post_ra>
// kernel: transformer_forward.32
= control target key start
LH: loop header
LB: loop body
LE: loop exit
PB: predicated region body
PF: predicated region fallthrough
CT: control target
= control target key end

     0   :  { %s851_s12 = smov 0   ;;  %s985_s0 = inlined_call_operand.vmem [shape: bf16[512,128], index: 0, kind: input, shape index: {}]   ;;  %s986_s1 = inlined_call_operand.vmem [shape: f32[1,128], index: 1, kind: input, shape index: {}]   ;;  %s987_s2 = inlined_call_operand.vmem [shape: f32[1,128], index: 2, kind: input, shape index: {}]   ;;  %s988_s3 = inlined_call_operand.vmem [shape: bf16[512,128], index: 3, kind: output, shape index: {}]  }
   0x1 LB: > { %s564_s13 = sadd.s32 4294967295, %s829_s12   ;;  %p568_p0 = scmp.ge.s32.totalorder %s829_s12, 1  ;;  %s829_s12 = sphi %s851_s12, %s13_s12  }
   0x2   : > { %p138_p1 = scmp.lt.s32.totalorder %s829_s12, 3 }
   0x4   : > { %p139_p2 = pnand %p568_p0, %p138_p1 }
   0x5   : > { %s569_s14 = sshll.u32 (!%p139_p2), %s564_s13, 5  ;;  %v872_v0 = vld [vmem:[%s986_s1] ss:$0 sm:$0xff] (!%p139_p2) }
   0x6   : > { %142 = sbr.rel (%p139_p2) target bundleno = 59 (0x3b), region = 32  ;;  %p163_p3 = scmp.lt.s32.totalorder (!%p139_p2), %s569_s14, 63  ;;  %v881_v9 = vld [vmem:[%s987_s2] ss:$0 sm:$0xff] (!%p139_p2) }
   0xd   : > { %s990_s14 = smov (!%p163_p3, %s569_s14), 63 }
   0xe   : > { %s570_s15 = sshll.u32 %s990_s14, 2 }
   0xf   : > { %s867_s18 = scalar_lea.vmem %s985_s0, %s570_s15  ;;  %s906_s25 = scalar_lea.vmem %s988_s3, %s570_s15 }
  0x10   : > { %v642_v1 = vld [vmem:[%s867_s18] sm:$0xff]   ;;  %v785_v2 = vld [vmem:[%s867_s18 + $0x8] sm:$0xff]   ;;  %v786_v3 = vld [vmem:[%s867_s18 + $0x10] sm:$0xff]  }
  0x11   : > { %v643_v4 = vunpack.c.l.bf16 %v642_v1  ;;  %v644_v5 = vunpack.c.h.bf16 %v642_v1  ;;  %v647_v6 = vunpack.c.l.bf16 %v785_v2  ;;  %v648_v7 = vunpack.c.h.bf16 %v785_v2  ;;  %v787_v8 = vld [vmem:[%s867_s18 + $0x18] sm:$0xff]   ;;  %v788_v30 = vld [vmem:[%s867_s18 + $0x20] sm:$0xff]   ;;  %v789_v35 = vld [vmem:[%s867_s18 + $0x28] sm:$0xff]  }
  0x12   : > { %v651_v10 = vunpack.c.l.bf16 %v786_v3  ;;  %v652_v11 = vunpack.c.h.bf16 %v786_v3  ;;  %v655_v12 = vunpack.c.l.bf16 %v787_v8  ;;  %v656_v13 = vunpack.c.h.bf16 %v787_v8  ;;  %v790_v40 = vld [vmem:[%s867_s18 + $0x30] sm:$0xff]   ;;  %v791_v45 = vld [vmem:[%s867_s18 + $0x38] sm:$0xff]   ;;  %v792_v3 = vld [vmem:[%s867_s18 + $0x40] sm:$0xff]  }
  0x13   : > { %v245_v14 = vmul.f32 %v643_v4, %v872_v0  ;;  %v246_v15 = vmul.f32 %v644_v5, %v872_v0  ;;  %v247_v16 = vmul.f32 %v647_v6, %v872_v0  ;;  %v248_v17 = vmul.f32 %v648_v7, %v872_v0 }
  0x14   : > { %v249_v18 = vmul.f32 %v651_v10, %v872_v0  ;;  %v250_v19 = vmul.f32 %v652_v11, %v872_v0  ;;  %v251_v20 = vmul.f32 %v655_v12, %v872_v0  ;;  %v252_v21 = vmul.f32 %v656_v13, %v872_v0  ;;  %v793_v13 = vld [vmem:[%s867_s18 + $0x48] sm:$0xff]  }
  0x15   : > { %v284_v22 = vadd.f32 %v881_v9, %v245_v14  ;;  %v285_v23 = vadd.f32 %v881_v9, %v246_v15  ;;  %v286_v24 = vadd.f32 %v881_v9, %v247_v16  ;;  %v287_v25 = vadd.f32 %v881_v9, %v248_v17 }
  0x16   : > { %v288_v26 = vadd.f32 %v881_v9, %v249_v18  ;;  %v289_v27 = vadd.f32 %v881_v9, %v250_v19  ;;  %v290_v28 = vadd.f32 %v881_v9, %v251_v20  ;;  %v291_v29 = vadd.f32 %v881_v9, %v252_v21  ;;  %v794_v18 = vld [vmem:[%s867_s18 + $0x50] sm:$0xff]  }
  0x17   : > { %v316_v31 = vmax.f32 %v284_v22, 0.0  ;;  %v317_v32 = vmax.f32 %v285_v23, 0.0  ;;  %v318_v33 = vmax.f32 %v286_v24, 0.0  ;;  %v319_v34 = vmax.f32 %v287_v25, 0.0  ;;  %v795_v23 = vld [vmem:[%s867_s18 + $0x58] sm:$0xff]  }
  0x18   : > { %v320_v36 = vmax.f32 %v288_v26, 0.0  ;;  %v321_v37 = vmax.f32 %v289_v27, 0.0  ;;  %v322_v38 = vmax.f32 %v290_v28, 0.0  ;;  %v323_v39 = vmax.f32 %v291_v29, 0.0 }
  0x19   : > { %v708_v41 = vpack.c.bf16 %v317_v32, %v316_v31  ;;  %v713_v42 = vpack.c.bf16 %v319_v34, %v318_v33  ;;  %v659_v43 = vunpack.c.l.bf16 %v788_v30  ;;  %v660_v44 = vunpack.c.h.bf16 %v788_v30 }
  0x1a   : > { %v718_v46 = vpack.c.bf16 %v321_v37, %v320_v36  ;;  %v723_v47 = vpack.c.bf16 %v323_v39, %v322_v38  ;;  %v663_v48 = vunpack.c.l.bf16 %v789_v35  ;;  %v664_v49 = vunpack.c.h.bf16 %v789_v35 }
  0x1b   : > { %709 = vst [vmem:[%s906_s25] sm:$0xff] %v708_v41   ;;  %800 = vst [vmem:[%s906_s25 + $0x8] sm:$0xff] %v713_v42   ;;  %v253_v50 = vmul.f32 %v659_v43, %v872_v0  ;;  %v254_v51 = vmul.f32 %v660_v44, %v872_v0  ;;  %v667_v52 = vunpack.c.l.bf16 %v790_v40  ;;  %v668_v53 = vunpack.c.h.bf16 %v790_v40  ;;  %v796_v40 = vld [vmem:[%s867_s18 + $0x60] sm:$0xff]  }
  0x1c   : > { %801 = vst [vmem:[%s906_s25 + $0x10] sm:$0xff] %v718_v46   ;;  %802 = vst [vmem:[%s906_s25 + $0x18] sm:$0xff] %v723_v47   ;;  %v255_v54 = vmul.f32 %v663_v48, %v872_v0  ;;  %v256_v55 = vmul.f32 %v664_v49, %v872_v0  ;;  %v671_v56 = vunpack.c.l.bf16 %v791_v45  ;;  %v672_v57 = vunpack.c.h.bf16 %v791_v45 }
  0x1d   : > { %v292_v58 = vadd.f32 %v881_v9, %v253_v50  ;;  %v293_v59 = vadd.f32 %v881_v9, %v254_v51  ;;  %v257_v60 = vmul.f32 %v667_v52, %v872_v0  ;;  %v258_v61 = vmul.f32 %v668_v53, %v872_v0  ;;  %v797_v53 = vld [vmem:[%s867_s18 + $0x68] sm:$0xff]  }
  0x1e   : > { %v294_v62 = vadd.f32 %v881_v9, %v255_v54  ;;  %v295_v63 = vadd.f32 %v881_v9, %v256_v55  ;;  %v259_v1 = vmul.f32 %v671_v56, %v872_v0  ;;  %v260_v2 = vmul.f32 %v672_v57, %v872_v0 }
  0x1f   : > { %v324_v4 = vmax.f32 %v292_v58, 0.0  ;;  %v325_v5 = vmax.f32 %v293_v59, 0.0  ;;  %v296_v6 = vadd.f32 %v881_v9, %v257_v60  ;;  %v297_v7 = vadd.f32 %v881_v9, %v258_v61  ;;  %v798_v58 = vld [vmem:[%s867_s18 + $0x70] sm:$0xff]  }
  0x20   : > { %v326_v8 = vmax.f32 %v294_v62, 0.0  ;;  %v327_v10 = vmax.f32 %v295_v63, 0.0  ;;  %v298_v11 = vadd.f32 %v881_v9, %v259_v1  ;;  %v299_v12 = vadd.f32 %v881_v9, %v260_v2  ;;  %v799_v63 = vld [vmem:[%s867_s18 + $0x78] sm:$0xff]  }
  0x21   : > { %v728_v14 = vpack.c.bf16 %v325_v5, %v324_v4  ;;  %v328_v15 = vmax.f32 %v296_v6, 0.0  ;;  %v329_v16 = vmax.f32 %v297_v7, 0.0  ;;  %v675_v17 = vunpack.c.l.bf16 %v792_v3 }
  0x22   : > { %v733_v19 = vpack.c.bf16 %v327_v10, %v326_v8  ;;  %v330_v20 = vmax.f32 %v298_v11, 0.0  ;;  %v331_v21 = vmax.f32 %v299_v12, 0.0  ;;  %v676_v22 = vunpack.c.h.bf16 %v792_v3 }
  0x23   : > { %803 = vst [vmem:[%s906_s25 + $0x20] sm:$0xff] %v728_v14   ;;  %v738_v24 = vpack.c.bf16 %v329_v16, %v328_v15  ;;  %v261_v25 = vmul.f32 %v675_v17, %v872_v0  ;;  %v679_v26 = vunpack.c.l.bf16 %v793_v13  ;;  %v680_v27 = vunpack.c.h.bf16 %v793_v13 }
  0x24   : > { %804 = vst [vmem:[%s906_s25 + $0x28] sm:$0xff] %v733_v19   ;;  %v743_v28 = vpack.c.bf16 %v331_v21, %v330_v20  ;;  %v262_v29 = vmul.f32 %v676_v22, %v872_v0  ;;  %v683_v30 = vunpack.c.l.bf16 %v794_v18  ;;  %v684_v31 = vunpack.c.h.bf16 %v794_v18 }
  0x25   : > { %805 = vst [vmem:[%s906_s25 + $0x30] sm:$0xff] %v738_v24   ;;  %v300_v32 = vadd.f32 %v881_v9, %v261_v25  ;;  %v263_v33 = vmul.f32 %v679_v26, %v872_v0  ;;  %v264_v34 = vmul.f32 %v680_v27, %v872_v0  ;;  %v687_v35 = vunpack.c.l.bf16 %v795_v23 }
  0x26   : > { %806 = vst [vmem:[%s906_s25 + $0x38] sm:$0xff] %v743_v28   ;;  %v301_v36 = vadd.f32 %v881_v9, %v262_v29  ;;  %v265_v37 = vmul.f32 %v683_v30, %v872_v0  ;;  %v266_v38 = vmul.f32 %v684_v31, %v872_v0  ;;  %v688_v39 = vunpack.c.h.bf16 %v795_v23 }
  0x27   : > { %v332_v41 = vmax.f32 %v300_v32, 0.0  ;;  %v302_v42 = vadd.f32 %v881_v9, %v263_v33  ;;  %v303_v43 = vadd.f32 %v881_v9, %v264_v34  ;;  %v267_v44 = vmul.f32 %v687_v35, %v872_v0 }
  0x28   : > { %v333_v45 = vmax.f32 %v301_v36, 0.0  ;;  %v304_v46 = vadd.f32 %v881_v9, %v265_v37  ;;  %v305_v47 = vadd.f32 %v881_v9, %v266_v38  ;;  %v268_v48 = vmul.f32 %v688_v39, %v872_v0 }
  0x29   : > { %v334_v49 = vmax.f32 %v302_v42, 0.0  ;;  %v335_v50 = vmax.f32 %v303_v43, 0.0  ;;  %v306_v51 = vadd.f32 %v881_v9, %v267_v44  ;;  %v691_v52 = vunpack.c.l.bf16 %v796_v40 }
  0x2a   : > { %v748_v54 = vpack.c.bf16 %v333_v45, %v332_v41  ;;  %v336_v55 = vmax.f32 %v304_v46, 0.0  ;;  %v337_v56 = vmax.f32 %v305_v47, 0.0  ;;  %v307_v57 = vadd.f32 %v881_v9, %v268_v48 }
  0x2b   : > { %v753_v59 = vpack.c.bf16 %v335_v50, %v334_v49  ;;  %v338_v60 = vmax.f32 %v306_v51, 0.0  ;;  %v692_v61 = vunpack.c.h.bf16 %v796_v40  ;;  %v269_v62 = vmul.f32 %v691_v52, %v872_v0 }
  0x2c   : > { %807 = vst [vmem:[%s906_s25 + $0x40] sm:$0xff] %v748_v54   ;;  %v758_v1 = vpack.c.bf16 %v337_v56, %v336_v55  ;;  %v339_v2 = vmax.f32 %v307_v57, 0.0  ;;  %v695_v3 = vunpack.c.l.bf16 %v797_v53  ;;  %v696_v4 = vunpack.c.h.bf16 %v797_v53 }
  0x2d   : > { %808 = vst [vmem:[%s906_s25 + $0x48] sm:$0xff] %v753_v59   ;;  %v270_v5 = vmul.f32 %v692_v61, %v872_v0  ;;  %v308_v6 = vadd.f32 %v881_v9, %v269_v62  ;;  %v699_v7 = vunpack.c.l.bf16 %v798_v58  ;;  %v700_v8 = vunpack.c.h.bf16 %v798_v58 }
  0x2e   : > { %809 = vst [vmem:[%s906_s25 + $0x50] sm:$0xff] %v758_v1   ;;  %v763_v10 = vpack.c.bf16 %v339_v2, %v338_v60  ;;  %v271_v11 = vmul.f32 %v695_v3, %v872_v0  ;;  %v272_v12 = vmul.f32 %v696_v4, %v872_v0  ;;  %v703_v13 = vunpack.c.l.bf16 %v799_v63 }
  0x2f   : > { %v309_v14 = vadd.f32 %v881_v9, %v270_v5  ;;  %v340_v15 = vmax.f32 %v308_v6, 0.0  ;;  %v273_v16 = vmul.f32 %v699_v7, %v872_v0  ;;  %v274_v17 = vmul.f32 %v700_v8, %v872_v0 }
  0x30   : > { %810 = vst [vmem:[%s906_s25 + $0x58] sm:$0xff] %v763_v10   ;;  %v310_v18 = vadd.f32 %v881_v9, %v271_v11  ;;  %v311_v19 = vadd.f32 %v881_v9, %v272_v12  ;;  %v704_v20 = vunpack.c.h.bf16 %v799_v63  ;;  %v275_v21 = vmul.f32 %v703_v13, %v872_v0 }
  0x31   : > { %v341_v22 = vmax.f32 %v309_v14, 0.0  ;;  %v312_v23 = vadd.f32 %v881_v9, %v273_v16  ;;  %v313_v24 = vadd.f32 %v881_v9, %v274_v17 }
  0x32   : > { %v342_v25 = vmax.f32 %v310_v18, 0.0  ;;  %v343_v26 = vmax.f32 %v311_v19, 0.0  ;;  %v276_v27 = vmul.f32 %v704_v20, %v872_v0  ;;  %v314_v28 = vadd.f32 %v881_v9, %v275_v21 }
  0x33   : > { %v768_v29 = vpack.c.bf16 %v341_v22, %v340_v15  ;;  %v344_v30 = vmax.f32 %v312_v23, 0.0  ;;  %v345_v31 = vmax.f32 %v313_v24, 0.0 }
  0x34   : > { %v773_v32 = vpack.c.bf16 %v343_v26, %v342_v25  ;;  %v315_v33 = vadd.f32 %v881_v9, %v276_v27  ;;  %v346_v34 = vmax.f32 %v314_v28, 0.0 }
  0x35   : > { %811 = vst [vmem:[%s906_s25 + $0x60] sm:$0xff] %v768_v29   ;;  %v778_v35 = vpack.c.bf16 %v345_v31, %v344_v30 }
  0x36   : > { %812 = vst [vmem:[%s906_s25 + $0x68] sm:$0xff] %v773_v32   ;;  %v347_v36 = vmax.f32 %v315_v33, 0.0 }
  0x37   : > { %813 = vst [vmem:[%s906_s25 + $0x70] sm:$0xff] %v778_v35  }
  0x38   : > { %v783_v37 = vpack.c.bf16 %v347_v36, %v346_v34 }
  0x3a   : > { %814 = vst [vmem:[%s906_s25 + $0x78] sm:$0xff] %v783_v37  }
  0x3b PF: > { %s13_s12 = sadd.s32 1, %s829_s12  }
  0x3c   : > { %p10_p4 = scmp.ge.s32.totalorder %s13_s12, 4  }
  0x3e   :  { %12 = sbr.rel (!%p10_p4) target bundleno = 1 (0x1), region = 62 }

// kernel: transformer_forward.31
= control target key start
LH: loop header
LB: loop body
LE: loop exit
PB: predicated region body
PF: predicated region fallthrough
CT: control target
= control target key end

     0   :  { %s1528_s12 = smov 0   ;;  %s1759_s0 = inlined_call_operand.vmem [shape: bf16[512,243], index: 0, kind: input, shape index: {}]   ;;  %s1760_s1 = inlined_call_operand.vmem [shape: bf16[243,128], index: 1, kind: input, shape index: {}]   ;;  %s1761_s2 = inlined_call_operand.vmem [shape: bf16[512,128], index: 2, kind: output, shape index: {0}]   ;;  %s1762_s3 = inlined_call_operand.vmem [shape: f32[2,2,128], index: 3, kind: output, shape index: {1}]  }
   0x1 LB: > { %s1534_s13 = sadd.s32 4294967295, %s1505_s12   ;;  %p1065_p0 = scmp.ge.s32.totalorder %s1505_s12, 1  ;;  %s1505_s12 = sphi %s1528_s12, %s14_s12  }
   0x2   : > { %p142_p1 = scmp.lt.s32.totalorder %s1505_s12, 3 }
   0x4   : > { %p143_p2 = pnand %p1065_p0, %p142_p1 }
   0x5   : > { %v1435_v0 = vld [vmem:[%s1760_s1 + $0x40] sm:$0xff] (!%p143_p2)   ;;  %v1437_v2 = vld [vmem:[%s1760_s1 + $0x48] sm:$0xff] (!%p143_p2)   ;;  %v1439_v4 = vld [vmem:[%s1760_s1 + $0x50] sm:$0xff] (!%p143_p2)   ;;  %s1066_s24 = sshll.u32 (!%p143_p2), %s1534_s13, 5  ;;  %vm538_vm0 = vcmask (!%p143_p2), 1040384   ;;  %vm489_vm1 = vcmask (!%p143_p2), 941056  }
   0x6   : > { %146 = sbr.rel (%p143_p2) target bundleno = 361 (0x169), region = 28  ;;  %v1436_v1 = vld [vmem:[%s1760_s1] sm:$0xff] (!%p143_p2)   ;;  %1298 = vmatprep.subr.bf16.mxu0 (!%p143_p2), %v1435_v0  ;;  %1410 = vmatprep.subr.bf16.mxu1 (!%p143_p2), %v1435_v0  ;;  %v1438_v3 = vld [vmem:[%s1760_s1 + $0x8] sm:$0xff] (!%p143_p2)   ;;  %p172_p3 = scmp.lt.s32.totalorder (!%p143_p2), %s1066_s24, 63  ;;  %v1440_v5 = vld [vmem:[%s1760_s1 + $0x10] sm:$0xff] (!%p143_p2)   ;;  %vm539_vm2 = vcmask (!%p143_p2), 1041408  }
   0x7   : > { %1299 = vmatpush3.bf16.msra.mxu0 (!%p143_p2), %v1436_v1  ;;  %1418 = vmatpush3.bf16.msra.mxu1 (!%p143_p2), %v1436_v1  ;;  %v1441_v6 = vld [vmem:[%s1760_s1 + $0x58] sm:$0xff] (!%p143_p2)   ;;  %v1443_v8 = vld [vmem:[%s1760_s1 + $0x60] sm:$0xff] (!%p143_p2)   ;;  %v1445_v10 = vld [vmem:[%s1760_s1 + $0x68] sm:$0xff] (!%p143_p2)   ;;  %v1507_v12 = vmov (!%p143_p2), 65535   ;;  %p184_p4 = scmp.lt.s32.totalorder (!%p143_p2), %s1534_s13, 1 }
   0x8   : > { %1300 = vmatprep.subr.bf16.mxu0 (!%p143_p2), %v1437_v2  ;;  %1411 = vmatprep.subr.bf16.mxu1 (!%p143_p2), %v1437_v2  ;;  %v1442_v7 = vld [vmem:[%s1760_s1 + $0x18] sm:$0xff] (!%p143_p2)   ;;  %v1444_v9 = vld [vmem:[%s1760_s1 + $0x20] sm:$0xff] (!%p143_p2)   ;;  %v540_v13 = vsel (!%p143_p2), %vm538_vm0, 4294967295, %v1507_v12  ;;  %v1446_v14 = vld [vmem:[%s1760_s1 + $0x28] sm:$0xff] (!%p143_p2)  }
   0x9   : > { %v1447_v15 = vld [vmem:[%s1760_s1 + $0x70] sm:$0xff] (!%p143_p2)   ;;  %v1449_v16 = vld [vmem:[%s1760_s1 + $0x78] ss:$0 sps:$4 sm:$0x33] (!%p143_p2)   ;;  %v541_v17 = vsel (!%p143_p2), %vm539_vm2, %v540_v13, 0 }
   0xa   : > { %v1448_v19 = vld [vmem:[%s1760_s1 + $0x30] sm:$0xff] (!%p143_p2)   ;;  %v543_v20 = vand.u32 (!%p143_p2), %v1449_v16, %v541_v17  ;;  %v1450_v21 = vld [vmem:[%s1760_s1 + $0x38] sm:$0xff] (!%p143_p2)  }
   0xb   : > { %1301 = vmatpush3.bf16.msra.mxu0 (!%p143_p2), %v1438_v3  ;;  %1419 = vmatpush3.bf16.msra.mxu1 (!%p143_p2), %v1438_v3 }
   0xc   : > { %1302 = vmatprep.subr.bf16.mxu0 (!%p143_p2), %v1439_v4  ;;  %1412 = vmatprep.subr.bf16.mxu1 (!%p143_p2), %v1439_v4 }
   0xd   : > { %s1764_s24 = smov (!%p172_p3, %s1066_s24), 63  ;;  %s1766_s13 = smov (!%p184_p4, %s1534_s13), 1 }
   0xe   : > { %s1170_s29 = sshll.u32 %s1764_s24, 3  ;;  %s1070_s27 = sshll.u32 %s1764_s24, 2 }
   0xf   : > { %1303 = vmatpush3.bf16.msra.mxu0 %v1440_v5  ;;  %1420 = vmatpush3.bf16.msra.mxu1 %v1440_v5  ;;  %s1572_s9 = scalar_lea.vmem %s1759_s0, %s1170_s29  ;;  %s1652_s30 = scalar_lea.vmem %s1761_s2, %s1070_s27 }
  0x10   : > { %1304 = vmatprep.subr.bf16.mxu0 %v1441_v6  ;;  %1413 = vmatprep.subr.bf16.mxu1 %v1441_v6  ;;  %v1453_v11 = vld [vmem:[%s1572_s9 + $0x4] ss:$8 sps:$4 sm:$0xff]   ;;  %v1451_v22 = vld [vmem:[%s1572_s9] ss:$8 sps:$4 sm:$0xff]   ;;  %v1454_v24 = vld [vmem:[%s1572_s9 + $0x14] ss:$8 sps:$4 sm:$0xff]  }
  0x11   : > { %1120 = vmatprep.mubr.msk.bf16.mxu0 %vm489_vm1, %v1453_v11  ;;  %v1465_v18 = vld [vmem:[%s1572_s9 + $0x84] ss:$8 sps:$4 sm:$0xff]   ;;  %v1463_v23 = vld [vmem:[%s1572_s9 + $0x80] ss:$8 sps:$4 sm:$0xff]   ;;  %v1469_v25 = vld [vmem:[%s1572_s9 + $0x94] ss:$8 sps:$4 sm:$0xff]  }
  0x12   : > { %1128 = vmatprep.mubr.msk.bf16.mxu1 %vm489_vm1, %v1465_v18  ;;  %v1456_v26 = vld [vmem:[%s1572_s9 + $0x10] ss:$8 sps:$4 sm:$0xff]   ;;  %v1457_v28 = vld [vmem:[%s1572_s9 + $0x24] ss:$8 sps:$4 sm:$0xff]   ;;  %v1459_v30 = vld [vmem:[%s1572_s9 + $0x20] ss:$8 sps:$4 sm:$0xff]  }
  0x13   : > { %1305 = vmatpush3.bf16.msra.mxu0 %v1442_v7  ;;  %1421 = vmatpush3.bf16.msra.mxu1 %v1442_v7  ;;  %v1471_v27 = vld [vmem:[%s1572_s9 + $0x90] ss:$8 sps:$4 sm:$0xff]   ;;  %v1475_v29 = vld [vmem:[%s1572_s9 + $0xa4] ss:$8 sps:$4 sm:$0xff]   ;;  %v1477_v31 = vld [vmem:[%s1572_s9 + $0xa0] ss:$8 sps:$4 sm:$0xff]  }
  0x14   : > { %1306 = vmatprep.subr.bf16.mxu0 %v1443_v8  ;;  %1414 = vmatprep.subr.bf16.mxu1 %v1443_v8  ;;  %v1460_v32 = vld [vmem:[%s1572_s9 + $0x34] ss:$8 sps:$4 sm:$0xff]   ;;  %v1462_v34 = vld [vmem:[%s1572_s9 + $0x30] ss:$8 sps:$4 sm:$0xff]   ;;  %v1466_v36 = vld [vmem:[%s1572_s9 + $0x44] ss:$8 sps:$4 sm:$0xff]  }
  0x15   : > { %v1481_v33 = vld [vmem:[%s1572_s9 + $0xb4] ss:$8 sps:$4 sm:$0xff]   ;;  %v1483_v35 = vld [vmem:[%s1572_s9 + $0xb0] ss:$8 sps:$4 sm:$0xff]   ;;  %v1487_v37 = vld [vmem:[%s1572_s9 + $0xc4] ss:$8 sps:$4 sm:$0xff]  }
  0x16   : > { %v1468_v38 = vld [vmem:[%s1572_s9 + $0x40] ss:$8 sps:$4 sm:$0xff]   ;;  %v1472_v40 = vld [vmem:[%s1572_s9 + $0x54] ss:$8 sps:$4 sm:$0xff]   ;;  %v1474_v42 = vld [vmem:[%s1572_s9 + $0x50] ss:$8 sps:$4 sm:$0xff]  }
  0x17   : > { %1307 = vmatpush3.bf16.msra.mxu0 %v1444_v9  ;;  %1422 = vmatpush3.bf16.msra.mxu1 %v1444_v9  ;;  %v1489_v39 = vld [vmem:[%s1572_s9 + $0xc0] ss:$8 sps:$4 sm:$0xff]   ;;  %v1490_v41 = vld [vmem:[%s1572_s9 + $0xd4] ss:$8 sps:$4 sm:$0xff]   ;;  %v1492_v43 = vld [vmem:[%s1572_s9 + $0xd0] ss:$8 sps:$4 sm:$0xff]  }
  0x18   : > { %1308 = vmatprep.subr.bf16.mxu0 %v1445_v10  ;;  %1415 = vmatprep.subr.bf16.mxu1 %v1445_v10  ;;  %v1478_v44 = vld [vmem:[%s1572_s9 + $0x64] ss:$8 sps:$4 sm:$0xff]   ;;  %v1480_v46 = vld [vmem:[%s1572_s9 + $0x60] ss:$8 sps:$4 sm:$0xff]   ;;  %v1484_v48 = vld [vmem:[%s1572_s9 + $0x74] ss:$8 sps:$4 sm:$0xff]  }
  0x19   : > { %v1493_v45 = vld [vmem:[%s1572_s9 + $0xe4] ss:$8 sps:$4 sm:$0xff]   ;;  %v1495_v47 = vld [vmem:[%s1572_s9 + $0xe0] ss:$8 sps:$4 sm:$0xff]   ;;  %v1496_v49 = vld [vmem:[%s1572_s9 + $0xf4] ss:$8 sps:$4 sm:$0xff]  }
  0x1a   : > { %v1486_v50 = vld [vmem:[%s1572_s9 + $0x70] ss:$8 sps:$4 sm:$0xff]   ;;  %s1071_s24 = sshll.u32 %s1766_s13, 1 }
  0x1b   : > { %1309 = vmatpush3.bf16.msra.mxu0 %v1446_v14  ;;  %1423 = vmatpush3.bf16.msra.mxu1 %v1446_v14  ;;  %v1498_v51 = vld [vmem:[%s1572_s9 + $0xf0] ss:$8 sps:$4 sm:$0xff]   ;;  %s187_s6 = scalar_lea.vmem %s1762_s3, %s1071_s24 }
  0x1c   : > { %1310 = vmatprep.subr.bf16.mxu0 %v1447_v15  ;;  %1416 = vmatprep.subr.bf16.mxu1 %v1447_v15 }
  0x1f   : > { %1311 = vmatpush3.bf16.msra.mxu0 %v1448_v19  ;;  %1424 = vmatpush3.bf16.msra.mxu1 %v1448_v19 }
  0x20   : > { %1312 = vmatprep.subr.bf16.mxu0 %v543_v20  ;;  %1417 = vmatprep.subr.bf16.mxu1 %v543_v20 }
  0x23   : > { %1313 = vmatpush3.bf16.msra.mxu0 %v1450_v21  ;;  %1425 = vmatpush3.bf16.msra.mxu1 %v1450_v21 }
  0x26   : > { %578 = vmatmul.mubr.bf16.vlgmr.msra.gmra.mrb[0].mxu0 %v1451_v22  ;;  %642 = vmatmul.mubr.bf16.vlgmr.msra.gmra.mrb[0].mxu1 %v1463_v23 }
  0x27   : > { %1121 = vmatprep.mubr.msk.bf16.mxu0 %vm489_vm1, %v1454_v24  ;;  %1129 = vmatprep.mubr.msk.bf16.mxu1 %vm489_vm1, %v1469_v25 }
  0x2e   : > { %586 = vmatmul.mubr.bf16.gmra.mrb[4].mxu0 %v1456_v26  ;;  %650 = vmatmul.mubr.bf16.gmra.mrb[4].mxu1 %v1471_v27 }
  0x2f   : > { %1122 = vmatprep.mubr.msk.bf16.mxu0 %vm489_vm1, %v1457_v28  ;;  %1130 = vmatprep.mubr.msk.bf16.mxu1 %vm489_vm1, %v1475_v29 }
  0x36   : > { %594 = vmatmul.mubr.bf16.gmra.mrb[8].mxu0 %v1459_v30  ;;  %658 = vmatmul.mubr.bf16.gmra.mrb[8].mxu1 %v1477_v31 }
  0x37   : > { %1123 = vmatprep.mubr.msk.bf16.mxu0 %vm489_vm1, %v1460_v32  ;;  %1131 = vmatprep.mubr.msk.bf16.mxu1 %vm489_vm1, %v1481_v33 }
  0x3e   : > { %602 = vmatmul.mubr.bf16.gmra.mrb[12].mxu0 %v1462_v34  ;;  %666 = vmatmul.mubr.bf16.gmra.mrb[12].mxu1 %v1483_v35 }
  0x3f   : > { %1124 = vmatprep.mubr.msk.bf16.mxu0 %vm489_vm1, %v1466_v36  ;;  %1132 = vmatprep.mubr.msk.bf16.mxu1 %vm489_vm1, %v1487_v37 }
  0x46   : > { %610 = vmatmul.mubr.bf16.gmra.mrb[16].mxu0 %v1468_v38  ;;  %674 = vmatmul.mubr.bf16.gmra.mrb[16].mxu1 %v1489_v39 }
  0x47   : > { %1125 = vmatprep.mubr.msk.bf16.mxu0 %vm489_vm1, %v1472_v40  ;;  %1133 = vmatprep.mubr.msk.bf16.mxu1 %vm489_vm1, %v1490_v41 }
  0x4e   : > { %618 = vmatmul.mubr.bf16.gmra.mrb[20].mxu0 %v1474_v42  ;;  %682 = vmatmul.mubr.bf16.gmra.mrb[20].mxu1 %v1492_v43 }
  0x4f   : > { %1126 = vmatprep.mubr.msk.bf16.mxu0 %vm489_vm1, %v1478_v44  ;;  %1134 = vmatprep.mubr.msk.bf16.mxu1 %vm489_vm1, %v1493_v45 }
  0x56   : > { %626 = vmatmul.mubr.bf16.gmra.mrb[24].mxu0 %v1480_v46  ;;  %690 = vmatmul.mubr.bf16.gmra.mrb[24].mxu1 %v1495_v47 }
  0x57   : > { %1127 = vmatprep.mubr.msk.bf16.mxu0 %vm489_vm1, %v1484_v48  ;;  %1135 = vmatprep.mubr.msk.bf16.mxu1 %vm489_vm1, %v1496_v49 }
  0x5e   : > { %634 = vmatmul.mubr.bf16.gmra.mrb[28].mxu0 %v1486_v50  ;;  %698 = vmatmul.mubr.bf16.gmra.mrb[28].mxu1 %v1498_v51 }
  0xf9   : > { %v1314_v52 = vpop.f32.mrb[0].mxu0  ;;  %v1362_v53 = vpop.f32.mrb[0].mxu1 }
  0xfa   : > { %v1315_v54 = vpop.f32.mrb[1].mxu0  ;;  %v1363_v55 = vpop.f32.mrb[1].mxu1 }
  0xfb   : > { %v1316_v56 = vadd.f32 %v1315_v54, %v1314_v52  ;;  %v1317_v57 = vpop.f32.mrb[2].mxu0  ;;  %v1645_v58 = vadd.f32 %v1363_v55, %v1362_v53  ;;  %v1365_v59 = vpop.f32.mrb[2].mxu1 }
  0xfc   : > { %v1318_v60 = vpop.f32.mrb[3].mxu0  ;;  %v1366_v61 = vpop.f32.mrb[3].mxu1 }
  0xfd   : > { %v1319_v62 = vadd.f32 %v1318_v60, %v1317_v57  ;;  %v1647_v63 = vadd.f32 %v1366_v61, %v1365_v59  ;;  %v903_v0 = vmul.f32 %v1316_v56, %v1316_v56 }
  0xff   : > { %v1206_v1 = vpack.c.bf16 %v1319_v62, %v1316_v56  ;;  %v866_v2 = vadd.f32 %v1319_v62, %v1316_v56  ;;  %v904_v3 = vmul.f32 %v1319_v62, %v1319_v62  ;;  %v1246_v4 = vpack.c.bf16 %v1647_v63, %v1645_v58 }
 0x101   : > { %1207 = vst [vmem:[%s1652_s30] sm:$0xff] %v1206_v1   ;;  %v935_v5 = vadd.f32 %v904_v3, %v903_v0  ;;  %v1320_v6 = vpop.f32.mrb[4].mxu0  ;;  %1290 = vst [vmem:[%s1652_s30 + $0x40] sm:$0xff] %v1246_v4   ;;  %v1368_v7 = vpop.f32.mrb[4].mxu1 }
 0x102   : > { %v1321_v8 = vpop.f32.mrb[5].mxu0  ;;  %v1369_v9 = vpop.f32.mrb[5].mxu1 }
 0x103   : > { %v1322_v10 = vadd.f32 %v1321_v8, %v1320_v6  ;;  %v1323_v11 = vpop.f32.mrb[6].mxu0  ;;  %v1658_v12 = vadd.f32 %v1369_v9, %v1368_v7  ;;  %v1371_v13 = vpop.f32.mrb[6].mxu1 }
 0x104   : > { %v1324_v14 = vpop.f32.mrb[7].mxu0  ;;  %v1372_v15 = vpop.f32.mrb[7].mxu1 }
 0x105   : > { %v867_v16 = vadd.f32 %v1322_v10, %v866_v2  ;;  %v905_v17 = vmul.f32 %v1322_v10, %v1322_v10  ;;  %v1325_v18 = vadd.f32 %v1324_v14, %v1323_v11  ;;  %v1660_v19 = vadd.f32 %v1372_v15, %v1371_v13 }
 0x107   : > { %v936_v20 = vadd.f32 %v935_v5, %v905_v17  ;;  %v1211_v21 = vpack.c.bf16 %v1325_v18, %v1322_v10  ;;  %v868_v22 = vadd.f32 %v1325_v18, %v867_v16  ;;  %v906_v23 = vmul.f32 %v1325_v18, %v1325_v18 }
 0x108   : > { %v1251_v24 = vpack.c.bf16 %v1660_v19, %v1658_v12 }
 0x109   : > { %1283 = vst [vmem:[%s1652_s30 + $0x8] sm:$0xff] %v1211_v21   ;;  %v937_v25 = vadd.f32 %v936_v20, %v906_v23  ;;  %v1326_v26 = vpop.f32.mrb[8].mxu0  ;;  %v1374_v27 = vpop.f32.mrb[8].mxu1 }
 0x10a   : > { %v1327_v28 = vpop.f32.mrb[9].mxu0  ;;  %1291 = vst [vmem:[%s1652_s30 + $0x48] sm:$0xff] %v1251_v24   ;;  %v1375_v29 = vpop.f32.mrb[9].mxu1 }
 0x10b   : > { %v1328_v30 = vadd.f32 %v1327_v28, %v1326_v26  ;;  %v1329_v31 = vpop.f32.mrb[10].mxu0  ;;  %v1666_v32 = vadd.f32 %v1375_v29, %v1374_v27  ;;  %v1377_v33 = vpop.f32.mrb[10].mxu1 }
 0x10c   : > { %v1330_v34 = vpop.f32.mrb[11].mxu0  ;;  %v1378_v35 = vpop.f32.mrb[11].mxu1 }
 0x10d   : > { %v869_v36 = vadd.f32 %v1328_v30, %v868_v22  ;;  %v907_v37 = vmul.f32 %v1328_v30, %v1328_v30  ;;  %v1331_v38 = vadd.f32 %v1330_v34, %v1329_v31  ;;  %v1668_v39 = vadd.f32 %v1378_v35, %v1377_v33 }
 0x10f   : > { %v938_v40 = vadd.f32 %v937_v25, %v907_v37  ;;  %v1216_v41 = vpack.c.bf16 %v1331_v38, %v1328_v30  ;;  %v870_v42 = vadd.f32 %v1331_v38, %v869_v36  ;;  %v908_v43 = vmul.f32 %v1331_v38, %v1331_v38 }
 0x110   : > { %v1256_v44 = vpack.c.bf16 %v1668_v39, %v1666_v32 }
 0x111   : > { %1284 = vst [vmem:[%s1652_s30 + $0x10] sm:$0xff] %v1216_v41   ;;  %v939_v45 = vadd.f32 %v938_v40, %v908_v43  ;;  %v1332_v46 = vpop.f32.mrb[12].mxu0  ;;  %v1380_v47 = vpop.f32.mrb[12].mxu1 }
 0x112   : > { %v1333_v48 = vpop.f32.mrb[13].mxu0  ;;  %1292 = vst [vmem:[%s1652_s30 + $0x50] sm:$0xff] %v1256_v44   ;;  %v1381_v49 = vpop.f32.mrb[13].mxu1 }
 0x113   : > { %v1334_v50 = vadd.f32 %v1333_v48, %v1332_v46  ;;  %v1335_v51 = vpop.f32.mrb[14].mxu0  ;;  %v1674_v52 = vadd.f32 %v1381_v49, %v1380_v47  ;;  %v1383_v53 = vpop.f32.mrb[14].mxu1 }
 0x114   : > { %v1336_v54 = vpop.f32.mrb[15].mxu0  ;;  %v1384_v55 = vpop.f32.mrb[15].mxu1 }
 0x115   : > { %v871_v56 = vadd.f32 %v1334_v50, %v870_v42  ;;  %v909_v57 = vmul.f32 %v1334_v50, %v1334_v50  ;;  %v1337_v59 = vadd.f32 %v1336_v54, %v1335_v51  ;;  %v1676_v60 = vadd.f32 %v1384_v55, %v1383_v53 }
 0x117   : > { %v940_v61 = vadd.f32 %v939_v45, %v909_v57  ;;  %v1221_v62 = vpack.c.bf16 %v1337_v59, %v1334_v50  ;;  %v872_v0 = vadd.f32 %v1337_v59, %v871_v56  ;;  %v910_v1 = vmul.f32 %v1337_v59, %v1337_v59 }
 0x118   : > { %v1261_v2 = vpack.c.bf16 %v1676_v60, %v1674_v52 }
 0x119   : > { %1285 = vst [vmem:[%s1652_s30 + $0x18] sm:$0xff] %v1221_v62   ;;  %v941_v3 = vadd.f32 %v940_v61, %v910_v1  ;;  %v1338_v4 = vpop.f32.mrb[16].mxu0  ;;  %v1386_v5 = vpop.f32.mrb[16].mxu1 }
 0x11a   : > { %v1339_v6 = vpop.f32.mrb[17].mxu0  ;;  %1293 = vst [vmem:[%s1652_s30 + $0x58] sm:$0xff] %v1261_v2   ;;  %v1387_v7 = vpop.f32.mrb[17].mxu1 }
 0x11b   : > { %v1340_v8 = vadd.f32 %v1339_v6, %v1338_v4  ;;  %v1341_v9 = vpop.f32.mrb[18].mxu0  ;;  %v1682_v10 = vadd.f32 %v1387_v7, %v1386_v5  ;;  %v1389_v11 = vpop.f32.mrb[18].mxu1 }
 0x11c   : > { %v1342_v13 = vpop.f32.mrb[19].mxu0  ;;  %v1390_v14 = vpop.f32.mrb[19].mxu1 }
 0x11d   : > { %v873_v15 = vadd.f32 %v1340_v8, %v872_v0  ;;  %v911_v16 = vmul.f32 %v1340_v8, %v1340_v8  ;;  %v1343_v17 = vadd.f32 %v1342_v13, %v1341_v9  ;;  %v1684_v18 = vadd.f32 %v1390_v14, %v1389_v11 }
 0x11f   : > { %v942_v20 = vadd.f32 %v941_v3, %v911_v16  ;;  %v1226_v21 = vpack.c.bf16 %v1343_v17, %v1340_v8  ;;  %v874_v22 = vadd.f32 %v1343_v17, %v873_v15  ;;  %v912_v23 = vmul.f32 %v1343_v17, %v1343_v17 }
 0x120   : > { %v1266_v24 = vpack.c.bf16 %v1684_v18, %v1682_v10 }
 0x121   : > { %1286 = vst [vmem:[%s1652_s30 + $0x20] sm:$0xff] %v1226_v21   ;;  %v943_v25 = vadd.f32 %v942_v20, %v912_v23  ;;  %v1344_v26 = vpop.f32.mrb[20].mxu0  ;;  %v1392_v27 = vpop.f32.mrb[20].mxu1 }
 0x122   : > { %v1345_v28 = vpop.f32.mrb[21].mxu0  ;;  %1294 = vst [vmem:[%s1652_s30 + $0x60] sm:$0xff] %v1266_v24   ;;  %v1393_v29 = vpop.f32.mrb[21].mxu1 }
 0x123   : > { %v1346_v30 = vadd.f32 %v1345_v28, %v1344_v26  ;;  %v1347_v31 = vpop.f32.mrb[22].mxu0  ;;  %v1690_v33 = vadd.f32 %v1393_v29, %v1392_v27  ;;  %v1395_v34 = vpop.f32.mrb[22].mxu1 }
 0x124   : > { %v1348_v35 = vpop.f32.mrb[23].mxu0  ;;  %v1396_v36 = vpop.f32.mrb[23].mxu1 }
 0x125   : > { %v875_v37 = vadd.f32 %v1346_v30, %v874_v22  ;;  %v913_v38 = vmul.f32 %v1346_v30, %v1346_v30  ;;  %v1349_v40 = vadd.f32 %v1348_v35, %v1347_v31  ;;  %v1692_v41 = vadd.f32 %v1396_v36, %v1395_v34 }
 0x126   : > { %v919_v31 = vmul.f32 %v1645_v58, %v1645_v58  ;;  %v920_v36 = vmul.f32 %v1647_v63, %v1647_v63 }
 0x127   : > { %v944_v42 = vadd.f32 %v943_v25, %v913_v38  ;;  %v1231_v43 = vpack.c.bf16 %v1349_v40, %v1346_v30  ;;  %v876_v44 = vadd.f32 %v1349_v40, %v875_v37  ;;  %v914_v45 = vmul.f32 %v1349_v40, %v1349_v40 }
 0x128   : > { %v1271_v46 = vpack.c.bf16 %v1692_v41, %v1690_v33  ;;  %v921_v40 = vmul.f32 %v1658_v12, %v1658_v12 }
 0x129   : > { %1287 = vst [vmem:[%s1652_s30 + $0x28] sm:$0xff] %v1231_v43   ;;  %v945_v47 = vadd.f32 %v944_v42, %v914_v45  ;;  %v1350_v48 = vpop.f32.mrb[24].mxu0  ;;  %v1398_v49 = vpop.f32.mrb[24].mxu1 }
 0x12a   : > { %v1351_v50 = vpop.f32.mrb[25].mxu0  ;;  %1295 = vst [vmem:[%s1652_s30 + $0x68] sm:$0xff] %v1271_v46   ;;  %v1399_v51 = vpop.f32.mrb[25].mxu1  ;;  %v923_v46 = vmul.f32 %v1666_v32, %v1666_v32 }
 0x12b   : > { %v1352_v53 = vadd.f32 %v1351_v50, %v1350_v48  ;;  %v1353_v54 = vpop.f32.mrb[26].mxu0  ;;  %v1698_v55 = vadd.f32 %v1399_v51, %v1398_v49  ;;  %v1401_v56 = vpop.f32.mrb[26].mxu1 }
 0x12c   : > { %v1354_v57 = vpop.f32.mrb[27].mxu0  ;;  %v1402_v59 = vpop.f32.mrb[27].mxu1 }
 0x12d   : > { %v877_v61 = vadd.f32 %v1352_v53, %v876_v44  ;;  %v915_v62 = vmul.f32 %v1352_v53, %v1352_v53  ;;  %v1355_v0 = vadd.f32 %v1354_v57, %v1353_v54  ;;  %v1700_v1 = vadd.f32 %v1402_v59, %v1401_v56 }
 0x12e   : > { %v922_v44 = vmul.f32 %v1660_v19, %v1660_v19  ;;  %v927_v57 = vmul.f32 %v1682_v10, %v1682_v10 }
 0x12f   : > { %v946_v2 = vadd.f32 %v945_v47, %v915_v62  ;;  %v1236_v3 = vpack.c.bf16 %v1355_v0, %v1352_v53  ;;  %v878_v4 = vadd.f32 %v1355_v0, %v877_v61  ;;  %v916_v5 = vmul.f32 %v1355_v0, %v1355_v0 }
 0x130   : > { %v1276_v6 = vpack.c.bf16 %v1700_v1, %v1698_v55  ;;  %v928_v62 = vmul.f32 %v1684_v18, %v1684_v18 }
 0x131   : > { %1288 = vst [vmem:[%s1652_s30 + $0x30] sm:$0xff] %v1236_v3   ;;  %v947_v7 = vadd.f32 %v946_v2, %v916_v5  ;;  %v1356_v8 = vpop.f32.mrb[28].mxu0  ;;  %v1404_v9 = vpop.f32.mrb[28].mxu1  ;;  %v929_v2 = vmul.f32 %v1690_v33, %v1690_v33 }
 0x132   : > { %v1357_v11 = vpop.f32.mrb[29].mxu0  ;;  %1296 = vst [vmem:[%s1652_s30 + $0x70] sm:$0xff] %v1276_v6   ;;  %v1405_v13 = vpop.f32.mrb[29].mxu1  ;;  %v931_v6 = vmul.f32 %v1698_v55, %v1698_v55 }
 0x133   : > { %v1358_v14 = vadd.f32 %v1357_v11, %v1356_v8  ;;  %v1359_v15 = vpop.f32.mrb[30].mxu0  ;;  %v1406_v16 = vadd.f32 %v1405_v13, %v1404_v9  ;;  %v1407_v17 = vpop.f32.mrb[30].mxu1 }
 0x134   : > { %v1360_v20 = vpop.f32.mrb[31].mxu0  ;;  %v1408_v21 = vpop.f32.mrb[31].mxu1 }
 0x135   : > { %v879_v22 = vadd.f32 %v1358_v14, %v878_v4  ;;  %v917_v23 = vmul.f32 %v1358_v14, %v1358_v14  ;;  %v1361_v24 = vadd.f32 %v1360_v20, %v1359_v15  ;;  %v1409_v25 = vadd.f32 %v1408_v21, %v1407_v17 }
 0x136   : > { %v933_v8 = vmul.f32 %v1406_v16, %v1406_v16 }
 0x137   : > { %v948_v26 = vadd.f32 %v947_v7, %v917_v23  ;;  %v1241_v27 = vpack.c.bf16 %v1361_v24, %v1358_v14  ;;  %v880_v28 = vadd.f32 %v1361_v24, %v879_v22  ;;  %v918_v29 = vmul.f32 %v1361_v24, %v1361_v24 }
 0x138   : > { %v1281_v30 = vpack.c.bf16 %v1409_v25, %v1406_v16  ;;  %v934_v15 = vmul.f32 %v1409_v25, %v1409_v25 }
 0x139   : > { %1289 = vst [vmem:[%s1652_s30 + $0x38] sm:$0xff] %v1241_v27   ;;  %v881_v34 = vadd.f32 %v1645_v58, %v880_v28  ;;  %v949_v35 = vadd.f32 %v948_v26, %v918_v29 }
 0x13a   : > { %1297 = vst [vmem:[%s1652_s30 + $0x78] sm:$0xff] %v1281_v30  }
 0x13b   : > { %v882_v37 = vadd.f32 %v1647_v63, %v881_v34  ;;  %v950_v38 = vadd.f32 %v949_v35, %v919_v31  ;;  %v924_v63 = vmul.f32 %v1668_v39, %v1668_v39 }
 0x13d   : > { %v883_v42 = vadd.f32 %v1658_v12, %v882_v37  ;;  %v951_v43 = vadd.f32 %v950_v38, %v920_v36  ;;  %v925_v12 = vmul.f32 %v1674_v52, %v1674_v52 }
 0x13f   : > { %v884_v45 = vadd.f32 %v1660_v19, %v883_v42  ;;  %v952_v58 = vadd.f32 %v951_v43, %v921_v40  ;;  %v926_v19 = vmul.f32 %v1676_v60, %v1676_v60 }
 0x141   : > { %v953_v47 = vadd.f32 %v952_v58, %v922_v44  ;;  %v885_v48 = vadd.f32 %v1666_v32, %v884_v45 }
 0x143   : > { %v886_v49 = vadd.f32 %v1668_v39, %v885_v48  ;;  %v954_v50 = vadd.f32 %v953_v47, %v923_v46 }
 0x145   : > { %v887_v51 = vadd.f32 %v1674_v52, %v886_v49  ;;  %v955_v53 = vadd.f32 %v954_v50, %v924_v63 }
 0x147   : > { %v888_v54 = vadd.f32 %v1676_v60, %v887_v51  ;;  %v956_v56 = vadd.f32 %v955_v53, %v925_v12 }
 0x149   : > { %v889_v32 = vadd.f32 %v1682_v10, %v888_v54  ;;  %v957_v59 = vadd.f32 %v956_v56, %v926_v19  ;;  %v930_v10 = vmul.f32 %v1692_v41, %v1692_v41 }
 0x14b   : > { %v958_v39 = vadd.f32 %v957_v59, %v927_v57  ;;  %v890_v61 = vadd.f32 %v1684_v18, %v889_v32 }
 0x14d   : > { %v959_v52 = vadd.f32 %v958_v39, %v928_v62  ;;  %v891_v0 = vadd.f32 %v1690_v33, %v890_v61  ;;  %v932_v33 = vmul.f32 %v1700_v1, %v1700_v1 }
 0x14f   : > { %v960_v60 = vadd.f32 %v959_v52, %v929_v2  ;;  %v892_v3 = vadd.f32 %v1692_v41, %v891_v0 }
 0x151   : > { %v961_v4 = vadd.f32 %v960_v60, %v930_v10  ;;  %v893_v5 = vadd.f32 %v1698_v55, %v892_v3 }
 0x153   : > { %v962_v18 = vadd.f32 %v961_v4, %v931_v6  ;;  %v894_v7 = vadd.f32 %v1700_v1, %v893_v5 }
 0x155   : > { %v963_v9 = vadd.f32 %v962_v18, %v932_v33  ;;  %v895_v11 = vadd.f32 %v1406_v16, %v894_v7 }
 0x157   : > { %v964_v13 = vadd.f32 %v963_v9, %v933_v8  ;;  %v896_v14 = vadd.f32 %v1409_v25, %v895_v11 }
 0x159   : > { %v897_v41 = vrot.slane %v896_v14, 4  ;;  %v965_v17 = vadd.f32 %v964_v13, %v934_v15 }
 0x15b   : > { %v898_v20 = vadd.f32 %v897_v41, %v896_v14  ;;  %v966_v21 = vrot.slane %v965_v17, 4 }
 0x15d   : > { %v899_v22 = vrot.slane %v898_v20, 2  ;;  %v967_v55 = vadd.f32 %v966_v21, %v965_v17 }
 0x15f   : > { %v900_v23 = vadd.f32 %v899_v22, %v898_v20  ;;  %v968_v24 = vrot.slane %v967_v55, 2 }
 0x161   : > { %v901_v26 = vrot.slane %v900_v23, 1  ;;  %v969_v27 = vadd.f32 %v968_v24, %v967_v55 }
 0x163   : > { %v970_v1 = vrot.slane %v969_v27, 1  ;;  %v902_v16 = vadd.f32 %v901_v26, %v900_v23 }
 0x165   : > { %v971_v25 = vadd.f32 %v970_v1, %v969_v27 }
 0x167   : > { %v972_v28 = vsel %vm538_vm0, %v902_v16, %v971_v25 }
 0x168   : > { %973 = vst [vmem:[%s187_s6] sm:$0x3] %v972_v28 }
 0x169 PF: > { %s14_s12 = sadd.s32 1, %s1505_s12  }
 0x16a   : > { %p11_p5 = scmp.ge.s32.totalorder %s14_s12, 4  }
 0x16c   :  { %13 = sbr.rel (!%p11_p5) target bundleno = 1 (0x1), region = 70 }

// kernel: transformer_forward.34
= control target key start
LH: loop header
LB: loop body
LE: loop exit
PB: predicated region body
PF: predicated region fallthrough
CT: control target
= control target key end

     0   :  { %s422_s0 = inlined_call_operand.vmem [shape: bf16[128,128], index: 0, kind: input, shape index: {}]   ;;  %s423_s1 = inlined_call_operand.vmem [shape: f32[1,128], index: 1, kind: input, shape index: {}]   ;;  %s424_s2 = inlined_call_operand.vmem [shape: f32[1,128], index: 2, kind: input, shape index: {}]   ;;  %s425_s3 = inlined_call_operand.vmem [shape: bf16[128,128], index: 3, kind: output, shape index: {}]  }
   0x1   :  { %v227_v0 = vld [vmem:[%s422_s0] sm:$0xff]   ;;  %v298_v4 = vld [vmem:[%s422_s0 + $0x8] sm:$0xff]   ;;  %v299_v5 = vld [vmem:[%s422_s0 + $0x10] sm:$0xff]  }
   0x2   :  { %v338_v1 = vld [vmem:[%s423_s1] ss:$0 sm:$0xff]  ;;  %v228_v2 = vunpack.c.l.bf16 %v227_v0  ;;  %v229_v3 = vunpack.c.h.bf16 %v227_v0  ;;  %v300_v6 = vld [vmem:[%s422_s0 + $0x18] sm:$0xff]   ;;  %v232_v8 = vunpack.c.l.bf16 %v298_v4  ;;  %v233_v9 = vunpack.c.h.bf16 %v298_v4  ;;  %v302_v33 = vld [vmem:[%s422_s0 + $0x28] sm:$0xff]  }
   0x3   :  { %v352_v7 = vld [vmem:[%s424_s2] ss:$0 sm:$0xff]  ;;  %v236_v10 = vunpack.c.l.bf16 %v299_v5  ;;  %v237_v11 = vunpack.c.h.bf16 %v299_v5  ;;  %v240_v14 = vunpack.c.l.bf16 %v300_v6  ;;  %v241_v15 = vunpack.c.h.bf16 %v300_v6  ;;  %v303_v38 = vld [vmem:[%s422_s0 + $0x30] sm:$0xff]   ;;  %v304_v43 = vld [vmem:[%s422_s0 + $0x38] sm:$0xff]  }
   0x4   :  { %v53_v12 = vmul.f32 %v228_v2, %v338_v1  ;;  %v54_v13 = vmul.f32 %v229_v3, %v338_v1  ;;  %v55_v16 = vmul.f32 %v232_v8, %v338_v1  ;;  %v56_v17 = vmul.f32 %v233_v9, %v338_v1  ;;  %v301_v28 = vld [vmem:[%s422_s0 + $0x20] sm:$0xff]  }
   0x5   :  { %v57_v18 = vmul.f32 %v236_v10, %v338_v1  ;;  %v58_v19 = vmul.f32 %v237_v11, %v338_v1  ;;  %v59_v22 = vmul.f32 %v240_v14, %v338_v1  ;;  %v60_v23 = vmul.f32 %v241_v15, %v338_v1 }
   0x6   :  { %v76_v20 = vadd.f32 %v352_v7, %v53_v12  ;;  %v77_v21 = vadd.f32 %v352_v7, %v54_v13  ;;  %v78_v24 = vadd.f32 %v352_v7, %v55_v16  ;;  %v79_v25 = vadd.f32 %v352_v7, %v56_v17 }
   0x7   :  { %v80_v26 = vadd.f32 %v352_v7, %v57_v18  ;;  %v81_v27 = vadd.f32 %v352_v7, %v58_v19  ;;  %v82_v31 = vadd.f32 %v352_v7, %v59_v22  ;;  %v83_v32 = vadd.f32 %v352_v7, %v60_v23 }
   0x8   :  { %v92_v29 = vmax.f32 %v76_v20, 0.0  ;;  %v93_v30 = vmax.f32 %v77_v21, 0.0  ;;  %v94_v34 = vmax.f32 %v78_v24, 0.0  ;;  %v95_v35 = vmax.f32 %v79_v25, 0.0 }
   0x9   :  { %v96_v36 = vmax.f32 %v80_v26, 0.0  ;;  %v97_v37 = vmax.f32 %v81_v27, 0.0  ;;  %v98_v40 = vmax.f32 %v82_v31, 0.0  ;;  %v99_v41 = vmax.f32 %v83_v32, 0.0 }
   0xa   :  { %v261_v39 = vpack.c.bf16 %v93_v30, %v92_v29  ;;  %v244_v42 = vunpack.c.l.bf16 %v301_v28  ;;  %v266_v44 = vpack.c.bf16 %v95_v35, %v94_v34  ;;  %v245_v46 = vunpack.c.h.bf16 %v301_v28 }
   0xb   :  { %v271_v45 = vpack.c.bf16 %v97_v37, %v96_v36  ;;  %v248_v47 = vunpack.c.l.bf16 %v302_v33  ;;  %v276_v48 = vpack.c.bf16 %v99_v41, %v98_v40  ;;  %v249_v50 = vunpack.c.h.bf16 %v302_v33 }
   0xc   :  { %262 = vst [vmem:[%s425_s3] sm:$0xff] %v261_v39   ;;  %v61_v49 = vmul.f32 %v244_v42, %v338_v1  ;;  %v252_v51 = vunpack.c.l.bf16 %v303_v38  ;;  %305 = vst [vmem:[%s425_s3 + $0x8] sm:$0xff] %v266_v44   ;;  %v62_v52 = vmul.f32 %v245_v46, %v338_v1  ;;  %v253_v54 = vunpack.c.h.bf16 %v303_v38 }
   0xd   :  { %306 = vst [vmem:[%s425_s3 + $0x10] sm:$0xff] %v271_v45   ;;  %v63_v53 = vmul.f32 %v248_v47, %v338_v1  ;;  %v256_v55 = vunpack.c.l.bf16 %v304_v43  ;;  %307 = vst [vmem:[%s425_s3 + $0x18] sm:$0xff] %v276_v48   ;;  %v64_v57 = vmul.f32 %v249_v50, %v338_v1  ;;  %v257_v59 = vunpack.c.h.bf16 %v304_v43 }
   0xe   :  { %v84_v56 = vadd.f32 %v352_v7, %v61_v49  ;;  %v65_v58 = vmul.f32 %v252_v51, %v338_v1  ;;  %v85_v60 = vadd.f32 %v352_v7, %v62_v52  ;;  %v66_v62 = vmul.f32 %v253_v54, %v338_v1 }
   0xf   :  { %v86_v61 = vadd.f32 %v352_v7, %v63_v53  ;;  %v67_v63 = vmul.f32 %v256_v55, %v338_v1  ;;  %v87_v2 = vadd.f32 %v352_v7, %v64_v57  ;;  %v68_v4 = vmul.f32 %v257_v59, %v338_v1 }
  0x10   :  { %v100_v0 = vmax.f32 %v84_v56, 0.0  ;;  %v88_v3 = vadd.f32 %v352_v7, %v65_v58  ;;  %v101_v5 = vmax.f32 %v85_v60, 0.0  ;;  %v89_v8 = vadd.f32 %v352_v7, %v66_v62 }
  0x11   :  { %v102_v6 = vmax.f32 %v86_v61, 0.0  ;;  %v90_v9 = vadd.f32 %v352_v7, %v67_v63  ;;  %v103_v10 = vmax.f32 %v87_v2, 0.0  ;;  %v91_v12 = vadd.f32 %v352_v7, %v68_v4 }
  0x12   :  { %v104_v11 = vmax.f32 %v88_v3, 0.0  ;;  %v281_v13 = vpack.c.bf16 %v101_v5, %v100_v0  ;;  %v105_v14 = vmax.f32 %v89_v8, 0.0 }
  0x13   :  { %v106_v15 = vmax.f32 %v90_v9, 0.0  ;;  %v286_v16 = vpack.c.bf16 %v103_v10, %v102_v6  ;;  %v107_v17 = vmax.f32 %v91_v12, 0.0 }
  0x14   :  { %308 = vst [vmem:[%s425_s3 + $0x20] sm:$0xff] %v281_v13   ;;  %v291_v1 = vpack.c.bf16 %v105_v14, %v104_v11 }
  0x15   :  { %309 = vst [vmem:[%s425_s3 + $0x28] sm:$0xff] %v286_v16   ;;  %v296_v18 = vpack.c.bf16 %v107_v17, %v106_v15 }
  0x16   :  { %310 = vst [vmem:[%s425_s3 + $0x30] sm:$0xff] %v291_v1  }
  0x17   :  { %311 = vst [vmem:[%s425_s3 + $0x38] sm:$0xff] %v296_v18  }

// kernel: transformer_forward.33
= control target key start
LH: loop header
LB: loop body
LE: loop exit
PB: predicated region body
PF: predicated region fallthrough
CT: control target
= control target key end

     0   :  { %vm310_vm0 = vcmask 261120   ;;  %vm667_vm1 = vcmask 1040384   ;;  %s1160_s1 = inlined_call_operand.vmem [shape: bf16[288,128], index: 1, kind: input, shape index: {}]   ;;  %s1161_s0 = inlined_call_operand.vmem [shape: bf16[128,288], index: 0, kind: input, shape index: {}]   ;;  %s1162_s2 = inlined_call_operand.vmem [shape: bf16[128,128], index: 2, kind: output, shape index: {0}]   ;;  %s1163_s3 = inlined_call_operand.vmem [shape: f32[1,2,128], index: 3, kind: output, shape index: {1}]  }
   0x1   :  { %v917_v0 = vld [vmem:[%s1160_s1 + $0x40] sm:$0xff]   ;;  %v919_v2 = vld [vmem:[%s1160_s1 + $0x48] sm:$0xff]   ;;  %v921_v4 = vld [vmem:[%s1160_s1 + $0x50] sm:$0xff]  }
   0x2   :  { %v918_v1 = vld [vmem:[%s1160_s1] sm:$0xff]   ;;  %807 = vmatprep.subr.bf16.mxu0 %v917_v0  ;;  %901 = vmatprep.subr.bf16.mxu1 %v917_v0  ;;  %v920_v3 = vld [vmem:[%s1160_s1 + $0x8] sm:$0xff]   ;;  %v922_v5 = vld [vmem:[%s1160_s1 + $0x10] sm:$0xff]  }
   0x3   :  { %808 = vmatpush3.bf16.msra.mxu0 %v918_v1  ;;  %909 = vmatpush3.bf16.msra.mxu1 %v918_v1  ;;  %v923_v6 = vld [vmem:[%s1160_s1 + $0x58] sm:$0xff]   ;;  %v925_v8 = vld [vmem:[%s1160_s1 + $0x60] sm:$0xff]   ;;  %v927_v10 = vld [vmem:[%s1160_s1 + $0x68] sm:$0xff]  }
   0x4   :  { %809 = vmatprep.subr.bf16.mxu0 %v919_v2  ;;  %902 = vmatprep.subr.bf16.mxu1 %v919_v2  ;;  %v924_v7 = vld [vmem:[%s1160_s1 + $0x18] sm:$0xff]   ;;  %v926_v9 = vld [vmem:[%s1160_s1 + $0x20] sm:$0xff]   ;;  %v928_v13 = vld [vmem:[%s1160_s1 + $0x28] sm:$0xff]  }
   0x5   :  { %v935_v11 = vld [vmem:[%s1161_s0 + $0x4] ss:$12 sps:$4 sm:$0xff]   ;;  %v938_v12 = vld [vmem:[%s1161_s0 + $0x94] ss:$12 sps:$4 sm:$0xff]   ;;  %v931_v16 = vld [vmem:[%s1160_s1 + $0x78] sm:$0xff]  }
   0x6   :  { %v929_v14 = vld [vmem:[%s1160_s1 + $0x70] sm:$0xff]   ;;  %367 = vmatprep.mubr.bf16.mxu0 %v935_v11  ;;  %415 = vmatprep.mubr.bf16.mxu1 %v938_v12  ;;  %v932_v17 = vld [vmem:[%s1160_s1 + $0x38] sm:$0xff]   ;;  %v933_v18 = vld [vmem:[%s1161_s0] ss:$12 sps:$4 sm:$0xff]  }
   0x7   :  { %810 = vmatpush3.bf16.msra.mxu0 %v920_v3  ;;  %910 = vmatpush3.bf16.msra.mxu1 %v920_v3  ;;  %v930_v15 = vld [vmem:[%s1160_s1 + $0x30] sm:$0xff]   ;;  %v939_v19 = vld [vmem:[%s1160_s1 + $0x80] sm:$0xff]   ;;  %v940_v21 = vld [vmem:[%s1161_s0 + $0x1c] ss:$12 sps:$4 sm:$0xff]  }
   0x8   :  { %811 = vmatprep.subr.bf16.mxu0 %v921_v4  ;;  %903 = vmatprep.subr.bf16.mxu1 %v921_v4  ;;  %v936_v20 = vld [vmem:[%s1161_s0 + $0x90] ss:$12 sps:$4 sm:$0xff]   ;;  %v942_v22 = vld [vmem:[%s1161_s0 + $0xac] ss:$12 sps:$4 sm:$0xff]   ;;  %v945_v25 = vld [vmem:[%s1161_s0 + $0xa8] ss:$12 sps:$4 sm:$0xff]  }
   0x9   :  { %v946_v23 = vld [vmem:[%s1160_s1 + $0x88] sm:$0xff]   ;;  %v944_v24 = vld [vmem:[%s1161_s0 + $0x18] ss:$12 sps:$4 sm:$0xff]   ;;  %v947_v26 = vld [vmem:[%s1161_s0 + $0x34] ss:$12 sps:$4 sm:$0xff]  }
   0xa   :  { %v949_v27 = vld [vmem:[%s1161_s0 + $0x8] ss:$12 sps:$4 sm:$0xff]   ;;  %v950_v28 = vld [vmem:[%s1161_s0 + $0x30] ss:$12 sps:$4 sm:$0xff]   ;;  %v951_v29 = vld [vmem:[%s1161_s0 + $0x20] ss:$12 sps:$4 sm:$0xff]  }
   0xb   :  { %812 = vmatpush3.bf16.msra.mxu0 %v922_v5  ;;  %911 = vmatpush3.bf16.msra.mxu1 %v922_v5  ;;  %v952_v30 = vld [vmem:[%s1161_s0 + $0x4c] ss:$12 sps:$4 sm:$0xff]   ;;  %v955_v32 = vld [vmem:[%s1161_s0 + $0x48] ss:$12 sps:$4 sm:$0xff]   ;;  %v956_v33 = vld [vmem:[%s1161_s0 + $0x50] ss:$12 sps:$4 sm:$0xff]  }
   0xc   :  { %813 = vmatprep.subr.bf16.mxu0 %v923_v6  ;;  %904 = vmatprep.subr.bf16.mxu1 %v923_v6  ;;  %v954_v31 = vld [vmem:[%s1161_s0 + $0x38] ss:$12 sps:$4 sm:$0xff]   ;;  %v959_v35 = vld [vmem:[%s1161_s0 + $0x68] ss:$12 sps:$4 sm:$0xff]   ;;  %v960_v36 = vld [vmem:[%s1161_s0 + $0x60] ss:$12 sps:$4 sm:$0xff]  }
   0xd   :  { %v957_v34 = vld [vmem:[%s1161_s0 + $0x64] ss:$12 sps:$4 sm:$0xff]   ;;  %v961_v37 = vld [vmem:[%s1161_s0 + $0x80] ss:$12 sps:$4 sm:$0xff]   ;;  %v962_v38 = vld [vmem:[%s1161_s0 + $0x7c] ss:$12 sps:$4 sm:$0xff]  }
   0xe   :  { %v964_v39 = vld [vmem:[%s1161_s0 + $0x98] ss:$12 sps:$4 sm:$0xff]   ;;  %v966_v41 = vld [vmem:[%s1161_s0 + $0xb0] ss:$12 sps:$4 sm:$0xff]  }
   0xf   :  { %814 = vmatpush3.bf16.msra.mxu0 %v924_v7  ;;  %912 = vmatpush3.bf16.msra.mxu1 %v924_v7  ;;  %v965_v40 = vld [vmem:[%s1161_s0 + $0x78] ss:$12 sps:$4 sm:$0xff]  }
  0x10   :  { %815 = vmatprep.subr.bf16.mxu0 %v925_v8  ;;  %905 = vmatprep.subr.bf16.mxu1 %v925_v8 }
  0x13   :  { %816 = vmatpush3.bf16.msra.mxu0 %v926_v9  ;;  %913 = vmatpush3.bf16.msra.mxu1 %v926_v9 }
  0x14   :  { %817 = vmatprep.subr.bf16.mxu0 %v927_v10  ;;  %906 = vmatprep.subr.bf16.mxu1 %v927_v10 }
  0x17   :  { %818 = vmatpush3.bf16.msra.mxu0 %v928_v13  ;;  %914 = vmatpush3.bf16.msra.mxu1 %v928_v13 }
  0x18   :  { %819 = vmatprep.subr.bf16.mxu0 %v929_v14  ;;  %907 = vmatprep.subr.bf16.mxu1 %v929_v14 }
  0x1b   :  { %820 = vmatpush3.bf16.msra.mxu0 %v930_v15  ;;  %915 = vmatpush3.bf16.msra.mxu1 %v930_v15 }
  0x1c   :  { %821 = vmatprep.subr.bf16.mxu0 %v931_v16  ;;  %908 = vmatprep.subr.bf16.mxu1 %v931_v16 }
  0x1f   :  { %822 = vmatpush3.bf16.msra.mxu0 %v932_v17  ;;  %916 = vmatpush3.bf16.msra.mxu1 %v932_v17 }
  0x20   :  { %881 = vmatprep.subr.bf16.mxu1 %v939_v19 }
  0x22   :  { %368 = vmatmul.mubr.bf16.vlgmr.msra.gmra.mrb[0].mxu0 %v933_v18  ;;  %416 = vmatmul.mubr.bf16.vlgmr.msra.gmra.mrb[0].mxu1 %v936_v20 }
  0x23   :  { %882 = vmatpush3.bf16.msra.mxu1 %v939_v19  ;;  %375 = vmatprep.mubr.bf16.mxu0 %v940_v21 }
  0x24   :  { %423 = vmatprep.mubr.bf16.mxu1 %v942_v22  ;;  %883 = vmatprep.subr.bf16.mxu1 %v946_v23 }
  0x27   :  { %884 = vmatpush3.bf16.msra.mxu1 %v946_v23 }
  0x2a   :  { %376 = vmatmul.mubr.bf16.gmra.mrb[4].mxu0 %v944_v24  ;;  %424 = vmatmul.mubr.bf16.gmra.mrb[4].mxu1 %v945_v25 }
  0x2b   :  { %383 = vmatprep.mubr.bf16.mxu0 %v947_v26  ;;  %885 = vmatprep.mubr.msk.bf16.mxu1 %vm310_vm0, %v949_v27 }
  0x32   :  { %384 = vmatmul.mubr.bf16.gmra.mrb[8].mxu0 %v950_v28  ;;  %886 = vmatmul.mubr.msk.bf16.vlgmr.msra.gmra.mrb[8].mxu1 %vm310_vm0, %v951_v29 }
  0x33   :  { %391 = vmatprep.mubr.bf16.mxu0 %v952_v30  ;;  %889 = vmatprep.mubr.msk.bf16.mxu1 %vm310_vm0, %v954_v31 }
  0x3a   :  { %392 = vmatmul.mubr.bf16.gmra.mrb[12].mxu0 %v955_v32  ;;  %890 = vmatmul.mubr.msk.bf16.gmra.mrb[12].mxu1 %vm310_vm0, %v956_v33 }
  0x3b   :  { %399 = vmatprep.mubr.bf16.mxu0 %v957_v34  ;;  %893 = vmatprep.mubr.msk.bf16.mxu1 %vm310_vm0, %v959_v35 }
  0x42   :  { %400 = vmatmul.mubr.bf16.gmra.mrb[16].mxu0 %v960_v36  ;;  %894 = vmatmul.mubr.msk.bf16.gmra.mrb[16].mxu1 %vm310_vm0, %v961_v37 }
  0x43   :  { %407 = vmatprep.mubr.bf16.mxu0 %v962_v38  ;;  %897 = vmatprep.mubr.msk.bf16.mxu1 %vm310_vm0, %v964_v39 }
  0x4a   :  { %408 = vmatmul.mubr.bf16.gmra.mrb[20].mxu0 %v965_v40  ;;  %898 = vmatmul.mubr.msk.bf16.gmra.mrb[20].mxu1 %vm310_vm0, %v966_v41 }
  0xf5   :  { %v823_v42 = vpop.f32.mrb[0].mxu0  ;;  %v859_v43 = vpop.f32.mrb[0].mxu1 }
  0xf6   :  { %v824_v44 = vpop.f32.mrb[1].mxu0  ;;  %v860_v45 = vpop.f32.mrb[1].mxu1 }
  0xf7   :  { %v825_v46 = vadd.f32 %v824_v44, %v823_v42  ;;  %v826_v47 = vpop.f32.mrb[2].mxu0  ;;  %v1121_v48 = vadd.f32 %v860_v45, %v859_v43  ;;  %v862_v49 = vpop.f32.mrb[2].mxu1 }
  0xf8   :  { %v827_v50 = vpop.f32.mrb[3].mxu0  ;;  %v863_v51 = vpop.f32.mrb[3].mxu1 }
  0xf9   :  { %v828_v52 = vadd.f32 %v827_v50, %v826_v47  ;;  %v1123_v53 = vadd.f32 %v863_v51, %v862_v49 }
  0xfd   :  { %v829_v54 = vpop.f32.mrb[4].mxu0  ;;  %v865_v55 = vpop.f32.mrb[4].mxu1 }
  0xfe   :  { %v830_v56 = vpop.f32.mrb[5].mxu0  ;;  %v866_v57 = vpop.f32.mrb[5].mxu1 }
  0xff   :  { %v831_v58 = vadd.f32 %v830_v56, %v829_v54  ;;  %v832_v59 = vpop.f32.mrb[6].mxu0  ;;  %v1125_v60 = vadd.f32 %v866_v57, %v865_v55  ;;  %v868_v61 = vpop.f32.mrb[6].mxu1 }
 0x100   :  { %v833_v62 = vpop.f32.mrb[7].mxu0  ;;  %v869_v63 = vpop.f32.mrb[7].mxu1 }
 0x101   :  { %v834_v0 = vadd.f32 %v833_v62, %v832_v59  ;;  %v1127_v1 = vadd.f32 %v869_v63, %v868_v61 }
 0x105   :  { %v835_v2 = vpop.f32.mrb[8].mxu0  ;;  %v887_v3 = vpop.f32.mrb[8].mxu1 }
 0x106   :  { %v475_v4 = vadd.f32 %v887_v3, %v831_v58  ;;  %v836_v5 = vpop.f32.mrb[9].mxu0  ;;  %v466_v6 = vpop.f32.mrb[9].mxu1 }
 0x107   :  { %v837_v7 = vadd.f32 %v836_v5, %v835_v2  ;;  %v467_v8 = vadd.f32 %v825_v46, %v466_v6  ;;  %v838_v9 = vpop.f32.mrb[10].mxu0  ;;  %v888_v10 = vpop.f32.mrb[10].mxu1 }
 0x108   :  { %v478_v11 = vadd.f32 %v888_v10, %v834_v0  ;;  %v839_v12 = vpop.f32.mrb[11].mxu0  ;;  %v469_v13 = vpop.f32.mrb[11].mxu1  ;;  %v632_v21 = vmul.f32 %v475_v4, %v475_v4 }
 0x109   :  { %v840_v14 = vadd.f32 %v839_v12, %v838_v9  ;;  %v470_v15 = vadd.f32 %v828_v52, %v469_v13  ;;  %v630_v17 = vmul.f32 %v467_v8, %v467_v8 }
 0x10a   :  { %v768_v16 = vpack.c.bf16 %v478_v11, %v475_v4  ;;  %v633_v26 = vmul.f32 %v478_v11, %v478_v11 }
 0x10b   :  { %v763_v18 = vpack.c.bf16 %v470_v15, %v467_v8  ;;  %v609_v19 = vadd.f32 %v470_v15, %v467_v8  ;;  %v631_v20 = vmul.f32 %v470_v15, %v470_v15 }
 0x10c   :  { %800 = vst [vmem:[%s1162_s2 + $0x8] sm:$0xff] %v768_v16  }
 0x10d   :  { %764 = vst [vmem:[%s1162_s2] sm:$0xff] %v763_v18   ;;  %v610_v22 = vadd.f32 %v609_v19, %v475_v4  ;;  %v646_v23 = vadd.f32 %v631_v20, %v630_v17  ;;  %v841_v24 = vpop.f32.mrb[12].mxu0  ;;  %v891_v25 = vpop.f32.mrb[12].mxu1 }
 0x10e   :  { %v842_v27 = vpop.f32.mrb[13].mxu0  ;;  %v482_v28 = vpop.f32.mrb[13].mxu1 }
 0x10f   :  { %v647_v29 = vadd.f32 %v646_v23, %v632_v21  ;;  %v843_v30 = vadd.f32 %v842_v27, %v841_v24  ;;  %v483_v31 = vadd.f32 %v837_v7, %v482_v28  ;;  %v611_v32 = vadd.f32 %v610_v22, %v478_v11  ;;  %v844_v33 = vpop.f32.mrb[14].mxu0  ;;  %v892_v34 = vpop.f32.mrb[14].mxu1 }
 0x110   :  { %v845_v35 = vpop.f32.mrb[15].mxu0  ;;  %v485_v36 = vpop.f32.mrb[15].mxu1 }
 0x111   :  { %v491_v37 = vadd.f32 %v891_v25, %v843_v30  ;;  %v612_v38 = vadd.f32 %v611_v32, %v483_v31  ;;  %v634_v39 = vmul.f32 %v483_v31, %v483_v31  ;;  %v648_v40 = vadd.f32 %v647_v29, %v633_v26 }
 0x112   :  { %v846_v41 = vadd.f32 %v845_v35, %v844_v33  ;;  %v486_v42 = vadd.f32 %v840_v14, %v485_v36 }
 0x113   :  { %v649_v43 = vadd.f32 %v648_v40, %v634_v39  ;;  %v636_v51 = vmul.f32 %v491_v37, %v491_v37 }
 0x114   :  { %v494_v44 = vadd.f32 %v892_v34, %v846_v41  ;;  %v773_v45 = vpack.c.bf16 %v486_v42, %v483_v31  ;;  %v613_v46 = vadd.f32 %v612_v38, %v486_v42  ;;  %v635_v47 = vmul.f32 %v486_v42, %v486_v42 }
 0x115   :  { %v847_v49 = vpop.f32.mrb[16].mxu0  ;;  %v895_v50 = vpop.f32.mrb[16].mxu1 }
 0x116   :  { %v778_v52 = vpack.c.bf16 %v494_v44, %v491_v37  ;;  %801 = vst [vmem:[%s1162_s2 + $0x10] sm:$0xff] %v773_v45   ;;  %v614_v54 = vadd.f32 %v613_v46, %v491_v37  ;;  %v650_v55 = vadd.f32 %v649_v43, %v635_v47  ;;  %v848_v56 = vpop.f32.mrb[17].mxu0  ;;  %v498_v57 = vpop.f32.mrb[17].mxu1  ;;  %v637_v62 = vmul.f32 %v494_v44, %v494_v44 }
 0x117   :  { %v849_v58 = vadd.f32 %v848_v56, %v847_v49  ;;  %v850_v59 = vpop.f32.mrb[18].mxu0  ;;  %v896_v61 = vpop.f32.mrb[18].mxu1 }
 0x118   :  { %802 = vst [vmem:[%s1162_s2 + $0x18] sm:$0xff] %v778_v52   ;;  %v651_v63 = vadd.f32 %v650_v55, %v636_v51  ;;  %v851_v0 = vpop.f32.mrb[19].mxu0  ;;  %v615_v2 = vadd.f32 %v614_v54, %v494_v44  ;;  %v501_v3 = vpop.f32.mrb[19].mxu1 }
 0x119   :  { %v852_v4 = vadd.f32 %v851_v0, %v850_v59  ;;  %v499_v5 = vadd.f32 %v849_v58, %v498_v57 }
 0x11a   :  { %v652_v6 = vadd.f32 %v651_v63, %v637_v62 }
 0x11b   :  { %v616_v7 = vadd.f32 %v615_v2, %v499_v5  ;;  %v638_v8 = vmul.f32 %v499_v5, %v499_v5  ;;  %v502_v9 = vadd.f32 %v852_v4, %v501_v3 }
 0x11d   :  { %v653_v10 = vadd.f32 %v652_v6, %v638_v8  ;;  %v783_v11 = vpack.c.bf16 %v502_v9, %v499_v5  ;;  %v617_v12 = vadd.f32 %v616_v7, %v502_v9  ;;  %v639_v13 = vmul.f32 %v502_v9, %v502_v9  ;;  %v853_v14 = vpop.f32.mrb[20].mxu0  ;;  %v899_v15 = vpop.f32.mrb[20].mxu1 }
 0x11e   :  { %v523_v16 = vadd.f32 %v899_v15, %v1125_v60  ;;  %v854_v17 = vpop.f32.mrb[21].mxu0  ;;  %v514_v18 = vpop.f32.mrb[21].mxu1 }
 0x11f   :  { %803 = vst [vmem:[%s1162_s2 + $0x20] sm:$0xff] %v783_v11   ;;  %v654_v19 = vadd.f32 %v653_v10, %v639_v13  ;;  %v855_v20 = vadd.f32 %v854_v17, %v853_v14  ;;  %v515_v21 = vadd.f32 %v1121_v48, %v514_v18  ;;  %v856_v22 = vpop.f32.mrb[22].mxu0  ;;  %v900_v23 = vpop.f32.mrb[22].mxu1 }
 0x120   :  { %v526_v24 = vadd.f32 %v900_v23, %v1127_v1  ;;  %v857_v25 = vpop.f32.mrb[23].mxu0  ;;  %v517_v26 = vpop.f32.mrb[23].mxu1  ;;  %v644_v41 = vmul.f32 %v523_v16, %v523_v16 }
 0x121   :  { %v507_v27 = vadd.f32 %v895_v50, %v855_v20  ;;  %v858_v28 = vadd.f32 %v857_v25, %v856_v22  ;;  %v518_v60 = vadd.f32 %v1123_v53, %v517_v26  ;;  %v642_v1 = vmul.f32 %v515_v21, %v515_v21 }
 0x122   :  { %v798_v29 = vpack.c.bf16 %v526_v24, %v523_v16  ;;  %v645_v44 = vmul.f32 %v526_v24, %v526_v24 }
 0x123   :  { %v618_v30 = vadd.f32 %v617_v12, %v507_v27  ;;  %v640_v31 = vmul.f32 %v507_v27, %v507_v27  ;;  %v510_v32 = vadd.f32 %v896_v61, %v858_v28  ;;  %v793_v33 = vpack.c.bf16 %v518_v60, %v515_v21 }
 0x124   :  { %806 = vst [vmem:[%s1162_s2 + $0x38] sm:$0xff] %v798_v29   ;;  %v643_v39 = vmul.f32 %v518_v60, %v518_v60 }
 0x125   :  { %v655_v48 = vadd.f32 %v654_v19, %v640_v31  ;;  %v788_v34 = vpack.c.bf16 %v510_v32, %v507_v27  ;;  %v619_v35 = vadd.f32 %v618_v30, %v510_v32  ;;  %v641_v36 = vmul.f32 %v510_v32, %v510_v32  ;;  %805 = vst [vmem:[%s1162_s2 + $0x30] sm:$0xff] %v793_v33  }
 0x127   :  { %804 = vst [vmem:[%s1162_s2 + $0x28] sm:$0xff] %v788_v34   ;;  %v656_v53 = vadd.f32 %v655_v48, %v641_v36  ;;  %v620_v37 = vadd.f32 %v619_v35, %v515_v21 }
 0x129   :  { %v621_v38 = vadd.f32 %v620_v37, %v518_v60  ;;  %v657_v40 = vadd.f32 %v656_v53, %v642_v1 }
 0x12b   :  { %v622_v42 = vadd.f32 %v621_v38, %v523_v16  ;;  %v658_v43 = vadd.f32 %v657_v40, %v643_v39 }
 0x12d   :  { %v623_v45 = vadd.f32 %v622_v42, %v526_v24  ;;  %v659_v46 = vadd.f32 %v658_v43, %v644_v41 }
 0x12f   :  { %v624_v47 = vrot.slane %v623_v45, 4  ;;  %v660_v49 = vadd.f32 %v659_v46, %v645_v44 }
 0x131   :  { %v625_v50 = vadd.f32 %v624_v47, %v623_v45  ;;  %v661_v51 = vrot.slane %v660_v49, 4 }
 0x133   :  { %v626_v52 = vrot.slane %v625_v50, 2  ;;  %v662_v54 = vadd.f32 %v661_v51, %v660_v49 }
 0x135   :  { %v627_v55 = vadd.f32 %v626_v52, %v625_v50  ;;  %v663_v56 = vrot.slane %v662_v54, 2 }
 0x137   :  { %v628_v57 = vrot.slane %v627_v55, 1  ;;  %v664_v58 = vadd.f32 %v663_v56, %v662_v54 }
 0x139   :  { %v665_v59 = vrot.slane %v664_v58, 1  ;;  %v629_v61 = vadd.f32 %v628_v57, %v627_v55 }
 0x13b   :  { %v666_v62 = vadd.f32 %v665_v59, %v664_v58 }
 0x13d   :  { %v668_v63 = vsel %vm667_vm1, %v629_v61, %v666_v62 }
 0x13e   :  { %669 = vst [vmem:[%s1163_s3] sm:$0x3] %v668_v63 }

// kernel: transformer_forward.36
= control target key start
LH: loop header
LB: loop body
LE: loop exit
PB: predicated region body
PF: predicated region fallthrough
CT: control target
= control target key end

     0   :  { %s140_s0 = inlined_call_operand.vmem [shape: bf16[32,128], index: 0, kind: input, shape index: {}]   ;;  %s141_s1 = inlined_call_operand.vmem [shape: f32[1,128], index: 1, kind: input, shape index: {}]   ;;  %s142_s2 = inlined_call_operand.vmem [shape: f32[1,128], index: 2, kind: input, shape index: {}]   ;;  %s143_s3 = inlined_call_operand.vmem [shape: bf16[32,128], index: 3, kind: output, shape index: {}]  }
   0x1   :  { %v83_v0 = vld [vmem:[%s140_s0] sm:$0xff]   ;;  %v100_v4 = vld [vmem:[%s140_s0 + $0x8] sm:$0xff]  }
   0x2   :  { %v72_v1 = vld [vmem:[%s141_s1] ss:$0 sm:$0xff]  ;;  %v84_v2 = vunpack.c.l.bf16 %v83_v0  ;;  %v85_v3 = vunpack.c.h.bf16 %v83_v0  ;;  %v88_v6 = vunpack.c.l.bf16 %v100_v4  ;;  %v89_v7 = vunpack.c.h.bf16 %v100_v4 }
   0x3   :  { %v73_v5 = vld [vmem:[%s142_s2] ss:$0 sm:$0xff] }
   0x4   :  { %v29_v8 = vmul.f32 %v84_v2, %v72_v1  ;;  %v30_v9 = vmul.f32 %v85_v3, %v72_v1  ;;  %v31_v10 = vmul.f32 %v88_v6, %v72_v1  ;;  %v32_v11 = vmul.f32 %v89_v7, %v72_v1 }
   0x6   :  { %v40_v12 = vadd.f32 %v73_v5, %v29_v8  ;;  %v41_v13 = vadd.f32 %v73_v5, %v30_v9  ;;  %v42_v14 = vadd.f32 %v73_v5, %v31_v10  ;;  %v43_v15 = vadd.f32 %v73_v5, %v32_v11 }
   0x8   :  { %v44_v16 = vmax.f32 %v40_v12, 0.0  ;;  %v45_v17 = vmax.f32 %v41_v13, 0.0  ;;  %v46_v18 = vmax.f32 %v42_v14, 0.0  ;;  %v47_v19 = vmax.f32 %v43_v15, 0.0 }
   0xa   :  { %v93_v20 = vpack.c.bf16 %v45_v17, %v44_v16  ;;  %v98_v21 = vpack.c.bf16 %v47_v19, %v46_v18 }
   0xc   :  { %94 = vst [vmem:[%s143_s3] sm:$0xff] %v93_v20   ;;  %101 = vst [vmem:[%s143_s3 + $0x8] sm:$0xff] %v98_v21  }

// kernel: transformer_forward.35
= control target key start
LH: loop header
LB: loop body
LE: loop exit
PB: predicated region body
PF: predicated region fallthrough
CT: control target
= control target key end

     0   :  { %vm364_vm0 = vcmask 523264   ;;  %vm560_vm1 = vcmask 1040384   ;;  %s929_s1 = inlined_call_operand.vmem [shape: bf16[576,128], index: 1, kind: input, shape index: {}]   ;;  %s930_s0 = inlined_call_operand.vmem [shape: bf16[32,576], index: 0, kind: input, shape index: {}]   ;;  %s931_s2 = inlined_call_operand.vmem [shape: bf16[32,128], index: 2, kind: output, shape index: {0}]   ;;  %s932_s3 = inlined_call_operand.vmem [shape: f32[1,2,128], index: 3, kind: output, shape index: {1}]  }
   0x1   :  { %v712_v0 = vld [vmem:[%s929_s1 + $0x40] sm:$0xff]   ;;  %v716_v4 = vld [vmem:[%s929_s1 + $0x48] sm:$0xff]   ;;  %v720_v8 = vld [vmem:[%s929_s1 + $0x50] sm:$0xff]  }
   0x2   :  { %v713_v1 = vld [vmem:[%s929_s1 + $0xc0] sm:$0xff]   ;;  %638 = vmatprep.subr.bf16.mxu0 %v712_v0  ;;  %v717_v5 = vld [vmem:[%s929_s1 + $0xc8] sm:$0xff]   ;;  %v721_v9 = vld [vmem:[%s929_s1 + $0xd0] sm:$0xff]  }
   0x3   :  { %v714_v2 = vld [vmem:[%s929_s1] sm:$0xff]   ;;  %666 = vmatprep.subr.bf16.mxu1 %v713_v1  ;;  %v718_v6 = vld [vmem:[%s929_s1 + $0x8] sm:$0xff]   ;;  %v722_v10 = vld [vmem:[%s929_s1 + $0x10] sm:$0xff]  }
   0x4   :  { %v715_v3 = vld [vmem:[%s929_s1 + $0x80] sm:$0xff]   ;;  %639 = vmatpush3.bf16.msra.mxu0 %v714_v2  ;;  %v719_v7 = vld [vmem:[%s929_s1 + $0x88] sm:$0xff]   ;;  %v723_v11 = vld [vmem:[%s929_s1 + $0x90] sm:$0xff]  }
   0x5   :  { %667 = vmatpush3.bf16.msra.mxu1 %v715_v3  ;;  %640 = vmatprep.subr.bf16.mxu0 %v716_v4  ;;  %v724_v12 = vld [vmem:[%s929_s1 + $0x58] sm:$0xff]   ;;  %v728_v16 = vld [vmem:[%s929_s1 + $0x60] sm:$0xff]   ;;  %v732_v20 = vld [vmem:[%s929_s1 + $0x68] sm:$0xff]  }
   0x6   :  { %668 = vmatprep.subr.bf16.mxu1 %v717_v5  ;;  %v725_v13 = vld [vmem:[%s929_s1 + $0xd8] sm:$0xff]   ;;  %v729_v17 = vld [vmem:[%s929_s1 + $0xe0] sm:$0xff]   ;;  %v733_v21 = vld [vmem:[%s929_s1 + $0xe8] sm:$0xff]  }
   0x7   :  { %v726_v14 = vld [vmem:[%s929_s1 + $0x18] sm:$0xff]   ;;  %v730_v18 = vld [vmem:[%s929_s1 + $0x20] sm:$0xff]   ;;  %v734_v22 = vld [vmem:[%s929_s1 + $0x28] sm:$0xff]  }
   0x8   :  { %641 = vmatpush3.bf16.msra.mxu0 %v718_v6  ;;  %v727_v15 = vld [vmem:[%s929_s1 + $0x98] sm:$0xff]   ;;  %v731_v19 = vld [vmem:[%s929_s1 + $0xa0] sm:$0xff]   ;;  %v735_v23 = vld [vmem:[%s929_s1 + $0xa8] sm:$0xff]  }
   0x9   :  { %669 = vmatpush3.bf16.msra.mxu1 %v719_v7  ;;  %642 = vmatprep.subr.bf16.mxu0 %v720_v8  ;;  %v736_v24 = vld [vmem:[%s929_s1 + $0x70] sm:$0xff]   ;;  %v740_v28 = vld [vmem:[%s929_s1 + $0x78] sm:$0xff]   ;;  %v749_v35 = vld [vmem:[%s930_s0 + $0xc] ss:$20 sps:$4 sm:$0xff]  }
   0xa   :  { %670 = vmatprep.subr.bf16.mxu1 %v721_v9  ;;  %v737_v25 = vld [vmem:[%s929_s1 + $0xf0] sm:$0xff]   ;;  %v741_v29 = vld [vmem:[%s929_s1 + $0xf8] sm:$0xff]   ;;  %v750_v36 = vld [vmem:[%s929_s1 + $0x100] sm:$0xff]   ;;  %452 = vmatprep.mubr.bf16.mxu1 %v749_v35 }
   0xb   :  { %v738_v26 = vld [vmem:[%s929_s1 + $0x30] sm:$0xff]   ;;  %v742_v30 = vld [vmem:[%s929_s1 + $0x38] sm:$0xff]   ;;  %v751_v37 = vld [vmem:[%s929_s1 + $0x108] sm:$0xff]  }
   0xc   :  { %643 = vmatpush3.bf16.msra.mxu0 %v722_v10  ;;  %v739_v27 = vld [vmem:[%s929_s1 + $0xb0] sm:$0xff]   ;;  %v743_v31 = vld [vmem:[%s929_s1 + $0xb8] sm:$0xff]   ;;  %v752_v38 = vld [vmem:[%s930_s0 + $0x2c] ss:$20 sps:$4 sm:$0xff]  }
   0xd   :  { %671 = vmatpush3.bf16.msra.mxu1 %v723_v11  ;;  %644 = vmatprep.subr.bf16.mxu0 %v724_v12  ;;  %v744_v32 = vld [vmem:[%s930_s0] ss:$20 sps:$4 sm:$0xff]   ;;  %v746_v33 = vld [vmem:[%s930_s0 + $0x4] ss:$20 sps:$4 sm:$0xff]   ;;  %v747_v34 = vld [vmem:[%s930_s0 + $0x8] ss:$20 sps:$4 sm:$0xff]  }
   0xe   :  { %672 = vmatprep.subr.bf16.mxu1 %v725_v13  ;;  %403 = vmatprep.mubr.bf16.mxu0 %v746_v33  ;;  %v754_v39 = vld [vmem:[%s930_s0 + $0x34] ss:$20 sps:$4 sm:$0xff]   ;;  %v757_v42 = vld [vmem:[%s930_s0 + $0x30] ss:$20 sps:$4 sm:$0xff]   ;;  %v759_v44 = vld [vmem:[%s929_s1 + $0x118] sm:$0xff]  }
   0xf   :  { %v756_v40 = vld [vmem:[%s930_s0 + $0x28] ss:$20 sps:$4 sm:$0xff]   ;;  %v758_v41 = vld [vmem:[%s929_s1 + $0x110] sm:$0xff]   ;;  %v761_v45 = vld [vmem:[%s930_s0 + $0x38] ss:$20 sps:$4 sm:$0xff]  }
  0x10   :  { %645 = vmatpush3.bf16.msra.mxu0 %v726_v14  ;;  %v760_v43 = vld [vmem:[%s930_s0 + $0x10] ss:$20 sps:$4 sm:$0xff]  }
  0x11   :  { %673 = vmatpush3.bf16.msra.mxu1 %v727_v15  ;;  %646 = vmatprep.subr.bf16.mxu0 %v728_v16 }
  0x12   :  { %674 = vmatprep.subr.bf16.mxu1 %v729_v17 }
  0x14   :  { %647 = vmatpush3.bf16.msra.mxu0 %v730_v18 }
  0x15   :  { %675 = vmatpush3.bf16.msra.mxu1 %v731_v19  ;;  %648 = vmatprep.subr.bf16.mxu0 %v732_v20 }
  0x16   :  { %676 = vmatprep.subr.bf16.mxu1 %v733_v21 }
  0x18   :  { %649 = vmatpush3.bf16.msra.mxu0 %v734_v22 }
  0x19   :  { %677 = vmatpush3.bf16.msra.mxu1 %v735_v23  ;;  %650 = vmatprep.subr.bf16.mxu0 %v736_v24 }
  0x1a   :  { %678 = vmatprep.subr.bf16.mxu1 %v737_v25 }
  0x1c   :  { %651 = vmatpush3.bf16.msra.mxu0 %v738_v26 }
  0x1d   :  { %679 = vmatpush3.bf16.msra.mxu1 %v739_v27  ;;  %652 = vmatprep.subr.bf16.mxu0 %v740_v28 }
  0x1e   :  { %680 = vmatprep.subr.bf16.mxu1 %v741_v29 }
  0x20   :  { %653 = vmatpush3.bf16.msra.mxu0 %v742_v30 }
  0x21   :  { %681 = vmatpush3.bf16.msra.mxu1 %v743_v31  ;;  %700 = vmatprep.subr.bf16.mxu0 %v750_v36 }
  0x23   :  { %404 = vmatmul.mubr.bf16.vlgmr.msra.gmra.mrb[0].mxu0 %v744_v32 }
  0x24   :  { %453 = vmatmul.mubr.bf16.vlgmr.msra.gmra.mrb[0].mxu1 %v747_v34  ;;  %701 = vmatpush3.bf16.msra.mxu0 %v750_v36 }
  0x25   :  { %702 = vmatprep.subr.bf16.mxu0 %v751_v37  ;;  %411 = vmatprep.mubr.bf16.mxu0 %v752_v38 }
  0x26   :  { %460 = vmatprep.mubr.bf16.mxu1 %v754_v39 }
  0x28   :  { %703 = vmatpush3.bf16.msra.mxu0 %v751_v37 }
  0x29   :  { %704 = vmatprep.subr.bf16.mxu0 %v758_v41 }
  0x2b   :  { %412 = vmatmul.mubr.bf16.gmra.mrb[4].mxu0 %v756_v40 }
  0x2c   :  { %461 = vmatmul.mubr.bf16.gmra.mrb[4].mxu1 %v757_v42  ;;  %708 = vmatprep.mubr.msk.bf16.mxu0 %vm364_vm0, %v760_v43 }
  0x2d   :  { %705 = vmatpush3.bf16.msra.mxu0 %v758_v41 }
  0x2e   :  { %706 = vmatprep.subr.bf16.mxu0 %v759_v44 }
  0x31   :  { %707 = vmatpush3.bf16.msra.mxu0 %v759_v44 }
  0x34   :  { %709 = vmatmul.mubr.msk.bf16.vlgmr.msra.gmra.mrb[8].mxu0 %vm364_vm0, %v761_v45 }
  0xf6   :  { %v654_v46 = vpop.f32.mrb[0].mxu0 }
  0xf7   :  { %v682_v47 = vpop.f32.mrb[0].mxu1  ;;  %v655_v48 = vpop.f32.mrb[1].mxu0 }
  0xf8   :  { %v656_v49 = vadd.f32 %v655_v48, %v654_v46  ;;  %v683_v50 = vpop.f32.mrb[1].mxu1  ;;  %v657_v51 = vpop.f32.mrb[2].mxu0 }
  0xf9   :  { %v684_v52 = vadd.f32 %v683_v50, %v682_v47  ;;  %v685_v53 = vpop.f32.mrb[2].mxu1  ;;  %v658_v54 = vpop.f32.mrb[3].mxu0 }
  0xfa   :  { %v659_v55 = vadd.f32 %v658_v54, %v657_v51  ;;  %v686_v56 = vpop.f32.mrb[3].mxu1 }
  0xfb   :  { %v687_v57 = vadd.f32 %v686_v56, %v685_v53  ;;  %v455_v58 = vadd.f32 %v684_v52, %v656_v49 }
  0xfd   :  { %v458_v59 = vadd.f32 %v687_v57, %v659_v55 }
  0xfe   :  { %v660_v60 = vpop.f32.mrb[4].mxu0 }
  0xff   :  { %v688_v61 = vpop.f32.mrb[4].mxu1  ;;  %v661_v62 = vpop.f32.mrb[5].mxu0 }
 0x100   :  { %v662_v63 = vadd.f32 %v661_v62, %v660_v60  ;;  %v689_v0 = vpop.f32.mrb[5].mxu1  ;;  %v663_v1 = vpop.f32.mrb[6].mxu0 }
 0x101   :  { %v690_v2 = vadd.f32 %v689_v0, %v688_v61  ;;  %v691_v3 = vpop.f32.mrb[6].mxu1  ;;  %v664_v4 = vpop.f32.mrb[7].mxu0 }
 0x102   :  { %v665_v5 = vadd.f32 %v664_v4, %v663_v1  ;;  %v692_v6 = vpop.f32.mrb[7].mxu1 }
 0x103   :  { %v693_v7 = vadd.f32 %v692_v6, %v691_v3  ;;  %v463_v8 = vadd.f32 %v690_v2, %v662_v63 }
 0x105   :  { %v466_v9 = vadd.f32 %v693_v7, %v665_v5 }
 0x107   :  { %v710_v10 = vpop.f32.mrb[8].mxu0 }
 0x108   :  { %v512_v11 = vadd.f32 %v710_v10, %v463_v8  ;;  %v503_v12 = vpop.f32.mrb[9].mxu0 }
 0x109   :  { %v504_v13 = vadd.f32 %v503_v12, %v455_v58  ;;  %v711_v14 = vpop.f32.mrb[10].mxu0 }
 0x10a   :  { %v515_v15 = vadd.f32 %v711_v14, %v466_v9  ;;  %v506_v16 = vpop.f32.mrb[11].mxu0  ;;  %v549_v23 = vmul.f32 %v512_v11, %v512_v11 }
 0x10b   :  { %v507_v17 = vadd.f32 %v506_v16, %v458_v59  ;;  %v547_v19 = vmul.f32 %v504_v13, %v504_v13 }
 0x10c   :  { %v635_v18 = vpack.c.bf16 %v515_v15, %v512_v11  ;;  %v550_v26 = vmul.f32 %v515_v15, %v515_v15 }
 0x10d   :  { %v630_v20 = vpack.c.bf16 %v507_v17, %v504_v13  ;;  %v538_v21 = vadd.f32 %v507_v17, %v504_v13  ;;  %v548_v22 = vmul.f32 %v507_v17, %v507_v17 }
 0x10e   :  { %637 = vst [vmem:[%s931_s2 + $0x8] sm:$0xff] %v635_v18  }
 0x10f   :  { %631 = vst [vmem:[%s931_s2] sm:$0xff] %v630_v20   ;;  %v539_v24 = vadd.f32 %v538_v21, %v512_v11  ;;  %v551_v25 = vadd.f32 %v548_v22, %v547_v19 }
 0x111   :  { %v540_v27 = vadd.f32 %v539_v24, %v515_v15  ;;  %v552_v28 = vadd.f32 %v551_v25, %v549_v23 }
 0x113   :  { %v541_v29 = vrot.slane %v540_v27, 4  ;;  %v553_v30 = vadd.f32 %v552_v28, %v550_v26 }
 0x115   :  { %v542_v31 = vadd.f32 %v541_v29, %v540_v27  ;;  %v554_v32 = vrot.slane %v553_v30, 4 }
 0x117   :  { %v543_v33 = vrot.slane %v542_v31, 2  ;;  %v555_v34 = vadd.f32 %v554_v32, %v553_v30 }
 0x119   :  { %v544_v35 = vadd.f32 %v543_v33, %v542_v31  ;;  %v556_v36 = vrot.slane %v555_v34, 2 }
 0x11b   :  { %v545_v37 = vrot.slane %v544_v35, 1  ;;  %v557_v38 = vadd.f32 %v556_v36, %v555_v34 }
 0x11d   :  { %v558_v39 = vrot.slane %v557_v38, 1  ;;  %v546_v40 = vadd.f32 %v545_v37, %v544_v35 }
 0x11f   :  { %v559_v41 = vadd.f32 %v558_v39, %v557_v38 }
 0x121   :  { %v561_v42 = vsel %vm560_vm1, %v546_v40, %v559_v41 }
 0x122   :  { %562 = vst [vmem:[%s932_s3] sm:$0x3] %v561_v42 }

// kernel: transformer_forward.40
= control target key start
LH: loop header
LB: loop body
LE: loop exit
PB: predicated region body
PF: predicated region fallthrough
CT: control target
= control target key end

     0   :  { %s171_s0 = inlined_call_operand.vmem [shape: bf16[32,128], index: 0, kind: input, shape index: {}]   ;;  %s172_s1 = inlined_call_operand.vmem [shape: f32[1,128], index: 1, kind: input, shape index: {}]   ;;  %s173_s2 = inlined_call_operand.vmem [shape: f32[1,128], index: 2, kind: input, shape index: {}]   ;;  %s174_s3 = inlined_call_operand.vmem [shape: bf16[32,128], index: 3, kind: input, shape index: {}]   ;;  %s175_s4 = inlined_call_operand.vmem [shape: bf16[32,128], index: 4, kind: output, shape index: {}]  }
   0x1   :  { %v94_v0 = vld [vmem:[%s171_s0] sm:$0xff]   ;;  %v119_v5 = vld [vmem:[%s171_s0 + $0x8] sm:$0xff]  }
   0x2   :  { %v83_v1 = vld [vmem:[%s172_s1] ss:$0 sm:$0xff]  ;;  %v95_v2 = vunpack.c.l.bf16 %v94_v0  ;;  %v96_v3 = vunpack.c.h.bf16 %v94_v0  ;;  %v120_v6 = vld [vmem:[%s174_s3 + $0x8] sm:$0xff]   ;;  %v99_v8 = vunpack.c.l.bf16 %v119_v5  ;;  %v100_v9 = vunpack.c.h.bf16 %v119_v5 }
   0x3   :  { %v102_v4 = vld [vmem:[%s174_s3] sm:$0xff]   ;;  %v107_v16 = vunpack.c.l.bf16 %v120_v6  ;;  %v108_v17 = vunpack.c.h.bf16 %v120_v6 }
   0x4   :  { %v84_v7 = vld [vmem:[%s173_s2] ss:$0 sm:$0xff]  ;;  %v32_v10 = vmul.f32 %v95_v2, %v83_v1  ;;  %v33_v11 = vmul.f32 %v96_v3, %v83_v1  ;;  %v103_v12 = vunpack.c.l.bf16 %v102_v4  ;;  %v104_v13 = vunpack.c.h.bf16 %v102_v4 }
   0x5   :  { %v34_v14 = vmul.f32 %v99_v8, %v83_v1  ;;  %v35_v15 = vmul.f32 %v100_v9, %v83_v1 }
   0x6   :  { %v43_v18 = vadd.f32 %v84_v7, %v32_v10  ;;  %v44_v19 = vadd.f32 %v84_v7, %v33_v11 }
   0x7   :  { %v45_v20 = vadd.f32 %v84_v7, %v34_v14  ;;  %v46_v21 = vadd.f32 %v84_v7, %v35_v15 }
   0x8   :  { %v55_v22 = vadd.f32 %v103_v12, %v43_v18  ;;  %v56_v23 = vadd.f32 %v104_v13, %v44_v19 }
   0x9   :  { %v57_v24 = vadd.f32 %v107_v16, %v45_v20  ;;  %v58_v25 = vadd.f32 %v108_v17, %v46_v21 }
   0xa   :  { %v112_v26 = vpack.c.bf16 %v56_v23, %v55_v22 }
   0xb   :  { %v117_v27 = vpack.c.bf16 %v58_v25, %v57_v24 }
   0xc   :  { %113 = vst [vmem:[%s175_s4] sm:$0xff] %v112_v26  }
   0xd   :  { %121 = vst [vmem:[%s175_s4 + $0x8] sm:$0xff] %v117_v27  }

// kernel: transformer_forward.37
= control target key start
LH: loop header
LB: loop body
LE: loop exit
PB: predicated region body
PF: predicated region fallthrough
CT: control target
= control target key end

     0   :  { %vm989_vm0 = vcmask 1040384   ;;  %s1648_s1 = inlined_call_operand.vmem [shape: bf16[1152,128], index: 1, kind: input, shape index: {}]   ;;  %s1649_s0 = inlined_call_operand.vmem [shape: bf16[32,1152], index: 0, kind: input, shape index: {}]   ;;  %s1650_s2 = inlined_call_operand.vmem [shape: bf16[32,128], index: 2, kind: output, shape index: {0}]   ;;  %s1651_s3 = inlined_call_operand.vmem [shape: f32[1,2,128], index: 3, kind: output, shape index: {1}]  }
   0x1   :  { %v1251_v0 = vld [vmem:[%s1648_s1 + $0x40] sm:$0xff]   ;;  %v1255_v4 = vld [vmem:[%s1648_s1 + $0x48] sm:$0xff]   ;;  %v1259_v8 = vld [vmem:[%s1648_s1 + $0x50] sm:$0xff]  }
   0x2   :  { %v1252_v1 = vld [vmem:[%s1648_s1 + $0xc0] sm:$0xff]   ;;  %1109 = vmatprep.subr.bf16.mxu0 %v1251_v0  ;;  %v1256_v5 = vld [vmem:[%s1648_s1 + $0xc8] sm:$0xff]   ;;  %v1260_v9 = vld [vmem:[%s1648_s1 + $0xd0] sm:$0xff]  }
   0x3   :  { %v1253_v2 = vld [vmem:[%s1648_s1] sm:$0xff]   ;;  %1137 = vmatprep.subr.bf16.mxu1 %v1252_v1  ;;  %v1257_v6 = vld [vmem:[%s1648_s1 + $0x8] sm:$0xff]   ;;  %v1261_v10 = vld [vmem:[%s1648_s1 + $0x10] sm:$0xff]  }
   0x4   :  { %v1254_v3 = vld [vmem:[%s1648_s1 + $0x80] sm:$0xff]   ;;  %1110 = vmatpush3.bf16.msra.mxu0 %v1253_v2  ;;  %v1258_v7 = vld [vmem:[%s1648_s1 + $0x88] sm:$0xff]   ;;  %v1262_v11 = vld [vmem:[%s1648_s1 + $0x90] sm:$0xff]  }
   0x5   :  { %1138 = vmatpush3.bf16.msra.mxu1 %v1254_v3  ;;  %1111 = vmatprep.subr.bf16.mxu0 %v1255_v4  ;;  %v1263_v12 = vld [vmem:[%s1648_s1 + $0x58] sm:$0xff]   ;;  %v1267_v16 = vld [vmem:[%s1648_s1 + $0x60] sm:$0xff]   ;;  %v1271_v20 = vld [vmem:[%s1648_s1 + $0x68] sm:$0xff]  }
   0x6   :  { %1139 = vmatprep.subr.bf16.mxu1 %v1256_v5  ;;  %v1264_v13 = vld [vmem:[%s1648_s1 + $0xd8] sm:$0xff]   ;;  %v1268_v17 = vld [vmem:[%s1648_s1 + $0xe0] sm:$0xff]   ;;  %v1272_v21 = vld [vmem:[%s1648_s1 + $0xe8] sm:$0xff]  }
   0x7   :  { %v1265_v14 = vld [vmem:[%s1648_s1 + $0x18] sm:$0xff]   ;;  %v1269_v18 = vld [vmem:[%s1648_s1 + $0x20] sm:$0xff]   ;;  %v1273_v22 = vld [vmem:[%s1648_s1 + $0x28] sm:$0xff]  }
   0x8   :  { %1112 = vmatpush3.bf16.msra.mxu0 %v1257_v6  ;;  %v1266_v15 = vld [vmem:[%s1648_s1 + $0x98] sm:$0xff]   ;;  %v1270_v19 = vld [vmem:[%s1648_s1 + $0xa0] sm:$0xff]   ;;  %v1274_v23 = vld [vmem:[%s1648_s1 + $0xa8] sm:$0xff]  }
   0x9   :  { %1140 = vmatpush3.bf16.msra.mxu1 %v1258_v7  ;;  %1113 = vmatprep.subr.bf16.mxu0 %v1259_v8  ;;  %v1275_v24 = vld [vmem:[%s1648_s1 + $0x70] sm:$0xff]   ;;  %v1279_v28 = vld [vmem:[%s1648_s1 + $0x78] sm:$0xff]   ;;  %v1283_v32 = vld [vmem:[%s1649_s0] ss:$36 sps:$4 sm:$0xff]  }
   0xa   :  { %1141 = vmatprep.subr.bf16.mxu1 %v1260_v9  ;;  %v1276_v25 = vld [vmem:[%s1648_s1 + $0xf0] sm:$0xff]   ;;  %v1280_v29 = vld [vmem:[%s1648_s1 + $0xf8] sm:$0xff]   ;;  %v1285_v33 = vld [vmem:[%s1649_s0 + $0x4] ss:$36 sps:$4 sm:$0xff]  }
   0xb   :  { %v1277_v26 = vld [vmem:[%s1648_s1 + $0x30] sm:$0xff]   ;;  %v1281_v30 = vld [vmem:[%s1648_s1 + $0x38] sm:$0xff]   ;;  %v1286_v34 = vld [vmem:[%s1649_s0 + $0x8] ss:$36 sps:$4 sm:$0xff]   ;;  %734 = vmatprep.mubr.bf16.mxu0 %v1285_v33 }
   0xc   :  { %1114 = vmatpush3.bf16.msra.mxu0 %v1261_v10  ;;  %v1278_v27 = vld [vmem:[%s1648_s1 + $0xb0] sm:$0xff]   ;;  %v1282_v31 = vld [vmem:[%s1648_s1 + $0xb8] sm:$0xff]   ;;  %v1289_v36 = vld [vmem:[%s1648_s1 + $0x140] sm:$0xff]  }
   0xd   :  { %1142 = vmatpush3.bf16.msra.mxu1 %v1262_v11  ;;  %1115 = vmatprep.subr.bf16.mxu0 %v1263_v12  ;;  %v1288_v35 = vld [vmem:[%s1649_s0 + $0xc] ss:$36 sps:$4 sm:$0xff]   ;;  %v1290_v37 = vld [vmem:[%s1648_s1 + $0x100] sm:$0xff]   ;;  %v1301_v48 = vld [vmem:[%s1648_s1 + $0x158] sm:$0xff]  }
   0xe   :  { %1143 = vmatprep.subr.bf16.mxu1 %v1264_v13  ;;  %783 = vmatprep.mubr.bf16.mxu1 %v1288_v35  ;;  %v1291_v38 = vld [vmem:[%s1648_s1 + $0x1c0] sm:$0xff]   ;;  %v1293_v40 = vld [vmem:[%s1648_s1 + $0x148] sm:$0xff]   ;;  %v1297_v44 = vld [vmem:[%s1648_s1 + $0x150] sm:$0xff]  }
   0xf   :  { %v1292_v39 = vld [vmem:[%s1648_s1 + $0x180] sm:$0xff]   ;;  %v1294_v41 = vld [vmem:[%s1648_s1 + $0x108] sm:$0xff]   ;;  %v1298_v45 = vld [vmem:[%s1648_s1 + $0x110] sm:$0xff]  }
  0x10   :  { %1116 = vmatpush3.bf16.msra.mxu0 %v1265_v14  ;;  %v1295_v42 = vld [vmem:[%s1648_s1 + $0x1c8] sm:$0xff]   ;;  %v1299_v46 = vld [vmem:[%s1648_s1 + $0x1d0] sm:$0xff]   ;;  %v1302_v49 = vld [vmem:[%s1648_s1 + $0x118] sm:$0xff]  }
  0x11   :  { %1144 = vmatpush3.bf16.msra.mxu1 %v1266_v15  ;;  %1117 = vmatprep.subr.bf16.mxu0 %v1267_v16  ;;  %v1296_v43 = vld [vmem:[%s1648_s1 + $0x188] sm:$0xff]   ;;  %v1300_v47 = vld [vmem:[%s1648_s1 + $0x190] sm:$0xff]   ;;  %v1303_v50 = vld [vmem:[%s1648_s1 + $0x1d8] sm:$0xff]  }
  0x12   :  { %1145 = vmatprep.subr.bf16.mxu1 %v1268_v17  ;;  %v1304_v51 = vld [vmem:[%s1648_s1 + $0x198] sm:$0xff]   ;;  %v1305_v52 = vld [vmem:[%s1648_s1 + $0x160] sm:$0xff]   ;;  %v1309_v56 = vld [vmem:[%s1648_s1 + $0x168] sm:$0xff]  }
  0x13   :  { %v1306_v53 = vld [vmem:[%s1648_s1 + $0x120] sm:$0xff]   ;;  %v1310_v57 = vld [vmem:[%s1649_s0 + $0x4c] ss:$36 sps:$4 sm:$0xff]   ;;  %v1312_v58 = vld [vmem:[%s1649_s0 + $0x54] ss:$36 sps:$4 sm:$0xff]  }
  0x14   :  { %1118 = vmatpush3.bf16.msra.mxu0 %v1269_v18  ;;  %v1307_v54 = vld [vmem:[%s1648_s1 + $0x1e0] sm:$0xff]   ;;  %v1314_v59 = vld [vmem:[%s1648_s1 + $0x128] sm:$0xff]   ;;  %v1316_v61 = vld [vmem:[%s1649_s0 + $0x50] ss:$36 sps:$4 sm:$0xff]  }
  0x15   :  { %1146 = vmatpush3.bf16.msra.mxu1 %v1270_v19  ;;  %1119 = vmatprep.subr.bf16.mxu0 %v1271_v20  ;;  %v1308_v55 = vld [vmem:[%s1648_s1 + $0x1a0] sm:$0xff]   ;;  %v1315_v60 = vld [vmem:[%s1649_s0 + $0x48] ss:$36 sps:$4 sm:$0xff]   ;;  %v1319_v0 = vld [vmem:[%s1648_s1 + $0x170] sm:$0xff]  }
  0x16   :  { %1147 = vmatprep.subr.bf16.mxu1 %v1272_v21  ;;  %v1317_v62 = vld [vmem:[%s1648_s1 + $0x1e8] sm:$0xff]   ;;  %v1320_v1 = vld [vmem:[%s1648_s1 + $0x130] sm:$0xff]   ;;  %v1323_v4 = vld [vmem:[%s1648_s1 + $0x178] sm:$0xff]  }
  0x17   :  { %v1318_v63 = vld [vmem:[%s1648_s1 + $0x1a8] sm:$0xff]   ;;  %v1321_v2 = vld [vmem:[%s1648_s1 + $0x1f0] sm:$0xff]   ;;  %v1324_v5 = vld [vmem:[%s1648_s1 + $0x138] sm:$0xff]  }
  0x18   :  { %1120 = vmatpush3.bf16.msra.mxu0 %v1273_v22  ;;  %v1322_v3 = vld [vmem:[%s1648_s1 + $0x1b0] sm:$0xff]   ;;  %v1325_v6 = vld [vmem:[%s1648_s1 + $0x1f8] sm:$0xff]   ;;  %v1330_v10 = vld [vmem:[%s1648_s1 + $0x200] sm:$0xff]  }
  0x19   :  { %1148 = vmatpush3.bf16.msra.mxu1 %v1274_v23  ;;  %1121 = vmatprep.subr.bf16.mxu0 %v1275_v24  ;;  %v1326_v7 = vld [vmem:[%s1649_s0 + $0x10] ss:$36 sps:$4 sm:$0xff]   ;;  %v1329_v9 = vld [vmem:[%s1648_s1 + $0x1b8] sm:$0xff]   ;;  %v1334_v13 = vld [vmem:[%s1648_s1 + $0x208] sm:$0xff]  }
  0x1a   :  { %1149 = vmatprep.subr.bf16.mxu1 %v1276_v25  ;;  %v1328_v8 = vld [vmem:[%s1649_s0 + $0x14] ss:$36 sps:$4 sm:$0xff]   ;;  %v1333_v12 = vld [vmem:[%s1649_s0 + $0x1c] ss:$36 sps:$4 sm:$0xff]   ;;  %v1339_v17 = vld [vmem:[%s1649_s0 + $0x64] ss:$36 sps:$4 sm:$0xff]  }
  0x1b   :  { %v1331_v11 = vld [vmem:[%s1649_s0 + $0x18] ss:$36 sps:$4 sm:$0xff]   ;;  %v1338_v16 = vld [vmem:[%s1648_s1 + $0x210] sm:$0xff]   ;;  %v1341_v18 = vld [vmem:[%s1649_s0 + $0x60] ss:$36 sps:$4 sm:$0xff]  }
  0x1c   :  { %1122 = vmatpush3.bf16.msra.mxu0 %v1277_v26  ;;  %v1335_v14 = vld [vmem:[%s1649_s0 + $0x5c] ss:$36 sps:$4 sm:$0xff]   ;;  %v1344_v22 = vld [vmem:[%s1648_s1 + $0x228] sm:$0xff]   ;;  %v1345_v23 = vld [vmem:[%s1648_s1 + $0x230] sm:$0xff]  }
  0x1d   :  { %1150 = vmatpush3.bf16.msra.mxu1 %v1278_v27  ;;  %1123 = vmatprep.subr.bf16.mxu0 %v1279_v28  ;;  %v1337_v15 = vld [vmem:[%s1649_s0 + $0x58] ss:$36 sps:$4 sm:$0xff]   ;;  %v1343_v20 = vld [vmem:[%s1648_s1 + $0x220] sm:$0xff]   ;;  %v1348_v25 = vld [vmem:[%s1649_s0 + $0x68] ss:$36 sps:$4 sm:$0xff]  }
  0x1e   :  { %1151 = vmatprep.subr.bf16.mxu1 %v1280_v29  ;;  %v1342_v19 = vld [vmem:[%s1648_s1 + $0x218] sm:$0xff]   ;;  %v1347_v21 = vld [vmem:[%s1649_s0 + $0x20] ss:$36 sps:$4 sm:$0xff]  }
  0x1f   :  { %v1346_v24 = vld [vmem:[%s1648_s1 + $0x238] sm:$0xff]  }
  0x20   :  { %1124 = vmatpush3.bf16.msra.mxu0 %v1281_v30 }
  0x21   :  { %1152 = vmatpush3.bf16.msra.mxu1 %v1282_v31  ;;  %1165 = vmatprep.subr.bf16.mxu0 %v1289_v36 }
  0x22   :  { %1193 = vmatprep.subr.bf16.mxu1 %v1291_v38 }
  0x23   :  { %735 = vmatmul.mubr.bf16.vlgmr.msra.gmra.mrb[0].mxu0 %v1283_v32 }
  0x24   :  { %784 = vmatmul.mubr.bf16.vlgmr.msra.gmra.mrb[0].mxu1 %v1286_v34  ;;  %1166 = vmatpush3.bf16.msra.mxu0 %v1290_v37 }
  0x25   :  { %1194 = vmatpush3.bf16.msra.mxu1 %v1292_v39  ;;  %1167 = vmatprep.subr.bf16.mxu0 %v1293_v40 }
  0x26   :  { %1195 = vmatprep.subr.bf16.mxu1 %v1295_v42  ;;  %742 = vmatprep.mubr.bf16.mxu0 %v1310_v57 }
  0x27   :  { %791 = vmatprep.mubr.bf16.mxu1 %v1312_v58 }
  0x28   :  { %1168 = vmatpush3.bf16.msra.mxu0 %v1294_v41 }
  0x29   :  { %1196 = vmatpush3.bf16.msra.mxu1 %v1296_v43  ;;  %1169 = vmatprep.subr.bf16.mxu0 %v1297_v44 }
  0x2a   :  { %1197 = vmatprep.subr.bf16.mxu1 %v1299_v46 }
  0x2b   :  { %743 = vmatmul.mubr.bf16.gmra.mrb[4].mxu0 %v1315_v60 }
  0x2c   :  { %1170 = vmatpush3.bf16.msra.mxu0 %v1298_v45  ;;  %792 = vmatmul.mubr.bf16.gmra.mrb[4].mxu1 %v1316_v61 }
  0x2d   :  { %1198 = vmatpush3.bf16.msra.mxu1 %v1300_v47  ;;  %1171 = vmatprep.subr.bf16.mxu0 %v1301_v48 }
  0x2e   :  { %1199 = vmatprep.subr.bf16.mxu1 %v1303_v50  ;;  %832 = vmatprep.mubr.bf16.mxu0 %v1328_v8 }
  0x2f   :  { %881 = vmatprep.mubr.bf16.mxu1 %v1333_v12 }
  0x30   :  { %1172 = vmatpush3.bf16.msra.mxu0 %v1302_v49 }
  0x31   :  { %1200 = vmatpush3.bf16.msra.mxu1 %v1304_v51  ;;  %1173 = vmatprep.subr.bf16.mxu0 %v1305_v52 }
  0x32   :  { %1201 = vmatprep.subr.bf16.mxu1 %v1307_v54 }
  0x34   :  { %1174 = vmatpush3.bf16.msra.mxu0 %v1306_v53 }
  0x35   :  { %1202 = vmatpush3.bf16.msra.mxu1 %v1308_v55  ;;  %1175 = vmatprep.subr.bf16.mxu0 %v1309_v56 }
  0x36   :  { %1203 = vmatprep.subr.bf16.mxu1 %v1317_v62 }
  0x38   :  { %1176 = vmatpush3.bf16.msra.mxu0 %v1314_v59 }
  0x39   :  { %1204 = vmatpush3.bf16.msra.mxu1 %v1318_v63  ;;  %1177 = vmatprep.subr.bf16.mxu0 %v1319_v0 }
  0x3a   :  { %1205 = vmatprep.subr.bf16.mxu1 %v1321_v2 }
  0x3c   :  { %1178 = vmatpush3.bf16.msra.mxu0 %v1320_v1 }
  0x3d   :  { %1206 = vmatpush3.bf16.msra.mxu1 %v1322_v3  ;;  %1179 = vmatprep.subr.bf16.mxu0 %v1323_v4 }
  0x3e   :  { %1207 = vmatprep.subr.bf16.mxu1 %v1325_v6 }
  0x40   :  { %1180 = vmatpush3.bf16.msra.mxu0 %v1324_v5 }
  0x41   :  { %1208 = vmatpush3.bf16.msra.mxu1 %v1329_v9  ;;  %1231 = vmatprep.subr.bf16.mxu0 %v1330_v10 }
  0x43   :  { %833 = vmatmul.mubr.bf16.vlgmr.msra.gmra.mrb[8].mxu0 %v1326_v7 }
  0x44   :  { %1232 = vmatpush3.bf16.msra.mxu0 %v1330_v10  ;;  %882 = vmatmul.mubr.bf16.vlgmr.msra.gmra.mrb[8].mxu1 %v1331_v11 }
  0x45   :  { %1233 = vmatprep.subr.bf16.mxu0 %v1334_v13  ;;  %840 = vmatprep.mubr.bf16.mxu0 %v1335_v14 }
  0x46   :  { %889 = vmatprep.mubr.bf16.mxu1 %v1339_v17 }
  0x48   :  { %1234 = vmatpush3.bf16.msra.mxu0 %v1334_v13 }
  0x49   :  { %1235 = vmatprep.subr.bf16.mxu0 %v1338_v16 }
  0x4b   :  { %841 = vmatmul.mubr.bf16.gmra.mrb[12].mxu0 %v1337_v15 }
  0x4c   :  { %1236 = vmatpush3.bf16.msra.mxu0 %v1338_v16  ;;  %890 = vmatmul.mubr.bf16.gmra.mrb[12].mxu1 %v1341_v18 }
  0x4d   :  { %1237 = vmatprep.subr.bf16.mxu0 %v1342_v19  ;;  %1247 = vmatprep.mubr.bf16.mxu0 %v1347_v21 }
  0x50   :  { %1238 = vmatpush3.bf16.msra.mxu0 %v1342_v19 }
  0x51   :  { %1239 = vmatprep.subr.bf16.mxu0 %v1343_v20 }
  0x54   :  { %1240 = vmatpush3.bf16.msra.mxu0 %v1343_v20 }
  0x55   :  { %1241 = vmatprep.subr.bf16.mxu0 %v1344_v22 }
  0x58   :  { %1242 = vmatpush3.bf16.msra.mxu0 %v1344_v22 }
  0x59   :  { %1243 = vmatprep.subr.bf16.mxu0 %v1345_v23 }
  0x5c   :  { %1244 = vmatpush3.bf16.msra.mxu0 %v1345_v23 }
  0x5d   :  { %1245 = vmatprep.subr.bf16.mxu0 %v1346_v24 }
  0x60   :  { %1246 = vmatpush3.bf16.msra.mxu0 %v1346_v24 }
  0x63   :  { %1248 = vmatmul.mubr.bf16.vlgmr.msra.gmra.mrb[16].mxu0 %v1348_v25 }
  0xf6   :  { %v1125_v26 = vpop.f32.mrb[0].mxu0 }
  0xf7   :  { %v1153_v27 = vpop.f32.mrb[0].mxu1  ;;  %v1126_v28 = vpop.f32.mrb[1].mxu0 }
  0xf8   :  { %v1127_v29 = vadd.f32 %v1126_v28, %v1125_v26  ;;  %v1154_v30 = vpop.f32.mrb[1].mxu1  ;;  %v1128_v31 = vpop.f32.mrb[2].mxu0 }
  0xf9   :  { %v1155_v32 = vadd.f32 %v1154_v30, %v1153_v27  ;;  %v1156_v33 = vpop.f32.mrb[2].mxu1  ;;  %v1129_v34 = vpop.f32.mrb[3].mxu0 }
  0xfa   :  { %v1130_v35 = vadd.f32 %v1129_v34, %v1128_v31  ;;  %v1157_v36 = vpop.f32.mrb[3].mxu1 }
  0xfb   :  { %v786_v37 = vadd.f32 %v1155_v32, %v1127_v29  ;;  %v1158_v38 = vadd.f32 %v1157_v36, %v1156_v33 }
  0xfd   :  { %v789_v39 = vadd.f32 %v1158_v38, %v1130_v35 }
  0xfe   :  { %v1131_v40 = vpop.f32.mrb[4].mxu0 }
  0xff   :  { %v1159_v41 = vpop.f32.mrb[4].mxu1  ;;  %v1132_v42 = vpop.f32.mrb[5].mxu0 }
 0x100   :  { %v1160_v43 = vpop.f32.mrb[5].mxu1  ;;  %v1133_v44 = vadd.f32 %v1132_v42, %v1131_v40  ;;  %v1134_v46 = vpop.f32.mrb[6].mxu0 }
 0x101   :  { %v1161_v45 = vadd.f32 %v1160_v43, %v1159_v41  ;;  %v1162_v47 = vpop.f32.mrb[6].mxu1  ;;  %v1135_v48 = vpop.f32.mrb[7].mxu0 }
 0x102   :  { %v1163_v49 = vpop.f32.mrb[7].mxu1  ;;  %v1136_v51 = vadd.f32 %v1135_v48, %v1134_v46 }
 0x103   :  { %v794_v50 = vadd.f32 %v1161_v45, %v1133_v44  ;;  %v1164_v52 = vadd.f32 %v1163_v49, %v1162_v47 }
 0x105   :  { %v797_v53 = vadd.f32 %v1164_v52, %v1136_v51 }
 0x116   :  { %v1181_v54 = vpop.f32.mrb[8].mxu0 }
 0x117   :  { %v1182_v55 = vpop.f32.mrb[9].mxu0  ;;  %v1209_v58 = vpop.f32.mrb[8].mxu1 }
 0x118   :  { %v1183_v56 = vadd.f32 %v1182_v55, %v1181_v54  ;;  %v1184_v57 = vpop.f32.mrb[10].mxu0  ;;  %v1210_v62 = vpop.f32.mrb[9].mxu1 }
 0x119   :  { %v1185_v59 = vpop.f32.mrb[11].mxu0  ;;  %v1211_v63 = vadd.f32 %v1210_v62, %v1209_v58  ;;  %v1212_v0 = vpop.f32.mrb[10].mxu1 }
 0x11a   :  { %v835_v60 = vadd.f32 %v1183_v56, %v786_v37  ;;  %v1186_v61 = vadd.f32 %v1185_v59, %v1184_v57  ;;  %v1213_v2 = vpop.f32.mrb[11].mxu1 }
 0x11b   :  { %v1214_v3 = vadd.f32 %v1213_v2, %v1212_v0 }
 0x11c   :  { %v838_v1 = vadd.f32 %v1186_v61, %v789_v39  ;;  %v884_v4 = vadd.f32 %v1211_v63, %v835_v60 }
 0x11e   :  { %v1187_v5 = vpop.f32.mrb[12].mxu0  ;;  %v887_v7 = vadd.f32 %v1214_v3, %v838_v1 }
 0x11f   :  { %v1188_v6 = vpop.f32.mrb[13].mxu0  ;;  %v1215_v10 = vpop.f32.mrb[12].mxu1 }
 0x120   :  { %v1189_v8 = vadd.f32 %v1188_v6, %v1187_v5  ;;  %v1190_v9 = vpop.f32.mrb[14].mxu0  ;;  %v1216_v14 = vpop.f32.mrb[13].mxu1 }
 0x121   :  { %v1191_v11 = vpop.f32.mrb[15].mxu0  ;;  %v1217_v15 = vadd.f32 %v1216_v14, %v1215_v10  ;;  %v1218_v16 = vpop.f32.mrb[14].mxu1 }
 0x122   :  { %v843_v12 = vadd.f32 %v1189_v8, %v794_v50  ;;  %v1192_v13 = vadd.f32 %v1191_v11, %v1190_v9  ;;  %v1219_v18 = vpop.f32.mrb[15].mxu1 }
 0x123   :  { %v1220_v19 = vadd.f32 %v1219_v18, %v1218_v16 }
 0x124   :  { %v846_v17 = vadd.f32 %v1192_v13, %v797_v53  ;;  %v892_v20 = vadd.f32 %v1217_v15, %v843_v12 }
 0x126   :  { %v895_v21 = vadd.f32 %v1220_v19, %v846_v17 }
 0x136   :  { %v1249_v22 = vpop.f32.mrb[16].mxu0 }
 0x137   :  { %v941_v23 = vadd.f32 %v1249_v22, %v892_v20  ;;  %v932_v24 = vpop.f32.mrb[17].mxu0 }
 0x138   :  { %v933_v25 = vadd.f32 %v932_v24, %v884_v4  ;;  %v1250_v26 = vpop.f32.mrb[18].mxu0 }
 0x139   :  { %v944_v27 = vadd.f32 %v1250_v26, %v895_v21  ;;  %v935_v28 = vpop.f32.mrb[19].mxu0  ;;  %v978_v35 = vmul.f32 %v941_v23, %v941_v23 }
 0x13a   :  { %v936_v29 = vadd.f32 %v935_v28, %v887_v7  ;;  %v976_v31 = vmul.f32 %v933_v25, %v933_v25 }
 0x13b   :  { %v1106_v30 = vpack.c.bf16 %v944_v27, %v941_v23  ;;  %v979_v38 = vmul.f32 %v944_v27, %v944_v27 }
 0x13c   :  { %v1101_v32 = vpack.c.bf16 %v936_v29, %v933_v25  ;;  %v967_v33 = vadd.f32 %v936_v29, %v933_v25  ;;  %v977_v34 = vmul.f32 %v936_v29, %v936_v29 }
 0x13d   :  { %1108 = vst [vmem:[%s1650_s2 + $0x8] sm:$0xff] %v1106_v30  }
 0x13e   :  { %1102 = vst [vmem:[%s1650_s2] sm:$0xff] %v1101_v32   ;;  %v968_v36 = vadd.f32 %v967_v33, %v941_v23  ;;  %v980_v37 = vadd.f32 %v977_v34, %v976_v31 }
 0x140   :  { %v969_v39 = vadd.f32 %v968_v36, %v944_v27  ;;  %v981_v40 = vadd.f32 %v980_v37, %v978_v35 }
 0x142   :  { %v970_v41 = vrot.slane %v969_v39, 4  ;;  %v982_v42 = vadd.f32 %v981_v40, %v979_v38 }
 0x144   :  { %v971_v43 = vadd.f32 %v970_v41, %v969_v39  ;;  %v983_v44 = vrot.slane %v982_v42, 4 }
 0x146   :  { %v972_v45 = vrot.slane %v971_v43, 2  ;;  %v984_v46 = vadd.f32 %v983_v44, %v982_v42 }
 0x148   :  { %v973_v47 = vadd.f32 %v972_v45, %v971_v43  ;;  %v985_v48 = vrot.slane %v984_v46, 2 }
 0x14a   :  { %v974_v49 = vrot.slane %v973_v47, 1  ;;  %v986_v50 = vadd.f32 %v985_v48, %v984_v46 }
 0x14c   :  { %v987_v51 = vrot.slane %v986_v50, 1  ;;  %v975_v52 = vadd.f32 %v974_v49, %v973_v47 }
 0x14e   :  { %v988_v53 = vadd.f32 %v987_v51, %v986_v50 }
 0x150   :  { %v990_v54 = vsel %vm989_vm0, %v975_v52, %v988_v53 }
 0x151   :  { %991 = vst [vmem:[%s1651_s3] sm:$0x3] %v990_v54 }

// kernel: transformer_forward.57
= control target key start
LH: loop header
LB: loop body
LE: loop exit
PB: predicated region body
PF: predicated region fallthrough
CT: control target
= control target key end

     0   :  { %vm1661_vm0 = vcmask 1040384   ;;  %s2966_s1 = inlined_call_operand.vmem [shape: bf16[1152,128], index: 1, kind: input, shape index: {}]   ;;  %s2967_s0 = inlined_call_operand.vmem [shape: bf16[128,1152], index: 0, kind: input, shape index: {}]   ;;  %s2968_s2 = inlined_call_operand.vmem [shape: bf16[128,128], index: 2, kind: output, shape index: {0}]   ;;  %s2969_s3 = inlined_call_operand.vmem [shape: f32[1,2,128], index: 3, kind: output, shape index: {1}]  }
   0x1   :  { %v2215_v0 = vld [vmem:[%s2966_s1 + $0x40] sm:$0xff]   ;;  %v2219_v4 = vld [vmem:[%s2966_s1 + $0x48] sm:$0xff]   ;;  %v2223_v8 = vld [vmem:[%s2966_s1 + $0x50] sm:$0xff]  }
   0x2   :  { %v2216_v1 = vld [vmem:[%s2966_s1 + $0xc0] sm:$0xff]   ;;  %1895 = vmatprep.subr.bf16.mxu0 %v2215_v0  ;;  %v2220_v5 = vld [vmem:[%s2966_s1 + $0xc8] sm:$0xff]   ;;  %v2224_v9 = vld [vmem:[%s2966_s1 + $0xd0] sm:$0xff]  }
   0x3   :  { %v2217_v2 = vld [vmem:[%s2966_s1] sm:$0xff]   ;;  %1959 = vmatprep.subr.bf16.mxu1 %v2216_v1  ;;  %v2221_v6 = vld [vmem:[%s2966_s1 + $0x8] sm:$0xff]   ;;  %v2225_v10 = vld [vmem:[%s2966_s1 + $0x10] sm:$0xff]  }
   0x4   :  { %v2218_v3 = vld [vmem:[%s2966_s1 + $0x80] sm:$0xff]   ;;  %1896 = vmatpush3.bf16.msra.mxu0 %v2217_v2  ;;  %v2222_v7 = vld [vmem:[%s2966_s1 + $0x88] sm:$0xff]   ;;  %v2226_v11 = vld [vmem:[%s2966_s1 + $0x90] sm:$0xff]  }
   0x5   :  { %1960 = vmatpush3.bf16.msra.mxu1 %v2218_v3  ;;  %1897 = vmatprep.subr.bf16.mxu0 %v2219_v4  ;;  %v2227_v12 = vld [vmem:[%s2966_s1 + $0x58] sm:$0xff]   ;;  %v2231_v16 = vld [vmem:[%s2966_s1 + $0x60] sm:$0xff]   ;;  %v2235_v20 = vld [vmem:[%s2966_s1 + $0x68] sm:$0xff]  }
   0x6   :  { %1961 = vmatprep.subr.bf16.mxu1 %v2220_v5  ;;  %v2228_v13 = vld [vmem:[%s2966_s1 + $0xd8] sm:$0xff]   ;;  %v2232_v17 = vld [vmem:[%s2966_s1 + $0xe0] sm:$0xff]   ;;  %v2236_v21 = vld [vmem:[%s2966_s1 + $0xe8] sm:$0xff]  }
   0x7   :  { %v2229_v14 = vld [vmem:[%s2966_s1 + $0x18] sm:$0xff]   ;;  %v2233_v18 = vld [vmem:[%s2966_s1 + $0x20] sm:$0xff]   ;;  %v2237_v22 = vld [vmem:[%s2966_s1 + $0x28] sm:$0xff]  }
   0x8   :  { %1898 = vmatpush3.bf16.msra.mxu0 %v2221_v6  ;;  %v2230_v15 = vld [vmem:[%s2966_s1 + $0x98] sm:$0xff]   ;;  %v2234_v19 = vld [vmem:[%s2966_s1 + $0xa0] sm:$0xff]   ;;  %v2238_v23 = vld [vmem:[%s2966_s1 + $0xa8] sm:$0xff]  }
   0x9   :  { %1962 = vmatpush3.bf16.msra.mxu1 %v2222_v7  ;;  %1899 = vmatprep.subr.bf16.mxu0 %v2223_v8  ;;  %v2239_v24 = vld [vmem:[%s2966_s1 + $0x70] sm:$0xff]   ;;  %v2243_v28 = vld [vmem:[%s2966_s1 + $0x78] sm:$0xff]   ;;  %v2247_v32 = vld [vmem:[%s2967_s0] ss:$36 sps:$4 sm:$0xff]  }
   0xa   :  { %1963 = vmatprep.subr.bf16.mxu1 %v2224_v9  ;;  %v2240_v25 = vld [vmem:[%s2966_s1 + $0xf0] sm:$0xff]   ;;  %v2244_v29 = vld [vmem:[%s2966_s1 + $0xf8] sm:$0xff]   ;;  %v2249_v33 = vld [vmem:[%s2967_s0 + $0x4] ss:$36 sps:$4 sm:$0xff]  }
   0xb   :  { %v2241_v26 = vld [vmem:[%s2966_s1 + $0x30] sm:$0xff]   ;;  %v2245_v30 = vld [vmem:[%s2966_s1 + $0x38] sm:$0xff]   ;;  %v2250_v34 = vld [vmem:[%s2967_s0 + $0x8] ss:$36 sps:$4 sm:$0xff]   ;;  %1070 = vmatprep.mubr.bf16.mxu0 %v2249_v33 }
   0xc   :  { %1900 = vmatpush3.bf16.msra.mxu0 %v2225_v10  ;;  %v2242_v27 = vld [vmem:[%s2966_s1 + $0xb0] sm:$0xff]   ;;  %v2246_v31 = vld [vmem:[%s2966_s1 + $0xb8] sm:$0xff]   ;;  %v2253_v36 = vld [vmem:[%s2966_s1 + $0x140] sm:$0xff]  }
   0xd   :  { %1964 = vmatpush3.bf16.msra.mxu1 %v2226_v11  ;;  %1901 = vmatprep.subr.bf16.mxu0 %v2227_v12  ;;  %v2252_v35 = vld [vmem:[%s2967_s0 + $0xc] ss:$36 sps:$4 sm:$0xff]   ;;  %v2254_v37 = vld [vmem:[%s2966_s1 + $0x100] sm:$0xff]   ;;  %v2257_v39 = vld [vmem:[%s2967_s0 + $0x54] ss:$36 sps:$4 sm:$0xff]  }
   0xe   :  { %1965 = vmatprep.subr.bf16.mxu1 %v2228_v13  ;;  %1167 = vmatprep.mubr.bf16.mxu1 %v2252_v35  ;;  %v2255_v38 = vld [vmem:[%s2967_s0 + $0x4c] ss:$36 sps:$4 sm:$0xff]   ;;  %v2263_v44 = vld [vmem:[%s2967_s0 + $0x94] ss:$36 sps:$4 sm:$0xff]   ;;  %v2265_v45 = vld [vmem:[%s2967_s0 + $0x9c] ss:$36 sps:$4 sm:$0xff]  }
   0xf   :  { %v2259_v40 = vld [vmem:[%s2967_s0 + $0x48] ss:$36 sps:$4 sm:$0xff]   ;;  %v2260_v41 = vld [vmem:[%s2967_s0 + $0x50] ss:$36 sps:$4 sm:$0xff]   ;;  %v2270_v47 = vld [vmem:[%s2966_s1 + $0x1c0] sm:$0xff]  }
  0x10   :  { %1902 = vmatpush3.bf16.msra.mxu0 %v2229_v14  ;;  %v2261_v42 = vld [vmem:[%s2966_s1 + $0x148] sm:$0xff]   ;;  %v2269_v46 = vld [vmem:[%s2966_s1 + $0x150] sm:$0xff]   ;;  %v2272_v50 = vld [vmem:[%s2966_s1 + $0x180] sm:$0xff]  }
  0x11   :  { %1966 = vmatpush3.bf16.msra.mxu1 %v2230_v15  ;;  %1903 = vmatprep.subr.bf16.mxu0 %v2231_v16  ;;  %v2262_v43 = vld [vmem:[%s2966_s1 + $0x108] sm:$0xff]   ;;  %v2267_v48 = vld [vmem:[%s2967_s0 + $0x90] ss:$36 sps:$4 sm:$0xff]   ;;  %v2268_v51 = vld [vmem:[%s2967_s0 + $0x98] ss:$36 sps:$4 sm:$0xff]  }
  0x12   :  { %1967 = vmatprep.subr.bf16.mxu1 %v2232_v17  ;;  %v2271_v49 = vld [vmem:[%s2966_s1 + $0x110] sm:$0xff]   ;;  %v2273_v52 = vld [vmem:[%s2967_s0 + $0xdc] ss:$36 sps:$4 sm:$0xff]   ;;  %v2275_v53 = vld [vmem:[%s2967_s0 + $0xe4] ss:$36 sps:$4 sm:$0xff]  }
  0x13   :  { %v2279_v54 = vld [vmem:[%s2966_s1 + $0x158] sm:$0xff]   ;;  %v2280_v55 = vld [vmem:[%s2966_s1 + $0x1c8] sm:$0xff]   ;;  %v2278_v59 = vld [vmem:[%s2967_s0 + $0xe0] ss:$36 sps:$4 sm:$0xff]  }
  0x14   :  { %1904 = vmatpush3.bf16.msra.mxu0 %v2233_v18  ;;  %v2281_v56 = vld [vmem:[%s2966_s1 + $0x118] sm:$0xff]   ;;  %v2282_v57 = vld [vmem:[%s2966_s1 + $0x188] sm:$0xff]   ;;  %v2289_v62 = vld [vmem:[%s2966_s1 + $0x160] sm:$0xff]  }
  0x15   :  { %1968 = vmatpush3.bf16.msra.mxu1 %v2234_v19  ;;  %1905 = vmatprep.subr.bf16.mxu0 %v2235_v20  ;;  %v2277_v58 = vld [vmem:[%s2967_s0 + $0xd8] ss:$36 sps:$4 sm:$0xff]   ;;  %v2283_v60 = vld [vmem:[%s2967_s0 + $0x124] ss:$36 sps:$4 sm:$0xff]   ;;  %v2285_v61 = vld [vmem:[%s2967_s0 + $0x12c] ss:$36 sps:$4 sm:$0xff]  }
  0x16   :  { %1969 = vmatprep.subr.bf16.mxu1 %v2236_v21  ;;  %v2290_v63 = vld [vmem:[%s2966_s1 + $0x1d0] sm:$0xff]   ;;  %v2291_v0 = vld [vmem:[%s2966_s1 + $0x120] sm:$0xff]   ;;  %v2288_v3 = vld [vmem:[%s2967_s0 + $0x128] ss:$36 sps:$4 sm:$0xff]  }
  0x17   :  { %v2292_v1 = vld [vmem:[%s2966_s1 + $0x190] sm:$0xff]   ;;  %v2287_v2 = vld [vmem:[%s2967_s0 + $0x120] ss:$36 sps:$4 sm:$0xff]   ;;  %v2299_v6 = vld [vmem:[%s2966_s1 + $0x168] sm:$0xff]  }
  0x18   :  { %1906 = vmatpush3.bf16.msra.mxu0 %v2237_v22  ;;  %v2293_v4 = vld [vmem:[%s2967_s0 + $0x16c] ss:$36 sps:$4 sm:$0xff]   ;;  %v2295_v5 = vld [vmem:[%s2967_s0 + $0x174] ss:$36 sps:$4 sm:$0xff]   ;;  %v2305_v14 = vld [vmem:[%s2967_s0 + $0x1bc] ss:$36 sps:$4 sm:$0xff]  }
  0x19   :  { %1970 = vmatpush3.bf16.msra.mxu1 %v2238_v23  ;;  %1907 = vmatprep.subr.bf16.mxu0 %v2239_v24  ;;  %v2300_v7 = vld [vmem:[%s2966_s1 + $0x1d8] sm:$0xff]   ;;  %v2301_v8 = vld [vmem:[%s2966_s1 + $0x128] sm:$0xff]   ;;  %v2298_v11 = vld [vmem:[%s2967_s0 + $0x170] ss:$36 sps:$4 sm:$0xff]  }
  0x1a   :  { %1971 = vmatprep.subr.bf16.mxu1 %v2240_v25  ;;  %v2302_v9 = vld [vmem:[%s2966_s1 + $0x198] sm:$0xff]   ;;  %v2297_v10 = vld [vmem:[%s2967_s0 + $0x168] ss:$36 sps:$4 sm:$0xff]   ;;  %v2309_v13 = vld [vmem:[%s2966_s1 + $0x170] sm:$0xff]  }
  0x1b   :  { %v2303_v12 = vld [vmem:[%s2967_s0 + $0x1b4] ss:$36 sps:$4 sm:$0xff]   ;;  %v2310_v15 = vld [vmem:[%s2966_s1 + $0x1e0] sm:$0xff]   ;;  %v2313_v18 = vld [vmem:[%s2966_s1 + $0x1e8] sm:$0xff]  }
  0x1c   :  { %1908 = vmatpush3.bf16.msra.mxu0 %v2241_v26  ;;  %v2311_v16 = vld [vmem:[%s2966_s1 + $0x130] sm:$0xff]   ;;  %v2312_v17 = vld [vmem:[%s2966_s1 + $0x1a0] sm:$0xff]   ;;  %v2314_v19 = vld [vmem:[%s2966_s1 + $0x1a8] sm:$0xff]  }
  0x1d   :  { %1972 = vmatpush3.bf16.msra.mxu1 %v2242_v27  ;;  %1909 = vmatprep.subr.bf16.mxu0 %v2243_v28  ;;  %v2307_v20 = vld [vmem:[%s2967_s0 + $0x1b0] ss:$36 sps:$4 sm:$0xff]   ;;  %v2308_v21 = vld [vmem:[%s2967_s0 + $0x1b8] ss:$36 sps:$4 sm:$0xff]   ;;  %v2317_v23 = vld [vmem:[%s2967_s0 + $0x204] ss:$36 sps:$4 sm:$0xff]  }
  0x1e   :  { %1973 = vmatprep.subr.bf16.mxu1 %v2244_v29  ;;  %v2315_v22 = vld [vmem:[%s2967_s0 + $0x1fc] ss:$36 sps:$4 sm:$0xff]   ;;  %v2322_v25 = vld [vmem:[%s2966_s1 + $0x1f0] sm:$0xff]  }
  0x1f   :  { %v2321_v24 = vld [vmem:[%s2966_s1 + $0x178] sm:$0xff]   ;;  %v2324_v27 = vld [vmem:[%s2966_s1 + $0x1b0] sm:$0xff]  }
  0x20   :  { %1910 = vmatpush3.bf16.msra.mxu0 %v2245_v30  ;;  %v2323_v26 = vld [vmem:[%s2966_s1 + $0x138] sm:$0xff]   ;;  %v2320_v30 = vld [vmem:[%s2967_s0 + $0x200] ss:$36 sps:$4 sm:$0xff]   ;;  %v2327_v35 = vld [vmem:[%s2967_s0 + $0x10] ss:$36 sps:$4 sm:$0xff]  }
  0x21   :  { %1974 = vmatpush3.bf16.msra.mxu1 %v2246_v31  ;;  %2023 = vmatprep.subr.bf16.mxu0 %v2253_v36  ;;  %v2325_v28 = vld [vmem:[%s2966_s1 + $0x1f8] sm:$0xff]  }
  0x22   :  { %2087 = vmatprep.subr.bf16.mxu1 %v2270_v47  ;;  %v2319_v29 = vld [vmem:[%s2967_s0 + $0x1f8] ss:$36 sps:$4 sm:$0xff]   ;;  %v2345_v47 = vld [vmem:[%s2967_s0 + $0xa0] ss:$36 sps:$4 sm:$0xff]  }
  0x23   :  { %1071 = vmatmul.mubr.bf16.vlgmr.msra.gmra.mrb[0].mxu0 %v2247_v32  ;;  %v2326_v31 = vld [vmem:[%s2966_s1 + $0x1b8] sm:$0xff]   ;;  %v2333_v32 = vld [vmem:[%s2966_s1 + $0x200] sm:$0xff]  }
  0x24   :  { %1168 = vmatmul.mubr.bf16.vlgmr.msra.gmra.mrb[0].mxu1 %v2250_v34  ;;  %2024 = vmatpush3.bf16.msra.mxu0 %v2254_v37  ;;  %v2329_v33 = vld [vmem:[%s2967_s0 + $0x14] ss:$36 sps:$4 sm:$0xff]   ;;  %v2332_v34 = vld [vmem:[%s2967_s0 + $0x1c] ss:$36 sps:$4 sm:$0xff]  }
  0x25   :  { %1078 = vmatprep.mubr.bf16.mxu0 %v2255_v38  ;;  %1175 = vmatprep.mubr.bf16.mxu1 %v2257_v39  ;;  %v2330_v36 = vld [vmem:[%s2967_s0 + $0x18] ss:$36 sps:$4 sm:$0xff]   ;;  %v2336_v38 = vld [vmem:[%s2967_s0 + $0x64] ss:$36 sps:$4 sm:$0xff]  }
  0x26   :  { %2025 = vmatprep.subr.bf16.mxu0 %v2261_v42  ;;  %2088 = vmatpush3.bf16.msra.mxu1 %v2272_v50  ;;  %v2334_v37 = vld [vmem:[%s2967_s0 + $0x5c] ss:$36 sps:$4 sm:$0xff]   ;;  %v2340_v39 = vld [vmem:[%s2966_s1 + $0x208] sm:$0xff]   ;;  %v2350_v50 = vld [vmem:[%s2967_s0 + $0xf4] ss:$36 sps:$4 sm:$0xff]  }
  0x27   :  { %2089 = vmatprep.subr.bf16.mxu1 %v2280_v55  ;;  %v2339_v42 = vld [vmem:[%s2967_s0 + $0x60] ss:$36 sps:$4 sm:$0xff]   ;;  %v2355_v55 = vld [vmem:[%s2967_s0 + $0x134] ss:$36 sps:$4 sm:$0xff]  }
  0x28   :  { %2026 = vmatpush3.bf16.msra.mxu0 %v2262_v43  ;;  %v2341_v43 = vld [vmem:[%s2967_s0 + $0xa4] ss:$36 sps:$4 sm:$0xff]  }
  0x29   :  { %2027 = vmatprep.subr.bf16.mxu0 %v2269_v46  ;;  %v2361_v46 = vld [vmem:[%s2966_s1 + $0x220] sm:$0xff]  }
  0x2a   :  { %2090 = vmatpush3.bf16.msra.mxu1 %v2282_v57  ;;  %v2382_v57 = vld [vmem:[%s2966_s1 + $0x238] sm:$0xff]  }
  0x2b   :  { %1079 = vmatmul.mubr.bf16.gmra.mrb[4].mxu0 %v2259_v40  ;;  %2091 = vmatprep.subr.bf16.mxu1 %v2290_v63  ;;  %v2347_v40 = vld [vmem:[%s2966_s1 + $0x210] sm:$0xff]   ;;  %v2367_v63 = vld [vmem:[%s2967_s0 + $0x180] ss:$36 sps:$4 sm:$0xff]  }
  0x2c   :  { %1176 = vmatmul.mubr.bf16.gmra.mrb[4].mxu1 %v2260_v41  ;;  %1086 = vmatprep.mubr.bf16.mxu0 %v2263_v44  ;;  %v2338_v41 = vld [vmem:[%s2967_s0 + $0x58] ss:$36 sps:$4 sm:$0xff]   ;;  %v2343_v44 = vld [vmem:[%s2967_s0 + $0xac] ss:$36 sps:$4 sm:$0xff]  }
  0x2d   :  { %1183 = vmatprep.mubr.bf16.mxu1 %v2265_v45  ;;  %2028 = vmatpush3.bf16.msra.mxu0 %v2271_v49  ;;  %v2354_v45 = vld [vmem:[%s2966_s1 + $0x218] sm:$0xff]   ;;  %v2348_v49 = vld [vmem:[%s2967_s0 + $0xec] ss:$36 sps:$4 sm:$0xff]  }
  0x2e   :  { %2029 = vmatprep.subr.bf16.mxu0 %v2279_v54  ;;  %2092 = vmatpush3.bf16.msra.mxu1 %v2292_v1  ;;  %v2353_v54 = vld [vmem:[%s2967_s0 + $0xf0] ss:$36 sps:$4 sm:$0xff]  }
  0x2f   :  { %2093 = vmatprep.subr.bf16.mxu1 %v2300_v7  ;;  %v2371_v1 = vld [vmem:[%s2967_s0 + $0x1cc] ss:$36 sps:$4 sm:$0xff]  }
  0x30   :  { %v2381_v7 = vld [vmem:[%s2967_s0 + $0x210] ss:$36 sps:$4 sm:$0xff]  }
  0x31   :  { %2030 = vmatpush3.bf16.msra.mxu0 %v2281_v56  ;;  %v2357_v56 = vld [vmem:[%s2967_s0 + $0x13c] ss:$36 sps:$4 sm:$0xff]  }
  0x32   :  { %2031 = vmatprep.subr.bf16.mxu0 %v2289_v62  ;;  %2094 = vmatpush3.bf16.msra.mxu1 %v2302_v9  ;;  %v2366_v62 = vld [vmem:[%s2967_s0 + $0x178] ss:$36 sps:$4 sm:$0xff]   ;;  %v2384_v9 = vld [vmem:[%s2967_s0 + $0x140] ss:$36 sps:$4 sm:$0xff]  }
  0x33   :  { %1087 = vmatmul.mubr.bf16.gmra.mrb[8].mxu0 %v2267_v48  ;;  %2095 = vmatprep.subr.bf16.mxu1 %v2310_v15  ;;  %v2346_v48 = vld [vmem:[%s2967_s0 + $0xa8] ss:$36 sps:$4 sm:$0xff]   ;;  %v2390_v15 = vld [vmem:[%s2967_s0 + $0x218] ss:$36 sps:$4 sm:$0xff]  }
  0x34   :  { %1184 = vmatmul.mubr.bf16.gmra.mrb[8].mxu1 %v2268_v51  ;;  %1094 = vmatprep.mubr.bf16.mxu0 %v2273_v52  ;;  %v2368_v51 = vld [vmem:[%s2966_s1 + $0x228] sm:$0xff]  }
  0x35   :  { %1191 = vmatprep.mubr.bf16.mxu1 %v2275_v53  ;;  %2032 = vmatpush3.bf16.msra.mxu0 %v2291_v0  ;;  %v2352_v52 = vld [vmem:[%s2967_s0 + $0xe8] ss:$36 sps:$4 sm:$0xff]   ;;  %v2375_v53 = vld [vmem:[%s2966_s1 + $0x230] sm:$0xff]  }
  0x36   :  { %2033 = vmatprep.subr.bf16.mxu0 %v2299_v6  ;;  %2096 = vmatpush3.bf16.msra.mxu1 %v2312_v17  ;;  %v2369_v0 = vld [vmem:[%s2967_s0 + $0x1c4] ss:$36 sps:$4 sm:$0xff]  }
  0x37   :  { %2097 = vmatprep.subr.bf16.mxu1 %v2313_v18  ;;  %v2380_v6 = vld [vmem:[%s2967_s0 + $0x208] ss:$36 sps:$4 sm:$0xff]  }
  0x39   :  { %2034 = vmatpush3.bf16.msra.mxu0 %v2301_v8  ;;  %v2383_v8 = vld [vmem:[%s2967_s0 + $0x20] ss:$36 sps:$4 sm:$0xff]  }
  0x3a   :  { %2035 = vmatprep.subr.bf16.mxu0 %v2309_v13  ;;  %2098 = vmatpush3.bf16.msra.mxu1 %v2314_v19  ;;  %v2388_v13 = vld [vmem:[%s2967_s0 + $0x1d0] ss:$36 sps:$4 sm:$0xff]  }
  0x3b   :  { %1095 = vmatmul.mubr.bf16.gmra.mrb[12].mxu0 %v2277_v58  ;;  %2099 = vmatprep.subr.bf16.mxu1 %v2322_v25  ;;  %v2359_v58 = vld [vmem:[%s2967_s0 + $0x130] ss:$36 sps:$4 sm:$0xff]  }
  0x3c   :  { %1192 = vmatmul.mubr.bf16.gmra.mrb[12].mxu1 %v2278_v59  ;;  %1102 = vmatprep.mubr.bf16.mxu0 %v2283_v60  ;;  %v2360_v59 = vld [vmem:[%s2967_s0 + $0x138] ss:$36 sps:$4 sm:$0xff]  }
  0x3d   :  { %1199 = vmatprep.mubr.bf16.mxu1 %v2285_v61  ;;  %2036 = vmatpush3.bf16.msra.mxu0 %v2311_v16  ;;  %v2362_v60 = vld [vmem:[%s2967_s0 + $0x17c] ss:$36 sps:$4 sm:$0xff]   ;;  %v2364_v61 = vld [vmem:[%s2967_s0 + $0x184] ss:$36 sps:$4 sm:$0xff]  }
  0x3e   :  { %2037 = vmatprep.subr.bf16.mxu0 %v2321_v24  ;;  %2100 = vmatpush3.bf16.msra.mxu1 %v2324_v27 }
  0x3f   :  { %2101 = vmatprep.subr.bf16.mxu1 %v2325_v28 }
  0x41   :  { %2038 = vmatpush3.bf16.msra.mxu0 %v2323_v26 }
  0x42   :  { %2167 = vmatprep.subr.bf16.mxu0 %v2333_v32  ;;  %2102 = vmatpush3.bf16.msra.mxu1 %v2326_v31 }
  0x43   :  { %1103 = vmatmul.mubr.bf16.gmra.mrb[16].mxu0 %v2287_v2  ;;  %2199 = vmatprep.subr.bf16.mxu1 %v2333_v32  ;;  %v2373_v2 = vld [vmem:[%s2967_s0 + $0x1c0] ss:$36 sps:$4 sm:$0xff]  }
  0x44   :  { %1200 = vmatmul.mubr.bf16.gmra.mrb[16].mxu1 %v2288_v3  ;;  %1110 = vmatprep.mubr.bf16.mxu0 %v2293_v4  ;;  %v2374_v3 = vld [vmem:[%s2967_s0 + $0x1c8] ss:$36 sps:$4 sm:$0xff]  }
  0x45   :  { %1207 = vmatprep.mubr.bf16.mxu1 %v2295_v5  ;;  %v2376_v4 = vld [vmem:[%s2967_s0 + $0x20c] ss:$36 sps:$4 sm:$0xff]   ;;  %v2378_v5 = vld [vmem:[%s2967_s0 + $0x214] ss:$36 sps:$4 sm:$0xff]  }
  0x4b   :  { %1111 = vmatmul.mubr.bf16.gmra.mrb[20].mxu0 %v2297_v10  ;;  %v2385_v10 = vld [vmem:[%s2967_s0 + $0x68] ss:$36 sps:$4 sm:$0xff]  }
  0x4c   :  { %1208 = vmatmul.mubr.bf16.gmra.mrb[20].mxu1 %v2298_v11  ;;  %1118 = vmatprep.mubr.bf16.mxu0 %v2303_v12  ;;  %v2386_v11 = vld [vmem:[%s2967_s0 + $0x188] ss:$36 sps:$4 sm:$0xff]   ;;  %v2387_v12 = vld [vmem:[%s2967_s0 + $0xb0] ss:$36 sps:$4 sm:$0xff]  }
  0x4d   :  { %1215 = vmatprep.mubr.bf16.mxu1 %v2305_v14  ;;  %v2389_v14 = vld [vmem:[%s2967_s0 + $0xf8] ss:$36 sps:$4 sm:$0xff]  }
  0x53   :  { %1119 = vmatmul.mubr.bf16.gmra.mrb[24].mxu0 %v2307_v20 }
  0x54   :  { %1216 = vmatmul.mubr.bf16.gmra.mrb[24].mxu1 %v2308_v21  ;;  %1126 = vmatprep.mubr.bf16.mxu0 %v2315_v22 }
  0x55   :  { %1223 = vmatprep.mubr.bf16.mxu1 %v2317_v23 }
  0x5b   :  { %1127 = vmatmul.mubr.bf16.gmra.mrb[28].mxu0 %v2319_v29 }
  0x5c   :  { %1224 = vmatmul.mubr.bf16.gmra.mrb[28].mxu1 %v2320_v30  ;;  %1264 = vmatprep.mubr.bf16.mxu0 %v2329_v33 }
  0x5d   :  { %1361 = vmatprep.mubr.bf16.mxu1 %v2332_v34 }
  0x63   :  { %1265 = vmatmul.mubr.bf16.vlgmr.msra.gmra.mrb[32].mxu0 %v2327_v35 }
  0x64   :  { %1362 = vmatmul.mubr.bf16.vlgmr.msra.gmra.mrb[32].mxu1 %v2330_v36  ;;  %2168 = vmatpush3.bf16.msra.mxu0 %v2333_v32 }
  0x65   :  { %1272 = vmatprep.mubr.bf16.mxu0 %v2334_v37  ;;  %1369 = vmatprep.mubr.bf16.mxu1 %v2336_v38 }
  0x66   :  { %2169 = vmatprep.subr.bf16.mxu0 %v2340_v39  ;;  %2207 = vmatpush3.bf16.msra.mxu1 %v2333_v32 }
  0x67   :  { %2200 = vmatprep.subr.bf16.mxu1 %v2340_v39 }
  0x68   :  { %2170 = vmatpush3.bf16.msra.mxu0 %v2340_v39 }
  0x69   :  { %2171 = vmatprep.subr.bf16.mxu0 %v2347_v40 }
  0x6a   :  { %2208 = vmatpush3.bf16.msra.mxu1 %v2340_v39 }
  0x6b   :  { %1273 = vmatmul.mubr.bf16.gmra.mrb[36].mxu0 %v2338_v41  ;;  %2201 = vmatprep.subr.bf16.mxu1 %v2347_v40 }
  0x6c   :  { %1370 = vmatmul.mubr.bf16.gmra.mrb[36].mxu1 %v2339_v42  ;;  %1280 = vmatprep.mubr.bf16.mxu0 %v2341_v43 }
  0x6d   :  { %1377 = vmatprep.mubr.bf16.mxu1 %v2343_v44  ;;  %2172 = vmatpush3.bf16.msra.mxu0 %v2347_v40 }
  0x6e   :  { %2173 = vmatprep.subr.bf16.mxu0 %v2354_v45  ;;  %2209 = vmatpush3.bf16.msra.mxu1 %v2347_v40 }
  0x6f   :  { %2202 = vmatprep.subr.bf16.mxu1 %v2354_v45 }
  0x71   :  { %2174 = vmatpush3.bf16.msra.mxu0 %v2354_v45 }
  0x72   :  { %2175 = vmatprep.subr.bf16.mxu0 %v2361_v46  ;;  %2210 = vmatpush3.bf16.msra.mxu1 %v2354_v45 }
  0x73   :  { %1281 = vmatmul.mubr.bf16.gmra.mrb[40].mxu0 %v2345_v47  ;;  %2203 = vmatprep.subr.bf16.mxu1 %v2361_v46 }
  0x74   :  { %1378 = vmatmul.mubr.bf16.gmra.mrb[40].mxu1 %v2346_v48  ;;  %1288 = vmatprep.mubr.bf16.mxu0 %v2348_v49 }
  0x75   :  { %1385 = vmatprep.mubr.bf16.mxu1 %v2350_v50  ;;  %2176 = vmatpush3.bf16.msra.mxu0 %v2361_v46 }
  0x76   :  { %2177 = vmatprep.subr.bf16.mxu0 %v2368_v51  ;;  %2211 = vmatpush3.bf16.msra.mxu1 %v2361_v46 }
  0x77   :  { %2204 = vmatprep.subr.bf16.mxu1 %v2368_v51 }
  0x79   :  { %2178 = vmatpush3.bf16.msra.mxu0 %v2368_v51 }
  0x7a   :  { %2179 = vmatprep.subr.bf16.mxu0 %v2375_v53  ;;  %2212 = vmatpush3.bf16.msra.mxu1 %v2368_v51 }
  0x7b   :  { %1289 = vmatmul.mubr.bf16.gmra.mrb[44].mxu0 %v2352_v52  ;;  %2205 = vmatprep.subr.bf16.mxu1 %v2375_v53 }
  0x7c   :  { %1386 = vmatmul.mubr.bf16.gmra.mrb[44].mxu1 %v2353_v54  ;;  %1296 = vmatprep.mubr.bf16.mxu0 %v2355_v55 }
  0x7d   :  { %1393 = vmatprep.mubr.bf16.mxu1 %v2357_v56  ;;  %2180 = vmatpush3.bf16.msra.mxu0 %v2375_v53 }
  0x7e   :  { %2181 = vmatprep.subr.bf16.mxu0 %v2382_v57  ;;  %2213 = vmatpush3.bf16.msra.mxu1 %v2375_v53 }
  0x7f   :  { %2206 = vmatprep.subr.bf16.mxu1 %v2382_v57 }
  0x81   :  { %2182 = vmatpush3.bf16.msra.mxu0 %v2382_v57 }
  0x82   :  { %2214 = vmatpush3.bf16.msra.mxu1 %v2382_v57 }
  0x83   :  { %1297 = vmatmul.mubr.bf16.gmra.mrb[48].mxu0 %v2359_v58 }
  0x84   :  { %1394 = vmatmul.mubr.bf16.gmra.mrb[48].mxu1 %v2360_v59  ;;  %1304 = vmatprep.mubr.bf16.mxu0 %v2362_v60 }
  0x85   :  { %1401 = vmatprep.mubr.bf16.mxu1 %v2364_v61 }
  0x8b   :  { %1305 = vmatmul.mubr.bf16.gmra.mrb[52].mxu0 %v2366_v62 }
  0x8c   :  { %1402 = vmatmul.mubr.bf16.gmra.mrb[52].mxu1 %v2367_v63  ;;  %1312 = vmatprep.mubr.bf16.mxu0 %v2369_v0 }
  0x8d   :  { %1409 = vmatprep.mubr.bf16.mxu1 %v2371_v1 }
  0x93   :  { %1313 = vmatmul.mubr.bf16.gmra.mrb[56].mxu0 %v2373_v2 }
  0x94   :  { %1410 = vmatmul.mubr.bf16.gmra.mrb[56].mxu1 %v2374_v3  ;;  %1320 = vmatprep.mubr.bf16.mxu0 %v2376_v4 }
  0x95   :  { %1417 = vmatprep.mubr.bf16.mxu1 %v2378_v5 }
  0x9b   :  { %1321 = vmatmul.mubr.bf16.gmra.mrb[60].mxu0 %v2380_v6 }
  0x9c   :  { %1418 = vmatmul.mubr.bf16.gmra.mrb[60].mxu1 %v2381_v7  ;;  %2183 = vmatprep.mubr.bf16.mxu0 %v2383_v8 }
  0x9d   :  { %2191 = vmatprep.mubr.bf16.mxu1 %v2384_v9 }
  0xa3   :  { %2184 = vmatmul.mubr.bf16.vlgmr.msra.gmra.mrb[64].mxu0 %v2385_v10 }
  0xa4   :  { %2192 = vmatmul.mubr.bf16.vlgmr.msra.gmra.mrb[64].mxu1 %v2386_v11  ;;  %2187 = vmatprep.mubr.bf16.mxu0 %v2387_v12 }
  0xa5   :  { %2195 = vmatprep.mubr.bf16.mxu1 %v2388_v13 }
  0xab   :  { %2188 = vmatmul.mubr.bf16.gmra.mrb[68].mxu0 %v2389_v14 }
  0xac   :  { %2196 = vmatmul.mubr.bf16.gmra.mrb[68].mxu1 %v2390_v15 }
  0xf6   :  { %v1911_v16 = vpop.f32.mrb[0].mxu0 }
  0xf7   :  { %v1975_v17 = vpop.f32.mrb[0].mxu1  ;;  %v1912_v18 = vpop.f32.mrb[1].mxu0 }
  0xf8   :  { %v1913_v19 = vadd.f32 %v1912_v18, %v1911_v16  ;;  %v1976_v20 = vpop.f32.mrb[1].mxu1  ;;  %v1914_v21 = vpop.f32.mrb[2].mxu0 }
  0xf9   :  { %v1977_v22 = vadd.f32 %v1976_v20, %v1975_v17  ;;  %v1978_v23 = vpop.f32.mrb[2].mxu1  ;;  %v1915_v24 = vpop.f32.mrb[3].mxu0 }
  0xfa   :  { %v1916_v25 = vadd.f32 %v1915_v24, %v1914_v21  ;;  %v1979_v26 = vpop.f32.mrb[3].mxu1 }
  0xfb   :  { %v2843_v27 = vadd.f32 %v1977_v22, %v1913_v19  ;;  %v1980_v28 = vadd.f32 %v1979_v26, %v1978_v23 }
  0xfd   :  { %v2845_v29 = vadd.f32 %v1980_v28, %v1916_v25 }
  0xfe   :  { %v1917_v30 = vpop.f32.mrb[4].mxu0 }
  0xff   :  { %v1981_v31 = vpop.f32.mrb[4].mxu1  ;;  %v1918_v32 = vpop.f32.mrb[5].mxu0 }
 0x100   :  { %v1919_v33 = vadd.f32 %v1918_v32, %v1917_v30  ;;  %v1982_v34 = vpop.f32.mrb[5].mxu1  ;;  %v1920_v35 = vpop.f32.mrb[6].mxu0 }
 0x101   :  { %v1983_v36 = vadd.f32 %v1982_v34, %v1981_v31  ;;  %v1984_v37 = vpop.f32.mrb[6].mxu1  ;;  %v1921_v38 = vpop.f32.mrb[7].mxu0 }
 0x102   :  { %v1922_v39 = vadd.f32 %v1921_v38, %v1920_v35  ;;  %v1985_v40 = vpop.f32.mrb[7].mxu1 }
 0x103   :  { %v2847_v41 = vadd.f32 %v1983_v36, %v1919_v33  ;;  %v1986_v42 = vadd.f32 %v1985_v40, %v1984_v37 }
 0x105   :  { %v2849_v43 = vadd.f32 %v1986_v42, %v1922_v39 }
 0x106   :  { %v1923_v44 = vpop.f32.mrb[8].mxu0 }
 0x107   :  { %v1987_v45 = vpop.f32.mrb[8].mxu1  ;;  %v1924_v46 = vpop.f32.mrb[9].mxu0 }
 0x108   :  { %v1925_v47 = vadd.f32 %v1924_v46, %v1923_v44  ;;  %v1988_v48 = vpop.f32.mrb[9].mxu1  ;;  %v1926_v49 = vpop.f32.mrb[10].mxu0 }
 0x109   :  { %v1989_v50 = vadd.f32 %v1988_v48, %v1987_v45  ;;  %v1990_v51 = vpop.f32.mrb[10].mxu1  ;;  %v1927_v52 = vpop.f32.mrb[11].mxu0 }
 0x10a   :  { %v1928_v53 = vadd.f32 %v1927_v52, %v1926_v49  ;;  %v1991_v54 = vpop.f32.mrb[11].mxu1 }
 0x10b   :  { %v2851_v55 = vadd.f32 %v1989_v50, %v1925_v47  ;;  %v1992_v56 = vadd.f32 %v1991_v54, %v1990_v51 }
 0x10d   :  { %v2853_v57 = vadd.f32 %v1992_v56, %v1928_v53 }
 0x10e   :  { %v1929_v58 = vpop.f32.mrb[12].mxu0 }
 0x10f   :  { %v1993_v59 = vpop.f32.mrb[12].mxu1  ;;  %v1930_v60 = vpop.f32.mrb[13].mxu0 }
 0x110   :  { %v1931_v61 = vadd.f32 %v1930_v60, %v1929_v58  ;;  %v1994_v62 = vpop.f32.mrb[13].mxu1  ;;  %v1932_v63 = vpop.f32.mrb[14].mxu0 }
 0x111   :  { %v1995_v0 = vadd.f32 %v1994_v62, %v1993_v59  ;;  %v1996_v1 = vpop.f32.mrb[14].mxu1  ;;  %v1933_v2 = vpop.f32.mrb[15].mxu0 }
 0x112   :  { %v1934_v3 = vadd.f32 %v1933_v2, %v1932_v63  ;;  %v1997_v4 = vpop.f32.mrb[15].mxu1 }
 0x113   :  { %v2855_v5 = vadd.f32 %v1995_v0, %v1931_v61  ;;  %v1998_v6 = vadd.f32 %v1997_v4, %v1996_v1 }
 0x115   :  { %v2857_v7 = vadd.f32 %v1998_v6, %v1934_v3 }
 0x116   :  { %v1935_v8 = vpop.f32.mrb[16].mxu0 }
 0x117   :  { %v1999_v9 = vpop.f32.mrb[16].mxu1  ;;  %v1936_v10 = vpop.f32.mrb[17].mxu0 }
 0x118   :  { %v1937_v11 = vadd.f32 %v1936_v10, %v1935_v8  ;;  %v2000_v12 = vpop.f32.mrb[17].mxu1  ;;  %v1938_v13 = vpop.f32.mrb[18].mxu0 }
 0x119   :  { %v2001_v14 = vadd.f32 %v2000_v12, %v1999_v9  ;;  %v2002_v15 = vpop.f32.mrb[18].mxu1  ;;  %v1939_v16 = vpop.f32.mrb[19].mxu0 }
 0x11a   :  { %v1940_v17 = vadd.f32 %v1939_v16, %v1938_v13  ;;  %v2003_v18 = vpop.f32.mrb[19].mxu1 }
 0x11b   :  { %v2859_v19 = vadd.f32 %v2001_v14, %v1937_v11  ;;  %v2004_v20 = vadd.f32 %v2003_v18, %v2002_v15 }
 0x11d   :  { %v2861_v21 = vadd.f32 %v2004_v20, %v1940_v17 }
 0x11e   :  { %v1941_v22 = vpop.f32.mrb[20].mxu0 }
 0x11f   :  { %v2005_v23 = vpop.f32.mrb[20].mxu1  ;;  %v1942_v24 = vpop.f32.mrb[21].mxu0 }
 0x120   :  { %v1943_v25 = vadd.f32 %v1942_v24, %v1941_v22  ;;  %v2006_v26 = vpop.f32.mrb[21].mxu1  ;;  %v1944_v28 = vpop.f32.mrb[22].mxu0 }
 0x121   :  { %v2007_v30 = vadd.f32 %v2006_v26, %v2005_v23  ;;  %v2008_v31 = vpop.f32.mrb[22].mxu1  ;;  %v1945_v32 = vpop.f32.mrb[23].mxu0 }
 0x122   :  { %v1946_v33 = vadd.f32 %v1945_v32, %v1944_v28  ;;  %v2009_v34 = vpop.f32.mrb[23].mxu1 }
 0x123   :  { %v2863_v35 = vadd.f32 %v2007_v30, %v1943_v25  ;;  %v2010_v36 = vadd.f32 %v2009_v34, %v2008_v31 }
 0x125   :  { %v2865_v37 = vadd.f32 %v2010_v36, %v1946_v33 }
 0x126   :  { %v1947_v38 = vpop.f32.mrb[24].mxu0 }
 0x127   :  { %v2011_v39 = vpop.f32.mrb[24].mxu1  ;;  %v1948_v40 = vpop.f32.mrb[25].mxu0 }
 0x128   :  { %v1949_v42 = vadd.f32 %v1948_v40, %v1947_v38  ;;  %v2012_v44 = vpop.f32.mrb[25].mxu1  ;;  %v1950_v45 = vpop.f32.mrb[26].mxu0 }
 0x129   :  { %v2013_v46 = vadd.f32 %v2012_v44, %v2011_v39  ;;  %v2014_v47 = vpop.f32.mrb[26].mxu1  ;;  %v1951_v48 = vpop.f32.mrb[27].mxu0 }
 0x12a   :  { %v1952_v49 = vadd.f32 %v1951_v48, %v1950_v45  ;;  %v2015_v50 = vpop.f32.mrb[27].mxu1 }
 0x12b   :  { %v2867_v51 = vadd.f32 %v2013_v46, %v1949_v42  ;;  %v2016_v52 = vadd.f32 %v2015_v50, %v2014_v47 }
 0x12d   :  { %v2869_v53 = vadd.f32 %v2016_v52, %v1952_v49 }
 0x12e   :  { %v1953_v54 = vpop.f32.mrb[28].mxu0 }
 0x12f   :  { %v2017_v56 = vpop.f32.mrb[28].mxu1  ;;  %v1954_v58 = vpop.f32.mrb[29].mxu0 }
 0x130   :  { %v1955_v59 = vadd.f32 %v1954_v58, %v1953_v54  ;;  %v2018_v60 = vpop.f32.mrb[29].mxu1  ;;  %v1956_v61 = vpop.f32.mrb[30].mxu0 }
 0x131   :  { %v2019_v62 = vadd.f32 %v2018_v60, %v2017_v56  ;;  %v2020_v63 = vpop.f32.mrb[30].mxu1  ;;  %v1957_v0 = vpop.f32.mrb[31].mxu0 }
 0x132   :  { %v1958_v1 = vadd.f32 %v1957_v0, %v1956_v61  ;;  %v2021_v2 = vpop.f32.mrb[31].mxu1 }
 0x133   :  { %v2871_v3 = vadd.f32 %v2019_v62, %v1955_v59  ;;  %v2022_v4 = vadd.f32 %v2021_v2, %v2020_v63 }
 0x135   :  { %v2873_v6 = vadd.f32 %v2022_v4, %v1958_v1 }
 0x136   :  { %v2039_v8 = vpop.f32.mrb[32].mxu0 }
 0x137   :  { %v2040_v9 = vpop.f32.mrb[33].mxu0  ;;  %v2103_v10 = vpop.f32.mrb[32].mxu1 }
 0x138   :  { %v2041_v11 = vadd.f32 %v2040_v9, %v2039_v8  ;;  %v2042_v12 = vpop.f32.mrb[34].mxu0  ;;  %v2104_v13 = vpop.f32.mrb[33].mxu1 }
 0x139   :  { %v2043_v14 = vpop.f32.mrb[35].mxu0  ;;  %v2105_v15 = vadd.f32 %v2104_v13, %v2103_v10  ;;  %v2106_v16 = vpop.f32.mrb[34].mxu1 }
 0x13a   :  { %v1267_v17 = vadd.f32 %v2041_v11, %v2843_v27  ;;  %v2044_v18 = vadd.f32 %v2043_v14, %v2042_v12  ;;  %v2107_v20 = vpop.f32.mrb[35].mxu1 }
 0x13b   :  { %v2108_v22 = vadd.f32 %v2107_v20, %v2106_v16 }
 0x13c   :  { %v1270_v23 = vadd.f32 %v2044_v18, %v2845_v29  ;;  %v2877_v24 = vadd.f32 %v2105_v15, %v1267_v17 }
 0x13e   :  { %v2045_v25 = vpop.f32.mrb[36].mxu0  ;;  %v2879_v26 = vadd.f32 %v2108_v22, %v1270_v23 }
 0x13f   :  { %v2046_v28 = vpop.f32.mrb[37].mxu0  ;;  %v2109_v30 = vpop.f32.mrb[36].mxu1 }
 0x140   :  { %v2047_v31 = vadd.f32 %v2046_v28, %v2045_v25  ;;  %v2048_v32 = vpop.f32.mrb[38].mxu0  ;;  %v2110_v33 = vpop.f32.mrb[37].mxu1 }
 0x141   :  { %v2049_v34 = vpop.f32.mrb[39].mxu0  ;;  %v2111_v36 = vadd.f32 %v2110_v33, %v2109_v30  ;;  %v2112_v38 = vpop.f32.mrb[38].mxu1 }
 0x142   :  { %v1275_v27 = vadd.f32 %v2047_v31, %v2847_v41  ;;  %v2050_v39 = vadd.f32 %v2049_v34, %v2048_v32  ;;  %v2113_v40 = vpop.f32.mrb[39].mxu1 }
 0x143   :  { %v2114_v42 = vadd.f32 %v2113_v40, %v2112_v38 }
 0x144   :  { %v1278_v29 = vadd.f32 %v2050_v39, %v2849_v43  ;;  %v2883_v44 = vadd.f32 %v2111_v36, %v1275_v27 }
 0x146   :  { %v2051_v45 = vpop.f32.mrb[40].mxu0  ;;  %v2885_v46 = vadd.f32 %v2114_v42, %v1278_v29 }
 0x147   :  { %v2052_v47 = vpop.f32.mrb[41].mxu0  ;;  %v2115_v48 = vpop.f32.mrb[40].mxu1 }
 0x148   :  { %v2053_v49 = vadd.f32 %v2052_v47, %v2051_v45  ;;  %v2054_v50 = vpop.f32.mrb[42].mxu0  ;;  %v2116_v52 = vpop.f32.mrb[41].mxu1 }
 0x149   :  { %v2055_v54 = vpop.f32.mrb[43].mxu0  ;;  %v2117_v56 = vadd.f32 %v2116_v52, %v2115_v48  ;;  %v2118_v58 = vpop.f32.mrb[42].mxu1 }
 0x14a   :  { %v1283_v41 = vadd.f32 %v2053_v49, %v2851_v55  ;;  %v2056_v59 = vadd.f32 %v2055_v54, %v2054_v50  ;;  %v2119_v60 = vpop.f32.mrb[43].mxu1 }
 0x14b   :  { %v2120_v61 = vadd.f32 %v2119_v60, %v2118_v58 }
 0x14c   :  { %v1286_v43 = vadd.f32 %v2056_v59, %v2853_v57  ;;  %v2889_v62 = vadd.f32 %v2117_v56, %v1283_v41 }
 0x14e   :  { %v2057_v63 = vpop.f32.mrb[44].mxu0  ;;  %v2891_v0 = vadd.f32 %v2120_v61, %v1286_v43 }
 0x14f   :  { %v2058_v1 = vpop.f32.mrb[45].mxu0  ;;  %v2121_v2 = vpop.f32.mrb[44].mxu1 }
 0x150   :  { %v2059_v4 = vadd.f32 %v2058_v1, %v2057_v63  ;;  %v2060_v8 = vpop.f32.mrb[46].mxu0  ;;  %v2122_v9 = vpop.f32.mrb[45].mxu1 }
 0x151   :  { %v2061_v10 = vpop.f32.mrb[47].mxu0  ;;  %v2123_v11 = vadd.f32 %v2122_v9, %v2121_v2  ;;  %v2124_v12 = vpop.f32.mrb[46].mxu1 }
 0x152   :  { %v1291_v55 = vadd.f32 %v2059_v4, %v2855_v5  ;;  %v2062_v13 = vadd.f32 %v2061_v10, %v2060_v8  ;;  %v2125_v14 = vpop.f32.mrb[47].mxu1 }
 0x153   :  { %v2126_v15 = vadd.f32 %v2125_v14, %v2124_v12 }
 0x154   :  { %v1294_v57 = vadd.f32 %v2062_v13, %v2857_v7  ;;  %v2895_v16 = vadd.f32 %v2123_v11, %v1291_v55 }
 0x156   :  { %v2063_v17 = vpop.f32.mrb[48].mxu0  ;;  %v2897_v18 = vadd.f32 %v2126_v15, %v1294_v57 }
 0x157   :  { %v2064_v20 = vpop.f32.mrb[49].mxu0  ;;  %v2127_v22 = vpop.f32.mrb[48].mxu1 }
 0x158   :  { %v2065_v23 = vadd.f32 %v2064_v20, %v2063_v17  ;;  %v2066_v25 = vpop.f32.mrb[50].mxu0  ;;  %v2128_v28 = vpop.f32.mrb[49].mxu1 }
 0x159   :  { %v2067_v30 = vpop.f32.mrb[51].mxu0  ;;  %v2129_v31 = vadd.f32 %v2128_v28, %v2127_v22  ;;  %v2130_v32 = vpop.f32.mrb[50].mxu1 }
 0x15a   :  { %v1299_v5 = vadd.f32 %v2065_v23, %v2859_v19  ;;  %v2068_v33 = vadd.f32 %v2067_v30, %v2066_v25  ;;  %v2131_v34 = vpop.f32.mrb[51].mxu1 }
 0x15b   :  { %v2132_v36 = vadd.f32 %v2131_v34, %v2130_v32 }
 0x15c   :  { %v1302_v7 = vadd.f32 %v2068_v33, %v2861_v21  ;;  %v1396_v38 = vadd.f32 %v2129_v31, %v1299_v5 }
 0x15e   :  { %v2069_v27 = vpop.f32.mrb[52].mxu0  ;;  %v2901_v39 = vadd.f32 %v2132_v36, %v1302_v7 }
 0x15f   :  { %v2070_v40 = vpop.f32.mrb[53].mxu0  ;;  %v2133_v42 = vpop.f32.mrb[52].mxu1 }
 0x160   :  { %v2071_v29 = vadd.f32 %v2070_v40, %v2069_v27  ;;  %v2072_v45 = vpop.f32.mrb[54].mxu0  ;;  %v2134_v47 = vpop.f32.mrb[53].mxu1 }
 0x161   :  { %v2073_v48 = vpop.f32.mrb[55].mxu0  ;;  %v2135_v49 = vadd.f32 %v2134_v47, %v2133_v42  ;;  %v2136_v50 = vpop.f32.mrb[54].mxu1 }
 0x162   :  { %v1307_v52 = vadd.f32 %v2071_v29, %v2863_v35  ;;  %v2074_v19 = vadd.f32 %v2073_v48, %v2072_v45  ;;  %v2137_v54 = vpop.f32.mrb[55].mxu1 }
 0x163   :  { %v2138_v56 = vadd.f32 %v2137_v54, %v2136_v50 }
 0x164   :  { %v1310_v58 = vadd.f32 %v2074_v19, %v2865_v37  ;;  %v1404_v21 = vadd.f32 %v2135_v49, %v1307_v52 }
 0x166   :  { %v2075_v41 = vpop.f32.mrb[56].mxu0  ;;  %v1407_v59 = vadd.f32 %v2138_v56, %v1310_v58 }
 0x167   :  { %v2076_v60 = vpop.f32.mrb[57].mxu0  ;;  %v2139_v61 = vpop.f32.mrb[56].mxu1 }
 0x168   :  { %v2077_v43 = vadd.f32 %v2076_v60, %v2075_v41  ;;  %v2078_v63 = vpop.f32.mrb[58].mxu0  ;;  %v2140_v1 = vpop.f32.mrb[57].mxu1 }
 0x169   :  { %v2079_v2 = vpop.f32.mrb[59].mxu0  ;;  %v2141_v4 = vadd.f32 %v2140_v1, %v2139_v61  ;;  %v2142_v8 = vpop.f32.mrb[58].mxu1 }
 0x16a   :  { %v1315_v9 = vadd.f32 %v2077_v43, %v2867_v51  ;;  %v2080_v10 = vadd.f32 %v2079_v2, %v2078_v63  ;;  %v2143_v35 = vpop.f32.mrb[59].mxu1 }
 0x16b   :  { %v2144_v11 = vadd.f32 %v2143_v35, %v2142_v8 }
 0x16c   :  { %v1318_v12 = vadd.f32 %v2080_v10, %v2869_v53  ;;  %v1412_v55 = vadd.f32 %v2141_v4, %v1315_v9 }
 0x16e   :  { %v2081_v37 = vpop.f32.mrb[60].mxu0  ;;  %v2907_v13 = vadd.f32 %v2144_v11, %v1318_v12 }
 0x16f   :  { %v2082_v14 = vpop.f32.mrb[61].mxu0  ;;  %v2145_v15 = vpop.f32.mrb[60].mxu1 }
 0x170   :  { %v2083_v57 = vadd.f32 %v2082_v14, %v2081_v37  ;;  %v2084_v17 = vpop.f32.mrb[62].mxu0  ;;  %v2146_v20 = vpop.f32.mrb[61].mxu1 }
 0x171   :  { %v2085_v22 = vpop.f32.mrb[63].mxu0  ;;  %v2147_v23 = vadd.f32 %v2146_v20, %v2145_v15  ;;  %v2148_v25 = vpop.f32.mrb[62].mxu1 }
 0x172   :  { %v1323_v28 = vadd.f32 %v2083_v57, %v2871_v3  ;;  %v2086_v51 = vadd.f32 %v2085_v22, %v2084_v17  ;;  %v2149_v30 = vpop.f32.mrb[63].mxu1 }
 0x173   :  { %v2150_v31 = vadd.f32 %v2149_v30, %v2148_v25 }
 0x174   :  { %v1326_v32 = vadd.f32 %v2086_v51, %v2873_v6  ;;  %v1420_v53 = vadd.f32 %v2147_v23, %v1323_v28 }
 0x176   :  { %v2185_v5 = vpop.f32.mrb[64].mxu0  ;;  %v1423_v33 = vadd.f32 %v2150_v31, %v1326_v32 }
 0x177   :  { %v1469_v34 = vadd.f32 %v2185_v5, %v2883_v44  ;;  %v2193_v36 = vpop.f32.mrb[64].mxu1  ;;  %v1460_v7 = vpop.f32.mrb[65].mxu0 }
 0x178   :  { %v2912_v27 = vadd.f32 %v2193_v36, %v1404_v21  ;;  %v1461_v40 = vadd.f32 %v1460_v7, %v2877_v24  ;;  %v1492_v42 = vpop.f32.mrb[65].mxu1  ;;  %v2186_v29 = vpop.f32.mrb[66].mxu0 }
 0x179   :  { %v2915_v45 = vadd.f32 %v1492_v42, %v1396_v38  ;;  %v1472_v3 = vadd.f32 %v2186_v29, %v2885_v46  ;;  %v2194_v47 = vpop.f32.mrb[66].mxu1  ;;  %v1463_v48 = vpop.f32.mrb[67].mxu0  ;;  %v1626_v58 = vmul.f32 %v1469_v34, %v1469_v34 }
 0x17a   :  { %v2918_v6 = vadd.f32 %v2194_v47, %v1407_v59  ;;  %v1464_v49 = vadd.f32 %v1463_v48, %v2879_v26  ;;  %v1495_v50 = vpop.f32.mrb[67].mxu1  ;;  %v1624_v56 = vmul.f32 %v1461_v40, %v1461_v40  ;;  %v1634_v7 = vmul.f32 %v2912_v27, %v2912_v27 }
 0x17b   :  { %v1856_v44 = vpack.c.bf16 %v1472_v3, %v1469_v34  ;;  %v1496_v52 = vadd.f32 %v1495_v50, %v2901_v39  ;;  %v1627_v4 = vmul.f32 %v1472_v3, %v1472_v3  ;;  %v1632_v32 = vmul.f32 %v2915_v45, %v2915_v45 }
 0x17c   :  { %v1876_v19 = vpack.c.bf16 %v2918_v6, %v2912_v27  ;;  %v1851_v24 = vpack.c.bf16 %v1464_v49, %v1461_v40  ;;  %v1603_v54 = vadd.f32 %v1464_v49, %v1461_v40  ;;  %v1625_v46 = vmul.f32 %v1464_v49, %v1464_v49 }
 0x17d   :  { %1888 = vst [vmem:[%s2968_s2 + $0x8] sm:$0xff] %v1856_v44   ;;  %v1871_v38 = vpack.c.bf16 %v1496_v52, %v2915_v45  ;;  %v1635_v29 = vmul.f32 %v2918_v6, %v2918_v6 }
 0x17e   :  { %1892 = vst [vmem:[%s2968_s2 + $0x28] sm:$0xff] %v1876_v19   ;;  %1852 = vst [vmem:[%s2968_s2] sm:$0xff] %v1851_v24   ;;  %v1604_v26 = vadd.f32 %v1603_v54, %v1469_v34  ;;  %v2189_v39 = vpop.f32.mrb[68].mxu0  ;;  %v1640_v21 = vadd.f32 %v1625_v46, %v1624_v56 }
 0x17f   :  { %1891 = vst [vmem:[%s2968_s2 + $0x20] sm:$0xff] %v1871_v38   ;;  %v1485_v41 = vadd.f32 %v2189_v39, %v2895_v16  ;;  %v2197_v59 = vpop.f32.mrb[68].mxu1  ;;  %v1476_v60 = vpop.f32.mrb[69].mxu0 }
 0x180   :  { %v1517_v61 = vadd.f32 %v2197_v59, %v1420_v53  ;;  %v1477_v43 = vadd.f32 %v1476_v60, %v2889_v62  ;;  %v1605_v63 = vadd.f32 %v1604_v26, %v1472_v3  ;;  %v1508_v1 = vpop.f32.mrb[69].mxu1  ;;  %v2190_v2 = vpop.f32.mrb[70].mxu0  ;;  %v1641_v8 = vadd.f32 %v1640_v21, %v1626_v58 }
 0x181   :  { %v1509_v9 = vadd.f32 %v1508_v1, %v1412_v55  ;;  %v1488_v10 = vadd.f32 %v2190_v2, %v2897_v18  ;;  %v2198_v35 = vpop.f32.mrb[70].mxu1  ;;  %v1479_v11 = vpop.f32.mrb[71].mxu0  ;;  %v1630_v28 = vmul.f32 %v1485_v41, %v1485_v41 }
 0x182   :  { %v1606_v12 = vadd.f32 %v1605_v63, %v1477_v43  ;;  %v1628_v37 = vmul.f32 %v1477_v43, %v1477_v43  ;;  %v1520_v14 = vadd.f32 %v2198_v35, %v1423_v33  ;;  %v1511_v15 = vpop.f32.mrb[71].mxu1  ;;  %v1642_v16 = vadd.f32 %v1641_v8, %v1627_v4 }
 0x183   :  { %v1866_v57 = vpack.c.bf16 %v1488_v10, %v1485_v41  ;;  %v1480_v20 = vadd.f32 %v1479_v11, %v2891_v0  ;;  %v1512_v62 = vadd.f32 %v1511_v15, %v2907_v13  ;;  %v1631_v51 = vmul.f32 %v1488_v10, %v1488_v10 }
 0x184   :  { %v1886_v17 = vpack.c.bf16 %v1520_v14, %v1517_v61  ;;  %v1643_v22 = vadd.f32 %v1642_v16, %v1628_v37  ;;  %v1633_v33 = vmul.f32 %v1496_v52, %v1496_v52  ;;  %v1636_v48 = vmul.f32 %v1509_v9, %v1509_v9 }
 0x185   :  { %1890 = vst [vmem:[%s2968_s2 + $0x18] sm:$0xff] %v1866_v57   ;;  %v1861_v18 = vpack.c.bf16 %v1480_v20, %v1477_v43  ;;  %v1607_v55 = vadd.f32 %v1606_v12, %v1480_v20  ;;  %v1629_v23 = vmul.f32 %v1480_v20, %v1480_v20  ;;  %v1881_v25 = vpack.c.bf16 %v1512_v62, %v1509_v9 }
 0x186   :  { %1894 = vst [vmem:[%s2968_s2 + $0x38] sm:$0xff] %v1886_v17   ;;  %v1637_v44 = vmul.f32 %v1512_v62, %v1512_v62  ;;  %v1638_v24 = vmul.f32 %v1517_v61, %v1517_v61  ;;  %v1639_v56 = vmul.f32 %v1520_v14, %v1520_v14 }
 0x187   :  { %1889 = vst [vmem:[%s2968_s2 + $0x10] sm:$0xff] %v1861_v18   ;;  %v1608_v0 = vadd.f32 %v1607_v55, %v1485_v41  ;;  %v1644_v13 = vadd.f32 %v1643_v22, %v1629_v23  ;;  %1893 = vst [vmem:[%s2968_s2 + $0x30] sm:$0xff] %v1881_v25  }
 0x189   :  { %v1609_v30 = vadd.f32 %v1608_v0, %v1488_v10  ;;  %v1645_v31 = vadd.f32 %v1644_v13, %v1630_v28 }
 0x18b   :  { %v1610_v53 = vadd.f32 %v1609_v30, %v2915_v45  ;;  %v1646_v5 = vadd.f32 %v1645_v31, %v1631_v51 }
 0x18d   :  { %v1647_v34 = vadd.f32 %v1646_v5, %v1632_v32  ;;  %v1611_v36 = vadd.f32 %v1610_v53, %v1496_v52 }
 0x18f   :  { %v1612_v40 = vadd.f32 %v1611_v36, %v2912_v27  ;;  %v1648_v42 = vadd.f32 %v1647_v34, %v1633_v33 }
 0x191   :  { %v1613_v3 = vadd.f32 %v1612_v40, %v2918_v6  ;;  %v1649_v47 = vadd.f32 %v1648_v42, %v1634_v7 }
 0x193   :  { %v1614_v49 = vadd.f32 %v1613_v3, %v1509_v9  ;;  %v1650_v50 = vadd.f32 %v1649_v47, %v1635_v29 }
 0x195   :  { %v1615_v45 = vadd.f32 %v1614_v49, %v1512_v62  ;;  %v1651_v19 = vadd.f32 %v1650_v50, %v1636_v48 }
 0x197   :  { %v1616_v52 = vadd.f32 %v1615_v45, %v1517_v61  ;;  %v1652_v54 = vadd.f32 %v1651_v19, %v1637_v44 }
 0x199   :  { %v1617_v46 = vadd.f32 %v1616_v52, %v1520_v14  ;;  %v1653_v38 = vadd.f32 %v1652_v54, %v1638_v24 }
 0x19b   :  { %v1618_v27 = vrot.slane %v1617_v46, 4  ;;  %v1654_v26 = vadd.f32 %v1653_v38, %v1639_v56 }
 0x19d   :  { %v1619_v39 = vadd.f32 %v1618_v27, %v1617_v46  ;;  %v1655_v58 = vrot.slane %v1654_v26, 4 }
 0x19f   :  { %v1620_v21 = vrot.slane %v1619_v39, 2  ;;  %v1656_v41 = vadd.f32 %v1655_v58, %v1654_v26 }
 0x1a1   :  { %v1621_v6 = vadd.f32 %v1620_v21, %v1619_v39  ;;  %v1657_v59 = vrot.slane %v1656_v41, 2 }
 0x1a3   :  { %v1622_v60 = vrot.slane %v1621_v6, 1  ;;  %v1658_v43 = vadd.f32 %v1657_v59, %v1656_v41 }
 0x1a5   :  { %v1659_v63 = vrot.slane %v1658_v43, 1  ;;  %v1623_v1 = vadd.f32 %v1622_v60, %v1621_v6 }
 0x1a7   :  { %v1660_v2 = vadd.f32 %v1659_v63, %v1658_v43 }
 0x1a9   :  { %v1662_v4 = vsel %vm1661_vm0, %v1623_v1, %v1660_v2 }
 0x1aa   :  { %1663 = vst [vmem:[%s2969_s3] sm:$0x3] %v1662_v4 }

// kernel: transformer_forward.59
= control target key start
LH: loop header
LB: loop body
LE: loop exit
PB: predicated region body
PF: predicated region fallthrough
CT: control target
= control target key end

     0   :  { %s2649_s12 = smov 0   ;;  %s3028_s0 = inlined_call_operand.vmem [shape: bf16[512,576], index: 0, kind: input, shape index: {}]   ;;  %s3029_s1 = inlined_call_operand.vmem [shape: bf16[576,128], index: 1, kind: input, shape index: {}]   ;;  %s3030_s2 = inlined_call_operand.vmem [shape: bf16[512,128], index: 2, kind: output, shape index: {0}]   ;;  %s3031_s3 = inlined_call_operand.vmem [shape: f32[2,2,128], index: 3, kind: output, shape index: {1}]  }
   0x1 LB: > { %s2655_s13 = sadd.s32 4294967295, %s2627_s12   ;;  %p1865_p0 = scmp.ge.s32.totalorder %s2627_s12, 1  ;;  %s2627_s12 = sphi %s2649_s12, %s14_s12  }
   0x2   : > { %p142_p1 = scmp.lt.s32.totalorder %s2627_s12, 3 }
   0x4   : > { %p143_p2 = pnand %p1865_p0, %p142_p1 }
   0x5   : > { %v2473_v0 = vld [vmem:[%s3029_s1 + $0x40] sm:$0xff] (!%p143_p2)   ;;  %s1866_s16 = sshll.u32 (!%p143_p2), %s2655_s13, 5  ;;  %v2475_v2 = vld [vmem:[%s3029_s1 + $0x48] sm:$0xff] (!%p143_p2)   ;;  %v2477_v4 = vld [vmem:[%s3029_s1 + $0x50] sm:$0xff] (!%p143_p2)   ;;  %vm973_vm0 = vcmask (!%p143_p2), 523264   ;;  %p184_p4 = scmp.lt.s32.totalorder (!%p143_p2), %s2655_s13, 1 }
   0x6   : > { %146 = sbr.rel (%p143_p2) target bundleno = 430 (0x1ae), region = 28  ;;  %v2474_v1 = vld [vmem:[%s3029_s1] sm:$0xff] (!%p143_p2)   ;;  %2164 = vmatprep.subr.bf16.mxu0 (!%p143_p2), %v2473_v0  ;;  %2448 = vmatprep.subr.bf16.mxu1 (!%p143_p2), %v2473_v0  ;;  %p172_p3 = scmp.lt.s32.totalorder (!%p143_p2), %s1866_s16, 63  ;;  %v2476_v3 = vld [vmem:[%s3029_s1 + $0x8] sm:$0xff] (!%p143_p2)   ;;  %v2478_v5 = vld [vmem:[%s3029_s1 + $0x10] sm:$0xff] (!%p143_p2)   ;;  %vm1771_vm1 = vcmask (!%p143_p2), 1040384  }
   0x7   : > { %2165 = vmatpush3.bf16.msra.mxu0 (!%p143_p2), %v2474_v1  ;;  %2456 = vmatpush3.bf16.msra.mxu1 (!%p143_p2), %v2474_v1  ;;  %v2479_v6 = vld [vmem:[%s3029_s1 + $0x58] sm:$0xff] (!%p143_p2)   ;;  %v2481_v8 = vld [vmem:[%s3029_s1 + $0x60] sm:$0xff] (!%p143_p2)   ;;  %v2483_v10 = vld [vmem:[%s3029_s1 + $0x68] sm:$0xff] (!%p143_p2)  }
   0x8   : > { %2166 = vmatprep.subr.bf16.mxu0 (!%p143_p2), %v2475_v2  ;;  %2449 = vmatprep.subr.bf16.mxu1 (!%p143_p2), %v2475_v2  ;;  %v2480_v7 = vld [vmem:[%s3029_s1 + $0x18] sm:$0xff] (!%p143_p2)   ;;  %v2482_v9 = vld [vmem:[%s3029_s1 + $0x20] sm:$0xff] (!%p143_p2)   ;;  %v2484_v13 = vld [vmem:[%s3029_s1 + $0x28] sm:$0xff] (!%p143_p2)  }
   0x9   : > { %v2485_v14 = vld [vmem:[%s3029_s1 + $0x70] sm:$0xff] (!%p143_p2)   ;;  %v2487_v16 = vld [vmem:[%s3029_s1 + $0x78] sm:$0xff] (!%p143_p2)   ;;  %v2495_v18 = vld [vmem:[%s3029_s1 + $0xc0] sm:$0xff] (!%p143_p2)  }
   0xa   : > { %v2486_v15 = vld [vmem:[%s3029_s1 + $0x30] sm:$0xff] (!%p143_p2)   ;;  %v2488_v17 = vld [vmem:[%s3029_s1 + $0x38] sm:$0xff] (!%p143_p2)   ;;  %v2496_v19 = vld [vmem:[%s3029_s1 + $0x100] sm:$0xff] (!%p143_p2)  }
   0xb   : > { %2167 = vmatpush3.bf16.msra.mxu0 (!%p143_p2), %v2476_v3  ;;  %2457 = vmatpush3.bf16.msra.mxu1 (!%p143_p2), %v2476_v3  ;;  %v2497_v22 = vld [vmem:[%s3029_s1 + $0x80] sm:$0xff] (!%p143_p2)   ;;  %v2498_v23 = vld [vmem:[%s3029_s1 + $0xc8] sm:$0xff] (!%p143_p2)   ;;  %v2506_v28 = vld [vmem:[%s3029_s1 + $0xd0] sm:$0xff] (!%p143_p2)  }
   0xc   : > { %2168 = vmatprep.subr.bf16.mxu0 (!%p143_p2), %v2477_v4  ;;  %2450 = vmatprep.subr.bf16.mxu1 (!%p143_p2), %v2477_v4  ;;  %v2499_v26 = vld [vmem:[%s3029_s1 + $0x88] sm:$0xff] (!%p143_p2)   ;;  %v2507_v30 = vld [vmem:[%s3029_s1 + $0x90] sm:$0xff] (!%p143_p2)   ;;  %v2508_v31 = vld [vmem:[%s3029_s1 + $0xd8] sm:$0xff] (!%p143_p2)  }
   0xd   : > { %s3033_s16 = smov (!%p172_p3, %s1866_s16), 63  ;;  %v2527_v34 = vld [vmem:[%s3029_s1 + $0x108] sm:$0xff]   ;;  %v2509_v35 = vld [vmem:[%s3029_s1 + $0x98] sm:$0xff]   ;;  %v2516_v37 = vld [vmem:[%s3029_s1 + $0xe0] sm:$0xff]   ;;  %s3035_s13 = smov (!%p184_p4, %s2655_s13), 1 }
   0xe   : > { %s2464_s29 = smul.u32 20, %s3033_s16  ;;  %v2517_v39 = vld [vmem:[%s3029_s1 + $0xa0] sm:$0xff]   ;;  %v2518_v40 = vld [vmem:[%s3029_s1 + $0xe8] sm:$0xff]   ;;  %v2526_v46 = vld [vmem:[%s3029_s1 + $0xf0] sm:$0xff]  }
   0xf   : > { %2169 = vmatpush3.bf16.msra.mxu0 %v2478_v5  ;;  %2458 = vmatpush3.bf16.msra.mxu1 %v2478_v5  ;;  %v2519_v43 = vld [vmem:[%s3029_s1 + $0xa8] sm:$0xff]   ;;  %v2549_v47 = vld [vmem:[%s3029_s1 + $0x110] sm:$0xff]   ;;  %v2529_v49 = vld [vmem:[%s3029_s1 + $0xf8] sm:$0xff]  }
  0x10   : > { %2170 = vmatprep.subr.bf16.mxu0 %v2479_v6  ;;  %2451 = vmatprep.subr.bf16.mxu1 %v2479_v6  ;;  %s2693_s9 = scalar_lea.vmem %s3028_s0, %s2464_s29  ;;  %v2528_v48 = vld [vmem:[%s3029_s1 + $0xb0] sm:$0xff]   ;;  %v2530_v52 = vld [vmem:[%s3029_s1 + $0xb8] sm:$0xff]  }
  0x11   : > { %v2491_v11 = vld [vmem:[%s2693_s9 + $0x4] ss:$20 sps:$4 sm:$0xff]   ;;  %v2489_v20 = vld [vmem:[%s2693_s9] ss:$20 sps:$4 sm:$0xff]   ;;  %v2504_v27 = vld [vmem:[%s2693_s9 + $0x28] ss:$20 sps:$4 sm:$0xff]  }
  0x12   : > { %v2494_v12 = vld [vmem:[%s2693_s9 + $0x1e4] ss:$20 sps:$4 sm:$0xff]   ;;  %1054 = vmatprep.mubr.bf16.mxu0 %v2491_v11  ;;  %v2492_v21 = vld [vmem:[%s2693_s9 + $0x1e0] ss:$20 sps:$4 sm:$0xff]   ;;  %v2505_v29 = vld [vmem:[%s2693_s9 + $0x208] ss:$20 sps:$4 sm:$0xff]  }
  0x13   : > { %2171 = vmatpush3.bf16.msra.mxu0 %v2480_v7  ;;  %2459 = vmatpush3.bf16.msra.mxu1 %v2480_v7  ;;  %v2500_v24 = vld [vmem:[%s2693_s9 + $0x2c] ss:$20 sps:$4 sm:$0xff]   ;;  %v2510_v32 = vld [vmem:[%s2693_s9 + $0x54] ss:$20 sps:$4 sm:$0xff]   ;;  %v2514_v36 = vld [vmem:[%s2693_s9 + $0x50] ss:$20 sps:$4 sm:$0xff]  }
  0x14   : > { %2172 = vmatprep.subr.bf16.mxu0 %v2481_v8  ;;  %2452 = vmatprep.subr.bf16.mxu1 %v2481_v8  ;;  %v2502_v25 = vld [vmem:[%s2693_s9 + $0x20c] ss:$20 sps:$4 sm:$0xff]   ;;  %v2512_v33 = vld [vmem:[%s2693_s9 + $0x234] ss:$20 sps:$4 sm:$0xff]   ;;  %v2515_v38 = vld [vmem:[%s2693_s9 + $0x230] ss:$20 sps:$4 sm:$0xff]  }
  0x15   : > { %1150 = vmatprep.mubr.bf16.mxu1 %v2494_v12  ;;  %v2520_v41 = vld [vmem:[%s2693_s9 + $0x7c] ss:$20 sps:$4 sm:$0xff]   ;;  %v2524_v44 = vld [vmem:[%s2693_s9 + $0x78] ss:$20 sps:$4 sm:$0xff]   ;;  %v2536_v54 = vld [vmem:[%s2693_s9 + $0xa0] ss:$20 sps:$4 sm:$0xff]  }
  0x16   : > { %v2522_v42 = vld [vmem:[%s2693_s9 + $0x25c] ss:$20 sps:$4 sm:$0xff]   ;;  %v2525_v45 = vld [vmem:[%s2693_s9 + $0x258] ss:$20 sps:$4 sm:$0xff]   ;;  %v2539_v57 = vld [vmem:[%s2693_s9 + $0x34] ss:$20 sps:$4 sm:$0xff]  }
  0x17   : > { %2173 = vmatpush3.bf16.msra.mxu0 %v2482_v9  ;;  %2460 = vmatpush3.bf16.msra.mxu1 %v2482_v9  ;;  %v2531_v50 = vld [vmem:[%s2693_s9 + $0xa4] ss:$20 sps:$4 sm:$0xff]   ;;  %v2535_v51 = vld [vmem:[%s2693_s9 + $0xc] ss:$20 sps:$4 sm:$0xff]   ;;  %v2533_v53 = vld [vmem:[%s2693_s9 + $0x8] ss:$20 sps:$4 sm:$0xff]  }
  0x18   : > { %2174 = vmatprep.subr.bf16.mxu0 %v2483_v10  ;;  %2453 = vmatprep.subr.bf16.mxu1 %v2483_v10  ;;  %v2537_v55 = vld [vmem:[%s2693_s9 + $0xcc] ss:$20 sps:$4 sm:$0xff]   ;;  %v2568_v56 = vld [vmem:[%s3029_s1 + $0x118] sm:$0xff]   ;;  %v2542_v59 = vld [vmem:[%s2693_s9 + $0x30] ss:$20 sps:$4 sm:$0xff]  }
  0x19   : > { %v2541_v58 = vld [vmem:[%s2693_s9 + $0xc8] ss:$20 sps:$4 sm:$0xff]   ;;  %v2547_v62 = vld [vmem:[%s2693_s9 + $0xf0] ss:$20 sps:$4 sm:$0xff]   ;;  %v2548_v63 = vld [vmem:[%s2693_s9 + $0x58] ss:$20 sps:$4 sm:$0xff]  }
  0x1a   : > { %v2543_v60 = vld [vmem:[%s2693_s9 + $0xf4] ss:$20 sps:$4 sm:$0xff]   ;;  %v2545_v61 = vld [vmem:[%s2693_s9 + $0x5c] ss:$20 sps:$4 sm:$0xff]   ;;  %v2552_v1 = vld [vmem:[%s2693_s9 + $0x84] ss:$20 sps:$4 sm:$0xff]  }
  0x1b   : > { %2175 = vmatpush3.bf16.msra.mxu0 %v2484_v13  ;;  %2461 = vmatpush3.bf16.msra.mxu1 %v2484_v13  ;;  %v2550_v0 = vld [vmem:[%s2693_s9 + $0x11c] ss:$20 sps:$4 sm:$0xff]   ;;  %v2554_v2 = vld [vmem:[%s2693_s9 + $0x118] ss:$20 sps:$4 sm:$0xff]   ;;  %v2555_v3 = vld [vmem:[%s2693_s9 + $0x80] ss:$20 sps:$4 sm:$0xff]  }
  0x1c   : > { %2176 = vmatprep.subr.bf16.mxu0 %v2485_v14  ;;  %2454 = vmatprep.subr.bf16.mxu1 %v2485_v14  ;;  %v2556_v4 = vld [vmem:[%s2693_s9 + $0x144] ss:$20 sps:$4 sm:$0xff]   ;;  %v2558_v5 = vld [vmem:[%s2693_s9 + $0xac] ss:$20 sps:$4 sm:$0xff]   ;;  %v2561_v7 = vld [vmem:[%s2693_s9 + $0xa8] ss:$20 sps:$4 sm:$0xff]  }
  0x1d   : > { %v2560_v6 = vld [vmem:[%s2693_s9 + $0x140] ss:$20 sps:$4 sm:$0xff]   ;;  %v2566_v10 = vld [vmem:[%s2693_s9 + $0x168] ss:$20 sps:$4 sm:$0xff]   ;;  %v2567_v11 = vld [vmem:[%s2693_s9 + $0xd0] ss:$20 sps:$4 sm:$0xff]  }
  0x1e   : > { %v2562_v8 = vld [vmem:[%s2693_s9 + $0x16c] ss:$20 sps:$4 sm:$0xff]   ;;  %v2564_v9 = vld [vmem:[%s2693_s9 + $0xd4] ss:$20 sps:$4 sm:$0xff]   ;;  %v2571_v13 = vld [vmem:[%s2693_s9 + $0xfc] ss:$20 sps:$4 sm:$0xff]  }
  0x1f   : > { %2177 = vmatpush3.bf16.msra.mxu0 %v2486_v15  ;;  %2462 = vmatpush3.bf16.msra.mxu1 %v2486_v15  ;;  %v2569_v12 = vld [vmem:[%s2693_s9 + $0x194] ss:$20 sps:$4 sm:$0xff]   ;;  %v2573_v14 = vld [vmem:[%s2693_s9 + $0x190] ss:$20 sps:$4 sm:$0xff]   ;;  %v2574_v15 = vld [vmem:[%s2693_s9 + $0xf8] ss:$20 sps:$4 sm:$0xff]  }
  0x20   : > { %2178 = vmatprep.subr.bf16.mxu0 %v2487_v16  ;;  %2455 = vmatprep.subr.bf16.mxu1 %v2487_v16  ;;  %v2575_v16 = vld [vmem:[%s2693_s9 + $0x1bc] ss:$20 sps:$4 sm:$0xff]  }
  0x23   : > { %2179 = vmatpush3.bf16.msra.mxu0 %v2488_v17  ;;  %2463 = vmatpush3.bf16.msra.mxu1 %v2488_v17  ;;  %v2577_v17 = vld [vmem:[%s2693_s9 + $0x124] ss:$20 sps:$4 sm:$0xff]  }
  0x24   : > { %2276 = vmatprep.subr.bf16.mxu1 %v2495_v18  ;;  %2408 = vmatprep.subr.bf16.mxu0 %v2496_v19  ;;  %v2579_v18 = vld [vmem:[%s2693_s9 + $0x1b8] ss:$20 sps:$4 sm:$0xff]  }
  0x26   : > { %1055 = vmatmul.mubr.bf16.vlgmr.msra.gmra.mrb[0].mxu0 %v2489_v20  ;;  %1151 = vmatmul.mubr.bf16.vlgmr.msra.gmra.mrb[0].mxu1 %v2492_v21  ;;  %v2581_v20 = vld [vmem:[%s2693_s9 + $0x14c] ss:$20 sps:$4 sm:$0xff]   ;;  %v2583_v21 = vld [vmem:[%s2693_s9 + $0x10] ss:$20 sps:$4 sm:$0xff]  }
  0x27   : > { %2277 = vmatpush3.bf16.msra.mxu1 %v2497_v22  ;;  %2409 = vmatpush3.bf16.msra.mxu0 %v2496_v19  ;;  %v2580_v19 = vld [vmem:[%s2693_s9 + $0x120] ss:$20 sps:$4 sm:$0xff]   ;;  %v2584_v22 = vld [vmem:[%s2693_s9 + $0x148] ss:$20 sps:$4 sm:$0xff]  }
  0x28   : > { %2278 = vmatprep.subr.bf16.mxu1 %v2498_v23  ;;  %1062 = vmatprep.mubr.bf16.mxu0 %v2500_v24  ;;  %v2585_v23 = vld [vmem:[%s2693_s9 + $0x38] ss:$20 sps:$4 sm:$0xff]   ;;  %v2586_v24 = vld [vmem:[%s2693_s9 + $0x174] ss:$20 sps:$4 sm:$0xff]  }
  0x29   : > { %1158 = vmatprep.mubr.bf16.mxu1 %v2502_v25  ;;  %2410 = vmatprep.subr.bf16.mxu0 %v2527_v34  ;;  %v2588_v25 = vld [vmem:[%s2693_s9 + $0x60] ss:$20 sps:$4 sm:$0xff]  }
  0x2b   : > { %2279 = vmatpush3.bf16.msra.mxu1 %v2499_v26  ;;  %2411 = vmatpush3.bf16.msra.mxu0 %v2527_v34  ;;  %v2589_v26 = vld [vmem:[%s2693_s9 + $0x170] ss:$20 sps:$4 sm:$0xff]   ;;  %v2599_v34 = vld [vmem:[%s2693_s9 + $0x1c0] ss:$20 sps:$4 sm:$0xff]  }
  0x2c   : > { %2280 = vmatprep.subr.bf16.mxu1 %v2506_v28  ;;  %2412 = vmatprep.subr.bf16.mxu0 %v2549_v47  ;;  %v2591_v28 = vld [vmem:[%s2693_s9 + $0x19c] ss:$20 sps:$4 sm:$0xff]  }
  0x2e   : > { %1063 = vmatmul.mubr.bf16.gmra.mrb[4].mxu0 %v2504_v27  ;;  %1159 = vmatmul.mubr.bf16.gmra.mrb[4].mxu1 %v2505_v29  ;;  %v2590_v27 = vld [vmem:[%s2693_s9 + $0x88] ss:$20 sps:$4 sm:$0xff]   ;;  %v2593_v29 = vld [vmem:[%s2693_s9 + $0xb0] ss:$20 sps:$4 sm:$0xff]  }
  0x2f   : > { %2281 = vmatpush3.bf16.msra.mxu1 %v2507_v30  ;;  %1070 = vmatprep.mubr.bf16.mxu0 %v2510_v32  ;;  %v2594_v30 = vld [vmem:[%s2693_s9 + $0x198] ss:$20 sps:$4 sm:$0xff]  }
  0x30   : > { %2282 = vmatprep.subr.bf16.mxu1 %v2508_v31  ;;  %1166 = vmatprep.mubr.bf16.mxu1 %v2512_v33  ;;  %v2595_v31 = vld [vmem:[%s2693_s9 + $0xd8] ss:$20 sps:$4 sm:$0xff]   ;;  %v2598_v33 = vld [vmem:[%s2693_s9 + $0x100] ss:$20 sps:$4 sm:$0xff]  }
  0x31   : > { %2413 = vmatpush3.bf16.msra.mxu0 %v2549_v47  ;;  %v2596_v32 = vld [vmem:[%s2693_s9 + $0x1c4] ss:$20 sps:$4 sm:$0xff]  }
  0x32   : > { %2414 = vmatprep.subr.bf16.mxu0 %v2568_v56  ;;  %v2615_v47 = vld [vmem:[%s2693_s9 + $0x218] ss:$20 sps:$4 sm:$0xff]  }
  0x33   : > { %2283 = vmatpush3.bf16.msra.mxu1 %v2509_v35  ;;  %v2600_v35 = vld [vmem:[%s2693_s9 + $0x128] ss:$20 sps:$4 sm:$0xff]  }
  0x34   : > { %2284 = vmatprep.subr.bf16.mxu1 %v2516_v37  ;;  %v2603_v37 = vld [vmem:[%s2693_s9 + $0x150] ss:$20 sps:$4 sm:$0xff]  }
  0x35   : > { %2415 = vmatpush3.bf16.msra.mxu0 %v2568_v56 }
  0x36   : > { %1071 = vmatmul.mubr.bf16.gmra.mrb[8].mxu0 %v2514_v36  ;;  %1167 = vmatmul.mubr.bf16.gmra.mrb[8].mxu1 %v2515_v38  ;;  %v2601_v36 = vld [vmem:[%s2693_s9 + $0x1ec] ss:$20 sps:$4 sm:$0xff]   ;;  %v2604_v38 = vld [vmem:[%s2693_s9 + $0x1e8] ss:$20 sps:$4 sm:$0xff]  }
  0x37   : > { %2285 = vmatpush3.bf16.msra.mxu1 %v2517_v39  ;;  %1078 = vmatprep.mubr.bf16.mxu0 %v2520_v41  ;;  %v2605_v39 = vld [vmem:[%s2693_s9 + $0x178] ss:$20 sps:$4 sm:$0xff]   ;;  %v2608_v41 = vld [vmem:[%s2693_s9 + $0x1a0] ss:$20 sps:$4 sm:$0xff]  }
  0x38   : > { %2286 = vmatprep.subr.bf16.mxu1 %v2518_v40  ;;  %1174 = vmatprep.mubr.bf16.mxu1 %v2522_v42  ;;  %v2606_v40 = vld [vmem:[%s2693_s9 + $0x214] ss:$20 sps:$4 sm:$0xff]   ;;  %v2609_v42 = vld [vmem:[%s2693_s9 + $0x210] ss:$20 sps:$4 sm:$0xff]  }
  0x3b   : > { %2287 = vmatpush3.bf16.msra.mxu1 %v2519_v43  ;;  %v2610_v43 = vld [vmem:[%s2693_s9 + $0x1c8] ss:$20 sps:$4 sm:$0xff]  }
  0x3c   : > { %2288 = vmatprep.subr.bf16.mxu1 %v2526_v46  ;;  %v2614_v46 = vld [vmem:[%s2693_s9 + $0x238] ss:$20 sps:$4 sm:$0xff]  }
  0x3e   : > { %1079 = vmatmul.mubr.bf16.gmra.mrb[12].mxu0 %v2524_v44  ;;  %1175 = vmatmul.mubr.bf16.gmra.mrb[12].mxu1 %v2525_v45  ;;  %v2611_v44 = vld [vmem:[%s2693_s9 + $0x23c] ss:$20 sps:$4 sm:$0xff]  }
  0x3f   : > { %2289 = vmatpush3.bf16.msra.mxu1 %v2528_v48  ;;  %1086 = vmatprep.mubr.bf16.mxu0 %v2531_v50  ;;  %v2613_v45 = vld [vmem:[%s2693_s9 + $0x1f0] ss:$20 sps:$4 sm:$0xff]   ;;  %v2619_v50 = vld [vmem:[%s2693_s9 + $0x260] ss:$20 sps:$4 sm:$0xff]  }
  0x40   : > { %2290 = vmatprep.subr.bf16.mxu1 %v2529_v49  ;;  %1215 = vmatprep.mubr.bf16.mxu1 %v2535_v51  ;;  %v2616_v48 = vld [vmem:[%s2693_s9 + $0x264] ss:$20 sps:$4 sm:$0xff]   ;;  %v2618_v49 = vld [vmem:[%s2693_s9 + $0x240] ss:$20 sps:$4 sm:$0xff]   ;;  %v2620_v51 = vld [vmem:[%s2693_s9 + $0x268] ss:$20 sps:$4 sm:$0xff]  }
  0x41   : > { %s1869_s9 = sshll.u32 %s3033_s16, 2  ;;  %s1870_s16 = sshll.u32 %s3035_s13, 1 }
  0x42   : > { %s2955_s23 = scalar_lea.vmem %s3030_s2, %s1869_s9  ;;  %s187_s26 = scalar_lea.vmem %s3031_s3, %s1870_s16 }
  0x43   : > { %2291 = vmatpush3.bf16.msra.mxu1 %v2530_v52 }
  0x46   : > { %1087 = vmatmul.mubr.bf16.gmra.mrb[16].mxu0 %v2536_v54  ;;  %1216 = vmatmul.mubr.bf16.vlgmr.msra.gmra.mrb[16].mxu1 %v2533_v53 }
  0x47   : > { %1094 = vmatprep.mubr.bf16.mxu0 %v2537_v55  ;;  %1223 = vmatprep.mubr.bf16.mxu1 %v2539_v57 }
  0x4e   : > { %1095 = vmatmul.mubr.bf16.gmra.mrb[20].mxu0 %v2541_v58  ;;  %1224 = vmatmul.mubr.bf16.gmra.mrb[20].mxu1 %v2542_v59 }
  0x4f   : > { %1102 = vmatprep.mubr.bf16.mxu0 %v2543_v60  ;;  %1231 = vmatprep.mubr.bf16.mxu1 %v2545_v61 }
  0x56   : > { %1103 = vmatmul.mubr.bf16.gmra.mrb[24].mxu0 %v2547_v62  ;;  %1232 = vmatmul.mubr.bf16.gmra.mrb[24].mxu1 %v2548_v63 }
  0x57   : > { %1110 = vmatprep.mubr.bf16.mxu0 %v2550_v0  ;;  %1239 = vmatprep.mubr.bf16.mxu1 %v2552_v1 }
  0x5e   : > { %1111 = vmatmul.mubr.bf16.gmra.mrb[28].mxu0 %v2554_v2  ;;  %1240 = vmatmul.mubr.bf16.gmra.mrb[28].mxu1 %v2555_v3 }
  0x5f   : > { %1118 = vmatprep.mubr.bf16.mxu0 %v2556_v4  ;;  %1247 = vmatprep.mubr.bf16.mxu1 %v2558_v5 }
  0x66   : > { %1119 = vmatmul.mubr.bf16.gmra.mrb[32].mxu0 %v2560_v6  ;;  %1248 = vmatmul.mubr.bf16.gmra.mrb[32].mxu1 %v2561_v7 }
  0x67   : > { %1126 = vmatprep.mubr.bf16.mxu0 %v2562_v8  ;;  %1255 = vmatprep.mubr.bf16.mxu1 %v2564_v9 }
  0x6e   : > { %1127 = vmatmul.mubr.bf16.gmra.mrb[36].mxu0 %v2566_v10  ;;  %1256 = vmatmul.mubr.bf16.gmra.mrb[36].mxu1 %v2567_v11 }
  0x6f   : > { %1134 = vmatprep.mubr.bf16.mxu0 %v2569_v12  ;;  %1263 = vmatprep.mubr.bf16.mxu1 %v2571_v13 }
  0x76   : > { %1135 = vmatmul.mubr.bf16.gmra.mrb[40].mxu0 %v2573_v14  ;;  %1264 = vmatmul.mubr.bf16.gmra.mrb[40].mxu1 %v2574_v15 }
  0x77   : > { %1142 = vmatprep.mubr.bf16.mxu0 %v2575_v16  ;;  %1271 = vmatprep.mubr.bf16.mxu1 %v2577_v17 }
  0x7e   : > { %1143 = vmatmul.mubr.bf16.gmra.mrb[44].mxu0 %v2579_v18  ;;  %1272 = vmatmul.mubr.bf16.gmra.mrb[44].mxu1 %v2580_v19 }
  0x7f   : > { %1279 = vmatprep.mubr.bf16.mxu1 %v2581_v20  ;;  %2416 = vmatprep.mubr.msk.bf16.mxu0 %vm973_vm0, %v2583_v21 }
  0x86   : > { %1280 = vmatmul.mubr.bf16.gmra.mrb[48].mxu1 %v2584_v22  ;;  %2417 = vmatmul.mubr.msk.bf16.vlgmr.msra.gmra.mrb[48].mxu0 %vm973_vm0, %v2585_v23 }
  0x87   : > { %1287 = vmatprep.mubr.bf16.mxu1 %v2586_v24  ;;  %2420 = vmatprep.mubr.msk.bf16.mxu0 %vm973_vm0, %v2588_v25 }
  0x8e   : > { %1288 = vmatmul.mubr.bf16.gmra.mrb[52].mxu1 %v2589_v26  ;;  %2421 = vmatmul.mubr.msk.bf16.gmra.mrb[52].mxu0 %vm973_vm0, %v2590_v27 }
  0x8f   : > { %1295 = vmatprep.mubr.bf16.mxu1 %v2591_v28  ;;  %2424 = vmatprep.mubr.msk.bf16.mxu0 %vm973_vm0, %v2593_v29 }
  0x96   : > { %1296 = vmatmul.mubr.bf16.gmra.mrb[56].mxu1 %v2594_v30  ;;  %2425 = vmatmul.mubr.msk.bf16.gmra.mrb[56].mxu0 %vm973_vm0, %v2595_v31 }
  0x97   : > { %1303 = vmatprep.mubr.bf16.mxu1 %v2596_v32  ;;  %2428 = vmatprep.mubr.msk.bf16.mxu0 %vm973_vm0, %v2598_v33 }
  0x9e   : > { %1304 = vmatmul.mubr.bf16.gmra.mrb[60].mxu1 %v2599_v34  ;;  %2429 = vmatmul.mubr.msk.bf16.gmra.mrb[60].mxu0 %vm973_vm0, %v2600_v35 }
  0x9f   : > { %1311 = vmatprep.mubr.bf16.mxu1 %v2601_v36  ;;  %2432 = vmatprep.mubr.msk.bf16.mxu0 %vm973_vm0, %v2603_v37 }
  0xa6   : > { %1312 = vmatmul.mubr.bf16.gmra.mrb[64].mxu1 %v2604_v38  ;;  %2433 = vmatmul.mubr.msk.bf16.gmra.mrb[64].mxu0 %vm973_vm0, %v2605_v39 }
  0xa7   : > { %1319 = vmatprep.mubr.bf16.mxu1 %v2606_v40  ;;  %2436 = vmatprep.mubr.msk.bf16.mxu0 %vm973_vm0, %v2608_v41 }
  0xae   : > { %1320 = vmatmul.mubr.bf16.gmra.mrb[68].mxu1 %v2609_v42  ;;  %2437 = vmatmul.mubr.msk.bf16.gmra.mrb[68].mxu0 %vm973_vm0, %v2610_v43 }
  0xaf   : > { %1327 = vmatprep.mubr.bf16.mxu1 %v2611_v44  ;;  %2440 = vmatprep.mubr.msk.bf16.mxu0 %vm973_vm0, %v2613_v45 }
  0xb6   : > { %1328 = vmatmul.mubr.bf16.gmra.mrb[72].mxu1 %v2614_v46  ;;  %2441 = vmatmul.mubr.msk.bf16.gmra.mrb[72].mxu0 %vm973_vm0, %v2615_v47 }
  0xb7   : > { %1335 = vmatprep.mubr.bf16.mxu1 %v2616_v48  ;;  %2444 = vmatprep.mubr.msk.bf16.mxu0 %vm973_vm0, %v2618_v49 }
  0xbe   : > { %1336 = vmatmul.mubr.bf16.gmra.mrb[76].mxu1 %v2619_v50  ;;  %2445 = vmatmul.mubr.msk.bf16.gmra.mrb[76].mxu0 %vm973_vm0, %v2620_v51 }
  0xf9   : > { %v2180_v52 = vpop.f32.mrb[0].mxu0  ;;  %v2252_v53 = vpop.f32.mrb[0].mxu1 }
  0xfa   : > { %v2181_v54 = vpop.f32.mrb[1].mxu0  ;;  %v2253_v55 = vpop.f32.mrb[1].mxu1 }
  0xfb   : > { %v2182_v56 = vadd.f32 %v2181_v54, %v2180_v52  ;;  %v2872_v57 = vadd.f32 %v2253_v55, %v2252_v53  ;;  %v2183_v58 = vpop.f32.mrb[2].mxu0  ;;  %v2255_v59 = vpop.f32.mrb[2].mxu1 }
  0xfc   : > { %v2184_v60 = vpop.f32.mrb[3].mxu0  ;;  %v2256_v61 = vpop.f32.mrb[3].mxu1 }
  0xfd   : > { %v2185_v62 = vadd.f32 %v2184_v60, %v2183_v58  ;;  %v2874_v63 = vadd.f32 %v2256_v61, %v2255_v59 }
 0x101   : > { %v2186_v0 = vpop.f32.mrb[4].mxu0  ;;  %v2258_v1 = vpop.f32.mrb[4].mxu1 }
 0x102   : > { %v2187_v2 = vpop.f32.mrb[5].mxu0  ;;  %v2259_v3 = vpop.f32.mrb[5].mxu1 }
 0x103   : > { %v2188_v4 = vadd.f32 %v2187_v2, %v2186_v0  ;;  %v2876_v5 = vadd.f32 %v2259_v3, %v2258_v1  ;;  %v2189_v6 = vpop.f32.mrb[6].mxu0  ;;  %v2261_v7 = vpop.f32.mrb[6].mxu1 }
 0x104   : > { %v2190_v8 = vpop.f32.mrb[7].mxu0  ;;  %v2262_v9 = vpop.f32.mrb[7].mxu1 }
 0x105   : > { %v2191_v10 = vadd.f32 %v2190_v8, %v2189_v6  ;;  %v2878_v11 = vadd.f32 %v2262_v9, %v2261_v7 }
 0x109   : > { %v2192_v12 = vpop.f32.mrb[8].mxu0  ;;  %v2264_v13 = vpop.f32.mrb[8].mxu1 }
 0x10a   : > { %v2193_v14 = vpop.f32.mrb[9].mxu0  ;;  %v2265_v15 = vpop.f32.mrb[9].mxu1 }
 0x10b   : > { %v2194_v16 = vadd.f32 %v2193_v14, %v2192_v12  ;;  %v2880_v17 = vadd.f32 %v2265_v15, %v2264_v13  ;;  %v2195_v18 = vpop.f32.mrb[10].mxu0  ;;  %v2267_v19 = vpop.f32.mrb[10].mxu1 }
 0x10c   : > { %v2196_v20 = vpop.f32.mrb[11].mxu0  ;;  %v2268_v21 = vpop.f32.mrb[11].mxu1 }
 0x10d   : > { %v2197_v22 = vadd.f32 %v2196_v20, %v2195_v18  ;;  %v2882_v23 = vadd.f32 %v2268_v21, %v2267_v19 }
 0x111   : > { %v2198_v24 = vpop.f32.mrb[12].mxu0  ;;  %v2270_v25 = vpop.f32.mrb[12].mxu1 }
 0x112   : > { %v2199_v26 = vpop.f32.mrb[13].mxu0  ;;  %v2271_v27 = vpop.f32.mrb[13].mxu1 }
 0x113   : > { %v2200_v28 = vadd.f32 %v2199_v26, %v2198_v24  ;;  %v2884_v29 = vadd.f32 %v2271_v27, %v2270_v25  ;;  %v2201_v30 = vpop.f32.mrb[14].mxu0  ;;  %v2273_v31 = vpop.f32.mrb[14].mxu1 }
 0x114   : > { %v2202_v32 = vpop.f32.mrb[15].mxu0  ;;  %v2274_v33 = vpop.f32.mrb[15].mxu1 }
 0x115   : > { %v2203_v34 = vadd.f32 %v2202_v32, %v2201_v30  ;;  %v2886_v35 = vadd.f32 %v2274_v33, %v2273_v31 }
 0x119   : > { %v2204_v36 = vpop.f32.mrb[16].mxu0  ;;  %v2292_v37 = vpop.f32.mrb[16].mxu1 }
 0x11a   : > { %v2205_v38 = vpop.f32.mrb[17].mxu0  ;;  %v2293_v39 = vpop.f32.mrb[17].mxu1 }
 0x11b   : > { %v2888_v40 = vadd.f32 %v2205_v38, %v2204_v36  ;;  %v2294_v41 = vadd.f32 %v2293_v39, %v2292_v37  ;;  %v2207_v42 = vpop.f32.mrb[18].mxu0  ;;  %v2295_v43 = vpop.f32.mrb[18].mxu1 }
 0x11c   : > { %v2208_v44 = vpop.f32.mrb[19].mxu0  ;;  %v2296_v45 = vpop.f32.mrb[19].mxu1 }
 0x11d   : > { %v2209_v46 = vadd.f32 %v2208_v44, %v2207_v42  ;;  %v2297_v47 = vadd.f32 %v2296_v45, %v2295_v43  ;;  %v2890_v48 = vadd.f32 %v2294_v41, %v2182_v56 }
 0x11f   : > { %v2892_v49 = vadd.f32 %v2297_v47, %v2185_v62 }
 0x121   : > { %v2210_v50 = vpop.f32.mrb[20].mxu0  ;;  %v2298_v51 = vpop.f32.mrb[20].mxu1 }
 0x122   : > { %v2211_v52 = vpop.f32.mrb[21].mxu0  ;;  %v2299_v53 = vpop.f32.mrb[21].mxu1 }
 0x123   : > { %v2894_v54 = vadd.f32 %v2211_v52, %v2210_v50  ;;  %v2300_v55 = vadd.f32 %v2299_v53, %v2298_v51  ;;  %v2213_v58 = vpop.f32.mrb[22].mxu0  ;;  %v2301_v59 = vpop.f32.mrb[22].mxu1 }
 0x124   : > { %v2214_v60 = vpop.f32.mrb[23].mxu0  ;;  %v2302_v61 = vpop.f32.mrb[23].mxu1 }
 0x125   : > { %v2215_v0 = vadd.f32 %v2214_v60, %v2213_v58  ;;  %v2303_v1 = vadd.f32 %v2302_v61, %v2301_v59  ;;  %v2896_v2 = vadd.f32 %v2300_v55, %v2188_v4 }
 0x127   : > { %v2898_v3 = vadd.f32 %v2303_v1, %v2191_v10 }
 0x129   : > { %v2216_v56 = vpop.f32.mrb[24].mxu0  ;;  %v2304_v62 = vpop.f32.mrb[24].mxu1 }
 0x12a   : > { %v2217_v6 = vpop.f32.mrb[25].mxu0  ;;  %v2305_v7 = vpop.f32.mrb[25].mxu1 }
 0x12b   : > { %v2900_v8 = vadd.f32 %v2217_v6, %v2216_v56  ;;  %v2306_v9 = vadd.f32 %v2305_v7, %v2304_v62  ;;  %v2219_v12 = vpop.f32.mrb[26].mxu0  ;;  %v2307_v13 = vpop.f32.mrb[26].mxu1 }
 0x12c   : > { %v2220_v14 = vpop.f32.mrb[27].mxu0  ;;  %v2308_v15 = vpop.f32.mrb[27].mxu1 }
 0x12d   : > { %v2221_v18 = vadd.f32 %v2220_v14, %v2219_v12  ;;  %v2309_v19 = vadd.f32 %v2308_v15, %v2307_v13  ;;  %v2902_v20 = vadd.f32 %v2306_v9, %v2194_v16 }
 0x12f   : > { %v2904_v21 = vadd.f32 %v2309_v19, %v2197_v22 }
 0x131   : > { %v2222_v4 = vpop.f32.mrb[28].mxu0  ;;  %v2310_v10 = vpop.f32.mrb[28].mxu1 }
 0x132   : > { %v2223_v24 = vpop.f32.mrb[29].mxu0  ;;  %v2311_v25 = vpop.f32.mrb[29].mxu1 }
 0x133   : > { %v2906_v26 = vadd.f32 %v2223_v24, %v2222_v4  ;;  %v2312_v27 = vadd.f32 %v2311_v25, %v2310_v10  ;;  %v2225_v30 = vpop.f32.mrb[30].mxu0  ;;  %v2313_v31 = vpop.f32.mrb[30].mxu1 }
 0x134   : > { %v2226_v32 = vpop.f32.mrb[31].mxu0  ;;  %v2314_v33 = vpop.f32.mrb[31].mxu1 }
 0x135   : > { %v2227_v36 = vadd.f32 %v2226_v32, %v2225_v30  ;;  %v2315_v37 = vadd.f32 %v2314_v33, %v2313_v31  ;;  %v2908_v38 = vadd.f32 %v2312_v27, %v2200_v28 }
 0x137   : > { %v2910_v39 = vadd.f32 %v2315_v37, %v2203_v34 }
 0x139   : > { %v2228_v16 = vpop.f32.mrb[32].mxu0  ;;  %v2316_v22 = vpop.f32.mrb[32].mxu1 }
 0x13a   : > { %v2229_v41 = vpop.f32.mrb[33].mxu0  ;;  %v2317_v42 = vpop.f32.mrb[33].mxu1 }
 0x13b   : > { %v2912_v43 = vadd.f32 %v2229_v41, %v2228_v16  ;;  %v2318_v44 = vadd.f32 %v2317_v42, %v2316_v22  ;;  %v2231_v45 = vpop.f32.mrb[34].mxu0  ;;  %v2319_v47 = vpop.f32.mrb[34].mxu1 }
 0x13c   : > { %v2232_v50 = vpop.f32.mrb[35].mxu0  ;;  %v2320_v51 = vpop.f32.mrb[35].mxu1 }
 0x13d   : > { %v2914_v52 = vadd.f32 %v2232_v50, %v2231_v45  ;;  %v2321_v53 = vadd.f32 %v2320_v51, %v2319_v47  ;;  %v2917_v55 = vadd.f32 %v2318_v44, %v2888_v40 }
 0x13f   : > { %v2919_v28 = vadd.f32 %v2321_v53, %v2209_v46 }
 0x141   : > { %v2234_v34 = vpop.f32.mrb[36].mxu0  ;;  %v2322_v58 = vpop.f32.mrb[36].mxu1 }
 0x142   : > { %v2235_v59 = vpop.f32.mrb[37].mxu0  ;;  %v2323_v60 = vpop.f32.mrb[37].mxu1 }
 0x143   : > { %v2921_v61 = vadd.f32 %v2235_v59, %v2234_v34  ;;  %v2324_v1 = vadd.f32 %v2323_v60, %v2322_v58  ;;  %v2237_v56 = vpop.f32.mrb[38].mxu0  ;;  %v2325_v62 = vpop.f32.mrb[38].mxu1 }
 0x144   : > { %v2238_v6 = vpop.f32.mrb[39].mxu0  ;;  %v2326_v7 = vpop.f32.mrb[39].mxu1 }
 0x145   : > { %v2923_v9 = vadd.f32 %v2238_v6, %v2237_v56  ;;  %v2327_v12 = vadd.f32 %v2326_v7, %v2325_v62  ;;  %v2926_v13 = vadd.f32 %v2324_v1, %v2894_v54 }
 0x147   : > { %v2928_v40 = vadd.f32 %v2327_v12, %v2215_v0 }
 0x149   : > { %v2240_v46 = vpop.f32.mrb[40].mxu0  ;;  %v2328_v14 = vpop.f32.mrb[40].mxu1 }
 0x14a   : > { %v2241_v15 = vpop.f32.mrb[41].mxu0  ;;  %v2329_v19 = vpop.f32.mrb[41].mxu1 }
 0x14b   : > { %v2930_v4 = vadd.f32 %v2241_v15, %v2240_v46  ;;  %v2330_v10 = vadd.f32 %v2329_v19, %v2328_v14  ;;  %v2243_v24 = vpop.f32.mrb[42].mxu0  ;;  %v2331_v25 = vpop.f32.mrb[42].mxu1 }
 0x14c   : > { %v2244_v27 = vpop.f32.mrb[43].mxu0  ;;  %v2332_v30 = vpop.f32.mrb[43].mxu1 }
 0x14d   : > { %v2932_v31 = vadd.f32 %v2244_v27, %v2243_v24  ;;  %v2333_v32 = vadd.f32 %v2332_v30, %v2331_v25  ;;  %v2935_v33 = vadd.f32 %v2330_v10, %v2900_v8 }
 0x14f   : > { %v2937_v54 = vadd.f32 %v2333_v32, %v2221_v18 }
 0x151   : > { %v2246_v0 = vpop.f32.mrb[44].mxu0  ;;  %v2334_v37 = vpop.f32.mrb[44].mxu1 }
 0x152   : > { %v2247_v16 = vpop.f32.mrb[45].mxu0  ;;  %v2335_v22 = vpop.f32.mrb[45].mxu1 }
 0x153   : > { %v2939_v41 = vadd.f32 %v2247_v16, %v2246_v0  ;;  %v2336_v42 = vadd.f32 %v2335_v22, %v2334_v37  ;;  %v2249_v44 = vpop.f32.mrb[46].mxu0  ;;  %v2337_v45 = vpop.f32.mrb[46].mxu1 }
 0x154   : > { %v2250_v47 = vpop.f32.mrb[47].mxu0  ;;  %v2338_v50 = vpop.f32.mrb[47].mxu1 }
 0x155   : > { %v2941_v51 = vadd.f32 %v2250_v47, %v2249_v44  ;;  %v2339_v53 = vadd.f32 %v2338_v50, %v2337_v45  ;;  %v2944_v8 = vadd.f32 %v2336_v42, %v2906_v26 }
 0x157   : > { %v2946_v18 = vadd.f32 %v2339_v53, %v2227_v36 }
 0x159   : > { %v2340_v34 = vpop.f32.mrb[48].mxu1  ;;  %v2418_v58 = vpop.f32.mrb[48].mxu0 }
 0x15a   : > { %v1387_v59 = vadd.f32 %v2418_v58, %v2896_v2  ;;  %v2341_v60 = vpop.f32.mrb[49].mxu1  ;;  %v1378_v1 = vpop.f32.mrb[49].mxu0 }
 0x15b   : > { %v2342_v56 = vadd.f32 %v2341_v60, %v2340_v34  ;;  %v1379_v62 = vadd.f32 %v1378_v1, %v2890_v48  ;;  %v2343_v6 = vpop.f32.mrb[50].mxu1  ;;  %v2419_v7 = vpop.f32.mrb[50].mxu0 }
 0x15c   : > { %v1390_v12 = vadd.f32 %v2419_v7, %v2898_v3  ;;  %v2344_v46 = vpop.f32.mrb[51].mxu1  ;;  %v1381_v14 = vpop.f32.mrb[51].mxu0  ;;  %v1704_v25 = vmul.f32 %v1387_v59, %v1387_v59 }
 0x15d   : > { %v2345_v2 = vadd.f32 %v2344_v46, %v2343_v6  ;;  %v1382_v26 = vadd.f32 %v1381_v14, %v2892_v49  ;;  %v2959_v36 = vadd.f32 %v2342_v56, %v2912_v43  ;;  %v1702_v48 = vmul.f32 %v1379_v62, %v1379_v62 }
 0x15e   : > { %v2077_v15 = vpack.c.bf16 %v1390_v12, %v1387_v59  ;;  %v1705_v37 = vmul.f32 %v1390_v12, %v1390_v12 }
 0x15f   : > { %v2072_v19 = vpack.c.bf16 %v1382_v26, %v1379_v62  ;;  %v1665_v10 = vadd.f32 %v1382_v26, %v1379_v62  ;;  %v1703_v3 = vmul.f32 %v1382_v26, %v1382_v26  ;;  %v2962_v24 = vadd.f32 %v2345_v2, %v2914_v52 }
 0x160   : > { %2149 = vst [vmem:[%s2955_s23 + $0x8] sm:$0xff] %v2077_v15  }
 0x161   : > { %2073 = vst [vmem:[%s2955_s23] sm:$0xff] %v2072_v19   ;;  %v1666_v27 = vadd.f32 %v1665_v10, %v1387_v59  ;;  %v1734_v30 = vadd.f32 %v1703_v3, %v1702_v48  ;;  %v2346_v32 = vpop.f32.mrb[52].mxu1  ;;  %v2422_v0 = vpop.f32.mrb[52].mxu0 }
 0x162   : > { %v1403_v49 = vadd.f32 %v2422_v0, %v2908_v38  ;;  %v2347_v43 = vpop.f32.mrb[53].mxu1  ;;  %v1394_v16 = vpop.f32.mrb[53].mxu0 }
 0x163   : > { %v1735_v22 = vadd.f32 %v1734_v30, %v1704_v25  ;;  %v2348_v42 = vadd.f32 %v2347_v43, %v2346_v32  ;;  %v1395_v44 = vadd.f32 %v1394_v16, %v2902_v20  ;;  %v1667_v45 = vadd.f32 %v1666_v27, %v1390_v12  ;;  %v2349_v52 = vpop.f32.mrb[54].mxu1  ;;  %v2423_v47 = vpop.f32.mrb[54].mxu0 }
 0x164   : > { %v1406_v50 = vadd.f32 %v2423_v47, %v2910_v39  ;;  %v2350_v53 = vpop.f32.mrb[55].mxu1  ;;  %v1397_v34 = vpop.f32.mrb[55].mxu0  ;;  %v1708_v2 = vmul.f32 %v1403_v49, %v1403_v49 }
 0x165   : > { %v1668_v58 = vadd.f32 %v1667_v45, %v1395_v44  ;;  %v1706_v59 = vmul.f32 %v1395_v44, %v1395_v44  ;;  %v1736_v60 = vadd.f32 %v1735_v22, %v1705_v37  ;;  %v2351_v1 = vadd.f32 %v2350_v53, %v2349_v52 }
 0x166   : > { %v2087_v38 = vpack.c.bf16 %v1406_v50, %v1403_v49  ;;  %v1398_v56 = vadd.f32 %v1397_v34, %v2904_v21  ;;  %v2971_v62 = vadd.f32 %v2348_v42, %v2921_v61  ;;  %v1709_v25 = vmul.f32 %v1406_v50, %v1406_v50 }
 0x167   : > { %v1737_v20 = vadd.f32 %v1736_v60, %v1706_v59  ;;  %v2974_v6 = vadd.f32 %v2351_v1, %v2923_v9 }
 0x168   : > { %2151 = vst [vmem:[%s2955_s23 + $0x18] sm:$0xff] %v2087_v38   ;;  %v2082_v7 = vpack.c.bf16 %v1398_v56, %v1395_v44  ;;  %v1669_v39 = vadd.f32 %v1668_v58, %v1398_v56  ;;  %v1707_v12 = vmul.f32 %v1398_v56, %v1398_v56 }
 0x169   : > { %v2352_v46 = vpop.f32.mrb[56].mxu1  ;;  %v2426_v14 = vpop.f32.mrb[56].mxu0 }
 0x16a   : > { %2150 = vst [vmem:[%s2955_s23 + $0x10] sm:$0xff] %v2082_v7   ;;  %v1670_v26 = vadd.f32 %v1669_v39, %v1403_v49  ;;  %v1738_v48 = vadd.f32 %v1737_v20, %v1707_v12  ;;  %v1419_v15 = vadd.f32 %v2426_v14, %v2926_v13  ;;  %v2353_v21 = vpop.f32.mrb[57].mxu1  ;;  %v1410_v19 = vpop.f32.mrb[57].mxu0 }
 0x16b   : > { %v2354_v61 = vadd.f32 %v2353_v21, %v2352_v46  ;;  %v1411_v10 = vadd.f32 %v1410_v19, %v2917_v55  ;;  %v2355_v3 = vpop.f32.mrb[58].mxu1  ;;  %v2427_v9 = vpop.f32.mrb[58].mxu0 }
 0x16c   : > { %v1739_v27 = vadd.f32 %v1738_v48, %v1708_v2  ;;  %v1671_v30 = vadd.f32 %v1670_v26, %v1406_v50  ;;  %v1422_v32 = vadd.f32 %v2427_v9, %v2928_v40  ;;  %v2356_v0 = vpop.f32.mrb[59].mxu1  ;;  %v1413_v37 = vpop.f32.mrb[59].mxu0  ;;  %v1712_v34 = vmul.f32 %v1419_v15, %v1419_v15 }
 0x16d   : > { %v1710_v49 = vmul.f32 %v1411_v10, %v1411_v10  ;;  %v2357_v43 = vadd.f32 %v2356_v0, %v2355_v3  ;;  %v1414_v13 = vadd.f32 %v1413_v37, %v2919_v28  ;;  %v2983_v16 = vadd.f32 %v2354_v61, %v2930_v4 }
 0x16e   : > { %v1672_v22 = vadd.f32 %v1671_v30, %v1411_v10  ;;  %v1740_v55 = vadd.f32 %v1739_v27, %v1709_v25  ;;  %v2097_v42 = vpack.c.bf16 %v1422_v32, %v1419_v15 }
 0x16f   : > { %v2092_v44 = vpack.c.bf16 %v1414_v13, %v1411_v10  ;;  %v1711_v45 = vmul.f32 %v1414_v13, %v1414_v13  ;;  %v2986_v52 = vadd.f32 %v2357_v43, %v2932_v31  ;;  %v1713_v31 = vmul.f32 %v1422_v32, %v1422_v32 }
 0x170   : > { %v1741_v47 = vadd.f32 %v1740_v55, %v1710_v49  ;;  %2153 = vst [vmem:[%s2955_s23 + $0x28] sm:$0xff] %v2097_v42   ;;  %v1673_v40 = vadd.f32 %v1672_v22, %v1414_v13 }
 0x171   : > { %2152 = vst [vmem:[%s2955_s23 + $0x20] sm:$0xff] %v2092_v44   ;;  %v2358_v50 = vpop.f32.mrb[60].mxu1  ;;  %v2430_v53 = vpop.f32.mrb[60].mxu0 }
 0x172   : > { %v1674_v58 = vadd.f32 %v1673_v40, %v1419_v15  ;;  %v1742_v28 = vadd.f32 %v1741_v47, %v1711_v45  ;;  %v1435_v4 = vadd.f32 %v2430_v53, %v2944_v8  ;;  %v2359_v59 = vpop.f32.mrb[61].mxu1  ;;  %v1426_v60 = vpop.f32.mrb[61].mxu0 }
 0x173   : > { %v2360_v1 = vadd.f32 %v2359_v59, %v2358_v50  ;;  %v1427_v38 = vadd.f32 %v1426_v60, %v2935_v33  ;;  %v2361_v56 = vpop.f32.mrb[62].mxu1  ;;  %v2431_v20 = vpop.f32.mrb[62].mxu0 }
 0x174   : > { %v1743_v7 = vadd.f32 %v1742_v28, %v1712_v34  ;;  %v1675_v39 = vadd.f32 %v1674_v58, %v1422_v32  ;;  %v1438_v12 = vadd.f32 %v2431_v20, %v2946_v18  ;;  %v2362_v46 = vpop.f32.mrb[63].mxu1  ;;  %v1429_v14 = vpop.f32.mrb[63].mxu0  ;;  %v1716_v27 = vmul.f32 %v1435_v4, %v1435_v4 }
 0x175   : > { %v1714_v2 = vmul.f32 %v1427_v38, %v1427_v38  ;;  %v2363_v26 = vadd.f32 %v2362_v46, %v2361_v56  ;;  %v1430_v8 = vadd.f32 %v1429_v14, %v2937_v54  ;;  %v1306_v48 = vadd.f32 %v2360_v1, %v2939_v41 }
 0x176   : > { %v1676_v15 = vadd.f32 %v1675_v39, %v1427_v38  ;;  %v1744_v21 = vadd.f32 %v1743_v7, %v1713_v31  ;;  %v2107_v33 = vpack.c.bf16 %v1438_v12, %v1435_v4  ;;  %v1717_v22 = vmul.f32 %v1438_v12, %v1438_v12 }
 0x177   : > { %v2102_v19 = vpack.c.bf16 %v1430_v8, %v1427_v38  ;;  %v1715_v61 = vmul.f32 %v1430_v8, %v1430_v8  ;;  %v1309_v10 = vadd.f32 %v2363_v26, %v2941_v51 }
 0x178   : > { %v1745_v3 = vadd.f32 %v1744_v21, %v1714_v2  ;;  %2155 = vst [vmem:[%s2955_s23 + $0x38] sm:$0xff] %v2107_v33   ;;  %v1677_v9 = vadd.f32 %v1676_v15, %v1430_v8 }
 0x179   : > { %2154 = vst [vmem:[%s2955_s23 + $0x30] sm:$0xff] %v2102_v19   ;;  %v2364_v18 = vpop.f32.mrb[64].mxu1  ;;  %v2434_v25 = vpop.f32.mrb[64].mxu0 }
 0x17a   : > { %v1678_v30 = vadd.f32 %v1677_v9, %v1435_v4  ;;  %v1746_v32 = vadd.f32 %v1745_v3, %v1715_v61  ;;  %v1451_v54 = vadd.f32 %v2434_v25, %v2971_v62  ;;  %v2365_v0 = vpop.f32.mrb[65].mxu1  ;;  %v1442_v41 = vpop.f32.mrb[65].mxu0 }
 0x17b   : > { %v2366_v37 = vadd.f32 %v2365_v0, %v2364_v18  ;;  %v1443_v49 = vadd.f32 %v1442_v41, %v2959_v36  ;;  %v2367_v43 = vpop.f32.mrb[66].mxu1  ;;  %v2435_v13 = vpop.f32.mrb[66].mxu0 }
 0x17c   : > { %v1747_v51 = vadd.f32 %v1746_v32, %v1716_v27  ;;  %v1679_v55 = vadd.f32 %v1678_v30, %v1438_v12  ;;  %v1454_v42 = vadd.f32 %v2435_v13, %v2974_v6  ;;  %v2368_v44 = vpop.f32.mrb[67].mxu1  ;;  %v1445_v45 = vpop.f32.mrb[67].mxu0  ;;  %v1720_v38 = vmul.f32 %v1451_v54, %v1451_v54 }
 0x17d   : > { %v1718_v47 = vmul.f32 %v1443_v49, %v1443_v49  ;;  %v2369_v40 = vadd.f32 %v2368_v44, %v2367_v43  ;;  %v1446_v62 = vadd.f32 %v1445_v45, %v2962_v24  ;;  %v1314_v50 = vadd.f32 %v2366_v37, %v2872_v57 }
 0x17e   : > { %v1680_v53 = vadd.f32 %v1679_v55, %v1443_v49  ;;  %v1748_v34 = vadd.f32 %v1747_v51, %v1717_v22  ;;  %v2117_v36 = vpack.c.bf16 %v1454_v42, %v1451_v54  ;;  %v1721_v14 = vmul.f32 %v1454_v42, %v1454_v42 }
 0x17f   : > { %v2112_v58 = vpack.c.bf16 %v1446_v62, %v1443_v49  ;;  %v1719_v28 = vmul.f32 %v1446_v62, %v1446_v62  ;;  %v1317_v4 = vadd.f32 %v2369_v40, %v2874_v63 }
 0x180   : > { %v1749_v59 = vadd.f32 %v1748_v34, %v1718_v47  ;;  %2157 = vst [vmem:[%s2955_s23 + $0x48] sm:$0xff] %v2117_v36   ;;  %v1681_v60 = vadd.f32 %v1680_v53, %v1446_v62 }
 0x181   : > { %2156 = vst [vmem:[%s2955_s23 + $0x40] sm:$0xff] %v2112_v58   ;;  %v2370_v6 = vpop.f32.mrb[68].mxu1  ;;  %v2438_v1 = vpop.f32.mrb[68].mxu0 }
 0x182   : > { %v1682_v56 = vadd.f32 %v1681_v60, %v1451_v54  ;;  %v1750_v20 = vadd.f32 %v1749_v59, %v1719_v28  ;;  %v1467_v31 = vadd.f32 %v2438_v1, %v1306_v48  ;;  %v2371_v24 = vpop.f32.mrb[69].mxu1  ;;  %v1458_v7 = vpop.f32.mrb[69].mxu0 }
 0x183   : > { %v2372_v57 = vadd.f32 %v2371_v24, %v2370_v6  ;;  %v1459_v39 = vadd.f32 %v1458_v7, %v2983_v16  ;;  %v2373_v12 = vpop.f32.mrb[70].mxu1  ;;  %v2439_v46 = vpop.f32.mrb[70].mxu0 }
 0x184   : > { %v1751_v2 = vadd.f32 %v1750_v20, %v1720_v38  ;;  %v1683_v63 = vadd.f32 %v1682_v56, %v1454_v42  ;;  %v1470_v26 = vadd.f32 %v2439_v46, %v1309_v10  ;;  %v2374_v8 = vpop.f32.mrb[71].mxu1  ;;  %v1461_v15 = vpop.f32.mrb[71].mxu0  ;;  %v1724_v54 = vmul.f32 %v1467_v31, %v1467_v31 }
 0x185   : > { %v1722_v21 = vmul.f32 %v1459_v39, %v1459_v39  ;;  %v2375_v33 = vadd.f32 %v2374_v8, %v2373_v12  ;;  %v1462_v19 = vadd.f32 %v1461_v15, %v2986_v52  ;;  %v1322_v48 = vadd.f32 %v2372_v57, %v2876_v5 }
 0x186   : > { %v1684_v61 = vadd.f32 %v1683_v63, %v1459_v39  ;;  %v1752_v3 = vadd.f32 %v1751_v2, %v1721_v14  ;;  %v2127_v9 = vpack.c.bf16 %v1470_v26, %v1467_v31  ;;  %v1725_v51 = vmul.f32 %v1470_v26, %v1470_v26 }
 0x187   : > { %v2122_v16 = vpack.c.bf16 %v1462_v19, %v1459_v39  ;;  %v1723_v18 = vmul.f32 %v1462_v19, %v1462_v19  ;;  %v1325_v25 = vadd.f32 %v2375_v33, %v2878_v11 }
 0x188   : > { %v1753_v27 = vadd.f32 %v1752_v3, %v1722_v21  ;;  %2159 = vst [vmem:[%s2955_s23 + $0x58] sm:$0xff] %v2127_v9   ;;  %v1685_v30 = vadd.f32 %v1684_v61, %v1462_v19 }
 0x189   : > { %2158 = vst [vmem:[%s2955_s23 + $0x50] sm:$0xff] %v2122_v16   ;;  %v2376_v10 = vpop.f32.mrb[72].mxu1  ;;  %v2442_v32 = vpop.f32.mrb[72].mxu0 }
 0x18a   : > { %v1686_v0 = vadd.f32 %v1685_v30, %v1467_v31  ;;  %v1754_v41 = vadd.f32 %v1753_v27, %v1723_v18  ;;  %v1483_v37 = vadd.f32 %v2442_v32, %v1322_v48  ;;  %v2377_v52 = vpop.f32.mrb[73].mxu1  ;;  %v1474_v49 = vpop.f32.mrb[73].mxu0 }
 0x18b   : > { %v2378_v5 = vadd.f32 %v2377_v52, %v2376_v10  ;;  %v1475_v43 = vadd.f32 %v1474_v49, %v1314_v50  ;;  %v2379_v13 = vpop.f32.mrb[74].mxu1  ;;  %v2443_v22 = vpop.f32.mrb[74].mxu0 }
 0x18c   : > { %v1755_v55 = vadd.f32 %v1754_v41, %v1724_v54  ;;  %v1687_v11 = vadd.f32 %v1686_v0, %v1470_v26  ;;  %v1486_v42 = vadd.f32 %v2443_v22, %v1325_v25  ;;  %v2380_v44 = vpop.f32.mrb[75].mxu1  ;;  %v1477_v45 = vpop.f32.mrb[75].mxu0  ;;  %v1728_v56 = vmul.f32 %v1483_v37, %v1483_v37 }
 0x18d   : > { %v1726_v47 = vmul.f32 %v1475_v43, %v1475_v43  ;;  %v2381_v40 = vadd.f32 %v2380_v44, %v2379_v13  ;;  %v1478_v62 = vadd.f32 %v1477_v45, %v1317_v4  ;;  %v1330_v53 = vadd.f32 %v2378_v5, %v2880_v17 }
 0x18e   : > { %v1688_v34 = vadd.f32 %v1687_v11, %v1475_v43  ;;  %v1756_v36 = vadd.f32 %v1755_v55, %v1725_v51  ;;  %v2137_v58 = vpack.c.bf16 %v1486_v42, %v1483_v37  ;;  %v1729_v12 = vmul.f32 %v1486_v42, %v1486_v42 }
 0x18f   : > { %v2132_v28 = vpack.c.bf16 %v1478_v62, %v1475_v43  ;;  %v1727_v50 = vmul.f32 %v1478_v62, %v1478_v62  ;;  %v1333_v59 = vadd.f32 %v2381_v40, %v2882_v23 }
 0x190   : > { %v1757_v60 = vadd.f32 %v1756_v36, %v1726_v47  ;;  %2161 = vst [vmem:[%s2955_s23 + $0x68] sm:$0xff] %v2137_v58   ;;  %v1689_v6 = vadd.f32 %v1688_v34, %v1478_v62 }
 0x191   : > { %2160 = vst [vmem:[%s2955_s23 + $0x60] sm:$0xff] %v2132_v28   ;;  %v2382_v1 = vpop.f32.mrb[76].mxu1  ;;  %v2446_v38 = vpop.f32.mrb[76].mxu0 }
 0x192   : > { %v1690_v20 = vadd.f32 %v1689_v6, %v1483_v37  ;;  %v1758_v31 = vadd.f32 %v1757_v60, %v1727_v50  ;;  %v2383_v24 = vpop.f32.mrb[77].mxu1  ;;  %v1490_v4 = vpop.f32.mrb[77].mxu0 }
 0x193   : > { %v2384_v7 = vadd.f32 %v2383_v24, %v2382_v1  ;;  %v1491_v17 = vadd.f32 %v1490_v4, %v1330_v53  ;;  %v2385_v57 = vpop.f32.mrb[78].mxu1  ;;  %v2447_v39 = vpop.f32.mrb[78].mxu0 }
 0x194   : > { %v1759_v46 = vadd.f32 %v1758_v31, %v1728_v56  ;;  %v1691_v14 = vadd.f32 %v1690_v20, %v1486_v42  ;;  %v2386_v2 = vpop.f32.mrb[79].mxu1  ;;  %v1493_v23 = vpop.f32.mrb[79].mxu0 }
 0x195   : > { %v1338_v63 = vadd.f32 %v2384_v7, %v2884_v29  ;;  %v1730_v26 = vmul.f32 %v1491_v17, %v1491_v17  ;;  %v2387_v8 = vadd.f32 %v2386_v2, %v2385_v57  ;;  %v1494_v15 = vadd.f32 %v1493_v23, %v1333_v59 }
 0x196   : > { %v1692_v21 = vadd.f32 %v1691_v14, %v1491_v17  ;;  %v1760_v33 = vadd.f32 %v1759_v46, %v1729_v12 }
 0x197   : > { %v1499_v19 = vadd.f32 %v2446_v38, %v1338_v63  ;;  %v1341_v48 = vadd.f32 %v2387_v8, %v2886_v35  ;;  %v2142_v61 = vpack.c.bf16 %v1494_v15, %v1491_v17  ;;  %v1731_v3 = vmul.f32 %v1494_v15, %v1494_v15 }
 0x198   : > { %v1761_v9 = vadd.f32 %v1760_v33, %v1730_v26  ;;  %v1693_v16 = vadd.f32 %v1692_v21, %v1494_v15 }
 0x199   : > { %v1732_v18 = vmul.f32 %v1499_v19, %v1499_v19  ;;  %v1502_v25 = vadd.f32 %v2447_v39, %v1341_v48  ;;  %2162 = vst [vmem:[%s2955_s23 + $0x70] sm:$0xff] %v2142_v61  }
 0x19a   : > { %v1694_v27 = vadd.f32 %v1693_v16, %v1499_v19  ;;  %v1762_v29 = vadd.f32 %v1761_v9, %v1731_v3 }
 0x19b   : > { %v2147_v30 = vpack.c.bf16 %v1502_v25, %v1499_v19  ;;  %v1733_v10 = vmul.f32 %v1502_v25, %v1502_v25 }
 0x19c   : > { %v1695_v32 = vadd.f32 %v1694_v27, %v1502_v25  ;;  %v1763_v54 = vadd.f32 %v1762_v29, %v1732_v18 }
 0x19d   : > { %2163 = vst [vmem:[%s2955_s23 + $0x78] sm:$0xff] %v2147_v30  }
 0x19e   : > { %v1696_v0 = vrot.slane %v1695_v32, 4  ;;  %v1764_v41 = vadd.f32 %v1763_v54, %v1733_v10 }
 0x1a0   : > { %v1697_v35 = vadd.f32 %v1696_v0, %v1695_v32  ;;  %v1765_v37 = vrot.slane %v1764_v41, 4 }
 0x1a2   : > { %v1698_v52 = vrot.slane %v1697_v35, 2  ;;  %v1766_v49 = vadd.f32 %v1765_v37, %v1764_v41 }
 0x1a4   : > { %v1699_v5 = vadd.f32 %v1698_v52, %v1697_v35  ;;  %v1767_v43 = vrot.slane %v1766_v49, 2 }
 0x1a6   : > { %v1700_v13 = vrot.slane %v1699_v5, 1  ;;  %v1768_v22 = vadd.f32 %v1767_v43, %v1766_v49 }
 0x1a8   : > { %v1769_v51 = vrot.slane %v1768_v22, 1  ;;  %v1701_v55 = vadd.f32 %v1700_v13, %v1699_v5 }
 0x1aa   : > { %v1770_v11 = vadd.f32 %v1769_v51, %v1768_v22 }
 0x1ac   : > { %v1772_v42 = vsel %vm1771_vm1, %v1701_v55, %v1770_v11 }
 0x1ad   : > { %1773 = vst [vmem:[%s187_s26] sm:$0x3] %v1772_v42 }
 0x1ae PF: > { %s14_s12 = sadd.s32 1, %s2627_s12  }
 0x1af   : > { %p11_p5 = scmp.ge.s32.totalorder %s14_s12, 4  }
 0x1b1   :  { %13 = sbr.rel (!%p11_p5) target bundleno = 1 (0x1), region = 70 }

// kernel: transformer_forward.61
= control target key start
LH: loop header
LB: loop body
LE: loop exit
PB: predicated region body
PF: predicated region fallthrough
CT: control target
= control target key end

     0   :  { %s7833_s12 = smov 0   ;;  %s9692_s0 = inlined_call_operand.vmem [shape: bf16[512,2592], index: 0, kind: input, shape index: {}]   ;;  %s9693_s1 = inlined_call_operand.vmem [shape: bf16[2592,128], index: 1, kind: input, shape index: {}]   ;;  %s9694_s2 = inlined_call_operand.vmem [shape: f32[1,128], index: 2, kind: input, shape index: {}]   ;;  %s9695_s3 = inlined_call_operand.vmem [shape: f32[512,128], index: 3, kind: output, shape index: {}]  }
   0x1 LB: > { %s5421_s13 = sadd.s32 4294967295, %s7811_s12   ;;  %p5425_p0 = scmp.ge.s32.totalorder %s7811_s12, 1  ;;  %s7811_s12 = sphi %s7833_s12, %s13_s12  }
   0x2   : > { %p139_p1 = scmp.lt.s32.totalorder %s7811_s12, 3 }
   0x4   : > { %p140_p2 = pnand %p5425_p0, %p139_p1 }
   0x5   : > { %v7146_v0 = vld [vmem:[%s9693_s1 + $0x40] sm:$0xff] (!%p140_p2)   ;;  %s5426_s16 = sshll.u32 (!%p140_p2), %s5421_s13, 5  ;;  %v7148_v2 = vld [vmem:[%s9693_s1 + $0x48] sm:$0xff] (!%p140_p2)   ;;  %v7150_v4 = vld [vmem:[%s9693_s1 + $0x50] sm:$0xff] (!%p140_p2)   ;;  %vm3513_vm0 = vcmask (!%p140_p2), 261120  }
   0x6   : > { %143 = sbr.rel (%p140_p2) target bundleno = 924 (0x39c), region = 32  ;;  %v7147_v1 = vld [vmem:[%s9693_s1] sm:$0xff] (!%p140_p2)   ;;  %5947 = vmatprep.subr.bf16.mxu0 (!%p140_p2), %v7146_v0  ;;  %7121 = vmatprep.subr.bf16.mxu1 (!%p140_p2), %v7146_v0  ;;  %p165_p3 = scmp.lt.s32.totalorder (!%p140_p2), %s5426_s16, 63  ;;  %v7149_v3 = vld [vmem:[%s9693_s1 + $0x8] sm:$0xff] (!%p140_p2)   ;;  %v7151_v5 = vld [vmem:[%s9693_s1 + $0x10] sm:$0xff] (!%p140_p2)  }
   0x7   : > { %5948 = vmatpush3.bf16.msra.mxu0 (!%p140_p2), %v7147_v1  ;;  %7129 = vmatpush3.bf16.msra.mxu1 (!%p140_p2), %v7147_v1  ;;  %v7152_v6 = vld [vmem:[%s9693_s1 + $0x58] sm:$0xff] (!%p140_p2)   ;;  %v7154_v8 = vld [vmem:[%s9693_s1 + $0x60] sm:$0xff] (!%p140_p2)   ;;  %v7156_v10 = vld [vmem:[%s9693_s1 + $0x68] sm:$0xff] (!%p140_p2)  }
   0x8   : > { %5949 = vmatprep.subr.bf16.mxu0 (!%p140_p2), %v7148_v2  ;;  %7122 = vmatprep.subr.bf16.mxu1 (!%p140_p2), %v7148_v2  ;;  %v7153_v7 = vld [vmem:[%s9693_s1 + $0x18] sm:$0xff] (!%p140_p2)   ;;  %v7155_v9 = vld [vmem:[%s9693_s1 + $0x20] sm:$0xff] (!%p140_p2)   ;;  %v7157_v13 = vld [vmem:[%s9693_s1 + $0x28] sm:$0xff] (!%p140_p2)  }
   0x9   : > { %v7158_v14 = vld [vmem:[%s9693_s1 + $0x70] sm:$0xff] (!%p140_p2)   ;;  %v7160_v16 = vld [vmem:[%s9693_s1 + $0x78] sm:$0xff] (!%p140_p2)   ;;  %v7168_v18 = vld [vmem:[%s9693_s1 + $0xc0] sm:$0xff] (!%p140_p2)  }
   0xa   : > { %v7159_v15 = vld [vmem:[%s9693_s1 + $0x30] sm:$0xff] (!%p140_p2)   ;;  %v7161_v17 = vld [vmem:[%s9693_s1 + $0x38] sm:$0xff] (!%p140_p2)   ;;  %v7171_v21 = vld [vmem:[%s9693_s1 + $0x140] sm:$0xff] (!%p140_p2)  }
   0xb   : > { %5950 = vmatpush3.bf16.msra.mxu0 (!%p140_p2), %v7149_v3  ;;  %7130 = vmatpush3.bf16.msra.mxu1 (!%p140_p2), %v7149_v3  ;;  %v7169_v22 = vld [vmem:[%s9693_s1 + $0x80] sm:$0xff] (!%p140_p2)   ;;  %v7170_v23 = vld [vmem:[%s9693_s1 + $0xc8] sm:$0xff] (!%p140_p2)   ;;  %v7180_v31 = vld [vmem:[%s9693_s1 + $0xd0] sm:$0xff] (!%p140_p2)  }
   0xc   : > { %5951 = vmatprep.subr.bf16.mxu0 (!%p140_p2), %v7150_v4  ;;  %7123 = vmatprep.subr.bf16.mxu1 (!%p140_p2), %v7150_v4  ;;  %v7173_v24 = vld [vmem:[%s9693_s1 + $0x100] sm:$0xff] (!%p140_p2)   ;;  %v7172_v27 = vld [vmem:[%s9693_s1 + $0x88] sm:$0xff] (!%p140_p2)   ;;  %v7181_v32 = vld [vmem:[%s9693_s1 + $0x90] sm:$0xff] (!%p140_p2)  }
   0xd   : > { %s9697_s16 = smov (!%p165_p3, %s5426_s16), 63  ;;  %v7191_v28 = vld [vmem:[%s9693_s1 + $0x148] sm:$0xff]   ;;  %v7182_v34 = vld [vmem:[%s9693_s1 + $0xd8] sm:$0xff]   ;;  %v7190_v40 = vld [vmem:[%s9693_s1 + $0xe0] sm:$0xff]  }
   0xe   : > { %s7137_s29 = smul.u32 84, %s9697_s16  ;;  %v7193_v33 = vld [vmem:[%s9693_s1 + $0x108] sm:$0xff]   ;;  %v7183_v37 = vld [vmem:[%s9693_s1 + $0x98] sm:$0xff]   ;;  %v7192_v41 = vld [vmem:[%s9693_s1 + $0xa0] sm:$0xff]  }
   0xf   : > { %5952 = vmatpush3.bf16.msra.mxu0 %v7151_v5  ;;  %7131 = vmatpush3.bf16.msra.mxu1 %v7151_v5  ;;  %v7194_v42 = vld [vmem:[%s9693_s1 + $0xe8] sm:$0xff]   ;;  %v7205_v43 = vld [vmem:[%s9693_s1 + $0x150] sm:$0xff]   ;;  %v7204_v52 = vld [vmem:[%s9693_s1 + $0xf8] sm:$0xff]  }
  0x10   : > { %5953 = vmatprep.subr.bf16.mxu0 %v7152_v6  ;;  %7124 = vmatprep.subr.bf16.mxu1 %v7152_v6  ;;  %s7874_s9 = scalar_lea.vmem %s9692_s0, %s7137_s29  ;;  %v7207_v46 = vld [vmem:[%s9693_s1 + $0x110] sm:$0xff]   ;;  %v7195_v47 = vld [vmem:[%s9693_s1 + $0xa8] sm:$0xff]   ;;  %v7222_v55 = vld [vmem:[%s9693_s1 + $0x158] sm:$0xff]  }
  0x11   : > { %v7164_v11 = vld [vmem:[%s7874_s9 + $0x4] ss:$84 sps:$4 sm:$0xff]   ;;  %v7162_v19 = vld [vmem:[%s7874_s9] ss:$84 sps:$4 sm:$0xff]   ;;  %v7178_v29 = vld [vmem:[%s7874_s9 + $0xa8] ss:$84 sps:$4 sm:$0xff]  }
  0x12   : > { %v7167_v12 = vld [vmem:[%s7874_s9 + $0x7e4] ss:$84 sps:$4 sm:$0xff]   ;;  %3594 = vmatprep.mubr.bf16.mxu0 %v7164_v11  ;;  %v7165_v20 = vld [vmem:[%s7874_s9 + $0x7e0] ss:$84 sps:$4 sm:$0xff]   ;;  %v7179_v30 = vld [vmem:[%s7874_s9 + $0x888] ss:$84 sps:$4 sm:$0xff]  }
  0x13   : > { %5954 = vmatpush3.bf16.msra.mxu0 %v7153_v7  ;;  %7132 = vmatpush3.bf16.msra.mxu1 %v7153_v7  ;;  %v7174_v25 = vld [vmem:[%s7874_s9 + $0xac] ss:$84 sps:$4 sm:$0xff]   ;;  %v7184_v35 = vld [vmem:[%s7874_s9 + $0x154] ss:$84 sps:$4 sm:$0xff]   ;;  %v7188_v38 = vld [vmem:[%s7874_s9 + $0x150] ss:$84 sps:$4 sm:$0xff]  }
  0x14   : > { %5955 = vmatprep.subr.bf16.mxu0 %v7154_v8  ;;  %7125 = vmatprep.subr.bf16.mxu1 %v7154_v8  ;;  %v7176_v26 = vld [vmem:[%s7874_s9 + $0x88c] ss:$84 sps:$4 sm:$0xff]   ;;  %v7186_v36 = vld [vmem:[%s7874_s9 + $0x934] ss:$84 sps:$4 sm:$0xff]   ;;  %v7189_v39 = vld [vmem:[%s7874_s9 + $0x930] ss:$84 sps:$4 sm:$0xff]  }
  0x15   : > { %3690 = vmatprep.mubr.bf16.mxu1 %v7167_v12  ;;  %v7196_v44 = vld [vmem:[%s7874_s9 + $0x1fc] ss:$84 sps:$4 sm:$0xff]   ;;  %v7200_v49 = vld [vmem:[%s7874_s9 + $0x1f8] ss:$84 sps:$4 sm:$0xff]   ;;  %v7213_v59 = vld [vmem:[%s7874_s9 + $0x2a0] ss:$84 sps:$4 sm:$0xff]  }
  0x16   : > { %v7198_v45 = vld [vmem:[%s7874_s9 + $0x9dc] ss:$84 sps:$4 sm:$0xff]   ;;  %v7201_v50 = vld [vmem:[%s7874_s9 + $0x9d8] ss:$84 sps:$4 sm:$0xff]   ;;  %v7214_v60 = vld [vmem:[%s9693_s1 + $0x1c0] sm:$0xff]  }
  0x17   : > { %5956 = vmatpush3.bf16.msra.mxu0 %v7155_v9  ;;  %7133 = vmatpush3.bf16.msra.mxu1 %v7155_v9  ;;  %v7202_v48 = vld [vmem:[%s9693_s1 + $0xf0] sm:$0xff]   ;;  %v7208_v53 = vld [vmem:[%s7874_s9 + $0x2a4] ss:$84 sps:$4 sm:$0xff]   ;;  %v7212_v54 = vld [vmem:[%s7874_s9 + $0xc] ss:$84 sps:$4 sm:$0xff]  }
  0x18   : > { %5957 = vmatprep.subr.bf16.mxu0 %v7156_v10  ;;  %7126 = vmatprep.subr.bf16.mxu1 %v7156_v10  ;;  %v7203_v51 = vld [vmem:[%s9693_s1 + $0xb0] sm:$0xff]   ;;  %v7223_v56 = vld [vmem:[%s9693_s1 + $0x118] sm:$0xff]   ;;  %v7215_v61 = vld [vmem:[%s9693_s1 + $0x180] sm:$0xff]  }
  0x19   : > { %v7206_v57 = vld [vmem:[%s9693_s1 + $0xb8] sm:$0xff]   ;;  %v7216_v62 = vld [vmem:[%s7874_s9 + $0x34c] ss:$84 sps:$4 sm:$0xff]   ;;  %v7218_v63 = vld [vmem:[%s7874_s9 + $0xb4] ss:$84 sps:$4 sm:$0xff]  }
  0x1a   : > { %v7210_v58 = vld [vmem:[%s7874_s9 + $0x8] ss:$84 sps:$4 sm:$0xff]   ;;  %v7232_v0 = vld [vmem:[%s9693_s1 + $0x160] sm:$0xff]   ;;  %v7247_v9 = vld [vmem:[%s9693_s1 + $0x1d0] sm:$0xff]  }
  0x1b   : > { %5958 = vmatpush3.bf16.msra.mxu0 %v7157_v13  ;;  %7134 = vmatpush3.bf16.msra.mxu1 %v7157_v13  ;;  %v7230_v1 = vld [vmem:[%s9693_s1 + $0x1c8] sm:$0xff]   ;;  %v7233_v2 = vld [vmem:[%s9693_s1 + $0x120] sm:$0xff]   ;;  %v7226_v7 = vld [vmem:[%s7874_s9 + $0x15c] ss:$84 sps:$4 sm:$0xff]  }
  0x1c   : > { %5959 = vmatprep.subr.bf16.mxu0 %v7158_v14  ;;  %7127 = vmatprep.subr.bf16.mxu1 %v7158_v14  ;;  %v7231_v3 = vld [vmem:[%s9693_s1 + $0x188] sm:$0xff]   ;;  %v7221_v5 = vld [vmem:[%s7874_s9 + $0xb0] ss:$84 sps:$4 sm:$0xff]  }
  0x1d   : > { %v7220_v4 = vld [vmem:[%s7874_s9 + $0x348] ss:$84 sps:$4 sm:$0xff]   ;;  %v7249_v11 = vld [vmem:[%s9693_s1 + $0x190] sm:$0xff]   ;;  %v7229_v13 = vld [vmem:[%s7874_s9 + $0x158] ss:$84 sps:$4 sm:$0xff]  }
  0x1e   : > { %v7224_v6 = vld [vmem:[%s7874_s9 + $0x3f4] ss:$84 sps:$4 sm:$0xff]   ;;  %v7228_v12 = vld [vmem:[%s7874_s9 + $0x3f0] ss:$84 sps:$4 sm:$0xff]  }
  0x1f   : > { %5960 = vmatpush3.bf16.msra.mxu0 %v7159_v15  ;;  %7135 = vmatpush3.bf16.msra.mxu1 %v7159_v15  ;;  %v7246_v8 = vld [vmem:[%s9693_s1 + $0x168] sm:$0xff]   ;;  %v7234_v14 = vld [vmem:[%s7874_s9 + $0x49c] ss:$84 sps:$4 sm:$0xff]  }
  0x20   : > { %5961 = vmatprep.subr.bf16.mxu0 %v7160_v16  ;;  %7128 = vmatprep.subr.bf16.mxu1 %v7160_v16  ;;  %v7248_v10 = vld [vmem:[%s9693_s1 + $0x128] sm:$0xff]   ;;  %v7256_v15 = vld [vmem:[%s9693_s1 + $0x170] sm:$0xff]  }
  0x21   : > { %v7257_v16 = vld [vmem:[%s9693_s1 + $0x130] sm:$0xff]  }
  0x23   : > { %5962 = vmatpush3.bf16.msra.mxu0 %v7161_v17  ;;  %7136 = vmatpush3.bf16.msra.mxu1 %v7161_v17  ;;  %v7236_v17 = vld [vmem:[%s7874_s9 + $0x204] ss:$84 sps:$4 sm:$0xff]  }
  0x24   : > { %6059 = vmatprep.subr.bf16.mxu1 %v7168_v18  ;;  %6171 = vmatprep.subr.bf16.mxu0 %v7171_v21  ;;  %v7264_v18 = vld [vmem:[%s9693_s1 + $0x1d8] sm:$0xff]   ;;  %v7239_v21 = vld [vmem:[%s7874_s9 + $0x200] ss:$84 sps:$4 sm:$0xff]  }
  0x26   : > { %3595 = vmatmul.mubr.bf16.vlgmr.msra.gmra.mrb[0].mxu0 %v7162_v19  ;;  %3691 = vmatmul.mubr.bf16.vlgmr.msra.gmra.mrb[0].mxu1 %v7165_v20  ;;  %v7265_v19 = vld [vmem:[%s9693_s1 + $0x198] sm:$0xff]  }
  0x27   : > { %6060 = vmatpush3.bf16.msra.mxu1 %v7169_v22  ;;  %6172 = vmatpush3.bf16.msra.mxu0 %v7173_v24  ;;  %v7238_v20 = vld [vmem:[%s7874_s9 + $0x498] ss:$84 sps:$4 sm:$0xff]  }
  0x28   : > { %6061 = vmatprep.subr.bf16.mxu1 %v7170_v23  ;;  %3602 = vmatprep.mubr.bf16.mxu0 %v7174_v25  ;;  %v7240_v22 = vld [vmem:[%s7874_s9 + $0x544] ss:$84 sps:$4 sm:$0xff]   ;;  %v7242_v23 = vld [vmem:[%s7874_s9 + $0x2ac] ss:$84 sps:$4 sm:$0xff]  }
  0x29   : > { %3698 = vmatprep.mubr.bf16.mxu1 %v7176_v26  ;;  %6173 = vmatprep.subr.bf16.mxu0 %v7191_v28  ;;  %v7272_v24 = vld [vmem:[%s9693_s1 + $0x178] sm:$0xff]   ;;  %v7280_v26 = vld [vmem:[%s9693_s1 + $0x1e0] sm:$0xff]  }
  0x2a   : > { %v7273_v25 = vld [vmem:[%s9693_s1 + $0x138] sm:$0xff]  }
  0x2b   : > { %6062 = vmatpush3.bf16.msra.mxu1 %v7172_v27  ;;  %6174 = vmatpush3.bf16.msra.mxu0 %v7193_v33  ;;  %v7244_v27 = vld [vmem:[%s7874_s9 + $0x540] ss:$84 sps:$4 sm:$0xff]   ;;  %v7245_v28 = vld [vmem:[%s7874_s9 + $0x2a8] ss:$84 sps:$4 sm:$0xff]  }
  0x2c   : > { %6063 = vmatprep.subr.bf16.mxu1 %v7180_v31  ;;  %6175 = vmatprep.subr.bf16.mxu0 %v7205_v43  ;;  %v7250_v31 = vld [vmem:[%s7874_s9 + $0x5ec] ss:$84 sps:$4 sm:$0xff]   ;;  %v7254_v33 = vld [vmem:[%s7874_s9 + $0x5e8] ss:$84 sps:$4 sm:$0xff]   ;;  %v7312_v43 = vld [vmem:[%s9693_s1 + $0x1f0] sm:$0xff]  }
  0x2e   : > { %3603 = vmatmul.mubr.bf16.gmra.mrb[4].mxu0 %v7178_v29  ;;  %3699 = vmatmul.mubr.bf16.gmra.mrb[4].mxu1 %v7179_v30  ;;  %v7281_v29 = vld [vmem:[%s9693_s1 + $0x1a0] sm:$0xff]  }
  0x2f   : > { %6064 = vmatpush3.bf16.msra.mxu1 %v7181_v32  ;;  %3610 = vmatprep.mubr.bf16.mxu0 %v7184_v35  ;;  %v7282_v30 = vld [vmem:[%s9693_s1 + $0x240] sm:$0xff]   ;;  %v7252_v32 = vld [vmem:[%s7874_s9 + $0x354] ss:$84 sps:$4 sm:$0xff]  }
  0x30   : > { %6065 = vmatprep.subr.bf16.mxu1 %v7182_v34  ;;  %3706 = vmatprep.mubr.bf16.mxu1 %v7186_v36  ;;  %v7255_v34 = vld [vmem:[%s7874_s9 + $0x350] ss:$84 sps:$4 sm:$0xff]   ;;  %v7296_v35 = vld [vmem:[%s9693_s1 + $0x1e8] sm:$0xff]  }
  0x31   : > { %6176 = vmatpush3.bf16.msra.mxu0 %v7207_v46  ;;  %v7297_v36 = vld [vmem:[%s9693_s1 + $0x1a8] sm:$0xff]   ;;  %v7271_v46 = vld [vmem:[%s7874_s9 + $0x4a0] ss:$84 sps:$4 sm:$0xff]  }
  0x32   : > { %6177 = vmatprep.subr.bf16.mxu0 %v7222_v55  ;;  %v7286_v55 = vld [vmem:[%s7874_s9 + $0xbc] ss:$84 sps:$4 sm:$0xff]  }
  0x33   : > { %6066 = vmatpush3.bf16.msra.mxu1 %v7183_v37  ;;  %v7258_v37 = vld [vmem:[%s7874_s9 + $0x694] ss:$84 sps:$4 sm:$0xff]  }
  0x34   : > { %6067 = vmatprep.subr.bf16.mxu1 %v7190_v40  ;;  %v7263_v40 = vld [vmem:[%s7874_s9 + $0x3f8] ss:$84 sps:$4 sm:$0xff]  }
  0x35   : > { %6178 = vmatpush3.bf16.msra.mxu0 %v7223_v56  ;;  %v7298_v56 = vld [vmem:[%s9693_s1 + $0x248] sm:$0xff]  }
  0x36   : > { %3611 = vmatmul.mubr.bf16.gmra.mrb[8].mxu0 %v7188_v38  ;;  %3707 = vmatmul.mubr.bf16.gmra.mrb[8].mxu1 %v7189_v39  ;;  %v7260_v38 = vld [vmem:[%s7874_s9 + $0x3fc] ss:$84 sps:$4 sm:$0xff]  }
  0x37   : > { %6068 = vmatpush3.bf16.msra.mxu1 %v7192_v41  ;;  %3618 = vmatprep.mubr.bf16.mxu0 %v7196_v44  ;;  %v7262_v39 = vld [vmem:[%s7874_s9 + $0x690] ss:$84 sps:$4 sm:$0xff]  }
  0x38   : > { %6069 = vmatprep.subr.bf16.mxu1 %v7194_v42  ;;  %3714 = vmatprep.mubr.bf16.mxu1 %v7198_v45  ;;  %v7266_v41 = vld [vmem:[%s7874_s9 + $0x73c] ss:$84 sps:$4 sm:$0xff]   ;;  %v7268_v42 = vld [vmem:[%s7874_s9 + $0x4a4] ss:$84 sps:$4 sm:$0xff]  }
  0x39   : > { %6179 = vmatprep.subr.bf16.mxu0 %v7232_v0  ;;  %v7313_v44 = vld [vmem:[%s9693_s1 + $0x1b0] sm:$0xff]   ;;  %v7270_v45 = vld [vmem:[%s7874_s9 + $0x738] ss:$84 sps:$4 sm:$0xff]  }
  0x3a   : > { %6180 = vmatpush3.bf16.msra.mxu0 %v7233_v2  ;;  %v7315_v0 = vld [vmem:[%s9693_s1 + $0x210] sm:$0xff]   ;;  %v7294_v2 = vld [vmem:[%s7874_s9 + $0x698] ss:$84 sps:$4 sm:$0xff]  }
  0x3b   : > { %6070 = vmatpush3.bf16.msra.mxu1 %v7195_v47  ;;  %6181 = vmatprep.subr.bf16.mxu0 %v7246_v8  ;;  %v7274_v47 = vld [vmem:[%s7874_s9 + $0x54c] ss:$84 sps:$4 sm:$0xff]  }
  0x3c   : > { %6071 = vmatprep.subr.bf16.mxu1 %v7202_v48  ;;  %v7278_v48 = vld [vmem:[%s7874_s9 + $0x14] ss:$84 sps:$4 sm:$0xff]   ;;  %v7347_v8 = vld [vmem:[%s9693_s1 + $0x220] sm:$0xff]  }
  0x3e   : > { %3619 = vmatmul.mubr.bf16.gmra.mrb[12].mxu0 %v7200_v49  ;;  %3715 = vmatmul.mubr.bf16.gmra.mrb[12].mxu1 %v7201_v50  ;;  %v7328_v49 = vld [vmem:[%s9693_s1 + $0x1f8] sm:$0xff]  }
  0x3f   : > { %6072 = vmatpush3.bf16.msra.mxu1 %v7203_v51  ;;  %3626 = vmatprep.mubr.bf16.mxu0 %v7208_v53  ;;  %v7329_v50 = vld [vmem:[%s9693_s1 + $0x1b8] sm:$0xff]   ;;  %v7276_v51 = vld [vmem:[%s7874_s9 + $0x10] ss:$84 sps:$4 sm:$0xff]  }
  0x40   : > { %6073 = vmatprep.subr.bf16.mxu1 %v7204_v52  ;;  %3755 = vmatprep.mubr.bf16.mxu1 %v7212_v54  ;;  %v7279_v52 = vld [vmem:[%s7874_s9 + $0x548] ss:$84 sps:$4 sm:$0xff]   ;;  %v7283_v53 = vld [vmem:[%s9693_s1 + $0x200] sm:$0xff]  }
  0x41   : > { %6182 = vmatpush3.bf16.msra.mxu0 %v7248_v10  ;;  %v7284_v54 = vld [vmem:[%s7874_s9 + $0x5f4] ss:$84 sps:$4 sm:$0xff]  }
  0x42   : > { %6183 = vmatprep.subr.bf16.mxu0 %v7256_v15  ;;  %v7304_v10 = vld [vmem:[%s7874_s9 + $0x740] ss:$84 sps:$4 sm:$0xff]  }
  0x43   : > { %6074 = vmatpush3.bf16.msra.mxu1 %v7206_v57  ;;  %v7344_v57 = vld [vmem:[%s9693_s1 + $0x2c0] sm:$0xff]   ;;  %v7308_v15 = vld [vmem:[%s7874_s9 + $0x2b4] ss:$84 sps:$4 sm:$0xff]  }
  0x44   : > { %6283 = vmatprep.subr.bf16.mxu1 %v7214_v60  ;;  %v7288_v60 = vld [vmem:[%s7874_s9 + $0x5f0] ss:$84 sps:$4 sm:$0xff]  }
  0x45   : > { %6184 = vmatpush3.bf16.msra.mxu0 %v7257_v16  ;;  %v7379_v16 = vld [vmem:[%s9693_s1 + $0x230] sm:$0xff]  }
  0x46   : > { %3627 = vmatmul.mubr.bf16.gmra.mrb[16].mxu0 %v7213_v59  ;;  %3756 = vmatmul.mubr.bf16.vlgmr.msra.gmra.mrb[16].mxu1 %v7210_v58  ;;  %v7299_v58 = vld [vmem:[%s9693_s1 + $0x208] sm:$0xff]   ;;  %v7314_v59 = vld [vmem:[%s9693_s1 + $0x250] sm:$0xff]  }
  0x47   : > { %6284 = vmatpush3.bf16.msra.mxu1 %v7215_v61  ;;  %3634 = vmatprep.mubr.bf16.mxu0 %v7216_v62  ;;  %v7289_v61 = vld [vmem:[%s7874_s9 + $0xb8] ss:$84 sps:$4 sm:$0xff]   ;;  %v7290_v62 = vld [vmem:[%s7874_s9 + $0x69c] ss:$84 sps:$4 sm:$0xff]  }
  0x48   : > { %3763 = vmatprep.mubr.bf16.mxu1 %v7218_v63  ;;  %6285 = vmatprep.subr.bf16.mxu1 %v7230_v1  ;;  %v7292_v63 = vld [vmem:[%s7874_s9 + $0x164] ss:$84 sps:$4 sm:$0xff]  }
  0x49   : > { %6185 = vmatprep.subr.bf16.mxu0 %v7272_v24  ;;  %v7330_v1 = vld [vmem:[%s9693_s1 + $0x258] sm:$0xff]  }
  0x4a   : > { %6186 = vmatpush3.bf16.msra.mxu0 %v7273_v25  ;;  %v7321_v24 = vld [vmem:[%s7874_s9 + $0x358] ss:$84 sps:$4 sm:$0xff]   ;;  %v7322_v25 = vld [vmem:[%s7874_s9 + $0x93c] ss:$84 sps:$4 sm:$0xff]  }
  0x4b   : > { %6286 = vmatpush3.bf16.msra.mxu1 %v7231_v3  ;;  %6395 = vmatprep.subr.bf16.mxu0 %v7282_v30  ;;  %v7331_v3 = vld [vmem:[%s9693_s1 + $0x218] sm:$0xff]  }
  0x4c   : > { %6287 = vmatprep.subr.bf16.mxu1 %v7247_v9  ;;  %v7362_v9 = vld [vmem:[%s9693_s1 + $0x268] sm:$0xff]   ;;  %v7332_v30 = vld [vmem:[%s7874_s9 + $0x9e4] ss:$84 sps:$4 sm:$0xff]  }
  0x4e   : > { %3635 = vmatmul.mubr.bf16.gmra.mrb[20].mxu0 %v7220_v4  ;;  %3764 = vmatmul.mubr.bf16.gmra.mrb[20].mxu1 %v7221_v5  ;;  %v7346_v4 = vld [vmem:[%s9693_s1 + $0x260] sm:$0xff]  }
  0x4f   : > { %3642 = vmatprep.mubr.bf16.mxu0 %v7224_v6  ;;  %3771 = vmatprep.mubr.bf16.mxu1 %v7226_v7  ;;  %v7295_v5 = vld [vmem:[%s7874_s9 + $0x160] ss:$84 sps:$4 sm:$0xff]   ;;  %v7300_v6 = vld [vmem:[%s7874_s9 + $0x744] ss:$84 sps:$4 sm:$0xff]  }
  0x50   : > { %6288 = vmatpush3.bf16.msra.mxu1 %v7249_v11  ;;  %v7302_v7 = vld [vmem:[%s7874_s9 + $0x20c] ss:$84 sps:$4 sm:$0xff]   ;;  %v7305_v11 = vld [vmem:[%s7874_s9 + $0x208] ss:$84 sps:$4 sm:$0xff]  }
  0x51   : > { %6289 = vmatprep.subr.bf16.mxu1 %v7264_v18  ;;  %v7311_v18 = vld [vmem:[%s7874_s9 + $0x2b0] ss:$84 sps:$4 sm:$0xff]  }
  0x54   : > { %6290 = vmatpush3.bf16.msra.mxu1 %v7265_v19  ;;  %v7316_v19 = vld [vmem:[%s7874_s9 + $0x894] ss:$84 sps:$4 sm:$0xff]  }
  0x55   : > { %6291 = vmatprep.subr.bf16.mxu1 %v7280_v26  ;;  %v7324_v26 = vld [vmem:[%s7874_s9 + $0x404] ss:$84 sps:$4 sm:$0xff]  }
  0x56   : > { %3643 = vmatmul.mubr.bf16.gmra.mrb[24].mxu0 %v7228_v12  ;;  %3772 = vmatmul.mubr.bf16.gmra.mrb[24].mxu1 %v7229_v13  ;;  %v7363_v12 = vld [vmem:[%s9693_s1 + $0x228] sm:$0xff]   ;;  %v7378_v13 = vld [vmem:[%s9693_s1 + $0x270] sm:$0xff]  }
  0x57   : > { %3650 = vmatprep.mubr.bf16.mxu0 %v7234_v14  ;;  %3779 = vmatprep.mubr.bf16.mxu1 %v7236_v17  ;;  %v7306_v14 = vld [vmem:[%s7874_s9 + $0x7ec] ss:$84 sps:$4 sm:$0xff]   ;;  %v7310_v17 = vld [vmem:[%s7874_s9 + $0x7e8] ss:$84 sps:$4 sm:$0xff]  }
  0x58   : > { %6292 = vmatpush3.bf16.msra.mxu1 %v7281_v29  ;;  %v7327_v29 = vld [vmem:[%s7874_s9 + $0x400] ss:$84 sps:$4 sm:$0xff]  }
  0x59   : > { %6293 = vmatprep.subr.bf16.mxu1 %v7296_v35  ;;  %v7342_v35 = vld [vmem:[%s7874_s9 + $0x1c] ss:$84 sps:$4 sm:$0xff]  }
  0x5c   : > { %6294 = vmatpush3.bf16.msra.mxu1 %v7297_v36  ;;  %v7340_v36 = vld [vmem:[%s7874_s9 + $0x18] ss:$84 sps:$4 sm:$0xff]  }
  0x5d   : > { %6295 = vmatprep.subr.bf16.mxu1 %v7312_v43  ;;  %v7376_v43 = vld [vmem:[%s9693_s1 + $0x2d0] sm:$0xff]  }
  0x5e   : > { %3651 = vmatmul.mubr.bf16.gmra.mrb[28].mxu0 %v7238_v20  ;;  %3780 = vmatmul.mubr.bf16.gmra.mrb[28].mxu1 %v7239_v21  ;;  %v7318_v20 = vld [vmem:[%s7874_s9 + $0x35c] ss:$84 sps:$4 sm:$0xff]  }
  0x5f   : > { %3658 = vmatprep.mubr.bf16.mxu0 %v7240_v22  ;;  %3787 = vmatprep.mubr.bf16.mxu1 %v7242_v23  ;;  %v7394_v21 = vld [vmem:[%s9693_s1 + $0x278] sm:$0xff]   ;;  %v7320_v23 = vld [vmem:[%s7874_s9 + $0x890] ss:$84 sps:$4 sm:$0xff]  }
  0x60   : > { %6296 = vmatpush3.bf16.msra.mxu1 %v7313_v44  ;;  %v7395_v22 = vld [vmem:[%s9693_s1 + $0x238] sm:$0xff]  }
  0x61   : > { %6297 = vmatprep.subr.bf16.mxu1 %v7328_v49  ;;  %v7352_v44 = vld [vmem:[%s7874_s9 + $0x5f8] ss:$84 sps:$4 sm:$0xff]  }
  0x62   : > { %v7392_v49 = vld [vmem:[%s9693_s1 + $0x2d8] sm:$0xff]  }
  0x64   : > { %6298 = vmatpush3.bf16.msra.mxu1 %v7329_v50  ;;  %v7358_v50 = vld [vmem:[%s7874_s9 + $0x6a0] ss:$84 sps:$4 sm:$0xff]  }
  0x65   : > { %6507 = vmatprep.subr.bf16.mxu1 %v7344_v57  ;;  %v7424_v57 = vld [vmem:[%s9693_s1 + $0x2e8] sm:$0xff]  }
  0x66   : > { %3659 = vmatmul.mubr.bf16.gmra.mrb[32].mxu0 %v7244_v27  ;;  %3788 = vmatmul.mubr.bf16.gmra.mrb[32].mxu1 %v7245_v28  ;;  %v7410_v27 = vld [vmem:[%s9693_s1 + $0x340] sm:$0xff]   ;;  %v7326_v28 = vld [vmem:[%s7874_s9 + $0x938] ss:$84 sps:$4 sm:$0xff]  }
  0x67   : > { %3666 = vmatprep.mubr.bf16.mxu0 %v7250_v31  ;;  %3795 = vmatprep.mubr.bf16.mxu1 %v7252_v32  ;;  %v7334_v31 = vld [vmem:[%s7874_s9 + $0x4ac] ss:$84 sps:$4 sm:$0xff]  }
  0x68   : > { %v7336_v32 = vld [vmem:[%s7874_s9 + $0x9e0] ss:$84 sps:$4 sm:$0xff]  }
  0x6e   : > { %3667 = vmatmul.mubr.bf16.gmra.mrb[36].mxu0 %v7254_v33  ;;  %3796 = vmatmul.mubr.bf16.gmra.mrb[36].mxu1 %v7255_v34  ;;  %v7337_v33 = vld [vmem:[%s7874_s9 + $0x4a8] ss:$84 sps:$4 sm:$0xff]  }
  0x6f   : > { %3674 = vmatprep.mubr.bf16.mxu0 %v7258_v37  ;;  %3803 = vmatprep.mubr.bf16.mxu1 %v7260_v38  ;;  %v7338_v34 = vld [vmem:[%s7874_s9 + $0x554] ss:$84 sps:$4 sm:$0xff]   ;;  %v7343_v37 = vld [vmem:[%s7874_s9 + $0x550] ss:$84 sps:$4 sm:$0xff]  }
  0x70   : > { %v7345_v38 = vld [vmem:[%s9693_s1 + $0x280] sm:$0xff]  }
  0x76   : > { %3675 = vmatmul.mubr.bf16.gmra.mrb[40].mxu0 %v7262_v39  ;;  %3804 = vmatmul.mubr.bf16.gmra.mrb[40].mxu1 %v7263_v40  ;;  %v7348_v39 = vld [vmem:[%s7874_s9 + $0x5fc] ss:$84 sps:$4 sm:$0xff]   ;;  %v7350_v40 = vld [vmem:[%s7874_s9 + $0xc4] ss:$84 sps:$4 sm:$0xff]  }
  0x77   : > { %3682 = vmatprep.mubr.bf16.mxu0 %v7266_v41  ;;  %3811 = vmatprep.mubr.bf16.mxu1 %v7268_v42  ;;  %v7360_v41 = vld [vmem:[%s9693_s1 + $0x2c8] sm:$0xff]  }
  0x78   : > { %v7361_v42 = vld [vmem:[%s9693_s1 + $0x288] sm:$0xff]  }
  0x7e   : > { %3683 = vmatmul.mubr.bf16.gmra.mrb[44].mxu0 %v7270_v45  ;;  %3812 = vmatmul.mubr.bf16.gmra.mrb[44].mxu1 %v7271_v46  ;;  %v7353_v45 = vld [vmem:[%s7874_s9 + $0xc0] ss:$84 sps:$4 sm:$0xff]   ;;  %v7354_v46 = vld [vmem:[%s7874_s9 + $0x6a4] ss:$84 sps:$4 sm:$0xff]  }
  0x7f   : > { %3819 = vmatprep.mubr.bf16.mxu1 %v7274_v47  ;;  %3916 = vmatprep.mubr.bf16.mxu0 %v7278_v48  ;;  %v7356_v47 = vld [vmem:[%s7874_s9 + $0x16c] ss:$84 sps:$4 sm:$0xff]   ;;  %v7377_v48 = vld [vmem:[%s9693_s1 + $0x290] sm:$0xff]  }
  0x86   : > { %3820 = vmatmul.mubr.bf16.gmra.mrb[48].mxu1 %v7279_v52  ;;  %3917 = vmatmul.mubr.bf16.vlgmr.msra.gmra.mrb[48].mxu0 %v7276_v51  ;;  %v7359_v51 = vld [vmem:[%s7874_s9 + $0x168] ss:$84 sps:$4 sm:$0xff]  }
  0x87   : > { %6396 = vmatpush3.bf16.msra.mxu0 %v7283_v53  ;;  %3827 = vmatprep.mubr.bf16.mxu1 %v7284_v54  ;;  %v7393_v52 = vld [vmem:[%s9693_s1 + $0x298] sm:$0xff]   ;;  %v7408_v53 = vld [vmem:[%s9693_s1 + $0x2e0] sm:$0xff]  }
  0x88   : > { %3924 = vmatprep.mubr.bf16.mxu0 %v7286_v55  ;;  %6397 = vmatprep.subr.bf16.mxu0 %v7298_v56  ;;  %v7364_v54 = vld [vmem:[%s7874_s9 + $0x74c] ss:$84 sps:$4 sm:$0xff]   ;;  %v7366_v55 = vld [vmem:[%s7874_s9 + $0x214] ss:$84 sps:$4 sm:$0xff]  }
  0x89   : > { %v7409_v56 = vld [vmem:[%s9693_s1 + $0x2a0] sm:$0xff]  }
  0x8b   : > { %6398 = vmatpush3.bf16.msra.mxu0 %v7299_v58  ;;  %v7368_v58 = vld [vmem:[%s7874_s9 + $0x748] ss:$84 sps:$4 sm:$0xff]  }
  0x8c   : > { %6399 = vmatprep.subr.bf16.mxu0 %v7314_v59  ;;  %v7369_v59 = vld [vmem:[%s7874_s9 + $0x210] ss:$84 sps:$4 sm:$0xff]  }
  0x8e   : > { %3828 = vmatmul.mubr.bf16.gmra.mrb[52].mxu1 %v7288_v60  ;;  %3925 = vmatmul.mubr.bf16.gmra.mrb[52].mxu0 %v7289_v61  ;;  %v7425_v60 = vld [vmem:[%s9693_s1 + $0x2a8] sm:$0xff]   ;;  %v7440_v61 = vld [vmem:[%s9693_s1 + $0x2f0] sm:$0xff]  }
  0x8f   : > { %3835 = vmatprep.mubr.bf16.mxu1 %v7290_v62  ;;  %3932 = vmatprep.mubr.bf16.mxu0 %v7292_v63  ;;  %v7370_v62 = vld [vmem:[%s7874_s9 + $0x7f4] ss:$84 sps:$4 sm:$0xff]   ;;  %v7372_v63 = vld [vmem:[%s7874_s9 + $0x2bc] ss:$84 sps:$4 sm:$0xff]  }
  0x90   : > { %6400 = vmatpush3.bf16.msra.mxu0 %v7315_v0  ;;  %v7441_v0 = vld [vmem:[%s9693_s1 + $0x2b0] sm:$0xff]  }
  0x91   : > { %6401 = vmatprep.subr.bf16.mxu0 %v7330_v1  ;;  %v7456_v1 = vld [vmem:[%s9693_s1 + $0x2f8] sm:$0xff]  }
  0x94   : > { %6402 = vmatpush3.bf16.msra.mxu0 %v7331_v3  ;;  %v7472_v3 = vld [vmem:[%s9693_s1 + $0x3c0] sm:$0xff]  }
  0x95   : > { %6403 = vmatprep.subr.bf16.mxu0 %v7346_v4  ;;  %v7374_v4 = vld [vmem:[%s7874_s9 + $0x7f0] ss:$84 sps:$4 sm:$0xff]  }
  0x96   : > { %3836 = vmatmul.mubr.bf16.gmra.mrb[56].mxu1 %v7294_v2  ;;  %3933 = vmatmul.mubr.bf16.gmra.mrb[56].mxu0 %v7295_v5  ;;  %v7457_v2 = vld [vmem:[%s9693_s1 + $0x2b8] sm:$0xff]  }
  0x97   : > { %3843 = vmatprep.mubr.bf16.mxu1 %v7300_v6  ;;  %3940 = vmatprep.mubr.bf16.mxu0 %v7302_v7  ;;  %v7375_v5 = vld [vmem:[%s7874_s9 + $0x2b8] ss:$84 sps:$4 sm:$0xff]   ;;  %v7380_v6 = vld [vmem:[%s7874_s9 + $0x89c] ss:$84 sps:$4 sm:$0xff]  }
  0x98   : > { %6404 = vmatpush3.bf16.msra.mxu0 %v7347_v8  ;;  %v7382_v7 = vld [vmem:[%s7874_s9 + $0x364] ss:$84 sps:$4 sm:$0xff]  }
  0x99   : > { %6405 = vmatprep.subr.bf16.mxu0 %v7362_v9  ;;  %v7384_v8 = vld [vmem:[%s7874_s9 + $0x898] ss:$84 sps:$4 sm:$0xff]   ;;  %v7385_v9 = vld [vmem:[%s7874_s9 + $0x360] ss:$84 sps:$4 sm:$0xff]  }
  0x9c   : > { %6406 = vmatpush3.bf16.msra.mxu0 %v7363_v12  ;;  %v7390_v12 = vld [vmem:[%s7874_s9 + $0x940] ss:$84 sps:$4 sm:$0xff]  }
  0x9d   : > { %6407 = vmatprep.subr.bf16.mxu0 %v7378_v13  ;;  %v7391_v13 = vld [vmem:[%s7874_s9 + $0x408] ss:$84 sps:$4 sm:$0xff]  }
  0x9e   : > { %3844 = vmatmul.mubr.bf16.gmra.mrb[60].mxu1 %v7304_v10  ;;  %3941 = vmatmul.mubr.bf16.gmra.mrb[60].mxu0 %v7305_v11  ;;  %v7386_v10 = vld [vmem:[%s7874_s9 + $0x944] ss:$84 sps:$4 sm:$0xff]   ;;  %v7388_v11 = vld [vmem:[%s7874_s9 + $0x40c] ss:$84 sps:$4 sm:$0xff]  }
  0x9f   : > { %3851 = vmatprep.mubr.bf16.mxu1 %v7306_v14  ;;  %3948 = vmatprep.mubr.bf16.mxu0 %v7308_v15  ;;  %v7396_v14 = vld [vmem:[%s7874_s9 + $0x9ec] ss:$84 sps:$4 sm:$0xff]   ;;  %v7398_v15 = vld [vmem:[%s7874_s9 + $0x4b4] ss:$84 sps:$4 sm:$0xff]  }
  0xa0   : > { %6408 = vmatpush3.bf16.msra.mxu0 %v7379_v16  ;;  %v7400_v16 = vld [vmem:[%s7874_s9 + $0x9e8] ss:$84 sps:$4 sm:$0xff]  }
  0xa1   : > { %6409 = vmatprep.subr.bf16.mxu0 %v7394_v21 }
  0xa4   : > { %6410 = vmatpush3.bf16.msra.mxu0 %v7395_v22 }
  0xa5   : > { %6619 = vmatprep.subr.bf16.mxu0 %v7410_v27  ;;  %v7406_v27 = vld [vmem:[%s7874_s9 + $0x24] ss:$84 sps:$4 sm:$0xff]  }
  0xa6   : > { %3852 = vmatmul.mubr.bf16.gmra.mrb[64].mxu1 %v7310_v17  ;;  %3949 = vmatmul.mubr.bf16.gmra.mrb[64].mxu0 %v7311_v18  ;;  %v7401_v17 = vld [vmem:[%s7874_s9 + $0x4b0] ss:$84 sps:$4 sm:$0xff]  }
  0xa7   : > { %3859 = vmatprep.mubr.bf16.mxu1 %v7316_v19  ;;  %3956 = vmatprep.mubr.bf16.mxu0 %v7318_v20 }
  0xae   : > { %3860 = vmatmul.mubr.bf16.gmra.mrb[68].mxu1 %v7320_v23  ;;  %3957 = vmatmul.mubr.bf16.gmra.mrb[68].mxu0 %v7321_v24 }
  0xaf   : > { %3867 = vmatprep.mubr.bf16.mxu1 %v7322_v25  ;;  %3964 = vmatprep.mubr.bf16.mxu0 %v7324_v26  ;;  %v7402_v26 = vld [vmem:[%s7874_s9 + $0x55c] ss:$84 sps:$4 sm:$0xff]  }
  0xb6   : > { %3868 = vmatmul.mubr.bf16.gmra.mrb[72].mxu1 %v7326_v28  ;;  %3965 = vmatmul.mubr.bf16.gmra.mrb[72].mxu0 %v7327_v29 }
  0xb7   : > { %3875 = vmatprep.mubr.bf16.mxu1 %v7332_v30  ;;  %3972 = vmatprep.mubr.bf16.mxu0 %v7334_v31 }
  0xbe   : > { %3876 = vmatmul.mubr.bf16.gmra.mrb[76].mxu1 %v7336_v32  ;;  %3973 = vmatmul.mubr.bf16.gmra.mrb[76].mxu0 %v7337_v33  ;;  %v7404_v32 = vld [vmem:[%s7874_s9 + $0x20] ss:$84 sps:$4 sm:$0xff]   ;;  %v7407_v33 = vld [vmem:[%s7874_s9 + $0x558] ss:$84 sps:$4 sm:$0xff]  }
  0xbf   : > { %3980 = vmatprep.mubr.bf16.mxu0 %v7338_v34  ;;  %4077 = vmatprep.mubr.bf16.mxu1 %v7342_v35 }
  0xc6   : > { %3981 = vmatmul.mubr.bf16.gmra.mrb[80].mxu0 %v7343_v37  ;;  %4078 = vmatmul.mubr.bf16.vlgmr.msra.gmra.mrb[80].mxu1 %v7340_v36 }
  0xc7   : > { %6508 = vmatpush3.bf16.msra.mxu1 %v7345_v38  ;;  %3988 = vmatprep.mubr.bf16.mxu0 %v7348_v39 }
  0xc8   : > { %4085 = vmatprep.mubr.bf16.mxu1 %v7350_v40  ;;  %6509 = vmatprep.subr.bf16.mxu1 %v7360_v41 }
  0xcb   : > { %6510 = vmatpush3.bf16.msra.mxu1 %v7361_v42  ;;  %v7411_v42 = vld [vmem:[%s9693_s1 + $0x300] sm:$0xff]  }
  0xcc   : > { %6511 = vmatprep.subr.bf16.mxu1 %v7376_v43  ;;  %v7412_v43 = vld [vmem:[%s7874_s9 + $0x604] ss:$84 sps:$4 sm:$0xff]  }
  0xce   : > { %3989 = vmatmul.mubr.bf16.gmra.mrb[84].mxu0 %v7352_v44  ;;  %4086 = vmatmul.mubr.bf16.gmra.mrb[84].mxu1 %v7353_v45 }
  0xcf   : > { %3996 = vmatprep.mubr.bf16.mxu0 %v7354_v46  ;;  %4093 = vmatprep.mubr.bf16.mxu1 %v7356_v47  ;;  %v7414_v46 = vld [vmem:[%s7874_s9 + $0xcc] ss:$84 sps:$4 sm:$0xff]  }
  0xd0   : > { %6512 = vmatpush3.bf16.msra.mxu1 %v7377_v48  ;;  %v7426_v47 = vld [vmem:[%s9693_s1 + $0x348] sm:$0xff]  }
  0xd1   : > { %6513 = vmatprep.subr.bf16.mxu1 %v7392_v49 }
  0xd4   : > { %6514 = vmatpush3.bf16.msra.mxu1 %v7393_v52  ;;  %v7416_v52 = vld [vmem:[%s7874_s9 + $0x600] ss:$84 sps:$4 sm:$0xff]  }
  0xd5   : > { %6515 = vmatprep.subr.bf16.mxu1 %v7408_v53  ;;  %v7417_v53 = vld [vmem:[%s7874_s9 + $0xc8] ss:$84 sps:$4 sm:$0xff]  }
  0xd6   : > { %3997 = vmatmul.mubr.bf16.gmra.mrb[88].mxu0 %v7358_v50  ;;  %4094 = vmatmul.mubr.bf16.gmra.mrb[88].mxu1 %v7359_v51  ;;  %v7427_v50 = vld [vmem:[%s9693_s1 + $0x308] sm:$0xff]   ;;  %v7442_v51 = vld [vmem:[%s9693_s1 + $0x350] sm:$0xff]  }
  0xd7   : > { %4004 = vmatprep.mubr.bf16.mxu0 %v7364_v54  ;;  %4101 = vmatprep.mubr.bf16.mxu1 %v7366_v55 }
  0xd8   : > { %6516 = vmatpush3.bf16.msra.mxu1 %v7409_v56 }
  0xd9   : > { %6517 = vmatprep.subr.bf16.mxu1 %v7424_v57 }
  0xdc   : > { %6518 = vmatpush3.bf16.msra.mxu1 %v7425_v60 }
  0xdd   : > { %6519 = vmatprep.subr.bf16.mxu1 %v7440_v61 }
  0xde   : > { %4005 = vmatmul.mubr.bf16.gmra.mrb[92].mxu0 %v7368_v58  ;;  %4102 = vmatmul.mubr.bf16.gmra.mrb[92].mxu1 %v7369_v59 }
  0xdf   : > { %4012 = vmatprep.mubr.bf16.mxu0 %v7370_v62  ;;  %4109 = vmatprep.mubr.bf16.mxu1 %v7372_v63  ;;  %v7418_v62 = vld [vmem:[%s7874_s9 + $0x6ac] ss:$84 sps:$4 sm:$0xff]   ;;  %v7420_v63 = vld [vmem:[%s7874_s9 + $0x174] ss:$84 sps:$4 sm:$0xff]  }
  0xe0   : > { %6520 = vmatpush3.bf16.msra.mxu1 %v7441_v0 }
  0xe1   : > { %6521 = vmatprep.subr.bf16.mxu1 %v7456_v1 }
  0xe4   : > { %6522 = vmatpush3.bf16.msra.mxu1 %v7457_v2  ;;  %v7443_v2 = vld [vmem:[%s9693_s1 + $0x310] sm:$0xff]  }
  0xe5   : > { %6731 = vmatprep.subr.bf16.mxu1 %v7472_v3 }
  0xe6   : > { %4013 = vmatmul.mubr.bf16.gmra.mrb[96].mxu0 %v7374_v4  ;;  %4110 = vmatmul.mubr.bf16.gmra.mrb[96].mxu1 %v7375_v5  ;;  %v7458_v5 = vld [vmem:[%s9693_s1 + $0x358] sm:$0xff]  }
  0xe7   : > { %4020 = vmatprep.mubr.bf16.mxu0 %v7380_v6  ;;  %4117 = vmatprep.mubr.bf16.mxu1 %v7382_v7  ;;  %v7459_v6 = vld [vmem:[%s9693_s1 + $0x318] sm:$0xff]   ;;  %v7474_v7 = vld [vmem:[%s9693_s1 + $0x360] sm:$0xff]  }
  0xee   : > { %4021 = vmatmul.mubr.bf16.gmra.mrb[100].mxu0 %v7384_v8  ;;  %4118 = vmatmul.mubr.bf16.gmra.mrb[100].mxu1 %v7385_v9  ;;  %v7422_v8 = vld [vmem:[%s7874_s9 + $0x6a8] ss:$84 sps:$4 sm:$0xff]   ;;  %v7423_v9 = vld [vmem:[%s7874_s9 + $0x170] ss:$84 sps:$4 sm:$0xff]  }
  0xef   : > { %4028 = vmatprep.mubr.bf16.mxu0 %v7386_v10  ;;  %4125 = vmatprep.mubr.bf16.mxu1 %v7388_v11 }
  0xf6   : > { %4029 = vmatmul.mubr.bf16.gmra.mrb[104].mxu0 %v7390_v12  ;;  %4126 = vmatmul.mubr.bf16.gmra.mrb[104].mxu1 %v7391_v13 }
  0xf7   : > { %4036 = vmatprep.mubr.bf16.mxu0 %v7396_v14  ;;  %4133 = vmatprep.mubr.bf16.mxu1 %v7398_v15 }
  0xf9   : > { %v6035_v18 = vpop.f32.mrb[0].mxu1  ;;  %v5963_v19 = vpop.f32.mrb[0].mxu0 }
  0xfa   : > { %v6036_v20 = vpop.f32.mrb[1].mxu1  ;;  %v5964_v21 = vpop.f32.mrb[1].mxu0 }
  0xfb   : > { %v8255_v22 = vadd.f32 %v6036_v20, %v6035_v18  ;;  %v6038_v23 = vpop.f32.mrb[2].mxu1  ;;  %v8257_v24 = vadd.f32 %v5964_v21, %v5963_v19  ;;  %v5966_v25 = vpop.f32.mrb[2].mxu0  ;;  %v7428_v18 = vld [vmem:[%s7874_s9 + $0x754] ss:$84 sps:$4 sm:$0xff]   ;;  %v7430_v19 = vld [vmem:[%s7874_s9 + $0x21c] ss:$84 sps:$4 sm:$0xff]  }
  0xfc   : > { %v6039_v28 = vpop.f32.mrb[3].mxu1  ;;  %v5967_v29 = vpop.f32.mrb[3].mxu0 }
  0xfd   : > { %v8261_v30 = vadd.f32 %v6039_v28, %v6038_v23  ;;  %v8263_v31 = vadd.f32 %v5967_v29, %v5966_v25  ;;  %v7475_v23 = vld [vmem:[%s9693_s1 + $0x320] sm:$0xff]   ;;  %v7490_v25 = vld [vmem:[%s9693_s1 + $0x368] sm:$0xff]   ;;  %v7506_v29 = vld [vmem:[%s9693_s1 + $0x370] sm:$0xff]  }
  0xfe   : > { %4037 = vmatmul.mubr.bf16.gmra.mrb[108].mxu0 %v7400_v16  ;;  %4134 = vmatmul.mubr.bf16.gmra.mrb[108].mxu1 %v7401_v17  ;;  %v7491_v28 = vld [vmem:[%s9693_s1 + $0x328] sm:$0xff]  }
  0xff   : > { %4141 = vmatprep.mubr.bf16.mxu1 %v7402_v26  ;;  %4238 = vmatprep.mubr.bf16.mxu0 %v7406_v27 }
 0x101   : > { %v6041_v34 = vpop.f32.mrb[4].mxu1  ;;  %v5969_v35 = vpop.f32.mrb[4].mxu0 }
 0x102   : > { %v6042_v36 = vpop.f32.mrb[5].mxu1  ;;  %v5970_v37 = vpop.f32.mrb[5].mxu0 }
 0x103   : > { %v8267_v38 = vadd.f32 %v6042_v36, %v6041_v34  ;;  %v6044_v39 = vpop.f32.mrb[6].mxu1  ;;  %v8269_v40 = vadd.f32 %v5970_v37, %v5969_v35  ;;  %v5972_v41 = vpop.f32.mrb[6].mxu0  ;;  %v7433_v34 = vld [vmem:[%s7874_s9 + $0x218] ss:$84 sps:$4 sm:$0xff]  }
 0x104   : > { %v6045_v44 = vpop.f32.mrb[7].mxu1  ;;  %v5973_v45 = vpop.f32.mrb[7].mxu0 }
 0x105   : > { %v8279_v48 = vadd.f32 %v6045_v44, %v6044_v39  ;;  %v8281_v49 = vadd.f32 %v5973_v45, %v5972_v41 }
 0x106   : > { %4142 = vmatmul.mubr.bf16.gmra.mrb[112].mxu1 %v7407_v33  ;;  %4239 = vmatmul.mubr.bf16.vlgmr.msra.gmra.mrb[112].mxu0 %v7404_v32  ;;  %v8340_v32 = vld [vmem:[%s9694_s2] ss:$0 sm:$0xff]  ;;  %v7432_v33 = vld [vmem:[%s7874_s9 + $0x750] ss:$84 sps:$4 sm:$0xff]  }
 0x107   : > { %6620 = vmatpush3.bf16.msra.mxu0 %v7411_v42  ;;  %4149 = vmatprep.mubr.bf16.mxu1 %v7412_v43  ;;  %v3597_v41 = vadd.f32 %v8257_v24, %v8340_v32 }
 0x108   : > { %4246 = vmatprep.mubr.bf16.mxu0 %v7414_v46  ;;  %6621 = vmatprep.subr.bf16.mxu0 %v7426_v47  ;;  %v7434_v46 = vld [vmem:[%s7874_s9 + $0x7fc] ss:$84 sps:$4 sm:$0xff]   ;;  %v7436_v47 = vld [vmem:[%s7874_s9 + $0x2c4] ss:$84 sps:$4 sm:$0xff]  }
 0x109   : > { %v6047_v54 = vpop.f32.mrb[8].mxu1  ;;  %v5975_v55 = vpop.f32.mrb[8].mxu0 }
 0x10a   : > { %v6048_v56 = vpop.f32.mrb[9].mxu1  ;;  %v5976_v57 = vpop.f32.mrb[9].mxu0 }
 0x10b   : > { %v8291_v58 = vadd.f32 %v6048_v56, %v6047_v54  ;;  %v6050_v59 = vpop.f32.mrb[10].mxu1  ;;  %v8293_v60 = vadd.f32 %v5976_v57, %v5975_v55  ;;  %v5978_v61 = vpop.f32.mrb[10].mxu0  ;;  %6622 = vmatpush3.bf16.msra.mxu0 %v7427_v50  ;;  %v7522_v56 = vld [vmem:[%s9693_s1 + $0x378] sm:$0xff]  }
 0x10c   : > { %v6051_v0 = vpop.f32.mrb[11].mxu1  ;;  %v5979_v1 = vpop.f32.mrb[11].mxu0  ;;  %6623 = vmatprep.subr.bf16.mxu0 %v7442_v51  ;;  %v7523_v57 = vld [vmem:[%s9693_s1 + $0x338] sm:$0xff]  }
 0x10d   : > { %v8300_v3 = vadd.f32 %v6051_v0, %v6050_v59  ;;  %v8302_v4 = vadd.f32 %v5979_v1, %v5978_v61  ;;  %v7438_v61 = vld [vmem:[%s7874_s9 + $0x7f8] ss:$84 sps:$4 sm:$0xff]  }
 0x10e   : > { %4150 = vmatmul.mubr.bf16.gmra.mrb[116].mxu1 %v7416_v52  ;;  %4247 = vmatmul.mubr.bf16.gmra.mrb[116].mxu0 %v7417_v53  ;;  %v7507_v52 = vld [vmem:[%s9693_s1 + $0x330] sm:$0xff]   ;;  %v3600_v53 = vadd.f32 %v8263_v31, %v8340_v32  ;;  %v7538_v31 = vld [vmem:[%s9693_s1 + $0x440] sm:$0xff]  }
 0x10f   : > { %4157 = vmatprep.mubr.bf16.mxu1 %v7418_v62  ;;  %4254 = vmatprep.mubr.bf16.mxu0 %v7420_v63  ;;  %v7439_v62 = vld [vmem:[%s7874_s9 + $0x2c0] ss:$84 sps:$4 sm:$0xff]  }
 0x110   : > { %6624 = vmatpush3.bf16.msra.mxu0 %v7443_v2 }
 0x111   : > { %v6053_v10 = vpop.f32.mrb[12].mxu1  ;;  %v5981_v11 = vpop.f32.mrb[12].mxu0  ;;  %6625 = vmatprep.subr.bf16.mxu0 %v7458_v5  ;;  %v3605_v5 = vadd.f32 %v8269_v40, %v8340_v32 }
 0x112   : > { %v6054_v12 = vpop.f32.mrb[13].mxu1  ;;  %v5982_v13 = vpop.f32.mrb[13].mxu0 }
 0x113   : > { %v8315_v14 = vadd.f32 %v6054_v12, %v6053_v10  ;;  %v6056_v15 = vpop.f32.mrb[14].mxu1  ;;  %v8317_v16 = vadd.f32 %v5982_v13, %v5981_v11  ;;  %v5984_v17 = vpop.f32.mrb[14].mxu0  ;;  %v7444_v10 = vld [vmem:[%s7874_s9 + $0x8a4] ss:$84 sps:$4 sm:$0xff]   ;;  %v7446_v11 = vld [vmem:[%s7874_s9 + $0x36c] ss:$84 sps:$4 sm:$0xff]  }
 0x114   : > { %v6057_v20 = vpop.f32.mrb[15].mxu1  ;;  %v5985_v21 = vpop.f32.mrb[15].mxu0  ;;  %6626 = vmatpush3.bf16.msra.mxu0 %v7459_v6 }
 0x115   : > { %v8327_v26 = vadd.f32 %v6057_v20, %v6056_v15  ;;  %v8329_v27 = vadd.f32 %v5985_v21, %v5984_v17  ;;  %6627 = vmatprep.subr.bf16.mxu0 %v7474_v7  ;;  %v3608_v15 = vadd.f32 %v8281_v49, %v8340_v32  ;;  %v7448_v20 = vld [vmem:[%s7874_s9 + $0x8a0] ss:$84 sps:$4 sm:$0xff]   ;;  %v7449_v21 = vld [vmem:[%s7874_s9 + $0x368] ss:$84 sps:$4 sm:$0xff]  }
 0x116   : > { %4158 = vmatmul.mubr.bf16.gmra.mrb[120].mxu1 %v7422_v8  ;;  %4255 = vmatmul.mubr.bf16.gmra.mrb[120].mxu0 %v7423_v9 }
 0x117   : > { %4165 = vmatprep.mubr.bf16.mxu1 %v7428_v18  ;;  %4262 = vmatprep.mubr.bf16.mxu0 %v7430_v19 }
 0x118   : > { %6628 = vmatpush3.bf16.msra.mxu0 %v7475_v23 }
 0x119   : > { %v6075_v35 = vpop.f32.mrb[16].mxu1  ;;  %v5987_v36 = vpop.f32.mrb[16].mxu0  ;;  %6629 = vmatprep.subr.bf16.mxu0 %v7490_v25 }
 0x11a   : > { %v6076_v37 = vpop.f32.mrb[17].mxu1  ;;  %v5988_v39 = vpop.f32.mrb[17].mxu0 }
 0x11b   : > { %v6077_v42 = vadd.f32 %v6076_v37, %v6075_v35  ;;  %v6078_v43 = vpop.f32.mrb[18].mxu1  ;;  %v8346_v44 = vadd.f32 %v5988_v39, %v5987_v36  ;;  %v5990_v45 = vpop.f32.mrb[18].mxu0  ;;  %v7450_v37 = vld [vmem:[%s7874_s9 + $0x94c] ss:$84 sps:$4 sm:$0xff]   ;;  %v7452_v39 = vld [vmem:[%s7874_s9 + $0x414] ss:$84 sps:$4 sm:$0xff]  }
 0x11c   : > { %v6079_v50 = vpop.f32.mrb[19].mxu1  ;;  %v5991_v51 = vpop.f32.mrb[19].mxu0  ;;  %6630 = vmatpush3.bf16.msra.mxu0 %v7491_v28 }
 0x11d   : > { %v8355_v24 = vadd.f32 %v6077_v42, %v3597_v41  ;;  %v6080_v54 = vadd.f32 %v6079_v50, %v6078_v43  ;;  %v8357_v55 = vadd.f32 %v5991_v51, %v5990_v45  ;;  %6631 = vmatprep.subr.bf16.mxu0 %v7506_v29  ;;  %v3613_v29 = vadd.f32 %v8293_v60, %v8340_v32  ;;  %v7454_v50 = vld [vmem:[%s7874_s9 + $0x948] ss:$84 sps:$4 sm:$0xff]   ;;  %v7455_v51 = vld [vmem:[%s7874_s9 + $0x410] ss:$84 sps:$4 sm:$0xff]  }
 0x11e   : > { %4166 = vmatmul.mubr.bf16.gmra.mrb[124].mxu1 %v7432_v33  ;;  %4263 = vmatmul.mubr.bf16.gmra.mrb[124].mxu0 %v7433_v34  ;;  %v3616_v43 = vadd.f32 %v8302_v4, %v8340_v32  ;;  %v3621_v4 = vadd.f32 %v8317_v16, %v8340_v32 }
 0x11f   : > { %v8365_v59 = vadd.f32 %v6080_v54, %v3600_v53  ;;  %4173 = vmatprep.mubr.bf16.mxu1 %v7434_v46  ;;  %4270 = vmatprep.mubr.bf16.mxu0 %v7436_v47 }
 0x120   : > { %6632 = vmatpush3.bf16.msra.mxu0 %v7507_v52 }
 0x121   : > { %v6081_v63 = vpop.f32.mrb[20].mxu1  ;;  %v5993_v0 = vpop.f32.mrb[20].mxu0  ;;  %6633 = vmatprep.subr.bf16.mxu0 %v7522_v56 }
 0x122   : > { %v6082_v1 = vpop.f32.mrb[21].mxu1  ;;  %v5994_v2 = vpop.f32.mrb[21].mxu0 }
 0x123   : > { %v6083_v6 = vadd.f32 %v6082_v1, %v6081_v63  ;;  %v6084_v7 = vpop.f32.mrb[22].mxu1  ;;  %v8374_v8 = vadd.f32 %v5994_v2, %v5993_v0  ;;  %v5996_v9 = vpop.f32.mrb[22].mxu0  ;;  %v7460_v63 = vld [vmem:[%s7874_s9 + $0x9f4] ss:$84 sps:$4 sm:$0xff]   ;;  %v7462_v0 = vld [vmem:[%s7874_s9 + $0x4bc] ss:$84 sps:$4 sm:$0xff]  }
 0x124   : > { %v6085_v12 = vpop.f32.mrb[23].mxu1  ;;  %v5997_v13 = vpop.f32.mrb[23].mxu0  ;;  %6634 = vmatpush3.bf16.msra.mxu0 %v7523_v57 }
 0x125   : > { %v8380_v17 = vadd.f32 %v6083_v6, %v3605_v5  ;;  %v6086_v18 = vadd.f32 %v6085_v12, %v6084_v7  ;;  %v8382_v19 = vadd.f32 %v5997_v13, %v5996_v9  ;;  %6843 = vmatprep.subr.bf16.mxu0 %v7538_v31  ;;  %v3624_v5 = vadd.f32 %v8329_v27, %v8340_v32 }
 0x126   : > { %4174 = vmatmul.mubr.bf16.gmra.mrb[128].mxu1 %v7438_v61  ;;  %4271 = vmatmul.mubr.bf16.gmra.mrb[128].mxu0 %v7439_v62  ;;  %v3629_v27 = vadd.f32 %v8346_v44, %v8340_v32 }
 0x127   : > { %v8384_v40 = vadd.f32 %v6086_v18, %v3608_v15  ;;  %4181 = vmatprep.mubr.bf16.mxu1 %v7444_v10  ;;  %4278 = vmatprep.mubr.bf16.mxu0 %v7446_v11  ;;  %v7464_v10 = vld [vmem:[%s7874_s9 + $0x9f0] ss:$84 sps:$4 sm:$0xff]   ;;  %v7465_v11 = vld [vmem:[%s7874_s9 + $0x4b8] ss:$84 sps:$4 sm:$0xff]  }
 0x129   : > { %v6087_v23 = vpop.f32.mrb[24].mxu1  ;;  %v5999_v25 = vpop.f32.mrb[24].mxu0 }
 0x12a   : > { %v6088_v28 = vpop.f32.mrb[25].mxu1  ;;  %v6000_v49 = vpop.f32.mrb[25].mxu0 }
 0x12b   : > { %v6089_v33 = vadd.f32 %v6088_v28, %v6087_v23  ;;  %v6090_v34 = vpop.f32.mrb[26].mxu1  ;;  %v8390_v35 = vadd.f32 %v6000_v49, %v5999_v25  ;;  %v6002_v36 = vpop.f32.mrb[26].mxu0  ;;  %v7466_v28 = vld [vmem:[%s7874_s9 + $0x564] ss:$84 sps:$4 sm:$0xff]   ;;  %v7470_v49 = vld [vmem:[%s7874_s9 + $0x2c] ss:$84 sps:$4 sm:$0xff]  }
 0x12c   : > { %v6091_v41 = vpop.f32.mrb[27].mxu1  ;;  %v6003_v42 = vpop.f32.mrb[27].mxu0 }
 0x12d   : > { %v8396_v45 = vadd.f32 %v6089_v33, %v3613_v29  ;;  %v6092_v46 = vadd.f32 %v6091_v41, %v6090_v34  ;;  %v8398_v47 = vadd.f32 %v6003_v42, %v6002_v36  ;;  %v3632_v34 = vadd.f32 %v8357_v55, %v8340_v32  ;;  %v7468_v41 = vld [vmem:[%s7874_s9 + $0x28] ss:$84 sps:$4 sm:$0xff]   ;;  %v7471_v42 = vld [vmem:[%s7874_s9 + $0x560] ss:$84 sps:$4 sm:$0xff]  }
 0x12e   : > { %4182 = vmatmul.mubr.bf16.gmra.mrb[132].mxu1 %v7448_v20  ;;  %4279 = vmatmul.mubr.bf16.gmra.mrb[132].mxu0 %v7449_v21  ;;  %v3637_v55 = vadd.f32 %v8374_v8, %v8340_v32  ;;  %v3640_v8 = vadd.f32 %v8382_v19, %v8340_v32  ;;  %v7504_v19 = vld [vmem:[%s9693_s1 + $0x3d0] sm:$0xff]  }
 0x12f   : > { %v8400_v60 = vadd.f32 %v6092_v46, %v3616_v43  ;;  %4189 = vmatprep.mubr.bf16.mxu1 %v7450_v37  ;;  %4286 = vmatprep.mubr.bf16.mxu0 %v7452_v39 }
 0x131   : > { %v6093_v52 = vpop.f32.mrb[28].mxu1  ;;  %v6005_v53 = vpop.f32.mrb[28].mxu0 }
 0x132   : > { %v6094_v54 = vpop.f32.mrb[29].mxu1  ;;  %v6006_v56 = vpop.f32.mrb[29].mxu0 }
 0x133   : > { %v6095_v57 = vadd.f32 %v6094_v54, %v6093_v52  ;;  %v6096_v31 = vpop.f32.mrb[30].mxu1  ;;  %v8406_v61 = vadd.f32 %v6006_v56, %v6005_v53  ;;  %v6008_v62 = vpop.f32.mrb[30].mxu0 }
 0x134   : > { %v6097_v1 = vpop.f32.mrb[31].mxu1  ;;  %v6009_v2 = vpop.f32.mrb[31].mxu0 }
 0x135   : > { %v8412_v6 = vadd.f32 %v6095_v57, %v3621_v4  ;;  %v6098_v7 = vadd.f32 %v6097_v1, %v6096_v31  ;;  %v8414_v9 = vadd.f32 %v6009_v2, %v6008_v62  ;;  %v7473_v4 = vld [vmem:[%s9693_s1 + $0x380] sm:$0xff]  }
 0x136   : > { %4190 = vmatmul.mubr.bf16.gmra.mrb[136].mxu1 %v7454_v50  ;;  %4287 = vmatmul.mubr.bf16.gmra.mrb[136].mxu0 %v7455_v51  ;;  %v7476_v57 = vld [vmem:[%s7874_s9 + $0x60c] ss:$84 sps:$4 sm:$0xff]  }
 0x137   : > { %v8416_v16 = vadd.f32 %v6098_v7, %v3624_v5  ;;  %4197 = vmatprep.mubr.bf16.mxu1 %v7460_v63  ;;  %4294 = vmatprep.mubr.bf16.mxu0 %v7462_v0  ;;  %v7478_v63 = vld [vmem:[%s7874_s9 + $0xd4] ss:$84 sps:$4 sm:$0xff]  }
 0x138   : > { %v7488_v0 = vld [vmem:[%s9693_s1 + $0x3c8] sm:$0xff]  }
 0x139   : > { %v6099_v12 = vpop.f32.mrb[32].mxu1  ;;  %v6011_v13 = vpop.f32.mrb[32].mxu0 }
 0x13a   : > { %v6100_v15 = vpop.f32.mrb[33].mxu1  ;;  %v6012_v18 = vpop.f32.mrb[33].mxu0 }
 0x13b   : > { %v6101_v20 = vadd.f32 %v6100_v15, %v6099_v12  ;;  %v6102_v21 = vpop.f32.mrb[34].mxu1  ;;  %v8422_v23 = vadd.f32 %v6012_v18, %v6011_v13  ;;  %v6014_v25 = vpop.f32.mrb[34].mxu0  ;;  %v7481_v12 = vld [vmem:[%s7874_s9 + $0xd0] ss:$84 sps:$4 sm:$0xff]  }
 0x13c   : > { %v6103_v29 = vpop.f32.mrb[35].mxu1  ;;  %v6015_v33 = vpop.f32.mrb[35].mxu0 }
 0x13d   : > { %v8428_v36 = vadd.f32 %v6101_v20, %v3629_v27  ;;  %v6104_v37 = vadd.f32 %v6103_v29, %v6102_v21  ;;  %v8430_v39 = vadd.f32 %v6015_v33, %v6014_v25  ;;  %v3645_v20 = vadd.f32 %v8390_v35, %v8340_v32  ;;  %v7482_v29 = vld [vmem:[%s7874_s9 + $0x6b4] ss:$84 sps:$4 sm:$0xff]   ;;  %v7484_v33 = vld [vmem:[%s7874_s9 + $0x17c] ss:$84 sps:$4 sm:$0xff]  }
 0x13e   : > { %4198 = vmatmul.mubr.bf16.gmra.mrb[140].mxu1 %v7464_v10  ;;  %4295 = vmatmul.mubr.bf16.gmra.mrb[140].mxu0 %v7465_v11  ;;  %v7489_v10 = vld [vmem:[%s9693_s1 + $0x388] sm:$0xff]   ;;  %v3648_v35 = vadd.f32 %v8398_v47, %v8340_v32  ;;  %v7536_v47 = vld [vmem:[%s9693_s1 + $0x3e0] sm:$0xff]  }
 0x13f   : > { %v8432_v44 = vadd.f32 %v6104_v37, %v3632_v34  ;;  %4302 = vmatprep.mubr.bf16.mxu0 %v7466_v28  ;;  %4399 = vmatprep.mubr.bf16.mxu1 %v7470_v49  ;;  %v7480_v11 = vld [vmem:[%s7874_s9 + $0x608] ss:$84 sps:$4 sm:$0xff]  }
 0x141   : > { %v6105_v43 = vpop.f32.mrb[36].mxu1  ;;  %v6017_v46 = vpop.f32.mrb[36].mxu0 }
 0x142   : > { %v6106_v50 = vpop.f32.mrb[37].mxu1  ;;  %v6018_v51 = vpop.f32.mrb[37].mxu0 }
 0x143   : > { %v6107_v52 = vadd.f32 %v6106_v50, %v6105_v43  ;;  %v6108_v53 = vpop.f32.mrb[38].mxu1  ;;  %v8438_v54 = vadd.f32 %v6018_v51, %v6017_v46  ;;  %v6020_v56 = vpop.f32.mrb[38].mxu0  ;;  %v7520_v50 = vld [vmem:[%s9693_s1 + $0x3d8] sm:$0xff]  }
 0x144   : > { %v6109_v31 = vpop.f32.mrb[39].mxu1  ;;  %v6021_v62 = vpop.f32.mrb[39].mxu0  ;;  %v7521_v51 = vld [vmem:[%s9693_s1 + $0x398] sm:$0xff]  }
 0x145   : > { %v8450_v1 = vadd.f32 %v6107_v52, %v3637_v55  ;;  %v6110_v2 = vadd.f32 %v6109_v31, %v6108_v53  ;;  %v8452_v5 = vadd.f32 %v6021_v62, %v6020_v56  ;;  %v7486_v52 = vld [vmem:[%s7874_s9 + $0x6b0] ss:$84 sps:$4 sm:$0xff]   ;;  %v7487_v53 = vld [vmem:[%s7874_s9 + $0x178] ss:$84 sps:$4 sm:$0xff]   ;;  %v3653_v62 = vadd.f32 %v8406_v61, %v8340_v32 }
 0x146   : > { %4303 = vmatmul.mubr.bf16.gmra.mrb[144].mxu0 %v7471_v42  ;;  %4400 = vmatmul.mubr.bf16.vlgmr.msra.gmra.mrb[144].mxu1 %v7468_v41  ;;  %v7505_v41 = vld [vmem:[%s9693_s1 + $0x390] sm:$0xff]   ;;  %v7552_v61 = vld [vmem:[%s9693_s1 + $0x3e8] sm:$0xff]  }
 0x147   : > { %v8454_v7 = vadd.f32 %v6110_v2, %v3640_v8  ;;  %6732 = vmatpush3.bf16.msra.mxu1 %v7473_v4  ;;  %4310 = vmatprep.mubr.bf16.mxu0 %v7476_v57 }
 0x148   : > { %4407 = vmatprep.mubr.bf16.mxu1 %v7478_v63  ;;  %6733 = vmatprep.subr.bf16.mxu1 %v7488_v0 }
 0x149   : > { %v6111_v13 = vpop.f32.mrb[40].mxu1  ;;  %v6023_v15 = vpop.f32.mrb[40].mxu0 }
 0x14a   : > { %v6112_v18 = vpop.f32.mrb[41].mxu1  ;;  %v6024_v27 = vpop.f32.mrb[41].mxu0 }
 0x14b   : > { %v6113_v21 = vadd.f32 %v6112_v18, %v6111_v13  ;;  %v6114_v25 = vpop.f32.mrb[42].mxu1  ;;  %v8466_v28 = vadd.f32 %v6024_v27, %v6023_v15  ;;  %v6026_v49 = vpop.f32.mrb[42].mxu0  ;;  %6734 = vmatpush3.bf16.msra.mxu1 %v7489_v10  ;;  %v7492_v10 = vld [vmem:[%s7874_s9 + $0x75c] ss:$84 sps:$4 sm:$0xff]   ;;  %v7537_v13 = vld [vmem:[%s9693_s1 + $0x3a0] sm:$0xff]   ;;  %v3656_v15 = vadd.f32 %v8414_v9, %v8340_v32 }
 0x14c   : > { %v6115_v34 = vpop.f32.mrb[43].mxu1  ;;  %v6027_v37 = vpop.f32.mrb[43].mxu0  ;;  %6735 = vmatprep.subr.bf16.mxu1 %v7504_v19  ;;  %v7494_v19 = vld [vmem:[%s7874_s9 + $0x224] ss:$84 sps:$4 sm:$0xff]   ;;  %v7568_v9 = vld [vmem:[%s9693_s1 + $0x3f0] sm:$0xff]  }
 0x14d   : > { %v8475_v42 = vadd.f32 %v6113_v21, %v3645_v20  ;;  %v6116_v43 = vadd.f32 %v6115_v34, %v6114_v25  ;;  %v8477_v46 = vadd.f32 %v6027_v37, %v6026_v49  ;;  %v7553_v25 = vld [vmem:[%s9693_s1 + $0x3a8] sm:$0xff]  }
 0x14e   : > { %4311 = vmatmul.mubr.bf16.gmra.mrb[148].mxu0 %v7480_v11  ;;  %4408 = vmatmul.mubr.bf16.gmra.mrb[148].mxu1 %v7481_v12  ;;  %v7496_v49 = vld [vmem:[%s7874_s9 + $0x758] ss:$84 sps:$4 sm:$0xff]  }
 0x14f   : > { %v8485_v55 = vadd.f32 %v6116_v43, %v3648_v35  ;;  %4318 = vmatprep.mubr.bf16.mxu0 %v7482_v29  ;;  %4415 = vmatprep.mubr.bf16.mxu1 %v7484_v33  ;;  %v7497_v29 = vld [vmem:[%s7874_s9 + $0x220] ss:$84 sps:$4 sm:$0xff]   ;;  %v3661_v35 = vadd.f32 %v8422_v23, %v8340_v32 }
 0x150   : > { %6736 = vmatpush3.bf16.msra.mxu1 %v7505_v41 }
 0x151   : > { %v6117_v56 = vpop.f32.mrb[44].mxu1  ;;  %v6029_v4 = vpop.f32.mrb[44].mxu0  ;;  %6737 = vmatprep.subr.bf16.mxu1 %v7520_v50 }
 0x152   : > { %v6118_v57 = vpop.f32.mrb[45].mxu1  ;;  %v6030_v31 = vpop.f32.mrb[45].mxu0 }
 0x153   : > { %v6119_v63 = vadd.f32 %v6118_v57, %v6117_v56  ;;  %v6120_v0 = vpop.f32.mrb[46].mxu1  ;;  %v8494_v8 = vadd.f32 %v6030_v31, %v6029_v4  ;;  %v6032_v2 = vpop.f32.mrb[46].mxu0  ;;  %v3664_v56 = vadd.f32 %v8430_v39, %v8340_v32  ;;  %v7569_v31 = vld [vmem:[%s9693_s1 + $0x3b0] sm:$0xff]   ;;  %v7584_v39 = vld [vmem:[%s9693_s1 + $0x3f8] sm:$0xff]  }
 0x154   : > { %v6121_v11 = vpop.f32.mrb[47].mxu1  ;;  %v6033_v12 = vpop.f32.mrb[47].mxu0  ;;  %6738 = vmatpush3.bf16.msra.mxu1 %v7521_v51 }
 0x155   : > { %v8506_v18 = vadd.f32 %v6119_v63, %v3653_v62  ;;  %v6122_v27 = vadd.f32 %v6121_v11, %v6120_v0  ;;  %v8508_v20 = vadd.f32 %v6033_v12, %v6032_v2  ;;  %6739 = vmatprep.subr.bf16.mxu1 %v7536_v47  ;;  %v7585_v2 = vld [vmem:[%s9693_s1 + $0x3b8] sm:$0xff]   ;;  %v7502_v11 = vld [vmem:[%s7874_s9 + $0x800] ss:$84 sps:$4 sm:$0xff]  }
 0x156   : > { %4319 = vmatmul.mubr.bf16.gmra.mrb[152].mxu0 %v7486_v52  ;;  %4416 = vmatmul.mubr.bf16.gmra.mrb[152].mxu1 %v7487_v53  ;;  %v7498_v52 = vld [vmem:[%s7874_s9 + $0x804] ss:$84 sps:$4 sm:$0xff]   ;;  %v7500_v53 = vld [vmem:[%s7874_s9 + $0x2cc] ss:$84 sps:$4 sm:$0xff]   ;;  %v7503_v12 = vld [vmem:[%s7874_s9 + $0x2c8] ss:$84 sps:$4 sm:$0xff]  }
 0x157   : > { %v8510_v21 = vadd.f32 %v6122_v27, %v3656_v15  ;;  %4326 = vmatprep.mubr.bf16.mxu0 %v7492_v10  ;;  %4423 = vmatprep.mubr.bf16.mxu1 %v7494_v19 }
 0x158   : > { %6740 = vmatpush3.bf16.msra.mxu1 %v7537_v13 }
 0x159   : > { %v6123_v33 = vpop.f32.mrb[48].mxu1  ;;  %v6187_v34 = vpop.f32.mrb[48].mxu0  ;;  %6741 = vmatprep.subr.bf16.mxu1 %v7552_v61 }
 0x15a   : > { %v6124_v37 = vpop.f32.mrb[49].mxu1  ;;  %v6188_v41 = vpop.f32.mrb[49].mxu0 }
 0x15b   : > { %v6125_v43 = vadd.f32 %v6124_v37, %v6123_v33  ;;  %v6189_v50 = vadd.f32 %v6188_v41, %v6187_v34  ;;  %v6126_v51 = vpop.f32.mrb[50].mxu1  ;;  %v6190_v47 = vpop.f32.mrb[50].mxu0  ;;  %v7508_v33 = vld [vmem:[%s7874_s9 + $0x8ac] ss:$84 sps:$4 sm:$0xff]   ;;  %v7510_v34 = vld [vmem:[%s7874_s9 + $0x374] ss:$84 sps:$4 sm:$0xff]   ;;  %v3672_v37 = vadd.f32 %v8452_v5, %v8340_v32 }
 0x15c   : > { %v6127_v4 = vpop.f32.mrb[51].mxu1  ;;  %v6191_v57 = vpop.f32.mrb[51].mxu0  ;;  %6742 = vmatpush3.bf16.msra.mxu1 %v7553_v25  ;;  %v3669_v25 = vadd.f32 %v8438_v54, %v8340_v32 }
 0x15d   : > { %v6128_v62 = vadd.f32 %v6127_v4, %v6126_v51  ;;  %v6192_v23 = vadd.f32 %v6191_v57, %v6190_v47  ;;  %v8529_v63 = vadd.f32 %v6125_v43, %v3661_v35  ;;  %v8532_v0 = vadd.f32 %v6189_v50, %v8355_v24  ;;  %6743 = vmatprep.subr.bf16.mxu1 %v7568_v9  ;;  %v7600_v24 = vld [vmem:[%s9693_s1 + $0x4c0] sm:$0xff]  }
 0x15e   : > { %4327 = vmatmul.mubr.bf16.gmra.mrb[156].mxu0 %v7496_v49  ;;  %4424 = vmatmul.mubr.bf16.gmra.mrb[156].mxu1 %v7497_v29 }
 0x15f   : > { %4334 = vmatprep.mubr.bf16.mxu0 %v7498_v52  ;;  %4431 = vmatprep.mubr.bf16.mxu1 %v7500_v53  ;;  %v8540_v10 = vadd.f32 %v6128_v62, %v3664_v56  ;;  %v8543_v19 = vadd.f32 %v6192_v23, %v8365_v59  ;;  %v7512_v52 = vld [vmem:[%s7874_s9 + $0x8a8] ss:$84 sps:$4 sm:$0xff]   ;;  %v7513_v53 = vld [vmem:[%s7874_s9 + $0x370] ss:$84 sps:$4 sm:$0xff]  }
 0x160   : > { %6744 = vmatpush3.bf16.msra.mxu1 %v7569_v31 }
 0x161   : > { %v6129_v13 = vpop.f32.mrb[52].mxu1  ;;  %v6193_v61 = vpop.f32.mrb[52].mxu0  ;;  %6745 = vmatprep.subr.bf16.mxu1 %v7584_v39 }
 0x162   : > { %v6130_v15 = vpop.f32.mrb[53].mxu1  ;;  %v6194_v27 = vpop.f32.mrb[53].mxu0 }
 0x163   : > { %v6131_v9 = vadd.f32 %v6130_v15, %v6129_v13  ;;  %v6195_v49 = vadd.f32 %v6194_v27, %v6193_v61  ;;  %v6132_v59 = vpop.f32.mrb[54].mxu1  ;;  %v6196_v29 = vpop.f32.mrb[54].mxu0 }
 0x164   : > { %v6133_v41 = vpop.f32.mrb[55].mxu1  ;;  %v6197_v35 = vpop.f32.mrb[55].mxu0  ;;  %6746 = vmatpush3.bf16.msra.mxu1 %v7585_v2 }
 0x165   : > { %v6134_v43 = vadd.f32 %v6133_v41, %v6132_v59  ;;  %v6198_v50 = vadd.f32 %v6197_v35, %v6196_v29  ;;  %v8556_v51 = vadd.f32 %v6131_v9, %v3669_v25  ;;  %v8559_v54 = vadd.f32 %v6195_v49, %v8380_v17  ;;  %6955 = vmatprep.subr.bf16.mxu1 %v7600_v24  ;;  %v7514_v24 = vld [vmem:[%s7874_s9 + $0x954] ss:$84 sps:$4 sm:$0xff]  }
 0x166   : > { %4335 = vmatmul.mubr.bf16.gmra.mrb[160].mxu0 %v7502_v11  ;;  %4432 = vmatmul.mubr.bf16.gmra.mrb[160].mxu1 %v7503_v12  ;;  %v3677_v17 = vadd.f32 %v8466_v28, %v8340_v32  ;;  %v7516_v11 = vld [vmem:[%s7874_s9 + $0x41c] ss:$84 sps:$4 sm:$0xff]   ;;  %v3680_v12 = vadd.f32 %v8477_v46, %v8340_v32 }
 0x167   : > { %4342 = vmatprep.mubr.bf16.mxu0 %v7508_v33  ;;  %4439 = vmatprep.mubr.bf16.mxu1 %v7510_v34  ;;  %v8561_v47 = vadd.f32 %v6134_v43, %v3672_v37  ;;  %v8564_v5 = vadd.f32 %v6198_v50, %v8384_v40  ;;  %v7518_v33 = vld [vmem:[%s7874_s9 + $0x950] ss:$84 sps:$4 sm:$0xff]   ;;  %v7519_v34 = vld [vmem:[%s7874_s9 + $0x418] ss:$84 sps:$4 sm:$0xff]  }
 0x168   : > { %v7524_v50 = vld [vmem:[%s7874_s9 + $0x9fc] ss:$84 sps:$4 sm:$0xff]  }
 0x169   : > { %v6135_v56 = vpop.f32.mrb[56].mxu1  ;;  %v6199_v4 = vpop.f32.mrb[56].mxu0 }
 0x16a   : > { %v6136_v57 = vpop.f32.mrb[57].mxu1  ;;  %v6200_v31 = vpop.f32.mrb[57].mxu0 }
 0x16b   : > { %v6137_v62 = vadd.f32 %v6136_v57, %v6135_v56  ;;  %v6201_v23 = vadd.f32 %v6200_v31, %v6199_v4  ;;  %v6138_v39 = vpop.f32.mrb[58].mxu1  ;;  %v6202_v2 = vpop.f32.mrb[58].mxu0 }
 0x16c   : > { %v6139_v40 = vpop.f32.mrb[59].mxu1  ;;  %v6203_v13 = vpop.f32.mrb[59].mxu0 }
 0x16d   : > { %v6140_v61 = vadd.f32 %v6139_v40, %v6138_v39  ;;  %v6204_v15 = vadd.f32 %v6203_v13, %v6202_v2  ;;  %v8574_v27 = vadd.f32 %v6137_v62, %v3677_v17  ;;  %v8577_v25 = vadd.f32 %v6201_v23, %v8396_v45  ;;  %v7528_v2 = vld [vmem:[%s7874_s9 + $0x9f8] ss:$84 sps:$4 sm:$0xff]  }
 0x16e   : > { %4343 = vmatmul.mubr.bf16.gmra.mrb[164].mxu0 %v7512_v52  ;;  %4440 = vmatmul.mubr.bf16.gmra.mrb[164].mxu1 %v7513_v53  ;;  %v3685_v45 = vadd.f32 %v8494_v8, %v8340_v32  ;;  %v7526_v52 = vld [vmem:[%s7874_s9 + $0x4c4] ss:$84 sps:$4 sm:$0xff]   ;;  %v3688_v53 = vadd.f32 %v8508_v20, %v8340_v32 }
 0x16f   : > { %4350 = vmatprep.mubr.bf16.mxu0 %v7514_v24  ;;  %4447 = vmatprep.mubr.bf16.mxu1 %v7516_v11  ;;  %v8579_v28 = vadd.f32 %v6140_v61, %v3680_v12  ;;  %v8582_v46 = vadd.f32 %v6204_v15, %v8400_v60  ;;  %v7529_v24 = vld [vmem:[%s7874_s9 + $0x4c0] ss:$84 sps:$4 sm:$0xff]  }
 0x170   : > { %v7534_v15 = vld [vmem:[%s7874_s9 + $0x34] ss:$84 sps:$4 sm:$0xff]  }
 0x171   : > { %v6141_v9 = vpop.f32.mrb[60].mxu1  ;;  %v6205_v49 = vpop.f32.mrb[60].mxu0 }
 0x172   : > { %v6142_v59 = vpop.f32.mrb[61].mxu1  ;;  %v6206_v29 = vpop.f32.mrb[61].mxu0 }
 0x173   : > { %v6143_v37 = vadd.f32 %v6142_v59, %v6141_v9  ;;  %v6207_v41 = vadd.f32 %v6206_v29, %v6205_v49  ;;  %v6144_v35 = vpop.f32.mrb[62].mxu1  ;;  %v6208_v43 = vpop.f32.mrb[62].mxu0 }
 0x174   : > { %v6145_v60 = vpop.f32.mrb[63].mxu1  ;;  %v6209_v56 = vpop.f32.mrb[63].mxu0 }
 0x175   : > { %v6146_v4 = vadd.f32 %v6145_v60, %v6144_v35  ;;  %v6210_v57 = vadd.f32 %v6209_v56, %v6208_v43  ;;  %v8592_v31 = vadd.f32 %v6143_v37, %v3685_v45  ;;  %v8595_v17 = vadd.f32 %v6207_v41, %v8412_v6  ;;  %v8607_v6 = vld [vmem:[%s9694_s2] ss:$0 sm:$0xff] }
 0x176   : > { %4351 = vmatmul.mubr.bf16.gmra.mrb[168].mxu0 %v7518_v33  ;;  %4448 = vmatmul.mubr.bf16.gmra.mrb[168].mxu1 %v7519_v34  ;;  %v3693_v11 = vadd.f32 %v8607_v6, %v8255_v22  ;;  %v3696_v9 = vadd.f32 %v8607_v6, %v8261_v30 }
 0x177   : > { %4358 = vmatprep.mubr.bf16.mxu0 %v7524_v50  ;;  %4455 = vmatprep.mubr.bf16.mxu1 %v7526_v52  ;;  %v8597_v8 = vadd.f32 %v6146_v4, %v3688_v53  ;;  %v8600_v32 = vadd.f32 %v6210_v57, %v8416_v16  ;;  %v7530_v16 = vld [vmem:[%s7874_s9 + $0x56c] ss:$84 sps:$4 sm:$0xff]   ;;  %v7532_v50 = vld [vmem:[%s7874_s9 + $0x30] ss:$84 sps:$4 sm:$0xff]   ;;  %v7535_v52 = vld [vmem:[%s7874_s9 + $0x568] ss:$84 sps:$4 sm:$0xff]  }
 0x178   : > { %v7539_v57 = vld [vmem:[%s9693_s1 + $0x400] sm:$0xff]  }
 0x179   : > { %v6147_v20 = vpop.f32.mrb[64].mxu1  ;;  %v6211_v62 = vpop.f32.mrb[64].mxu0 }
 0x17a   : > { %v6148_v23 = vpop.f32.mrb[65].mxu1  ;;  %v6212_v39 = vpop.f32.mrb[65].mxu0 }
 0x17b   : > { %v6149_v12 = vadd.f32 %v6148_v23, %v6147_v20  ;;  %v6213_v40 = vadd.f32 %v6212_v39, %v6211_v62  ;;  %v6150_v13 = vpop.f32.mrb[66].mxu1  ;;  %v6214_v61 = vpop.f32.mrb[66].mxu0  ;;  %v3704_v20 = vadd.f32 %v8607_v6, %v8279_v48  ;;  %v7542_v39 = vld [vmem:[%s7874_s9 + $0xdc] ss:$84 sps:$4 sm:$0xff]   ;;  %v7555_v48 = vld [vmem:[%s9693_s1 + $0x408] sm:$0xff]  }
 0x17c   : > { %v6151_v49 = vpop.f32.mrb[67].mxu1  ;;  %v6215_v59 = vpop.f32.mrb[67].mxu0 }
 0x17d   : > { %v6152_v29 = vadd.f32 %v6151_v49, %v6150_v13  ;;  %v6216_v33 = vadd.f32 %v6215_v59, %v6214_v61  ;;  %v8615_v34 = vadd.f32 %v6149_v12, %v3693_v11  ;;  %v8618_v45 = vadd.f32 %v6213_v40, %v8428_v36  ;;  %v7544_v49 = vld [vmem:[%s7874_s9 + $0x610] ss:$84 sps:$4 sm:$0xff]   ;;  %v7545_v59 = vld [vmem:[%s7874_s9 + $0xd8] ss:$84 sps:$4 sm:$0xff]  }
 0x17e   : > { %4359 = vmatmul.mubr.bf16.gmra.mrb[172].mxu0 %v7528_v2  ;;  %4456 = vmatmul.mubr.bf16.gmra.mrb[172].mxu1 %v7529_v24  ;;  %v3701_v36 = vadd.f32 %v8607_v6, %v8267_v38  ;;  %v7554_v2 = vld [vmem:[%s9693_s1 + $0x448] sm:$0xff]  }
 0x17f   : > { %4463 = vmatprep.mubr.bf16.mxu1 %v7530_v16  ;;  %4560 = vmatprep.mubr.bf16.mxu0 %v7534_v15  ;;  %v8620_v22 = vadd.f32 %v6152_v29, %v3696_v9  ;;  %v8623_v30 = vadd.f32 %v6216_v33, %v8432_v44  ;;  %v7540_v44 = vld [vmem:[%s7874_s9 + $0x614] ss:$84 sps:$4 sm:$0xff]   ;;  %v3709_v29 = vadd.f32 %v8607_v6, %v8291_v58  ;;  %v7586_v58 = vld [vmem:[%s9693_s1 + $0x458] sm:$0xff]  }
 0x181   : > { %v6153_v37 = vpop.f32.mrb[68].mxu1  ;;  %v6217_v41 = vpop.f32.mrb[68].mxu0 }
 0x182   : > { %v6154_v35 = vpop.f32.mrb[69].mxu1  ;;  %v6218_v43 = vpop.f32.mrb[69].mxu0 }
 0x183   : > { %v6155_v53 = vadd.f32 %v6154_v35, %v6153_v37  ;;  %v6219_v60 = vadd.f32 %v6218_v43, %v6217_v41  ;;  %v6156_v56 = vpop.f32.mrb[70].mxu1  ;;  %v6220_v4 = vpop.f32.mrb[70].mxu0  ;;  %v7546_v35 = vld [vmem:[%s7874_s9 + $0x6bc] ss:$84 sps:$4 sm:$0xff]   ;;  %v7548_v43 = vld [vmem:[%s7874_s9 + $0x184] ss:$84 sps:$4 sm:$0xff]  }
 0x184   : > { %v6157_v62 = vpop.f32.mrb[71].mxu1  ;;  %v6221_v23 = vpop.f32.mrb[71].mxu0 }
 0x185   : > { %v6158_v38 = vadd.f32 %v6157_v62, %v6156_v56  ;;  %v6222_v24 = vadd.f32 %v6221_v23, %v6220_v4  ;;  %v8639_v11 = vadd.f32 %v6155_v53, %v3701_v36  ;;  %v8642_v12 = vadd.f32 %v6219_v60, %v8450_v1  ;;  %v7570_v1 = vld [vmem:[%s9693_s1 + $0x450] sm:$0xff]   ;;  %v7602_v23 = vld [vmem:[%s9693_s1 + $0x460] sm:$0xff]  }
 0x186   : > { %4464 = vmatmul.mubr.bf16.gmra.mrb[176].mxu1 %v7535_v52  ;;  %4561 = vmatmul.mubr.bf16.vlgmr.msra.gmra.mrb[176].mxu0 %v7532_v50  ;;  %v3712_v50 = vadd.f32 %v8607_v6, %v8300_v3  ;;  %v7571_v53 = vld [vmem:[%s9693_s1 + $0x410] sm:$0xff]  }
 0x187   : > { %6844 = vmatpush3.bf16.msra.mxu0 %v7539_v57  ;;  %4471 = vmatprep.mubr.bf16.mxu1 %v7540_v44  ;;  %v8647_v40 = vadd.f32 %v6158_v38, %v3704_v20  ;;  %v8650_v13 = vadd.f32 %v6222_v24, %v8454_v7  ;;  %v7587_v20 = vld [vmem:[%s9693_s1 + $0x418] sm:$0xff]   ;;  %v7551_v24 = vld [vmem:[%s7874_s9 + $0x180] ss:$84 sps:$4 sm:$0xff]  }
 0x188   : > { %4568 = vmatprep.mubr.bf16.mxu0 %v7542_v39  ;;  %6845 = vmatprep.subr.bf16.mxu0 %v7554_v2  ;;  %v7550_v38 = vld [vmem:[%s7874_s9 + $0x6b8] ss:$84 sps:$4 sm:$0xff]  }
 0x189   : > { %v6159_v61 = vpop.f32.mrb[72].mxu1  ;;  %v6223_v16 = vpop.f32.mrb[72].mxu0 }
 0x18a   : > { %v6160_v15 = vpop.f32.mrb[73].mxu1  ;;  %v6224_v9 = vpop.f32.mrb[73].mxu0 }
 0x18b   : > { %v6161_v33 = vadd.f32 %v6160_v15, %v6159_v61  ;;  %v6225_v37 = vadd.f32 %v6224_v9, %v6223_v16  ;;  %v6162_v7 = vpop.f32.mrb[74].mxu1  ;;  %v6226_v41 = vpop.f32.mrb[74].mxu0  ;;  %6846 = vmatpush3.bf16.msra.mxu0 %v7555_v48  ;;  %v7556_v15 = vld [vmem:[%s7874_s9 + $0x764] ss:$84 sps:$4 sm:$0xff]   ;;  %v7558_v9 = vld [vmem:[%s7874_s9 + $0x22c] ss:$84 sps:$4 sm:$0xff]  }
 0x18c   : > { %v6163_v52 = vpop.f32.mrb[75].mxu1  ;;  %v6227_v36 = vpop.f32.mrb[75].mxu0  ;;  %6847 = vmatprep.subr.bf16.mxu0 %v7570_v1 }
 0x18d   : > { %v6164_v60 = vadd.f32 %v6163_v52, %v6162_v7  ;;  %v6228_v56 = vadd.f32 %v6227_v36, %v6226_v41  ;;  %v8669_v4 = vadd.f32 %v6161_v33, %v3709_v29  ;;  %v8672_v57 = vadd.f32 %v6225_v37, %v8475_v42  ;;  %v7603_v33 = vld [vmem:[%s9693_s1 + $0x420] sm:$0xff]   ;;  %v7634_v52 = vld [vmem:[%s9693_s1 + $0x470] sm:$0xff]  }
 0x18e   : > { %4472 = vmatmul.mubr.bf16.gmra.mrb[180].mxu1 %v7544_v49  ;;  %4569 = vmatmul.mubr.bf16.gmra.mrb[180].mxu0 %v7545_v59  ;;  %v3720_v49 = vadd.f32 %v8607_v6, %v8327_v26  ;;  %v7618_v26 = vld [vmem:[%s9693_s1 + $0x468] sm:$0xff]  }
 0x18f   : > { %4479 = vmatprep.mubr.bf16.mxu1 %v7546_v35  ;;  %4576 = vmatprep.mubr.bf16.mxu0 %v7548_v43  ;;  %v8674_v3 = vadd.f32 %v6164_v60, %v3712_v50  ;;  %v8677_v44 = vadd.f32 %v6228_v56, %v8485_v55  ;;  %v3717_v55 = vadd.f32 %v8607_v6, %v8315_v14  ;;  %v7560_v60 = vld [vmem:[%s7874_s9 + $0x760] ss:$84 sps:$4 sm:$0xff]   ;;  %v7561_v56 = vld [vmem:[%s7874_s9 + $0x228] ss:$84 sps:$4 sm:$0xff]  }
 0x190   : > { %6848 = vmatpush3.bf16.msra.mxu0 %v7571_v53 }
 0x191   : > { %v6165_v62 = vpop.f32.mrb[76].mxu1  ;;  %v6229_v42 = vpop.f32.mrb[76].mxu0  ;;  %6849 = vmatprep.subr.bf16.mxu0 %v7586_v58 }
 0x192   : > { %v6166_v39 = vpop.f32.mrb[77].mxu1  ;;  %v6230_v2 = vpop.f32.mrb[77].mxu0 }
 0x193   : > { %v6167_v48 = vadd.f32 %v6166_v39, %v6165_v62  ;;  %v6231_v1 = vadd.f32 %v6230_v2, %v6229_v42  ;;  %v6168_v61 = vpop.f32.mrb[78].mxu1  ;;  %v6232_v16 = vpop.f32.mrb[78].mxu0  ;;  %v7562_v42 = vld [vmem:[%s7874_s9 + $0x80c] ss:$84 sps:$4 sm:$0xff]  }
 0x194   : > { %v6169_v59 = vpop.f32.mrb[79].mxu1  ;;  %v6233_v29 = vpop.f32.mrb[79].mxu0  ;;  %6850 = vmatpush3.bf16.msra.mxu0 %v7587_v20 }
 0x195   : > { %v6170_v37 = vadd.f32 %v6169_v59, %v6168_v61  ;;  %v6234_v7 = vadd.f32 %v6233_v29, %v6232_v16  ;;  %6851 = vmatprep.subr.bf16.mxu0 %v7602_v23  ;;  %v8696_v14 = vadd.f32 %v6167_v48, %v3717_v55  ;;  %v8699_v41 = vadd.f32 %v6231_v1, %v8506_v18  ;;  %v7619_v18 = vld [vmem:[%s9693_s1 + $0x428] sm:$0xff]   ;;  %v7650_v61 = vld [vmem:[%s9693_s1 + $0x478] sm:$0xff]   ;;  %v7567_v29 = vld [vmem:[%s7874_s9 + $0x2d0] ss:$84 sps:$4 sm:$0xff]  }
 0x196   : > { %4480 = vmatmul.mubr.bf16.gmra.mrb[184].mxu1 %v7550_v38  ;;  %4577 = vmatmul.mubr.bf16.gmra.mrb[184].mxu0 %v7551_v24  ;;  %v7564_v23 = vld [vmem:[%s7874_s9 + $0x2d4] ss:$84 sps:$4 sm:$0xff]  }
 0x197   : > { %4487 = vmatprep.mubr.bf16.mxu1 %v7556_v15  ;;  %4584 = vmatprep.mubr.bf16.mxu0 %v7558_v9  ;;  %v8704_v6 = vadd.f32 %v6170_v37, %v3720_v49  ;;  %v8707_v35 = vadd.f32 %v6234_v7, %v8510_v21  ;;  %v7635_v38 = vld [vmem:[%s9693_s1 + $0x430] sm:$0xff]   ;;  %v7566_v59 = vld [vmem:[%s7874_s9 + $0x808] ss:$84 sps:$4 sm:$0xff]  }
 0x198   : > { %6852 = vmatpush3.bf16.msra.mxu0 %v7603_v33 }
 0x199   : > { %v6235_v43 = vpop.f32.mrb[80].mxu0  ;;  %v6299_v50 = vpop.f32.mrb[80].mxu1  ;;  %6853 = vmatprep.subr.bf16.mxu0 %v7618_v26 }
 0x19a   : > { %v6236_v36 = vpop.f32.mrb[81].mxu0  ;;  %v6300_v53 = vpop.f32.mrb[81].mxu1 }
 0x19b   : > { %v6237_v58 = vadd.f32 %v6236_v36, %v6235_v43  ;;  %v6301_v21 = vadd.f32 %v6300_v53, %v6299_v50  ;;  %v6238_v20 = vpop.f32.mrb[82].mxu0  ;;  %v6302_v62 = vpop.f32.mrb[82].mxu1  ;;  %v7574_v43 = vld [vmem:[%s7874_s9 + $0x37c] ss:$84 sps:$4 sm:$0xff]  }
 0x19c   : > { %v6239_v39 = vpop.f32.mrb[83].mxu0  ;;  %v6303_v2 = vpop.f32.mrb[83].mxu1  ;;  %6854 = vmatpush3.bf16.msra.mxu0 %v7619_v18  ;;  %v7572_v18 = vld [vmem:[%s7874_s9 + $0x8b4] ss:$84 sps:$4 sm:$0xff]  }
 0x19d   : > { %v8723_v24 = vadd.f32 %v6237_v58, %v8529_v63  ;;  %v8726_v55 = vadd.f32 %v6301_v21, %v8532_v0  ;;  %v6240_v48 = vadd.f32 %v6239_v39, %v6238_v20  ;;  %v6304_v1 = vadd.f32 %v6303_v2, %v6302_v62  ;;  %6855 = vmatprep.subr.bf16.mxu0 %v7634_v52  ;;  %v7651_v0 = vld [vmem:[%s9693_s1 + $0x438] sm:$0xff]  }
 0x19e   : > { %4488 = vmatmul.mubr.bf16.gmra.mrb[188].mxu1 %v7560_v60  ;;  %4585 = vmatmul.mubr.bf16.gmra.mrb[188].mxu0 %v7561_v56 }
 0x19f   : > { %v8732_v16 = vadd.f32 %v6240_v48, %v8540_v10  ;;  %v8735_v63 = vadd.f32 %v6304_v1, %v8543_v19  ;;  %4495 = vmatprep.mubr.bf16.mxu1 %v7562_v42  ;;  %4592 = vmatprep.mubr.bf16.mxu0 %v7564_v23  ;;  %v8743_v10 = vld [vmem:[%s9693_s1 + $0x500] sm:$0xff]   ;;  %v7577_v23 = vld [vmem:[%s7874_s9 + $0x378] ss:$84 sps:$4 sm:$0xff]   ;;  %v7578_v1 = vld [vmem:[%s7874_s9 + $0x95c] ss:$84 sps:$4 sm:$0xff]  }
 0x1a0   : > { %6856 = vmatpush3.bf16.msra.mxu0 %v7635_v38  ;;  %v7576_v42 = vld [vmem:[%s7874_s9 + $0x8b0] ss:$84 sps:$4 sm:$0xff]  }
 0x1a1   : > { %v6241_v15 = vpop.f32.mrb[84].mxu0  ;;  %v6305_v9 = vpop.f32.mrb[84].mxu1  ;;  %6857 = vmatprep.subr.bf16.mxu0 %v7650_v61  ;;  %v7580_v61 = vld [vmem:[%s7874_s9 + $0x424] ss:$84 sps:$4 sm:$0xff]  }
 0x1a2   : > { %v6242_v49 = vpop.f32.mrb[85].mxu0  ;;  %v6306_v19 = vpop.f32.mrb[85].mxu1 }
 0x1a3   : > { %v6243_v33 = vadd.f32 %v6242_v49, %v6241_v15  ;;  %v6307_v37 = vadd.f32 %v6306_v19, %v6305_v9  ;;  %v6244_v7 = vpop.f32.mrb[86].mxu0  ;;  %v6308_v26 = vpop.f32.mrb[86].mxu1 }
 0x1a4   : > { %v6245_v50 = vpop.f32.mrb[87].mxu0  ;;  %v6309_v52 = vpop.f32.mrb[87].mxu1  ;;  %6858 = vmatpush3.bf16.msra.mxu0 %v7651_v0 }
 0x1a5   : > { %v8750_v36 = vadd.f32 %v6243_v33, %v8556_v51  ;;  %v8753_v53 = vadd.f32 %v6307_v37, %v8559_v54  ;;  %v6246_v60 = vadd.f32 %v6245_v50, %v6244_v7  ;;  %v6310_v56 = vadd.f32 %v6309_v52, %v6308_v26  ;;  %7085 = vmatprep.subr.bf16.mxu0 %v8743_v10  ;;  %v7583_v7 = vld [vmem:[%s7874_s9 + $0x420] ss:$84 sps:$4 sm:$0xff]   ;;  %v7588_v52 = vld [vmem:[%s7874_s9 + $0xa04] ss:$84 sps:$4 sm:$0xff]  }
 0x1a6   : > { %4496 = vmatmul.mubr.bf16.gmra.mrb[192].mxu1 %v7566_v59  ;;  %4593 = vmatmul.mubr.bf16.gmra.mrb[192].mxu0 %v7567_v29 }
 0x1a7   : > { %v8757_v58 = vadd.f32 %v6246_v60, %v8561_v47  ;;  %v8760_v21 = vadd.f32 %v6310_v56, %v8564_v5  ;;  %4503 = vmatprep.mubr.bf16.mxu1 %v7572_v18  ;;  %4600 = vmatprep.mubr.bf16.mxu0 %v7574_v43  ;;  %v7590_v60 = vld [vmem:[%s7874_s9 + $0x4cc] ss:$84 sps:$4 sm:$0xff]  }
 0x1a9   : > { %v6247_v51 = vpop.f32.mrb[88].mxu0  ;;  %v6311_v20 = vpop.f32.mrb[88].mxu1 }
 0x1aa   : > { %v6248_v54 = vpop.f32.mrb[89].mxu0  ;;  %v6312_v62 = vpop.f32.mrb[89].mxu1 }
 0x1ab   : > { %v6249_v39 = vadd.f32 %v6248_v54, %v6247_v51  ;;  %v6313_v2 = vadd.f32 %v6312_v62, %v6311_v20  ;;  %v6250_v38 = vpop.f32.mrb[90].mxu0  ;;  %v6314_v48 = vpop.f32.mrb[90].mxu1 }
 0x1ac   : > { %v6251_v0 = vpop.f32.mrb[91].mxu0  ;;  %v6315_v47 = vpop.f32.mrb[91].mxu1 }
 0x1ad   : > { %v8767_v5 = vadd.f32 %v6249_v39, %v8574_v27  ;;  %v8770_v15 = vadd.f32 %v6313_v2, %v8577_v25  ;;  %v6252_v9 = vadd.f32 %v6251_v0, %v6250_v38  ;;  %v6316_v49 = vadd.f32 %v6315_v47, %v6314_v48  ;;  %v7582_v25 = vld [vmem:[%s7874_s9 + $0x958] ss:$84 sps:$4 sm:$0xff]   ;;  %v7593_v38 = vld [vmem:[%s7874_s9 + $0x4c8] ss:$84 sps:$4 sm:$0xff]  }
 0x1ae   : > { %4504 = vmatmul.mubr.bf16.gmra.mrb[196].mxu1 %v7576_v42  ;;  %4601 = vmatmul.mubr.bf16.gmra.mrb[196].mxu0 %v7577_v23  ;;  %v7594_v47 = vld [vmem:[%s7874_s9 + $0x574] ss:$84 sps:$4 sm:$0xff]  }
 0x1af   : > { %v8773_v19 = vadd.f32 %v6252_v9, %v8579_v28  ;;  %v8776_v59 = vadd.f32 %v6316_v49, %v8582_v46  ;;  %4511 = vmatprep.mubr.bf16.mxu1 %v7578_v1  ;;  %4608 = vmatprep.mubr.bf16.mxu0 %v7580_v61  ;;  %v7598_v9 = vld [vmem:[%s7874_s9 + $0x3c] ss:$84 sps:$4 sm:$0xff]  }
 0x1b1   : > { %v6253_v29 = vpop.f32.mrb[92].mxu0  ;;  %v6317_v27 = vpop.f32.mrb[92].mxu1 }
 0x1b2   : > { %v6254_v33 = vpop.f32.mrb[93].mxu0  ;;  %v6318_v37 = vpop.f32.mrb[93].mxu1 }
 0x1b3   : > { %v6255_v26 = vadd.f32 %v6254_v33, %v6253_v29  ;;  %v6319_v18 = vadd.f32 %v6318_v37, %v6317_v27  ;;  %v6256_v43 = vpop.f32.mrb[94].mxu0  ;;  %v6320_v50 = vpop.f32.mrb[94].mxu1 }
 0x1b4   : > { %v6257_v56 = vpop.f32.mrb[95].mxu0  ;;  %v6321_v28 = vpop.f32.mrb[95].mxu1 }
 0x1b5   : > { %v8783_v46 = vadd.f32 %v6255_v26, %v8592_v31  ;;  %v8786_v51 = vadd.f32 %v6319_v18, %v8595_v17  ;;  %v6258_v20 = vadd.f32 %v6257_v56, %v6256_v43  ;;  %v6322_v54 = vadd.f32 %v6321_v28, %v6320_v50  ;;  %v7592_v17 = vld [vmem:[%s7874_s9 + $0xa00] ss:$84 sps:$4 sm:$0xff]   ;;  %v7599_v43 = vld [vmem:[%s7874_s9 + $0x570] ss:$84 sps:$4 sm:$0xff]  }
 0x1b6   : > { %4512 = vmatmul.mubr.bf16.gmra.mrb[200].mxu1 %v7582_v25  ;;  %4609 = vmatmul.mubr.bf16.gmra.mrb[200].mxu0 %v7583_v7  ;;  %v7604_v28 = vld [vmem:[%s7874_s9 + $0x61c] ss:$84 sps:$4 sm:$0xff]  }
 0x1b7   : > { %v8789_v62 = vadd.f32 %v6258_v20, %v8597_v8  ;;  %v8792_v42 = vadd.f32 %v6322_v54, %v8600_v32  ;;  %4519 = vmatprep.mubr.bf16.mxu1 %v7588_v52  ;;  %4616 = vmatprep.mubr.bf16.mxu0 %v7590_v60  ;;  %v7606_v54 = vld [vmem:[%s7874_s9 + $0xe4] ss:$84 sps:$4 sm:$0xff]  }
 0x1b9   : > { %v6259_v23 = vpop.f32.mrb[96].mxu0  ;;  %v6323_v31 = vpop.f32.mrb[96].mxu1 }
 0x1ba   : > { %v6260_v39 = vpop.f32.mrb[97].mxu0  ;;  %v6324_v2 = vpop.f32.mrb[97].mxu1 }
 0x1bb   : > { %v6261_v48 = vadd.f32 %v6260_v39, %v6259_v23  ;;  %v6325_v1 = vadd.f32 %v6324_v2, %v6323_v31  ;;  %v6262_v61 = vpop.f32.mrb[98].mxu0  ;;  %v6326_v0 = vpop.f32.mrb[98].mxu1  ;;  %v7616_v23 = vld [vmem:[%s9693_s1 + $0x4c8] sm:$0xff]  }
 0x1bc   : > { %v6263_v49 = vpop.f32.mrb[99].mxu0  ;;  %v6327_v8 = vpop.f32.mrb[99].mxu1 }
 0x1bd   : > { %v8799_v32 = vadd.f32 %v6261_v48, %v8615_v34  ;;  %v8802_v29 = vadd.f32 %v6325_v1, %v8618_v45  ;;  %v6264_v27 = vadd.f32 %v6263_v49, %v6262_v61  ;;  %v6328_v33 = vadd.f32 %v6327_v8, %v6326_v0  ;;  %v7596_v45 = vld [vmem:[%s7874_s9 + $0x38] ss:$84 sps:$4 sm:$0xff]  }
 0x1be   : > { %4520 = vmatmul.mubr.bf16.gmra.mrb[204].mxu1 %v7592_v17  ;;  %4617 = vmatmul.mubr.bf16.gmra.mrb[204].mxu0 %v7593_v38 }
 0x1bf   : > { %v8805_v37 = vadd.f32 %v6264_v27, %v8620_v22  ;;  %v8808_v25 = vadd.f32 %v6328_v33, %v8623_v30  ;;  %4624 = vmatprep.mubr.bf16.mxu0 %v7594_v47  ;;  %4721 = vmatprep.mubr.bf16.mxu1 %v7598_v9  ;;  %v7601_v22 = vld [vmem:[%s9693_s1 + $0x480] sm:$0xff]  }
 0x1c0   : > { %v7609_v47 = vld [vmem:[%s7874_s9 + $0xe0] ss:$84 sps:$4 sm:$0xff]   ;;  %v7610_v33 = vld [vmem:[%s7874_s9 + $0x6c4] ss:$84 sps:$4 sm:$0xff]  }
 0x1c1   : > { %v6265_v7 = vpop.f32.mrb[100].mxu0  ;;  %v6329_v34 = vpop.f32.mrb[100].mxu1 }
 0x1c2   : > { %v6266_v26 = vpop.f32.mrb[101].mxu0  ;;  %v6330_v18 = vpop.f32.mrb[101].mxu1 }
 0x1c3   : > { %v6267_v50 = vadd.f32 %v6266_v26, %v6265_v7  ;;  %v6331_v52 = vadd.f32 %v6330_v18, %v6329_v34  ;;  %v6268_v60 = vpop.f32.mrb[102].mxu0  ;;  %v6332_v56 = vpop.f32.mrb[102].mxu1  ;;  %v7612_v7 = vld [vmem:[%s7874_s9 + $0x18c] ss:$84 sps:$4 sm:$0xff]   ;;  %v7633_v18 = vld [vmem:[%s9693_s1 + $0x490] sm:$0xff]  }
 0x1c4   : > { %v6269_v30 = vpop.f32.mrb[103].mxu0  ;;  %v6333_v20 = vpop.f32.mrb[103].mxu1 }
 0x1c5   : > { %v8821_v31 = vadd.f32 %v6267_v50, %v8639_v11  ;;  %v8824_v39 = vadd.f32 %v6331_v52, %v8642_v12  ;;  %v6270_v2 = vadd.f32 %v6269_v30, %v6268_v60  ;;  %v6334_v17 = vadd.f32 %v6333_v20, %v6332_v56  ;;  %v7617_v11 = vld [vmem:[%s9693_s1 + $0x488] sm:$0xff]   ;;  %v7632_v12 = vld [vmem:[%s9693_s1 + $0x4d0] sm:$0xff]   ;;  %v7648_v60 = vld [vmem:[%s9693_s1 + $0x4d8] sm:$0xff]  }
 0x1c6   : > { %4625 = vmatmul.mubr.bf16.gmra.mrb[208].mxu0 %v7599_v43  ;;  %4722 = vmatmul.mubr.bf16.vlgmr.msra.gmra.mrb[208].mxu1 %v7596_v45 }
 0x1c7   : > { %v8827_v38 = vadd.f32 %v6270_v2, %v8647_v40  ;;  %v8830_v48 = vadd.f32 %v6334_v17, %v8650_v13  ;;  %6956 = vmatpush3.bf16.msra.mxu1 %v7601_v22  ;;  %4632 = vmatprep.mubr.bf16.mxu0 %v7604_v28  ;;  %v7608_v13 = vld [vmem:[%s7874_s9 + $0x618] ss:$84 sps:$4 sm:$0xff]  }
 0x1c8   : > { %4729 = vmatprep.mubr.bf16.mxu1 %v7606_v54  ;;  %6957 = vmatprep.subr.bf16.mxu1 %v7616_v23  ;;  %v7615_v54 = vld [vmem:[%s7874_s9 + $0x188] ss:$84 sps:$4 sm:$0xff]  }
 0x1c9   : > { %v6271_v1 = vpop.f32.mrb[104].mxu0  ;;  %v6335_v40 = vpop.f32.mrb[104].mxu1 }
 0x1ca   : > { %v6272_v61 = vpop.f32.mrb[105].mxu0  ;;  %v6336_v0 = vpop.f32.mrb[105].mxu1 }
 0x1cb   : > { %v6273_v9 = vadd.f32 %v6272_v61, %v6271_v1  ;;  %v6337_v49 = vadd.f32 %v6336_v0, %v6335_v40  ;;  %v6274_v8 = vpop.f32.mrb[106].mxu0  ;;  %v6338_v27 = vpop.f32.mrb[106].mxu1  ;;  %6958 = vmatpush3.bf16.msra.mxu1 %v7617_v11  ;;  %v7622_v1 = vld [vmem:[%s7874_s9 + $0x234] ss:$84 sps:$4 sm:$0xff]   ;;  %v7665_v0 = vld [vmem:[%s9693_s1 + $0x4a0] sm:$0xff]  }
 0x1cc   : > { %v6275_v34 = vpop.f32.mrb[107].mxu0  ;;  %v6339_v26 = vpop.f32.mrb[107].mxu1  ;;  %6959 = vmatprep.subr.bf16.mxu1 %v7632_v12  ;;  %v7620_v12 = vld [vmem:[%s7874_s9 + $0x76c] ss:$84 sps:$4 sm:$0xff]  }
 0x1cd   : > { %v8846_v45 = vadd.f32 %v6273_v9, %v8669_v4  ;;  %v8849_v43 = vadd.f32 %v6337_v49, %v8672_v57  ;;  %v6276_v50 = vadd.f32 %v6275_v34, %v6274_v8  ;;  %v6340_v52 = vadd.f32 %v6339_v26, %v6338_v27  ;;  %v7649_v4 = vld [vmem:[%s9693_s1 + $0x498] sm:$0xff]   ;;  %v7679_v8 = vld [vmem:[%s9693_s1 + $0x4e8] sm:$0xff]  }
 0x1ce   : > { %4633 = vmatmul.mubr.bf16.gmra.mrb[212].mxu0 %v7608_v13  ;;  %4730 = vmatmul.mubr.bf16.gmra.mrb[212].mxu1 %v7609_v47 }
 0x1cf   : > { %v8855_v56 = vadd.f32 %v6276_v50, %v8674_v3  ;;  %v8858_v22 = vadd.f32 %v6340_v52, %v8677_v44  ;;  %4640 = vmatprep.mubr.bf16.mxu0 %v7610_v33  ;;  %4737 = vmatprep.mubr.bf16.mxu1 %v7612_v7  ;;  %v7664_v3 = vld [vmem:[%s9693_s1 + $0x4e0] sm:$0xff]  }
 0x1d0   : > { %6960 = vmatpush3.bf16.msra.mxu1 %v7633_v18  ;;  %v7614_v44 = vld [vmem:[%s7874_s9 + $0x6c0] ss:$84 sps:$4 sm:$0xff]   ;;  %v7625_v18 = vld [vmem:[%s7874_s9 + $0x230] ss:$84 sps:$4 sm:$0xff]  }
 0x1d1   : > { %v6277_v57 = vpop.f32.mrb[108].mxu0  ;;  %v6341_v28 = vpop.f32.mrb[108].mxu1  ;;  %6961 = vmatprep.subr.bf16.mxu1 %v7648_v60 }
 0x1d2   : > { %v6278_v30 = vpop.f32.mrb[109].mxu0  ;;  %v6342_v20 = vpop.f32.mrb[109].mxu1 }
 0x1d3   : > { %v6279_v23 = vadd.f32 %v6278_v30, %v6277_v57  ;;  %v6343_v2 = vadd.f32 %v6342_v20, %v6341_v28  ;;  %v6280_v17 = vpop.f32.mrb[110].mxu0  ;;  %v6344_v11 = vpop.f32.mrb[110].mxu1  ;;  %v7626_v57 = vld [vmem:[%s7874_s9 + $0x814] ss:$84 sps:$4 sm:$0xff]   ;;  %v7628_v28 = vld [vmem:[%s7874_s9 + $0x2dc] ss:$84 sps:$4 sm:$0xff]  }
 0x1d4   : > { %v6281_v40 = vpop.f32.mrb[111].mxu0  ;;  %v6345_v61 = vpop.f32.mrb[111].mxu1  ;;  %6962 = vmatpush3.bf16.msra.mxu1 %v7649_v4  ;;  %v7694_v20 = vld [vmem:[%s9693_s1 + $0x4b0] sm:$0xff]  }
 0x1d5   : > { %v8874_v13 = vadd.f32 %v6279_v23, %v8696_v14  ;;  %v8877_v47 = vadd.f32 %v6343_v2, %v8699_v41  ;;  %v6282_v9 = vadd.f32 %v6281_v40, %v6280_v17  ;;  %v6346_v49 = vadd.f32 %v6345_v61, %v6344_v11  ;;  %6963 = vmatprep.subr.bf16.mxu1 %v7664_v3  ;;  %v7680_v41 = vld [vmem:[%s9693_s1 + $0x4a8] sm:$0xff]   ;;  %v7707_v17 = vld [vmem:[%s9693_s1 + $0x4f8] sm:$0xff]  }
 0x1d6   : > { %4641 = vmatmul.mubr.bf16.gmra.mrb[216].mxu0 %v7614_v44  ;;  %4738 = vmatmul.mubr.bf16.gmra.mrb[216].mxu1 %v7615_v54 }
 0x1d7   : > { %v8883_v27 = vadd.f32 %v6282_v9, %v8704_v6  ;;  %v8886_v14 = vadd.f32 %v6346_v49, %v8707_v35  ;;  %4648 = vmatprep.mubr.bf16.mxu0 %v7620_v12  ;;  %4745 = vmatprep.mubr.bf16.mxu1 %v7622_v1  ;;  %v7693_v6 = vld [vmem:[%s9693_s1 + $0x4f0] sm:$0xff]   ;;  %v7624_v35 = vld [vmem:[%s7874_s9 + $0x768] ss:$84 sps:$4 sm:$0xff]  }
 0x1d8   : > { %6964 = vmatpush3.bf16.msra.mxu1 %v7665_v0  ;;  %v7630_v0 = vld [vmem:[%s7874_s9 + $0x810] ss:$84 sps:$4 sm:$0xff]  }
 0x1d9   : > { %v6347_v33 = vpop.f32.mrb[112].mxu1  ;;  %v6411_v7 = vpop.f32.mrb[112].mxu0  ;;  %6965 = vmatprep.subr.bf16.mxu1 %v7679_v8 }
 0x1da   : > { %v6348_v34 = vpop.f32.mrb[113].mxu1  ;;  %v6412_v26 = vpop.f32.mrb[113].mxu0 }
 0x1db   : > { %v6349_v50 = vadd.f32 %v6348_v34, %v6347_v33  ;;  %v6413_v52 = vadd.f32 %v6412_v26, %v6411_v7  ;;  %v6350_v60 = vpop.f32.mrb[114].mxu1  ;;  %v6414_v4 = vpop.f32.mrb[114].mxu0  ;;  %v7638_v33 = vld [vmem:[%s7874_s9 + $0x384] ss:$84 sps:$4 sm:$0xff]  }
 0x1dc   : > { %v6351_v3 = vpop.f32.mrb[115].mxu1  ;;  %v6415_v30 = vpop.f32.mrb[115].mxu0  ;;  %6966 = vmatpush3.bf16.msra.mxu1 %v7680_v41  ;;  %v7636_v41 = vld [vmem:[%s7874_s9 + $0x8bc] ss:$84 sps:$4 sm:$0xff]  }
 0x1dd   : > { %v8902_v44 = vadd.f32 %v6349_v50, %v8723_v24  ;;  %v8905_v54 = vadd.f32 %v6413_v52, %v8726_v55  ;;  %v6352_v23 = vadd.f32 %v6351_v3, %v6350_v60  ;;  %v6416_v2 = vadd.f32 %v6415_v30, %v6414_v4  ;;  %6967 = vmatprep.subr.bf16.mxu1 %v7693_v6  ;;  %v7708_v55 = vld [vmem:[%s9693_s1 + $0x4b8] sm:$0xff]  }
 0x1de   : > { %4649 = vmatmul.mubr.bf16.gmra.mrb[220].mxu0 %v7624_v35  ;;  %4746 = vmatmul.mubr.bf16.gmra.mrb[220].mxu1 %v7625_v18 }
 0x1df   : > { %v8911_v11 = vadd.f32 %v6352_v23, %v8732_v16  ;;  %v8914_v24 = vadd.f32 %v6416_v2, %v8735_v63  ;;  %4656 = vmatprep.mubr.bf16.mxu0 %v7626_v57  ;;  %4753 = vmatprep.mubr.bf16.mxu1 %v7628_v28  ;;  %v7631_v16 = vld [vmem:[%s7874_s9 + $0x2d8] ss:$84 sps:$4 sm:$0xff]   ;;  %v7641_v28 = vld [vmem:[%s7874_s9 + $0x380] ss:$84 sps:$4 sm:$0xff]  }
 0x1e0   : > { %6968 = vmatpush3.bf16.msra.mxu1 %v7694_v20  ;;  %v7642_v2 = vld [vmem:[%s7874_s9 + $0x964] ss:$84 sps:$4 sm:$0xff]  }
 0x1e1   : > { %v6353_v12 = vpop.f32.mrb[116].mxu1  ;;  %v6417_v1 = vpop.f32.mrb[116].mxu0  ;;  %6969 = vmatprep.subr.bf16.mxu1 %v7707_v17  ;;  %v7644_v17 = vld [vmem:[%s7874_s9 + $0x42c] ss:$84 sps:$4 sm:$0xff]  }
 0x1e2   : > { %v6354_v40 = vpop.f32.mrb[117].mxu1  ;;  %v6418_v61 = vpop.f32.mrb[117].mxu0 }
 0x1e3   : > { %v6355_v9 = vadd.f32 %v6354_v40, %v6353_v12  ;;  %v6419_v49 = vadd.f32 %v6418_v61, %v6417_v1  ;;  %v6356_v63 = vpop.f32.mrb[118].mxu1  ;;  %v6420_v8 = vpop.f32.mrb[118].mxu0 }
 0x1e4   : > { %v6357_v7 = vpop.f32.mrb[119].mxu1  ;;  %v6421_v6 = vpop.f32.mrb[119].mxu0  ;;  %6970 = vmatpush3.bf16.msra.mxu1 %v7708_v55 }
 0x1e5   : > { %v8924_v34 = vadd.f32 %v6355_v9, %v8750_v36  ;;  %v8927_v26 = vadd.f32 %v6419_v49, %v8753_v53  ;;  %v6358_v35 = vadd.f32 %v6357_v7, %v6356_v63  ;;  %v6422_v18 = vadd.f32 %v6421_v6, %v6420_v8  ;;  %v7640_v53 = vld [vmem:[%s7874_s9 + $0x8b8] ss:$84 sps:$4 sm:$0xff]   ;;  %v7647_v63 = vld [vmem:[%s7874_s9 + $0x428] ss:$84 sps:$4 sm:$0xff]  }
 0x1e6   : > { %4657 = vmatmul.mubr.bf16.gmra.mrb[224].mxu0 %v7630_v0  ;;  %4754 = vmatmul.mubr.bf16.gmra.mrb[224].mxu1 %v7631_v16  ;;  %v7652_v6 = vld [vmem:[%s7874_s9 + $0xa0c] ss:$84 sps:$4 sm:$0xff]  }
 0x1e7   : > { %v8930_v50 = vadd.f32 %v6358_v35, %v8757_v58  ;;  %v8933_v52 = vadd.f32 %v6422_v18, %v8760_v21  ;;  %4664 = vmatprep.mubr.bf16.mxu0 %v7636_v41  ;;  %4761 = vmatprep.mubr.bf16.mxu1 %v7638_v33  ;;  %v7654_v35 = vld [vmem:[%s7874_s9 + $0x4d4] ss:$84 sps:$4 sm:$0xff]  }
 0x1e9   : > { %v6359_v60 = vpop.f32.mrb[120].mxu1  ;;  %v6423_v36 = vpop.f32.mrb[120].mxu0 }
 0x1ea   : > { %v6360_v4 = vpop.f32.mrb[121].mxu1  ;;  %v6424_v57 = vpop.f32.mrb[121].mxu0 }
 0x1eb   : > { %v6361_v3 = vadd.f32 %v6360_v4, %v6359_v60  ;;  %v6425_v30 = vadd.f32 %v6424_v57, %v6423_v36  ;;  %v6362_v20 = vpop.f32.mrb[122].mxu1  ;;  %v6426_v23 = vpop.f32.mrb[122].mxu0 }
 0x1ec   : > { %v6363_v55 = vpop.f32.mrb[123].mxu1  ;;  %v6427_v58 = vpop.f32.mrb[123].mxu0 }
 0x1ed   : > { %v8940_v21 = vadd.f32 %v6361_v3, %v8767_v5  ;;  %v8943_v12 = vadd.f32 %v6425_v30, %v8770_v15  ;;  %v6364_v1 = vadd.f32 %v6363_v55, %v6362_v20  ;;  %v6428_v40 = vadd.f32 %v6427_v58, %v6426_v23  ;;  %v7646_v15 = vld [vmem:[%s7874_s9 + $0x960] ss:$84 sps:$4 sm:$0xff]   ;;  %v7657_v20 = vld [vmem:[%s7874_s9 + $0x4d0] ss:$84 sps:$4 sm:$0xff]  }
 0x1ee   : > { %4665 = vmatmul.mubr.bf16.gmra.mrb[228].mxu0 %v7640_v53  ;;  %4762 = vmatmul.mubr.bf16.gmra.mrb[228].mxu1 %v7641_v28  ;;  %v7658_v58 = vld [vmem:[%s7874_s9 + $0x57c] ss:$84 sps:$4 sm:$0xff]  }
 0x1ef   : > { %v8946_v61 = vadd.f32 %v6364_v1, %v8773_v19  ;;  %v8949_v0 = vadd.f32 %v6428_v40, %v8776_v59  ;;  %4672 = vmatprep.mubr.bf16.mxu0 %v7642_v2  ;;  %4769 = vmatprep.mubr.bf16.mxu1 %v7644_v17  ;;  %v7662_v1 = vld [vmem:[%s7874_s9 + $0x44] ss:$84 sps:$4 sm:$0xff]  }
 0x1f1   : > { %v6365_v16 = vpop.f32.mrb[124].mxu1  ;;  %v6429_v5 = vpop.f32.mrb[124].mxu0 }
 0x1f2   : > { %v6366_v9 = vpop.f32.mrb[125].mxu1  ;;  %v6430_v49 = vpop.f32.mrb[125].mxu0 }
 0x1f3   : > { %v6367_v8 = vadd.f32 %v6366_v9, %v6365_v16  ;;  %v6431_v41 = vadd.f32 %v6430_v49, %v6429_v5  ;;  %v6368_v33 = vpop.f32.mrb[126].mxu1  ;;  %v6432_v7 = vpop.f32.mrb[126].mxu0 }
 0x1f4   : > { %v6369_v18 = vpop.f32.mrb[127].mxu1  ;;  %v6433_v19 = vpop.f32.mrb[127].mxu0 }
 0x1f5   : > { %v8956_v59 = vadd.f32 %v6367_v8, %v8783_v46  ;;  %v8959_v60 = vadd.f32 %v6431_v41, %v8786_v51  ;;  %v6370_v36 = vadd.f32 %v6369_v18, %v6368_v33  ;;  %v6434_v4 = vadd.f32 %v6433_v19, %v6432_v7  ;;  %v7656_v51 = vld [vmem:[%s7874_s9 + $0xa08] ss:$84 sps:$4 sm:$0xff]   ;;  %v7663_v33 = vld [vmem:[%s7874_s9 + $0x578] ss:$84 sps:$4 sm:$0xff]  }
 0x1f6   : > { %4673 = vmatmul.mubr.bf16.gmra.mrb[232].mxu0 %v7646_v15  ;;  %4770 = vmatmul.mubr.bf16.gmra.mrb[232].mxu1 %v7647_v63  ;;  %v7667_v19 = vld [vmem:[%s7874_s9 + $0x624] ss:$84 sps:$4 sm:$0xff]  }
 0x1f7   : > { %v8962_v57 = vadd.f32 %v6370_v36, %v8789_v62  ;;  %v8965_v53 = vadd.f32 %v6434_v4, %v8792_v42  ;;  %4680 = vmatprep.mubr.bf16.mxu0 %v7652_v6  ;;  %4777 = vmatprep.mubr.bf16.mxu1 %v7654_v35  ;;  %v7669_v4 = vld [vmem:[%s7874_s9 + $0xec] ss:$84 sps:$4 sm:$0xff]  }
 0x1f9   : > { %v6371_v28 = vpop.f32.mrb[128].mxu1  ;;  %v6435_v46 = vpop.f32.mrb[128].mxu0 }
 0x1fa   : > { %v6372_v3 = vpop.f32.mrb[129].mxu1  ;;  %v6436_v30 = vpop.f32.mrb[129].mxu0 }
 0x1fb   : > { %v6373_v23 = vadd.f32 %v6372_v3, %v6371_v28  ;;  %v6437_v2 = vadd.f32 %v6436_v30, %v6435_v46  ;;  %v6374_v17 = vpop.f32.mrb[130].mxu1  ;;  %v6438_v55 = vpop.f32.mrb[130].mxu0 }
 0x1fc   : > { %v6375_v40 = vpop.f32.mrb[131].mxu1  ;;  %v6439_v62 = vpop.f32.mrb[131].mxu0 }
 0x1fd   : > { %v8972_v42 = vadd.f32 %v6373_v23, %v8799_v32  ;;  %v8975_v16 = vadd.f32 %v6437_v2, %v8802_v29  ;;  %v6376_v5 = vadd.f32 %v6375_v40, %v6374_v17  ;;  %v6440_v9 = vadd.f32 %v6439_v62, %v6438_v55  ;;  %v7660_v29 = vld [vmem:[%s7874_s9 + $0x40] ss:$84 sps:$4 sm:$0xff]   ;;  %v7672_v55 = vld [vmem:[%s7874_s9 + $0xe8] ss:$84 sps:$4 sm:$0xff]  }
 0x1fe   : > { %4681 = vmatmul.mubr.bf16.gmra.mrb[236].mxu0 %v7656_v51  ;;  %4778 = vmatmul.mubr.bf16.gmra.mrb[236].mxu1 %v7657_v20  ;;  %v7671_v17 = vld [vmem:[%s7874_s9 + $0x620] ss:$84 sps:$4 sm:$0xff]  }
 0x1ff   : > { %v8978_v49 = vadd.f32 %v6376_v5, %v8805_v37  ;;  %v8981_v15 = vadd.f32 %v6440_v9, %v8808_v25  ;;  %4785 = vmatprep.mubr.bf16.mxu1 %v7658_v58  ;;  %4882 = vmatprep.mubr.bf16.mxu0 %v7662_v1  ;;  %v7721_v25 = vld [vmem:[%s9693_s1 + $0x508] sm:$0xff]  }
 0x200   : > { %v7673_v62 = vld [vmem:[%s7874_s9 + $0x6cc] ss:$84 sps:$4 sm:$0xff]   ;;  %v7675_v5 = vld [vmem:[%s7874_s9 + $0x194] ss:$84 sps:$4 sm:$0xff]  }
 0x201   : > { %v6377_v63 = vpop.f32.mrb[132].mxu1  ;;  %v6441_v32 = vpop.f32.mrb[132].mxu0 }
 0x202   : > { %v6378_v8 = vpop.f32.mrb[133].mxu1  ;;  %v6442_v41 = vpop.f32.mrb[133].mxu0 }
 0x203   : > { %v6379_v7 = vadd.f32 %v6378_v8, %v6377_v63  ;;  %v6443_v6 = vadd.f32 %v6442_v41, %v6441_v32  ;;  %v6380_v35 = vpop.f32.mrb[134].mxu1  ;;  %v6444_v18 = vpop.f32.mrb[134].mxu0 }
 0x204   : > { %v6381_v36 = vpop.f32.mrb[135].mxu1  ;;  %v6445_v37 = vpop.f32.mrb[135].mxu0 }
 0x205   : > { %v8991_v28 = vadd.f32 %v6379_v7, %v8821_v31  ;;  %v8994_v46 = vadd.f32 %v6443_v6, %v8824_v39  ;;  %v6382_v3 = vadd.f32 %v6381_v36, %v6380_v35  ;;  %v6446_v30 = vadd.f32 %v6445_v37, %v6444_v18  ;;  %v7678_v35 = vld [vmem:[%s7874_s9 + $0x190] ss:$84 sps:$4 sm:$0xff]  }
 0x206   : > { %4786 = vmatmul.mubr.bf16.gmra.mrb[240].mxu1 %v7663_v33  ;;  %4883 = vmatmul.mubr.bf16.vlgmr.msra.gmra.mrb[240].mxu0 %v7660_v29 }
 0x207   : > { %v8997_v51 = vadd.f32 %v6382_v3, %v8827_v38  ;;  %v9000_v20 = vadd.f32 %v6446_v30, %v8830_v48  ;;  %7086 = vmatpush3.bf16.msra.mxu0 %v8743_v10  ;;  %4793 = vmatprep.mubr.bf16.mxu1 %v7667_v19 }
 0x208   : > { %4890 = vmatprep.mubr.bf16.mxu0 %v7669_v4  ;;  %7087 = vmatprep.subr.bf16.mxu0 %v7721_v25  ;;  %v7681_v4 = vld [vmem:[%s7874_s9 + $0x774] ss:$84 sps:$4 sm:$0xff]  }
 0x209   : > { %v6383_v31 = vpop.f32.mrb[136].mxu1  ;;  %v6447_v39 = vpop.f32.mrb[136].mxu0 }
 0x20a   : > { %v6384_v23 = vpop.f32.mrb[137].mxu1  ;;  %v6448_v2 = vpop.f32.mrb[137].mxu0 }
 0x20b   : > { %v6385_v58 = vadd.f32 %v6384_v23, %v6383_v31  ;;  %v6449_v1 = vadd.f32 %v6448_v2, %v6447_v39  ;;  %v6386_v38 = vpop.f32.mrb[138].mxu1  ;;  %v6450_v40 = vpop.f32.mrb[138].mxu0  ;;  %7088 = vmatpush3.bf16.msra.mxu0 %v7721_v25  ;;  %v7683_v25 = vld [vmem:[%s7874_s9 + $0x23c] ss:$84 sps:$4 sm:$0xff]  }
 0x20c   : > { %v6387_v48 = vpop.f32.mrb[139].mxu1  ;;  %v6451_v9 = vpop.f32.mrb[139].mxu0 }
 0x20d   : > { %v9008_v10 = vadd.f32 %v6385_v58, %v8846_v45  ;;  %v9011_v63 = vadd.f32 %v6449_v1, %v8849_v43  ;;  %v6388_v32 = vadd.f32 %v6387_v48, %v6386_v38  ;;  %v6452_v8 = vadd.f32 %v6451_v9, %v6450_v40  ;;  %v7677_v43 = vld [vmem:[%s7874_s9 + $0x6c8] ss:$84 sps:$4 sm:$0xff]   ;;  %v7686_v1 = vld [vmem:[%s7874_s9 + $0x238] ss:$84 sps:$4 sm:$0xff]  }
 0x20e   : > { %4794 = vmatmul.mubr.bf16.gmra.mrb[244].mxu1 %v7671_v17  ;;  %4891 = vmatmul.mubr.bf16.gmra.mrb[244].mxu0 %v7672_v55  ;;  %v7689_v48 = vld [vmem:[%s7874_s9 + $0x81c] ss:$84 sps:$4 sm:$0xff]   ;;  %v7692_v9 = vld [vmem:[%s7874_s9 + $0x2e4] ss:$84 sps:$4 sm:$0xff]  }
 0x20f   : > { %v9014_v41 = vadd.f32 %v6388_v32, %v8855_v56  ;;  %v9017_v29 = vadd.f32 %v6452_v8, %v8858_v22  ;;  %4801 = vmatprep.mubr.bf16.mxu1 %v7673_v62  ;;  %4898 = vmatprep.mubr.bf16.mxu0 %v7675_v5 }
 0x211   : > { %v6389_v33 = vpop.f32.mrb[140].mxu1  ;;  %v6453_v45 = vpop.f32.mrb[140].mxu0 }
 0x212   : > { %v6390_v7 = vpop.f32.mrb[141].mxu1  ;;  %v6454_v6 = vpop.f32.mrb[141].mxu0 }
 0x213   : > { %v6391_v18 = vadd.f32 %v6390_v7, %v6389_v33  ;;  %v6455_v19 = vadd.f32 %v6454_v6, %v6453_v45  ;;  %v6392_v36 = vpop.f32.mrb[142].mxu1  ;;  %v6456_v37 = vpop.f32.mrb[142].mxu0 }
 0x214   : > { %v6393_v3 = vpop.f32.mrb[143].mxu1  ;;  %v6457_v56 = vpop.f32.mrb[143].mxu0 }
 0x215   : > { %v9024_v22 = vadd.f32 %v6391_v18, %v8874_v13  ;;  %v9027_v30 = vadd.f32 %v6455_v19, %v8877_v47  ;;  %v6394_v31 = vadd.f32 %v6393_v3, %v6392_v36  ;;  %v6458_v39 = vadd.f32 %v6457_v56, %v6456_v37  ;;  %v7685_v47 = vld [vmem:[%s7874_s9 + $0x770] ss:$84 sps:$4 sm:$0xff]   ;;  %v7690_v19 = vld [vmem:[%s7874_s9 + $0x2e0] ss:$84 sps:$4 sm:$0xff]  }
 0x216   : > { %4802 = vmatmul.mubr.bf16.gmra.mrb[248].mxu1 %v7677_v43  ;;  %4899 = vmatmul.mubr.bf16.gmra.mrb[248].mxu0 %v7678_v35  ;;  %v7697_v3 = vld [vmem:[%s7874_s9 + $0x8c4] ss:$84 sps:$4 sm:$0xff]   ;;  %v7700_v56 = vld [vmem:[%s7874_s9 + $0x38c] ss:$84 sps:$4 sm:$0xff]  }
 0x217   : > { %v9030_v23 = vadd.f32 %v6394_v31, %v8883_v27  ;;  %v9033_v2 = vadd.f32 %v6458_v39, %v8886_v14  ;;  %4809 = vmatprep.mubr.bf16.mxu1 %v7681_v4  ;;  %4906 = vmatprep.mubr.bf16.mxu0 %v7683_v25 }
 0x219   : > { %v6459_v17 = vpop.f32.mrb[144].mxu0  ;;  %v6523_v13 = vpop.f32.mrb[144].mxu1 }
 0x21a   : > { %v6460_v55 = vpop.f32.mrb[145].mxu0  ;;  %v6524_v58 = vpop.f32.mrb[145].mxu1 }
 0x21b   : > { %v6461_v38 = vadd.f32 %v6460_v55, %v6459_v17  ;;  %v6525_v40 = vadd.f32 %v6524_v58, %v6523_v13  ;;  %v6462_v62 = vpop.f32.mrb[146].mxu0  ;;  %v6526_v5 = vpop.f32.mrb[146].mxu1 }
 0x21c   : > { %v6463_v32 = vpop.f32.mrb[147].mxu0  ;;  %v6527_v27 = vpop.f32.mrb[147].mxu1 }
 0x21d   : > { %v9040_v14 = vadd.f32 %v6461_v38, %v8902_v44  ;;  %v9043_v8 = vadd.f32 %v6525_v40, %v8905_v54  ;;  %v6464_v33 = vadd.f32 %v6463_v32, %v6462_v62  ;;  %v6528_v45 = vadd.f32 %v6527_v27, %v6526_v5  ;;  %v7687_v54 = vld [vmem:[%s7874_s9 + $0x818] ss:$84 sps:$4 sm:$0xff]   ;;  %v7698_v40 = vld [vmem:[%s7874_s9 + $0x388] ss:$84 sps:$4 sm:$0xff]  }
 0x21e   : > { %4810 = vmatmul.mubr.bf16.gmra.mrb[252].mxu1 %v7685_v47  ;;  %4907 = vmatmul.mubr.bf16.gmra.mrb[252].mxu0 %v7686_v1  ;;  %v7703_v32 = vld [vmem:[%s7874_s9 + $0x96c] ss:$84 sps:$4 sm:$0xff]   ;;  %v7706_v27 = vld [vmem:[%s7874_s9 + $0x434] ss:$84 sps:$4 sm:$0xff]  }
 0x21f   : > { %v9046_v7 = vadd.f32 %v6464_v33, %v8911_v11  ;;  %v9049_v6 = vadd.f32 %v6528_v45, %v8914_v24  ;;  %4817 = vmatprep.mubr.bf16.mxu1 %v7689_v48  ;;  %4914 = vmatprep.mubr.bf16.mxu0 %v7692_v9 }
 0x221   : > { %v6465_v43 = vpop.f32.mrb[148].mxu0  ;;  %v6529_v44 = vpop.f32.mrb[148].mxu1 }
 0x222   : > { %v6466_v35 = vpop.f32.mrb[149].mxu0  ;;  %v6530_v18 = vpop.f32.mrb[149].mxu1 }
 0x223   : > { %v6467_v36 = vadd.f32 %v6466_v35, %v6465_v43  ;;  %v6531_v37 = vadd.f32 %v6530_v18, %v6529_v44  ;;  %v6468_v4 = vpop.f32.mrb[150].mxu0  ;;  %v6532_v25 = vpop.f32.mrb[150].mxu1 }
 0x224   : > { %v6469_v31 = vpop.f32.mrb[151].mxu0  ;;  %v6533_v11 = vpop.f32.mrb[151].mxu1 }
 0x225   : > { %v9056_v24 = vadd.f32 %v6467_v36, %v8924_v34  ;;  %v9059_v39 = vadd.f32 %v6531_v37, %v8927_v26  ;;  %v6470_v17 = vadd.f32 %v6469_v31, %v6468_v4  ;;  %v6534_v13 = vadd.f32 %v6533_v11, %v6532_v25  ;;  %v7695_v26 = vld [vmem:[%s7874_s9 + $0x8c0] ss:$84 sps:$4 sm:$0xff]   ;;  %v7704_v37 = vld [vmem:[%s7874_s9 + $0x430] ss:$84 sps:$4 sm:$0xff]  }
 0x226   : > { %4818 = vmatmul.mubr.bf16.gmra.mrb[0].mxu1 %v7687_v54  ;;  %4915 = vmatmul.mubr.bf16.gmra.mrb[0].mxu0 %v7690_v19  ;;  %v7711_v31 = vld [vmem:[%s7874_s9 + $0xa14] ss:$84 sps:$4 sm:$0xff]   ;;  %v7714_v11 = vld [vmem:[%s7874_s9 + $0x4dc] ss:$84 sps:$4 sm:$0xff]  }
 0x227   : > { %v9062_v55 = vadd.f32 %v6470_v17, %v8930_v50  ;;  %v9065_v58 = vadd.f32 %v6534_v13, %v8933_v52  ;;  %4825 = vmatprep.mubr.bf16.mxu1 %v7697_v3  ;;  %4922 = vmatprep.mubr.bf16.mxu0 %v7700_v56 }
 0x229   : > { %v6471_v47 = vpop.f32.mrb[152].mxu0  ;;  %v6535_v34 = vpop.f32.mrb[152].mxu1 }
 0x22a   : > { %v6472_v1 = vpop.f32.mrb[153].mxu0  ;;  %v6536_v38 = vpop.f32.mrb[153].mxu1 }
 0x22b   : > { %v6473_v62 = vadd.f32 %v6472_v1, %v6471_v47  ;;  %v6537_v5 = vadd.f32 %v6536_v38, %v6535_v34  ;;  %v6474_v48 = vpop.f32.mrb[154].mxu0  ;;  %v6538_v9 = vpop.f32.mrb[154].mxu1 }
 0x22c   : > { %v6475_v33 = vpop.f32.mrb[155].mxu0  ;;  %v6539_v50 = vpop.f32.mrb[155].mxu1 }
 0x22d   : > { %v9072_v52 = vadd.f32 %v6473_v62, %v8940_v21  ;;  %v9075_v45 = vadd.f32 %v6537_v5, %v8943_v12  ;;  %v6476_v43 = vadd.f32 %v6475_v33, %v6474_v48  ;;  %v6540_v44 = vadd.f32 %v6539_v50, %v6538_v9  ;;  %v7701_v12 = vld [vmem:[%s7874_s9 + $0x968] ss:$84 sps:$4 sm:$0xff]   ;;  %v7712_v5 = vld [vmem:[%s7874_s9 + $0x4d8] ss:$84 sps:$4 sm:$0xff]  }
 0x22e   : > { %4826 = vmatmul.mubr.bf16.gmra.mrb[4].mxu1 %v7695_v26  ;;  %4923 = vmatmul.mubr.bf16.gmra.mrb[4].mxu0 %v7698_v40  ;;  %v7717_v33 = vld [vmem:[%s7874_s9 + $0x584] ss:$84 sps:$4 sm:$0xff]   ;;  %v7720_v50 = vld [vmem:[%s7874_s9 + $0x4c] ss:$84 sps:$4 sm:$0xff]  }
 0x22f   : > { %v9078_v35 = vadd.f32 %v6476_v43, %v8946_v61  ;;  %v9081_v18 = vadd.f32 %v6540_v44, %v8949_v0  ;;  %4833 = vmatprep.mubr.bf16.mxu1 %v7703_v32  ;;  %4930 = vmatprep.mubr.bf16.mxu0 %v7706_v27 }
 0x231   : > { %v6477_v54 = vpop.f32.mrb[156].mxu0  ;;  %v6541_v21 = vpop.f32.mrb[156].mxu1 }
 0x232   : > { %v6478_v19 = vpop.f32.mrb[157].mxu0  ;;  %v6542_v36 = vpop.f32.mrb[157].mxu1 }
 0x233   : > { %v6479_v4 = vadd.f32 %v6478_v19, %v6477_v54  ;;  %v6543_v25 = vadd.f32 %v6542_v36, %v6541_v21  ;;  %v6480_v3 = vpop.f32.mrb[158].mxu0  ;;  %v6544_v56 = vpop.f32.mrb[158].mxu1 }
 0x234   : > { %v6481_v17 = vpop.f32.mrb[159].mxu0  ;;  %v6545_v61 = vpop.f32.mrb[159].mxu1 }
 0x235   : > { %v9088_v0 = vadd.f32 %v6479_v4, %v8956_v59  ;;  %v9091_v13 = vadd.f32 %v6543_v25, %v8959_v60  ;;  %v6482_v47 = vadd.f32 %v6481_v17, %v6480_v3  ;;  %v6546_v34 = vadd.f32 %v6545_v61, %v6544_v56  ;;  %v7709_v60 = vld [vmem:[%s7874_s9 + $0xa10] ss:$84 sps:$4 sm:$0xff]   ;;  %v7718_v25 = vld [vmem:[%s7874_s9 + $0x48] ss:$84 sps:$4 sm:$0xff]   ;;  %v7724_v17 = vld [vmem:[%s7874_s9 + $0x62c] ss:$84 sps:$4 sm:$0xff]  }
 0x236   : > { %4834 = vmatmul.mubr.bf16.gmra.mrb[8].mxu1 %v7701_v12  ;;  %4931 = vmatmul.mubr.bf16.gmra.mrb[8].mxu0 %v7704_v37  ;;  %v7727_v61 = vld [vmem:[%s7874_s9 + $0xf4] ss:$84 sps:$4 sm:$0xff]  }
 0x237   : > { %v9094_v1 = vadd.f32 %v6482_v47, %v8962_v57  ;;  %v9097_v38 = vadd.f32 %v6546_v34, %v8965_v53  ;;  %4841 = vmatprep.mubr.bf16.mxu1 %v7711_v31  ;;  %4938 = vmatprep.mubr.bf16.mxu0 %v7714_v11 }
 0x239   : > { %v6483_v26 = vpop.f32.mrb[160].mxu0  ;;  %v6547_v59 = vpop.f32.mrb[160].mxu1 }
 0x23a   : > { %v6484_v40 = vpop.f32.mrb[161].mxu0  ;;  %v6548_v62 = vpop.f32.mrb[161].mxu1 }
 0x23b   : > { %v6485_v48 = vadd.f32 %v6484_v40, %v6483_v26  ;;  %v6549_v9 = vadd.f32 %v6548_v62, %v6547_v59  ;;  %v6486_v32 = vpop.f32.mrb[162].mxu0  ;;  %v6550_v27 = vpop.f32.mrb[162].mxu1 }
 0x23c   : > { %v6487_v43 = vpop.f32.mrb[163].mxu0  ;;  %v6551_v57 = vpop.f32.mrb[163].mxu1 }
 0x23d   : > { %v9104_v53 = vadd.f32 %v6485_v48, %v8972_v42  ;;  %v9107_v44 = vadd.f32 %v6549_v9, %v8975_v16  ;;  %v6488_v54 = vadd.f32 %v6487_v43, %v6486_v32  ;;  %v6552_v21 = vadd.f32 %v6551_v57, %v6550_v27  ;;  %v7715_v16 = vld [vmem:[%s7874_s9 + $0x580] ss:$84 sps:$4 sm:$0xff]   ;;  %v7725_v9 = vld [vmem:[%s7874_s9 + $0xf0] ss:$84 sps:$4 sm:$0xff]  }
 0x23e   : > { %4842 = vmatmul.mubr.bf16.gmra.mrb[12].mxu1 %v7709_v60  ;;  %4939 = vmatmul.mubr.bf16.gmra.mrb[12].mxu0 %v7712_v5  ;;  %v7730_v43 = vld [vmem:[%s7874_s9 + $0x6d4] ss:$84 sps:$4 sm:$0xff]   ;;  %v7733_v57 = vld [vmem:[%s7874_s9 + $0x19c] ss:$84 sps:$4 sm:$0xff]  }
 0x23f   : > { %v9110_v19 = vadd.f32 %v6488_v54, %v8978_v49  ;;  %v9113_v36 = vadd.f32 %v6552_v21, %v8981_v15  ;;  %4946 = vmatprep.mubr.bf16.mxu0 %v7717_v33  ;;  %5043 = vmatprep.mubr.bf16.mxu1 %v7720_v50 }
 0x241   : > { %v6489_v12 = vpop.f32.mrb[164].mxu0  ;;  %v6553_v42 = vpop.f32.mrb[164].mxu1 }
 0x242   : > { %v6490_v37 = vpop.f32.mrb[165].mxu0  ;;  %v6554_v4 = vpop.f32.mrb[165].mxu1 }
 0x243   : > { %v6491_v3 = vadd.f32 %v6490_v37, %v6489_v12  ;;  %v6555_v56 = vadd.f32 %v6554_v4, %v6553_v42  ;;  %v6492_v31 = vpop.f32.mrb[166].mxu0  ;;  %v6556_v11 = vpop.f32.mrb[166].mxu1 }
 0x244   : > { %v6493_v47 = vpop.f32.mrb[167].mxu0  ;;  %v6557_v49 = vpop.f32.mrb[167].mxu1 }
 0x245   : > { %v9120_v15 = vadd.f32 %v6491_v3, %v8991_v28  ;;  %v9123_v34 = vadd.f32 %v6555_v56, %v8994_v46  ;;  %v6494_v26 = vadd.f32 %v6493_v47, %v6492_v31  ;;  %v6558_v59 = vadd.f32 %v6557_v49, %v6556_v11  ;;  %v7722_v46 = vld [vmem:[%s7874_s9 + $0x628] ss:$84 sps:$4 sm:$0xff]   ;;  %v7731_v56 = vld [vmem:[%s7874_s9 + $0x198] ss:$84 sps:$4 sm:$0xff]  }
 0x246   : > { %4947 = vmatmul.mubr.bf16.gmra.mrb[16].mxu0 %v7715_v16  ;;  %5044 = vmatmul.mubr.bf16.vlgmr.msra.gmra.mrb[16].mxu1 %v7718_v25  ;;  %v7736_v47 = vld [vmem:[%s7874_s9 + $0x77c] ss:$84 sps:$4 sm:$0xff]   ;;  %v7739_v49 = vld [vmem:[%s7874_s9 + $0x244] ss:$84 sps:$4 sm:$0xff]  }
 0x247   : > { %v9126_v40 = vadd.f32 %v6494_v26, %v8997_v51  ;;  %v9129_v62 = vadd.f32 %v6558_v59, %v9000_v20  ;;  %4954 = vmatprep.mubr.bf16.mxu0 %v7724_v17  ;;  %5051 = vmatprep.mubr.bf16.mxu1 %v7727_v61 }
 0x249   : > { %v6495_v60 = vpop.f32.mrb[168].mxu0  ;;  %v6559_v28 = vpop.f32.mrb[168].mxu1 }
 0x24a   : > { %v6496_v5 = vpop.f32.mrb[169].mxu0  ;;  %v6560_v48 = vpop.f32.mrb[169].mxu1 }
 0x24b   : > { %v6497_v32 = vadd.f32 %v6496_v5, %v6495_v60  ;;  %v6561_v27 = vadd.f32 %v6560_v48, %v6559_v28  ;;  %v6498_v33 = vpop.f32.mrb[170].mxu0  ;;  %v6562_v50 = vpop.f32.mrb[170].mxu1 }
 0x24c   : > { %v6499_v54 = vpop.f32.mrb[171].mxu0  ;;  %v6563_v51 = vpop.f32.mrb[171].mxu1 }
 0x24d   : > { %v9136_v20 = vadd.f32 %v6497_v32, %v9008_v10  ;;  %v9139_v21 = vadd.f32 %v6561_v27, %v9011_v63  ;;  %v6500_v12 = vadd.f32 %v6499_v54, %v6498_v33  ;;  %v6564_v42 = vadd.f32 %v6563_v51, %v6562_v50  ;;  %v7728_v63 = vld [vmem:[%s7874_s9 + $0x6d0] ss:$84 sps:$4 sm:$0xff]   ;;  %v7737_v27 = vld [vmem:[%s7874_s9 + $0x240] ss:$84 sps:$4 sm:$0xff]  }
 0x24e   : > { %4955 = vmatmul.mubr.bf16.gmra.mrb[20].mxu0 %v7722_v46  ;;  %5052 = vmatmul.mubr.bf16.gmra.mrb[20].mxu1 %v7725_v9  ;;  %v7742_v54 = vld [vmem:[%s7874_s9 + $0x824] ss:$84 sps:$4 sm:$0xff]   ;;  %v7745_v51 = vld [vmem:[%s7874_s9 + $0x2ec] ss:$84 sps:$4 sm:$0xff]  }
 0x24f   : > { %v9142_v37 = vadd.f32 %v6500_v12, %v9014_v41  ;;  %v9145_v4 = vadd.f32 %v6564_v42, %v9017_v29  ;;  %4962 = vmatprep.mubr.bf16.mxu0 %v7730_v43  ;;  %5059 = vmatprep.mubr.bf16.mxu1 %v7733_v57 }
 0x251   : > { %v6501_v16 = vpop.f32.mrb[172].mxu0  ;;  %v6565_v10 = vpop.f32.mrb[172].mxu1 }
 0x252   : > { %v6502_v25 = vpop.f32.mrb[173].mxu0  ;;  %v6566_v3 = vpop.f32.mrb[173].mxu1 }
 0x253   : > { %v6503_v31 = vadd.f32 %v6502_v25, %v6501_v16  ;;  %v6567_v11 = vadd.f32 %v6566_v3, %v6565_v10  ;;  %v6504_v17 = vpop.f32.mrb[174].mxu0  ;;  %v6568_v61 = vpop.f32.mrb[174].mxu1 }
 0x254   : > { %v6505_v26 = vpop.f32.mrb[175].mxu0  ;;  %v6569_v41 = vpop.f32.mrb[175].mxu1 }
 0x255   : > { %v9152_v29 = vadd.f32 %v6503_v31, %v9024_v22  ;;  %v9155_v59 = vadd.f32 %v6567_v11, %v9027_v30  ;;  %v6506_v60 = vadd.f32 %v6505_v26, %v6504_v17  ;;  %v6570_v28 = vadd.f32 %v6569_v41, %v6568_v61  ;;  %v7734_v30 = vld [vmem:[%s7874_s9 + $0x778] ss:$84 sps:$4 sm:$0xff]   ;;  %v7743_v11 = vld [vmem:[%s7874_s9 + $0x2e8] ss:$84 sps:$4 sm:$0xff]  }
 0x256   : > { %4963 = vmatmul.mubr.bf16.gmra.mrb[24].mxu0 %v7728_v63  ;;  %5060 = vmatmul.mubr.bf16.gmra.mrb[24].mxu1 %v7731_v56  ;;  %v7748_v26 = vld [vmem:[%s7874_s9 + $0x8cc] ss:$84 sps:$4 sm:$0xff]   ;;  %v7751_v41 = vld [vmem:[%s7874_s9 + $0x394] ss:$84 sps:$4 sm:$0xff]  }
 0x257   : > { %v9158_v5 = vadd.f32 %v6506_v60, %v9030_v23  ;;  %v9161_v48 = vadd.f32 %v6570_v28, %v9033_v2  ;;  %4970 = vmatprep.mubr.bf16.mxu0 %v7736_v47  ;;  %5067 = vmatprep.mubr.bf16.mxu1 %v7739_v49 }
 0x259   : > { %v6571_v46 = vpop.f32.mrb[176].mxu1  ;;  %v6635_v22 = vpop.f32.mrb[176].mxu0 }
 0x25a   : > { %v6572_v9 = vpop.f32.mrb[177].mxu1  ;;  %v6636_v32 = vpop.f32.mrb[177].mxu0 }
 0x25b   : > { %v6573_v33 = vadd.f32 %v6572_v9, %v6571_v46  ;;  %v6637_v50 = vadd.f32 %v6636_v32, %v6635_v22  ;;  %v6574_v43 = vpop.f32.mrb[178].mxu1  ;;  %v6638_v57 = vpop.f32.mrb[178].mxu0 }
 0x25c   : > { %v6575_v12 = vpop.f32.mrb[179].mxu1  ;;  %v6639_v23 = vpop.f32.mrb[179].mxu0 }
 0x25d   : > { %v9168_v2 = vadd.f32 %v6573_v33, %v9040_v14  ;;  %v9171_v42 = vadd.f32 %v6637_v50, %v9043_v8  ;;  %v6576_v16 = vadd.f32 %v6575_v12, %v6574_v43  ;;  %v6640_v10 = vadd.f32 %v6639_v23, %v6638_v57  ;;  %v7740_v8 = vld [vmem:[%s7874_s9 + $0x820] ss:$84 sps:$4 sm:$0xff]   ;;  %v7749_v50 = vld [vmem:[%s7874_s9 + $0x390] ss:$84 sps:$4 sm:$0xff]  }
 0x25e   : > { %4971 = vmatmul.mubr.bf16.gmra.mrb[28].mxu0 %v7734_v30  ;;  %5068 = vmatmul.mubr.bf16.gmra.mrb[28].mxu1 %v7737_v27  ;;  %v7754_v12 = vld [vmem:[%s7874_s9 + $0x974] ss:$84 sps:$4 sm:$0xff]   ;;  %v7757_v23 = vld [vmem:[%s7874_s9 + $0x43c] ss:$84 sps:$4 sm:$0xff]  }
 0x25f   : > { %v9174_v25 = vadd.f32 %v6576_v16, %v9046_v7  ;;  %v9177_v3 = vadd.f32 %v6640_v10, %v9049_v6  ;;  %4978 = vmatprep.mubr.bf16.mxu0 %v7742_v54  ;;  %5075 = vmatprep.mubr.bf16.mxu1 %v7745_v51 }
 0x261   : > { %v6577_v63 = vpop.f32.mrb[180].mxu1  ;;  %v6641_v14 = vpop.f32.mrb[180].mxu0 }
 0x262   : > { %v6578_v56 = vpop.f32.mrb[181].mxu1  ;;  %v6642_v31 = vpop.f32.mrb[181].mxu0 }
 0x263   : > { %v6579_v17 = vadd.f32 %v6578_v56, %v6577_v63  ;;  %v6643_v61 = vadd.f32 %v6642_v31, %v6641_v14  ;;  %v6580_v47 = vpop.f32.mrb[182].mxu1  ;;  %v6644_v49 = vpop.f32.mrb[182].mxu0 }
 0x264   : > { %v6581_v60 = vpop.f32.mrb[183].mxu1  ;;  %v6645_v7 = vpop.f32.mrb[183].mxu0 }
 0x265   : > { %v9184_v6 = vadd.f32 %v6579_v17, %v9056_v24  ;;  %v9187_v28 = vadd.f32 %v6643_v61, %v9059_v39  ;;  %v6582_v46 = vadd.f32 %v6581_v60, %v6580_v47  ;;  %v6646_v22 = vadd.f32 %v6645_v7, %v6644_v49  ;;  %v7746_v39 = vld [vmem:[%s7874_s9 + $0x8c8] ss:$84 sps:$4 sm:$0xff]   ;;  %v7755_v61 = vld [vmem:[%s7874_s9 + $0x438] ss:$84 sps:$4 sm:$0xff]  }
 0x266   : > { %4979 = vmatmul.mubr.bf16.gmra.mrb[32].mxu0 %v7740_v8  ;;  %5076 = vmatmul.mubr.bf16.gmra.mrb[32].mxu1 %v7743_v11  ;;  %v7760_v60 = vld [vmem:[%s7874_s9 + $0xa1c] ss:$84 sps:$4 sm:$0xff]   ;;  %v7763_v7 = vld [vmem:[%s7874_s9 + $0x4e4] ss:$84 sps:$4 sm:$0xff]  }
 0x267   : > { %v9190_v9 = vadd.f32 %v6582_v46, %v9062_v55  ;;  %v9193_v32 = vadd.f32 %v6646_v22, %v9065_v58  ;;  %4986 = vmatprep.mubr.bf16.mxu0 %v7748_v26  ;;  %5083 = vmatprep.mubr.bf16.mxu1 %v7751_v41 }
 0x269   : > { %v6583_v30 = vpop.f32.mrb[184].mxu1  ;;  %v6647_v24 = vpop.f32.mrb[184].mxu0 }
 0x26a   : > { %v6584_v27 = vpop.f32.mrb[185].mxu1  ;;  %v6648_v33 = vpop.f32.mrb[185].mxu0 }
 0x26b   : > { %v6585_v43 = vadd.f32 %v6584_v27, %v6583_v30  ;;  %v6649_v57 = vadd.f32 %v6648_v33, %v6647_v24  ;;  %v6586_v54 = vpop.f32.mrb[186].mxu1  ;;  %v6650_v51 = vpop.f32.mrb[186].mxu0 }
 0x26c   : > { %v6587_v16 = vpop.f32.mrb[187].mxu1  ;;  %v6651_v55 = vpop.f32.mrb[187].mxu0 }
 0x26d   : > { %v9200_v58 = vadd.f32 %v6585_v43, %v9072_v52  ;;  %v9203_v10 = vadd.f32 %v6649_v57, %v9075_v45  ;;  %v6588_v63 = vadd.f32 %v6587_v16, %v6586_v54  ;;  %v6652_v14 = vadd.f32 %v6651_v55, %v6650_v51  ;;  %v7752_v45 = vld [vmem:[%s7874_s9 + $0x970] ss:$84 sps:$4 sm:$0xff]   ;;  %v7761_v57 = vld [vmem:[%s7874_s9 + $0x4e0] ss:$84 sps:$4 sm:$0xff]  }
 0x26e   : > { %4987 = vmatmul.mubr.bf16.gmra.mrb[36].mxu0 %v7746_v39  ;;  %5084 = vmatmul.mubr.bf16.gmra.mrb[36].mxu1 %v7749_v50  ;;  %v7766_v16 = vld [vmem:[%s7874_s9 + $0x58c] ss:$84 sps:$4 sm:$0xff]   ;;  %v7767_v55 = vld [vmem:[%s7874_s9 + $0x50] ss:$84 sps:$4 sm:$0xff]  }
 0x26f   : > { %v9206_v56 = vadd.f32 %v6588_v63, %v9078_v35  ;;  %v9209_v31 = vadd.f32 %v6652_v14, %v9081_v18  ;;  %4994 = vmatprep.mubr.bf16.mxu0 %v7754_v12  ;;  %5091 = vmatprep.mubr.bf16.mxu1 %v7757_v23 }
 0x271   : > { %v6589_v8 = vpop.f32.mrb[188].mxu1  ;;  %v6653_v52 = vpop.f32.mrb[188].mxu0 }
 0x272   : > { %v6590_v11 = vpop.f32.mrb[189].mxu1  ;;  %v6654_v17 = vpop.f32.mrb[189].mxu0 }
 0x273   : > { %v6591_v47 = vadd.f32 %v6590_v11, %v6589_v8  ;;  %v6655_v49 = vadd.f32 %v6654_v17, %v6653_v52  ;;  %v6592_v26 = vpop.f32.mrb[190].mxu1  ;;  %v6656_v41 = vpop.f32.mrb[190].mxu0 }
 0x274   : > { %v6593_v46 = vpop.f32.mrb[191].mxu1  ;;  %v6657_v35 = vpop.f32.mrb[191].mxu0 }
 0x275   : > { %v9216_v18 = vadd.f32 %v6591_v47, %v9088_v0  ;;  %v9219_v22 = vadd.f32 %v6655_v49, %v9091_v13  ;;  %v6594_v30 = vadd.f32 %v6593_v46, %v6592_v26  ;;  %v6658_v24 = vadd.f32 %v6657_v35, %v6656_v41  ;;  %v7758_v13 = vld [vmem:[%s7874_s9 + $0xa18] ss:$84 sps:$4 sm:$0xff]   ;;  %v7764_v47 = vld [vmem:[%s7874_s9 + $0x588] ss:$84 sps:$4 sm:$0xff]   ;;  %v7772_v35 = vld [vmem:[%s7874_s9 + $0x1a0] ss:$84 sps:$4 sm:$0xff]  }
 0x276   : > { %4995 = vmatmul.mubr.bf16.gmra.mrb[40].mxu0 %v7752_v45  ;;  %5092 = vmatmul.mubr.bf16.gmra.mrb[40].mxu1 %v7755_v61  ;;  %v7768_v49 = vld [vmem:[%s7874_s9 + $0xf8] ss:$84 sps:$4 sm:$0xff]   ;;  %v7771_v46 = vld [vmem:[%s7874_s9 + $0x634] ss:$84 sps:$4 sm:$0xff]  }
 0x277   : > { %v9222_v27 = vadd.f32 %v6594_v30, %v9094_v1  ;;  %v9225_v33 = vadd.f32 %v6658_v24, %v9097_v38  ;;  %5002 = vmatprep.mubr.bf16.mxu0 %v7760_v60  ;;  %5099 = vmatprep.mubr.bf16.mxu1 %v7763_v7 }
 0x279   : > { %v6595_v39 = vpop.f32.mrb[192].mxu1  ;;  %v6659_v0 = vpop.f32.mrb[192].mxu0 }
 0x27a   : > { %v6596_v50 = vpop.f32.mrb[193].mxu1  ;;  %v6660_v43 = vpop.f32.mrb[193].mxu0 }
 0x27b   : > { %v6597_v54 = vadd.f32 %v6596_v50, %v6595_v39  ;;  %v6661_v51 = vadd.f32 %v6660_v43, %v6659_v0  ;;  %v6598_v12 = vpop.f32.mrb[194].mxu1  ;;  %v6662_v23 = vpop.f32.mrb[194].mxu0 }
 0x27c   : > { %v6599_v63 = vpop.f32.mrb[195].mxu1  ;;  %v6663_v1 = vpop.f32.mrb[195].mxu0 }
 0x27d   : > { %v9232_v38 = vadd.f32 %v6597_v54, %v9104_v53  ;;  %v9235_v14 = vadd.f32 %v6661_v51, %v9107_v44  ;;  %v6600_v8 = vadd.f32 %v6599_v63, %v6598_v12  ;;  %v6664_v52 = vadd.f32 %v6663_v1, %v6662_v23  ;;  %v7769_v54 = vld [vmem:[%s7874_s9 + $0x630] ss:$84 sps:$4 sm:$0xff]   ;;  %v7773_v51 = vld [vmem:[%s7874_s9 + $0x248] ss:$84 sps:$4 sm:$0xff]  }
 0x27e   : > { %5003 = vmatmul.mubr.bf16.gmra.mrb[44].mxu0 %v7758_v13  ;;  %5100 = vmatmul.mubr.bf16.gmra.mrb[44].mxu1 %v7761_v57  ;;  %v7776_v63 = vld [vmem:[%s7874_s9 + $0x6dc] ss:$84 sps:$4 sm:$0xff]  }
 0x27f   : > { %v9238_v11 = vadd.f32 %v6600_v8, %v9110_v19  ;;  %v9241_v17 = vadd.f32 %v6664_v52, %v9113_v36  ;;  %5107 = vmatprep.mubr.bf16.mxu1 %v7766_v16  ;;  %7089 = vmatprep.mubr.msk.bf16.mxu0 %vm3513_vm0, %v7767_v55  ;;  %v7777_v1 = vld [vmem:[%s7874_s9 + $0x2f0] ss:$84 sps:$4 sm:$0xff]  }
 0x281   : > { %v6601_v53 = vpop.f32.mrb[196].mxu1  ;;  %v6665_v45 = vpop.f32.mrb[196].mxu0 }
 0x282   : > { %v6602_v61 = vpop.f32.mrb[197].mxu1  ;;  %v6666_v44 = vpop.f32.mrb[197].mxu0 }
 0x283   : > { %v6603_v26 = vadd.f32 %v6602_v61, %v6601_v53  ;;  %v6667_v41 = vadd.f32 %v6666_v44, %v6665_v45  ;;  %v6604_v60 = vpop.f32.mrb[198].mxu1  ;;  %v6668_v7 = vpop.f32.mrb[198].mxu0 }
 0x284   : > { %v6605_v19 = vpop.f32.mrb[199].mxu1  ;;  %v6669_v30 = vpop.f32.mrb[199].mxu0 }
 0x285   : > { %v9249_v36 = vadd.f32 %v6603_v26, %v9120_v15  ;;  %v9252_v24 = vadd.f32 %v6667_v41, %v9123_v34  ;;  %v6606_v39 = vadd.f32 %v6605_v19, %v6604_v60  ;;  %v6670_v0 = vadd.f32 %v6669_v30, %v6668_v7  ;;  %v7774_v26 = vld [vmem:[%s7874_s9 + $0x6d8] ss:$84 sps:$4 sm:$0xff]   ;;  %v7782_v30 = vld [vmem:[%s7874_s9 + $0x440] ss:$84 sps:$4 sm:$0xff]  }
 0x286   : > { %5108 = vmatmul.mubr.bf16.gmra.mrb[48].mxu1 %v7764_v47  ;;  %7090 = vmatmul.mubr.msk.bf16.vlgmr.msra.gmra.mrb[48].mxu0 %vm3513_vm0, %v7768_v49  ;;  %v7778_v41 = vld [vmem:[%s7874_s9 + $0x398] ss:$84 sps:$4 sm:$0xff]  }
 0x287   : > { %v9256_v50 = vadd.f32 %v6606_v39, %v9126_v40  ;;  %v9259_v43 = vadd.f32 %v6670_v0, %v9129_v62  ;;  %5115 = vmatprep.mubr.bf16.mxu1 %v7771_v46  ;;  %7093 = vmatprep.mubr.msk.bf16.mxu0 %vm3513_vm0, %v7772_v35  ;;  %v7781_v19 = vld [vmem:[%s7874_s9 + $0x784] ss:$84 sps:$4 sm:$0xff]  }
 0x289   : > { %v6607_v15 = vpop.f32.mrb[200].mxu1  ;;  %v6671_v13 = vpop.f32.mrb[200].mxu0 }
 0x28a   : > { %v6608_v34 = vpop.f32.mrb[201].mxu1  ;;  %v6672_v57 = vpop.f32.mrb[201].mxu0 }
 0x28b   : > { %v6609_v12 = vadd.f32 %v6608_v34, %v6607_v15  ;;  %v6673_v23 = vadd.f32 %v6672_v57, %v6671_v13  ;;  %v6610_v16 = vpop.f32.mrb[202].mxu1  ;;  %v6674_v55 = vpop.f32.mrb[202].mxu0 }
 0x28c   : > { %v6611_v40 = vpop.f32.mrb[203].mxu1  ;;  %v6675_v8 = vpop.f32.mrb[203].mxu0 }
 0x28d   : > { %v9267_v62 = vadd.f32 %v6609_v12, %v9136_v20  ;;  %v9270_v52 = vadd.f32 %v6673_v23, %v9139_v21  ;;  %v6612_v53 = vadd.f32 %v6611_v40, %v6610_v16  ;;  %v6676_v45 = vadd.f32 %v6675_v8, %v6674_v55  ;;  %v7779_v12 = vld [vmem:[%s7874_s9 + $0x780] ss:$84 sps:$4 sm:$0xff]   ;;  %v7783_v23 = vld [vmem:[%s7874_s9 + $0x4e8] ss:$84 sps:$4 sm:$0xff]   ;;  %v7787_v8 = vld [vmem:[%s7874_s9 + $0x590] ss:$84 sps:$4 sm:$0xff]  }
 0x28e   : > { %5116 = vmatmul.mubr.bf16.gmra.mrb[52].mxu1 %v7769_v54  ;;  %7094 = vmatmul.mubr.msk.bf16.gmra.mrb[52].mxu0 %vm3513_vm0, %v7773_v51  ;;  %v7786_v40 = vld [vmem:[%s7874_s9 + $0x82c] ss:$84 sps:$4 sm:$0xff]  }
 0x28f   : > { %v9274_v61 = vadd.f32 %v6612_v53, %v9142_v37  ;;  %v9277_v44 = vadd.f32 %v6676_v45, %v9145_v4  ;;  %5123 = vmatprep.mubr.bf16.mxu1 %v7776_v63  ;;  %7097 = vmatprep.mubr.msk.bf16.mxu0 %vm3513_vm0, %v7777_v1 }
 0x291   : > { %v6613_v20 = vpop.f32.mrb[204].mxu1  ;;  %v6677_v47 = vpop.f32.mrb[204].mxu0 }
 0x292   : > { %v6614_v21 = vpop.f32.mrb[205].mxu1  ;;  %v6678_v49 = vpop.f32.mrb[205].mxu0 }
 0x293   : > { %v6615_v60 = vadd.f32 %v6614_v21, %v6613_v20  ;;  %v6679_v7 = vadd.f32 %v6678_v49, %v6677_v47  ;;  %v6616_v46 = vpop.f32.mrb[206].mxu1  ;;  %v6680_v35 = vpop.f32.mrb[206].mxu0 }
 0x294   : > { %v6617_v37 = vpop.f32.mrb[207].mxu1  ;;  %v6681_v39 = vpop.f32.mrb[207].mxu0 }
 0x295   : > { %v9285_v4 = vadd.f32 %v6615_v60, %v9152_v29  ;;  %v9288_v0 = vadd.f32 %v6679_v7, %v9155_v59  ;;  %v6618_v15 = vadd.f32 %v6617_v37, %v6616_v46  ;;  %v6682_v13 = vadd.f32 %v6681_v39, %v6680_v35  ;;  %v7784_v60 = vld [vmem:[%s7874_s9 + $0x828] ss:$84 sps:$4 sm:$0xff]   ;;  %v7788_v7 = vld [vmem:[%s7874_s9 + $0x638] ss:$84 sps:$4 sm:$0xff]   ;;  %v7792_v39 = vld [vmem:[%s7874_s9 + $0x6e0] ss:$84 sps:$4 sm:$0xff]  }
 0x296   : > { %5124 = vmatmul.mubr.bf16.gmra.mrb[56].mxu1 %v7774_v26  ;;  %7098 = vmatmul.mubr.msk.bf16.gmra.mrb[56].mxu0 %vm3513_vm0, %v7778_v41  ;;  %v7791_v37 = vld [vmem:[%s7874_s9 + $0x8d4] ss:$84 sps:$4 sm:$0xff]  }
 0x297   : > { %v9292_v34 = vadd.f32 %v6618_v15, %v9158_v5  ;;  %v9295_v57 = vadd.f32 %v6682_v13, %v9161_v48  ;;  %5131 = vmatprep.mubr.bf16.mxu1 %v7781_v19  ;;  %7101 = vmatprep.mubr.msk.bf16.mxu0 %vm3513_vm0, %v7782_v30 }
 0x299   : > { %v6683_v29 = vpop.f32.mrb[208].mxu0  ;;  %v6747_v54 = vpop.f32.mrb[208].mxu1 }
 0x29a   : > { %v6684_v59 = vpop.f32.mrb[209].mxu0  ;;  %v6748_v51 = vpop.f32.mrb[209].mxu1 }
 0x29b   : > { %v6685_v16 = vadd.f32 %v6684_v59, %v6683_v29  ;;  %v6749_v55 = vadd.f32 %v6748_v51, %v6747_v54  ;;  %v6686_v63 = vpop.f32.mrb[210].mxu0  ;;  %v6750_v1 = vpop.f32.mrb[210].mxu1 }
 0x29c   : > { %v6687_v5 = vpop.f32.mrb[211].mxu0  ;;  %v6751_v53 = vpop.f32.mrb[211].mxu1 }
 0x29d   : > { %v9303_v48 = vadd.f32 %v6685_v16, %v9168_v2  ;;  %v9306_v45 = vadd.f32 %v6749_v55, %v9171_v42  ;;  %v6688_v20 = vadd.f32 %v6687_v5, %v6686_v63  ;;  %v6752_v47 = vadd.f32 %v6751_v53, %v6750_v1  ;;  %v7789_v16 = vld [vmem:[%s7874_s9 + $0x8d0] ss:$84 sps:$4 sm:$0xff]   ;;  %v7793_v55 = vld [vmem:[%s7874_s9 + $0x788] ss:$84 sps:$4 sm:$0xff]  }
 0x29e   : > { %5132 = vmatmul.mubr.bf16.gmra.mrb[60].mxu1 %v7779_v12  ;;  %7102 = vmatmul.mubr.msk.bf16.gmra.mrb[60].mxu0 %vm3513_vm0, %v7783_v23  ;;  %v7796_v5 = vld [vmem:[%s7874_s9 + $0x97c] ss:$84 sps:$4 sm:$0xff]  }
 0x29f   : > { %v9310_v21 = vadd.f32 %v6688_v20, %v9174_v25  ;;  %v9313_v49 = vadd.f32 %v6752_v47, %v9177_v3  ;;  %5139 = vmatprep.mubr.bf16.mxu1 %v7786_v40  ;;  %7105 = vmatprep.mubr.msk.bf16.mxu0 %vm3513_vm0, %v7787_v8  ;;  %v7797_v53 = vld [vmem:[%s7874_s9 + $0x830] ss:$84 sps:$4 sm:$0xff]  }
 0x2a1   : > { %v6689_v2 = vpop.f32.mrb[212].mxu0  ;;  %v6753_v26 = vpop.f32.mrb[212].mxu1 }
 0x2a2   : > { %v6690_v42 = vpop.f32.mrb[213].mxu0  ;;  %v6754_v41 = vpop.f32.mrb[213].mxu1 }
 0x2a3   : > { %v6691_v46 = vadd.f32 %v6690_v42, %v6689_v2  ;;  %v6755_v35 = vadd.f32 %v6754_v41, %v6753_v26  ;;  %v6692_v19 = vpop.f32.mrb[214].mxu0  ;;  %v6756_v30 = vpop.f32.mrb[214].mxu1 }
 0x2a4   : > { %v6693_v25 = vpop.f32.mrb[215].mxu0  ;;  %v6757_v15 = vpop.f32.mrb[215].mxu1 }
 0x2a5   : > { %v9321_v3 = vadd.f32 %v6691_v46, %v9184_v6  ;;  %v9324_v13 = vadd.f32 %v6755_v35, %v9187_v28  ;;  %v6694_v29 = vadd.f32 %v6693_v25, %v6692_v19  ;;  %v6758_v54 = vadd.f32 %v6757_v15, %v6756_v30  ;;  %v7794_v46 = vld [vmem:[%s7874_s9 + $0x978] ss:$84 sps:$4 sm:$0xff]   ;;  %v7802_v15 = vld [vmem:[%s7874_s9 + $0x980] ss:$84 sps:$4 sm:$0xff]  }
 0x2a6   : > { %5140 = vmatmul.mubr.bf16.gmra.mrb[64].mxu1 %v7784_v60  ;;  %7106 = vmatmul.mubr.msk.bf16.gmra.mrb[64].mxu0 %vm3513_vm0, %v7788_v7  ;;  %v7798_v35 = vld [vmem:[%s7874_s9 + $0x8d8] ss:$84 sps:$4 sm:$0xff]  }
 0x2a7   : > { %v9328_v59 = vadd.f32 %v6694_v29, %v9190_v9  ;;  %v9331_v51 = vadd.f32 %v6758_v54, %v9193_v32  ;;  %5147 = vmatprep.mubr.bf16.mxu1 %v7791_v37  ;;  %7109 = vmatprep.mubr.msk.bf16.mxu0 %vm3513_vm0, %v7792_v39  ;;  %v7801_v25 = vld [vmem:[%s7874_s9 + $0xa24] ss:$84 sps:$4 sm:$0xff]  }
 0x2a9   : > { %v6695_v6 = vpop.f32.mrb[216].mxu0  ;;  %v6759_v12 = vpop.f32.mrb[216].mxu1 }
 0x2aa   : > { %v6696_v28 = vpop.f32.mrb[217].mxu0  ;;  %v6760_v23 = vpop.f32.mrb[217].mxu1 }
 0x2ab   : > { %v6697_v63 = vadd.f32 %v6696_v28, %v6695_v6  ;;  %v6761_v1 = vadd.f32 %v6760_v23, %v6759_v12  ;;  %v6698_v40 = vpop.f32.mrb[218].mxu0  ;;  %v6762_v8 = vpop.f32.mrb[218].mxu1 }
 0x2ac   : > { %v6699_v9 = vpop.f32.mrb[219].mxu0  ;;  %v6763_v20 = vpop.f32.mrb[219].mxu1 }
 0x2ad   : > { %v9339_v32 = vadd.f32 %v6697_v63, %v9200_v58  ;;  %v9342_v47 = vadd.f32 %v6761_v1, %v9203_v10  ;;  %v6700_v2 = vadd.f32 %v6699_v9, %v6698_v40  ;;  %v6764_v26 = vadd.f32 %v6763_v20, %v6762_v8  ;;  %v7803_v1 = vld [vmem:[%s7874_s9 + $0xa28] ss:$84 sps:$4 sm:$0xff]  }
 0x2ae   : > { %5148 = vmatmul.mubr.bf16.gmra.mrb[68].mxu1 %v7789_v16  ;;  %7110 = vmatmul.mubr.msk.bf16.gmra.mrb[68].mxu0 %vm3513_vm0, %v7793_v55 }
 0x2af   : > { %v9346_v42 = vadd.f32 %v6700_v2, %v9206_v56  ;;  %v9349_v41 = vadd.f32 %v6764_v26, %v9209_v31  ;;  %5155 = vmatprep.mubr.bf16.mxu1 %v7796_v5  ;;  %7113 = vmatprep.mubr.msk.bf16.mxu0 %vm3513_vm0, %v7797_v53 }
 0x2b1   : > { %v6701_v58 = vpop.f32.mrb[220].mxu0  ;;  %v6765_v60 = vpop.f32.mrb[220].mxu1 }
 0x2b2   : > { %v6702_v10 = vpop.f32.mrb[221].mxu0  ;;  %v6766_v7 = vpop.f32.mrb[221].mxu1 }
 0x2b3   : > { %v6703_v19 = vadd.f32 %v6702_v10, %v6701_v58  ;;  %v6767_v30 = vadd.f32 %v6766_v7, %v6765_v60  ;;  %v6704_v37 = vpop.f32.mrb[222].mxu0  ;;  %v6768_v39 = vpop.f32.mrb[222].mxu1 }
 0x2b4   : > { %v6705_v56 = vpop.f32.mrb[223].mxu0  ;;  %v6769_v29 = vpop.f32.mrb[223].mxu1 }
 0x2b5   : > { %v9357_v31 = vadd.f32 %v6703_v19, %v9216_v18  ;;  %v9360_v54 = vadd.f32 %v6767_v30, %v9219_v22  ;;  %v6706_v6 = vadd.f32 %v6705_v56, %v6704_v37  ;;  %v6770_v12 = vadd.f32 %v6769_v29, %v6768_v39  ;;  %v7799_v22 = vld [vmem:[%s7874_s9 + $0xa20] ss:$84 sps:$4 sm:$0xff]   ;;  %s5429_s9 = sshll.u32 %s9697_s16, 3 }
 0x2b6   : > { %5156 = vmatmul.mubr.bf16.gmra.mrb[72].mxu1 %v7794_v46  ;;  %7114 = vmatmul.mubr.msk.bf16.gmra.mrb[72].mxu0 %vm3513_vm0, %v7798_v35  ;;  %s9617_s10 = scalar_lea.vmem %s9695_s3, %s5429_s9 }
 0x2b7   : > { %v9364_v28 = vadd.f32 %v6706_v6, %v9222_v27  ;;  %v9367_v23 = vadd.f32 %v6770_v12, %v9225_v33  ;;  %5163 = vmatprep.mubr.bf16.mxu1 %v7801_v25  ;;  %7117 = vmatprep.mubr.msk.bf16.mxu0 %vm3513_vm0, %v7802_v15 }
 0x2b9   : > { %v6707_v16 = vpop.f32.mrb[224].mxu0  ;;  %v6771_v18 = vpop.f32.mrb[224].mxu1 }
 0x2ba   : > { %v6708_v55 = vpop.f32.mrb[225].mxu0  ;;  %v6772_v63 = vpop.f32.mrb[225].mxu1 }
 0x2bb   : > { %v6709_v40 = vadd.f32 %v6708_v55, %v6707_v16  ;;  %v6773_v8 = vadd.f32 %v6772_v63, %v6771_v18  ;;  %v6710_v5 = vpop.f32.mrb[226].mxu0  ;;  %v6774_v53 = vpop.f32.mrb[226].mxu1 }
 0x2bc   : > { %v6711_v9 = vpop.f32.mrb[227].mxu0  ;;  %v6775_v20 = vpop.f32.mrb[227].mxu1 }
 0x2bd   : > { %v9373_v27 = vadd.f32 %v6709_v40, %v9232_v38  ;;  %v9376_v33 = vadd.f32 %v6773_v8, %v9235_v14  ;;  %v6712_v2 = vadd.f32 %v6711_v9, %v6710_v5  ;;  %v6776_v26 = vadd.f32 %v6775_v20, %v6774_v53 }
 0x2be   : > { %5164 = vmatmul.mubr.bf16.gmra.mrb[76].mxu1 %v7799_v22  ;;  %7118 = vmatmul.mubr.msk.bf16.gmra.mrb[76].mxu0 %vm3513_vm0, %v7803_v1 }
 0x2bf   : > { %v9380_v58 = vadd.f32 %v6712_v2, %v9238_v11  ;;  %v9383_v60 = vadd.f32 %v6776_v26, %v9241_v17 }
 0x2c1   : > { %v6713_v10 = vpop.f32.mrb[228].mxu0  ;;  %v6777_v7 = vpop.f32.mrb[228].mxu1 }
 0x2c2   : > { %v6714_v46 = vpop.f32.mrb[229].mxu0  ;;  %v6778_v35 = vpop.f32.mrb[229].mxu1 }
 0x2c3   : > { %v6715_v38 = vadd.f32 %v6714_v46, %v6713_v10  ;;  %v6779_v19 = vadd.f32 %v6778_v35, %v6777_v7  ;;  %v6716_v30 = vpop.f32.mrb[230].mxu0  ;;  %v6780_v14 = vpop.f32.mrb[230].mxu1 }
 0x2c4   : > { %v6717_v37 = vpop.f32.mrb[231].mxu0  ;;  %v6781_v39 = vpop.f32.mrb[231].mxu1 }
 0x2c5   : > { %v9386_v25 = vadd.f32 %v6715_v38, %v9249_v36  ;;  %v9389_v15 = vadd.f32 %v6779_v19, %v9252_v24  ;;  %v6718_v11 = vadd.f32 %v6717_v37, %v6716_v30  ;;  %v6782_v56 = vadd.f32 %v6781_v39, %v6780_v14 }
 0x2c7   : > { %v9392_v17 = vadd.f32 %v6718_v11, %v9256_v50  ;;  %v9395_v29 = vadd.f32 %v6782_v56, %v9259_v43 }
 0x2c9   : > { %v6719_v6 = vpop.f32.mrb[232].mxu0  ;;  %v6783_v12 = vpop.f32.mrb[232].mxu1 }
 0x2ca   : > { %v6720_v16 = vpop.f32.mrb[233].mxu0  ;;  %v6784_v18 = vpop.f32.mrb[233].mxu1 }
 0x2cb   : > { %v6721_v55 = vadd.f32 %v6720_v16, %v6719_v6  ;;  %v6785_v63 = vadd.f32 %v6784_v18, %v6783_v12  ;;  %v6722_v22 = vpop.f32.mrb[234].mxu0  ;;  %v6786_v36 = vpop.f32.mrb[234].mxu1 }
 0x2cc   : > { %v6723_v1 = vpop.f32.mrb[235].mxu0  ;;  %v6787_v40 = vpop.f32.mrb[235].mxu1 }
 0x2cd   : > { %v9398_v24 = vadd.f32 %v6721_v55, %v9267_v62  ;;  %v9401_v8 = vadd.f32 %v6785_v63, %v9270_v52  ;;  %v6724_v50 = vadd.f32 %v6723_v1, %v6722_v22  ;;  %v6788_v5 = vadd.f32 %v6787_v40, %v6786_v36 }
 0x2cf   : > { %v9404_v43 = vadd.f32 %v6724_v50, %v9274_v61  ;;  %v9407_v53 = vadd.f32 %v6788_v5, %v9277_v44 }
 0x2d1   : > { %v6725_v9 = vpop.f32.mrb[236].mxu0  ;;  %v6789_v20 = vpop.f32.mrb[236].mxu1 }
 0x2d2   : > { %v6726_v2 = vpop.f32.mrb[237].mxu0  ;;  %v6790_v26 = vpop.f32.mrb[237].mxu1 }
 0x2d3   : > { %v6727_v10 = vadd.f32 %v6726_v2, %v6725_v9  ;;  %v6791_v7 = vadd.f32 %v6790_v26, %v6789_v20  ;;  %v6728_v46 = vpop.f32.mrb[238].mxu0  ;;  %v6792_v62 = vpop.f32.mrb[238].mxu1 }
 0x2d4   : > { %v6729_v35 = vpop.f32.mrb[239].mxu0  ;;  %v6793_v38 = vpop.f32.mrb[239].mxu1 }
 0x2d5   : > { %v9410_v52 = vadd.f32 %v6727_v10, %v9285_v4  ;;  %v9413_v19 = vadd.f32 %v6791_v7, %v9288_v0  ;;  %v6730_v61 = vadd.f32 %v6729_v35, %v6728_v46  ;;  %v6794_v30 = vadd.f32 %v6793_v38, %v6792_v62 }
 0x2d7   : > { %v9416_v44 = vadd.f32 %v6730_v61, %v9292_v34  ;;  %v9419_v14 = vadd.f32 %v6794_v30, %v9295_v57 }
 0x2d9   : > { %v6795_v37 = vpop.f32.mrb[240].mxu1  ;;  %v6859_v39 = vpop.f32.mrb[240].mxu0 }
 0x2da   : > { %v6796_v11 = vpop.f32.mrb[241].mxu1  ;;  %v6860_v56 = vpop.f32.mrb[241].mxu0 }
 0x2db   : > { %v6797_v6 = vadd.f32 %v6796_v11, %v6795_v37  ;;  %v6861_v12 = vadd.f32 %v6860_v56, %v6859_v39  ;;  %v6798_v16 = vpop.f32.mrb[242].mxu1  ;;  %v6862_v4 = vpop.f32.mrb[242].mxu0 }
 0x2dc   : > { %v6799_v18 = vpop.f32.mrb[243].mxu1  ;;  %v6863_v55 = vpop.f32.mrb[243].mxu0 }
 0x2dd   : > { %v9422_v0 = vadd.f32 %v6797_v6, %v9303_v48  ;;  %v9425_v63 = vadd.f32 %v6861_v12, %v9306_v45  ;;  %v6800_v34 = vadd.f32 %v6799_v18, %v6798_v16  ;;  %v6864_v22 = vadd.f32 %v6863_v55, %v6862_v4 }
 0x2df   : > { %v9428_v57 = vadd.f32 %v6800_v34, %v9310_v21  ;;  %v9431_v36 = vadd.f32 %v6864_v22, %v9313_v49 }
 0x2e1   : > { %v6801_v1 = vpop.f32.mrb[244].mxu1  ;;  %v6865_v40 = vpop.f32.mrb[244].mxu0 }
 0x2e2   : > { %v6802_v50 = vpop.f32.mrb[245].mxu1  ;;  %v6866_v5 = vpop.f32.mrb[245].mxu0 }
 0x2e3   : > { %v6803_v9 = vadd.f32 %v6802_v50, %v6801_v1  ;;  %v6867_v20 = vadd.f32 %v6866_v5, %v6865_v40  ;;  %v6804_v2 = vpop.f32.mrb[246].mxu1  ;;  %v6868_v48 = vpop.f32.mrb[246].mxu0 }
 0x2e4   : > { %v6805_v26 = vpop.f32.mrb[247].mxu1  ;;  %v6869_v10 = vpop.f32.mrb[247].mxu0 }
 0x2e5   : > { %v9434_v45 = vadd.f32 %v6803_v9, %v9321_v3  ;;  %v9437_v7 = vadd.f32 %v6867_v20, %v9324_v13  ;;  %v6806_v21 = vadd.f32 %v6805_v26, %v6804_v2  ;;  %v6870_v46 = vadd.f32 %v6869_v10, %v6868_v48 }
 0x2e7   : > { %v9440_v49 = vadd.f32 %v6806_v21, %v9328_v59  ;;  %v9443_v62 = vadd.f32 %v6870_v46, %v9331_v51 }
 0x2e9   : > { %v6807_v35 = vpop.f32.mrb[248].mxu1  ;;  %v6871_v38 = vpop.f32.mrb[248].mxu0 }
 0x2ea   : > { %v6808_v61 = vpop.f32.mrb[249].mxu1  ;;  %v6872_v30 = vpop.f32.mrb[249].mxu0 }
 0x2eb   : > { %v6809_v37 = vadd.f32 %v6808_v61, %v6807_v35  ;;  %v6873_v39 = vadd.f32 %v6872_v30, %v6871_v38  ;;  %v6810_v11 = vpop.f32.mrb[250].mxu1  ;;  %v6874_v3 = vpop.f32.mrb[250].mxu0 }
 0x2ec   : > { %v6811_v56 = vpop.f32.mrb[251].mxu1  ;;  %v6875_v6 = vpop.f32.mrb[251].mxu0 }
 0x2ed   : > { %v9446_v13 = vadd.f32 %v6809_v37, %v9339_v32  ;;  %v9449_v12 = vadd.f32 %v6873_v39, %v9342_v47  ;;  %v6812_v59 = vadd.f32 %v6811_v56, %v6810_v11  ;;  %v6876_v16 = vadd.f32 %v6875_v6, %v6874_v3 }
 0x2ef   : > { %v9452_v51 = vadd.f32 %v6812_v59, %v9346_v42  ;;  %v9455_v4 = vadd.f32 %v6876_v16, %v9349_v41 }
 0x2f1   : > { %v6813_v18 = vpop.f32.mrb[252].mxu1  ;;  %v6877_v55 = vpop.f32.mrb[252].mxu0 }
 0x2f2   : > { %v6814_v34 = vpop.f32.mrb[253].mxu1  ;;  %v6878_v22 = vpop.f32.mrb[253].mxu0 }
 0x2f3   : > { %v6815_v1 = vadd.f32 %v6814_v34, %v6813_v18  ;;  %v6879_v40 = vadd.f32 %v6878_v22, %v6877_v55  ;;  %v6816_v50 = vpop.f32.mrb[254].mxu1  ;;  %v6880_v32 = vpop.f32.mrb[254].mxu0 }
 0x2f4   : > { %v6817_v5 = vpop.f32.mrb[255].mxu1  ;;  %v6881_v9 = vpop.f32.mrb[255].mxu0 }
 0x2f5   : > { %v9458_v47 = vadd.f32 %v6815_v1, %v9357_v31  ;;  %v9461_v20 = vadd.f32 %v6879_v40, %v9360_v54  ;;  %v6818_v42 = vadd.f32 %v6817_v5, %v6816_v50  ;;  %v6882_v2 = vadd.f32 %v6881_v9, %v6880_v32 }
 0x2f7   : > { %v9464_v41 = vadd.f32 %v6818_v42, %v9364_v28  ;;  %v9467_v48 = vadd.f32 %v6882_v2, %v9367_v23 }
 0x2f9   : > { %v6819_v26 = vpop.f32.mrb[0].mxu1  ;;  %v6883_v10 = vpop.f32.mrb[0].mxu0 }
 0x2fa   : > { %v6820_v21 = vpop.f32.mrb[1].mxu1  ;;  %v6884_v46 = vpop.f32.mrb[1].mxu0 }
 0x2fb   : > { %v6821_v35 = vadd.f32 %v6820_v21, %v6819_v26  ;;  %v6885_v38 = vadd.f32 %v6884_v46, %v6883_v10  ;;  %v6822_v61 = vpop.f32.mrb[2].mxu1  ;;  %v6886_v31 = vpop.f32.mrb[2].mxu0 }
 0x2fc   : > { %v6823_v30 = vpop.f32.mrb[3].mxu1  ;;  %v6887_v37 = vpop.f32.mrb[3].mxu0 }
 0x2fd   : > { %v9470_v54 = vadd.f32 %v6821_v35, %v9373_v27  ;;  %v9473_v39 = vadd.f32 %v6885_v38, %v9376_v33  ;;  %v6824_v28 = vadd.f32 %v6823_v30, %v6822_v61  ;;  %v6888_v11 = vadd.f32 %v6887_v37, %v6886_v31 }
 0x2ff   : > { %v9476_v23 = vadd.f32 %v6824_v28, %v9380_v58  ;;  %v9479_v3 = vadd.f32 %v6888_v11, %v9383_v60 }
 0x301   : > { %v6825_v56 = vpop.f32.mrb[4].mxu1  ;;  %v6889_v6 = vpop.f32.mrb[4].mxu0 }
 0x302   : > { %v6826_v59 = vpop.f32.mrb[5].mxu1  ;;  %v6890_v16 = vpop.f32.mrb[5].mxu0 }
 0x303   : > { %v6827_v18 = vadd.f32 %v6826_v59, %v6825_v56  ;;  %v6891_v55 = vadd.f32 %v6890_v16, %v6889_v6  ;;  %v6828_v34 = vpop.f32.mrb[6].mxu1  ;;  %v6892_v27 = vpop.f32.mrb[6].mxu0 }
 0x304   : > { %v6829_v22 = vpop.f32.mrb[7].mxu1  ;;  %v6893_v1 = vpop.f32.mrb[7].mxu0 }
 0x305   : > { %v9482_v33 = vadd.f32 %v6827_v18, %v9386_v25  ;;  %v9485_v40 = vadd.f32 %v6891_v55, %v9389_v15  ;;  %v6830_v58 = vadd.f32 %v6829_v22, %v6828_v34  ;;  %v6894_v50 = vadd.f32 %v6893_v1, %v6892_v27 }
 0x307   : > { %v9488_v60 = vadd.f32 %v6830_v58, %v9392_v17  ;;  %v9491_v32 = vadd.f32 %v6894_v50, %v9395_v29 }
 0x309   : > { %v6831_v5 = vpop.f32.mrb[8].mxu1  ;;  %v6895_v9 = vpop.f32.mrb[8].mxu0 }
 0x30a   : > { %v6832_v42 = vpop.f32.mrb[9].mxu1  ;;  %v6896_v2 = vpop.f32.mrb[9].mxu0 }
 0x30b   : > { %v6833_v26 = vadd.f32 %v6832_v42, %v6831_v5  ;;  %v6897_v10 = vadd.f32 %v6896_v2, %v6895_v9  ;;  %v6834_v21 = vpop.f32.mrb[10].mxu1  ;;  %v6898_v25 = vpop.f32.mrb[10].mxu0 }
 0x30c   : > { %v6835_v46 = vpop.f32.mrb[11].mxu1  ;;  %v6899_v35 = vpop.f32.mrb[11].mxu0 }
 0x30d   : > { %v9494_v15 = vadd.f32 %v6833_v26, %v9398_v24  ;;  %v9497_v38 = vadd.f32 %v6897_v10, %v9401_v8  ;;  %v6836_v17 = vadd.f32 %v6835_v46, %v6834_v21  ;;  %v6900_v61 = vadd.f32 %v6899_v35, %v6898_v25 }
 0x30f   : > { %v9500_v29 = vadd.f32 %v6836_v17, %v9404_v43  ;;  %v9503_v31 = vadd.f32 %v6900_v61, %v9407_v53 }
 0x311   : > { %v6837_v30 = vpop.f32.mrb[12].mxu1  ;;  %v6901_v37 = vpop.f32.mrb[12].mxu0 }
 0x312   : > { %v6838_v28 = vpop.f32.mrb[13].mxu1  ;;  %v6902_v11 = vpop.f32.mrb[13].mxu0 }
 0x313   : > { %v6839_v56 = vadd.f32 %v6838_v28, %v6837_v30  ;;  %v6903_v6 = vadd.f32 %v6902_v11, %v6901_v37  ;;  %v6840_v59 = vpop.f32.mrb[14].mxu1  ;;  %v6904_v24 = vpop.f32.mrb[14].mxu0 }
 0x314   : > { %v6841_v16 = vpop.f32.mrb[15].mxu1  ;;  %v6905_v18 = vpop.f32.mrb[15].mxu0 }
 0x315   : > { %v9506_v8 = vadd.f32 %v6839_v56, %v9410_v52  ;;  %v9509_v55 = vadd.f32 %v6903_v6, %v9413_v19  ;;  %v6842_v43 = vadd.f32 %v6841_v16, %v6840_v59  ;;  %v6906_v34 = vadd.f32 %v6905_v18, %v6904_v24 }
 0x317   : > { %v9512_v53 = vadd.f32 %v6842_v43, %v9416_v44  ;;  %v9515_v27 = vadd.f32 %v6906_v34, %v9419_v14 }
 0x319   : > { %v6907_v22 = vpop.f32.mrb[16].mxu0  ;;  %v6971_v1 = vpop.f32.mrb[16].mxu1 }
 0x31a   : > { %v6908_v58 = vpop.f32.mrb[17].mxu0  ;;  %v6972_v50 = vpop.f32.mrb[17].mxu1 }
 0x31b   : > { %v6909_v5 = vadd.f32 %v6908_v58, %v6907_v22  ;;  %v6973_v9 = vadd.f32 %v6972_v50, %v6971_v1  ;;  %v6910_v42 = vpop.f32.mrb[18].mxu0  ;;  %v6974_v52 = vpop.f32.mrb[18].mxu1 }
 0x31c   : > { %v6911_v2 = vpop.f32.mrb[19].mxu0  ;;  %v6975_v26 = vpop.f32.mrb[19].mxu1 }
 0x31d   : > { %v9518_v19 = vadd.f32 %v6909_v5, %v9422_v0  ;;  %v6912_v10 = vadd.f32 %v6911_v2, %v6910_v42  ;;  %v6976_v21 = vadd.f32 %v6975_v26, %v6974_v52  ;;  %v9521_v44 = vadd.f32 %v6973_v9, %v9425_v63 }
 0x31f   : > { %v9524_v14 = vadd.f32 %v6912_v10, %v9428_v57  ;;  %v9527_v25 = vadd.f32 %v6976_v21, %v9431_v36 }
 0x321   : > { %v6913_v46 = vpop.f32.mrb[20].mxu0  ;;  %v6977_v35 = vpop.f32.mrb[20].mxu1 }
 0x322   : > { %v6914_v17 = vpop.f32.mrb[21].mxu0  ;;  %v6978_v61 = vpop.f32.mrb[21].mxu1 }
 0x323   : > { %v6915_v30 = vadd.f32 %v6914_v17, %v6913_v46  ;;  %v6979_v37 = vadd.f32 %v6978_v61, %v6977_v35  ;;  %v6916_v28 = vpop.f32.mrb[22].mxu0  ;;  %v6980_v0 = vpop.f32.mrb[22].mxu1 }
 0x324   : > { %v6917_v11 = vpop.f32.mrb[23].mxu0  ;;  %v6981_v56 = vpop.f32.mrb[23].mxu1 }
 0x325   : > { %v9530_v6 = vadd.f32 %v6915_v30, %v9434_v45  ;;  %v6918_v63 = vadd.f32 %v6917_v11, %v6916_v28  ;;  %v6982_v59 = vadd.f32 %v6981_v56, %v6980_v0  ;;  %v9533_v57 = vadd.f32 %v6979_v37, %v9437_v7 }
 0x327   : > { %v9536_v36 = vadd.f32 %v6918_v63, %v9440_v49  ;;  %v9539_v24 = vadd.f32 %v6982_v59, %v9443_v62 }
 0x329   : > { %v6919_v16 = vpop.f32.mrb[24].mxu0  ;;  %v6983_v18 = vpop.f32.mrb[24].mxu1 }
 0x32a   : > { %v6920_v43 = vpop.f32.mrb[25].mxu0  ;;  %v6984_v34 = vpop.f32.mrb[25].mxu1 }
 0x32b   : > { %v6921_v22 = vadd.f32 %v6920_v43, %v6919_v16  ;;  %v6985_v1 = vadd.f32 %v6984_v34, %v6983_v18  ;;  %v6922_v58 = vpop.f32.mrb[26].mxu0  ;;  %v6986_v45 = vpop.f32.mrb[26].mxu1 }
 0x32c   : > { %v6923_v50 = vpop.f32.mrb[27].mxu0  ;;  %v6987_v5 = vpop.f32.mrb[27].mxu1 }
 0x32d   : > { %v9542_v9 = vadd.f32 %v6921_v22, %v9446_v13  ;;  %v6924_v7 = vadd.f32 %v6923_v50, %v6922_v58  ;;  %v6988_v42 = vadd.f32 %v6987_v5, %v6986_v45  ;;  %v9545_v49 = vadd.f32 %v6985_v1, %v9449_v12 }
 0x32f   : > { %v9548_v62 = vadd.f32 %v6924_v7, %v9452_v51  ;;  %v9551_v52 = vadd.f32 %v6988_v42, %v9455_v4 }
 0x331   : > { %v6925_v2 = vpop.f32.mrb[28].mxu0  ;;  %v6989_v26 = vpop.f32.mrb[28].mxu1 }
 0x332   : > { %v6926_v10 = vpop.f32.mrb[29].mxu0  ;;  %v6990_v21 = vpop.f32.mrb[29].mxu1 }
 0x333   : > { %v6927_v46 = vadd.f32 %v6926_v10, %v6925_v2  ;;  %v6991_v35 = vadd.f32 %v6990_v21, %v6989_v26  ;;  %v6928_v17 = vpop.f32.mrb[30].mxu0  ;;  %v6992_v13 = vpop.f32.mrb[30].mxu1 }
 0x334   : > { %v6929_v61 = vpop.f32.mrb[31].mxu0  ;;  %v6993_v30 = vpop.f32.mrb[31].mxu1 }
 0x335   : > { %v9554_v37 = vadd.f32 %v6927_v46, %v9458_v47  ;;  %v6930_v12 = vadd.f32 %v6929_v61, %v6928_v17  ;;  %v6994_v28 = vadd.f32 %v6993_v30, %v6992_v13  ;;  %v9557_v51 = vadd.f32 %v6991_v35, %v9461_v20 }
 0x337   : > { %v9560_v4 = vadd.f32 %v6930_v12, %v9464_v41  ;;  %v9563_v0 = vadd.f32 %v6994_v28, %v9467_v48 }
 0x339   : > { %v6931_v11 = vpop.f32.mrb[32].mxu0  ;;  %v6995_v56 = vpop.f32.mrb[32].mxu1 }
 0x33a   : > { %v6932_v63 = vpop.f32.mrb[33].mxu0  ;;  %v6996_v59 = vpop.f32.mrb[33].mxu1 }
 0x33b   : > { %v6933_v16 = vadd.f32 %v6932_v63, %v6931_v11  ;;  %v6997_v18 = vadd.f32 %v6996_v59, %v6995_v56  ;;  %v6934_v43 = vpop.f32.mrb[34].mxu0  ;;  %v6998_v47 = vpop.f32.mrb[34].mxu1 }
 0x33c   : > { %v6935_v34 = vpop.f32.mrb[35].mxu0  ;;  %v6999_v22 = vpop.f32.mrb[35].mxu1 }
 0x33d   : > { %v9566_v1 = vadd.f32 %v6933_v16, %v9470_v54  ;;  %v6936_v20 = vadd.f32 %v6935_v34, %v6934_v43  ;;  %v7000_v58 = vadd.f32 %v6999_v22, %v6998_v47  ;;  %v9569_v41 = vadd.f32 %v6997_v18, %v9473_v39 }
 0x33f   : > { %v9572_v48 = vadd.f32 %v6936_v20, %v9476_v23  ;;  %v9575_v45 = vadd.f32 %v7000_v58, %v9479_v3 }
 0x341   : > { %v6937_v50 = vpop.f32.mrb[36].mxu0  ;;  %v7001_v5 = vpop.f32.mrb[36].mxu1 }
 0x342   : > { %v6938_v7 = vpop.f32.mrb[37].mxu0  ;;  %v7002_v42 = vpop.f32.mrb[37].mxu1 }
 0x343   : > { %v6939_v2 = vadd.f32 %v6938_v7, %v6937_v50  ;;  %v7003_v26 = vadd.f32 %v7002_v42, %v7001_v5  ;;  %v6940_v10 = vpop.f32.mrb[38].mxu0  ;;  %v7004_v54 = vpop.f32.mrb[38].mxu1 }
 0x344   : > { %v6941_v21 = vpop.f32.mrb[39].mxu0  ;;  %v7005_v46 = vpop.f32.mrb[39].mxu1 }
 0x345   : > { %v9578_v35 = vadd.f32 %v6939_v2, %v9482_v33  ;;  %v6942_v39 = vadd.f32 %v6941_v21, %v6940_v10  ;;  %v7006_v17 = vadd.f32 %v7005_v46, %v7004_v54  ;;  %v9581_v23 = vadd.f32 %v7003_v26, %v9485_v40 }
 0x347   : > { %v9584_v3 = vadd.f32 %v6942_v39, %v9488_v60  ;;  %v9587_v13 = vadd.f32 %v7006_v17, %v9491_v32 }
 0x349   : > { %v6943_v61 = vpop.f32.mrb[40].mxu0  ;;  %v7007_v30 = vpop.f32.mrb[40].mxu1 }
 0x34a   : > { %v6944_v12 = vpop.f32.mrb[41].mxu0  ;;  %v7008_v28 = vpop.f32.mrb[41].mxu1 }
 0x34b   : > { %v6945_v11 = vadd.f32 %v6944_v12, %v6943_v61  ;;  %v7009_v56 = vadd.f32 %v7008_v28, %v7007_v30  ;;  %v6946_v63 = vpop.f32.mrb[42].mxu0  ;;  %v7010_v33 = vpop.f32.mrb[42].mxu1 }
 0x34c   : > { %v6947_v59 = vpop.f32.mrb[43].mxu0  ;;  %v7011_v16 = vpop.f32.mrb[43].mxu1 }
 0x34d   : > { %v9590_v18 = vadd.f32 %v6945_v11, %v9494_v15  ;;  %v6948_v40 = vadd.f32 %v6947_v59, %v6946_v63  ;;  %v7012_v43 = vadd.f32 %v7011_v16, %v7010_v33  ;;  %v9593_v60 = vadd.f32 %v7009_v56, %v9497_v38 }
 0x34f   : > { %v9596_v32 = vadd.f32 %v6948_v40, %v9500_v29  ;;  %v9599_v47 = vadd.f32 %v7012_v43, %v9503_v31 }
 0x351   : > { %v6949_v34 = vpop.f32.mrb[44].mxu0  ;;  %v7013_v22 = vpop.f32.mrb[44].mxu1 }
 0x352   : > { %v6950_v20 = vpop.f32.mrb[45].mxu0  ;;  %v7014_v58 = vpop.f32.mrb[45].mxu1 }
 0x353   : > { %v6951_v50 = vadd.f32 %v6950_v20, %v6949_v34  ;;  %v7015_v5 = vadd.f32 %v7014_v58, %v7013_v22  ;;  %v6952_v15 = vpop.f32.mrb[46].mxu0  ;;  %v7016_v7 = vpop.f32.mrb[46].mxu1 }
 0x354   : > { %v6953_v42 = vpop.f32.mrb[47].mxu0  ;;  %v7017_v2 = vpop.f32.mrb[47].mxu1 }
 0x355   : > { %v9602_v38 = vadd.f32 %v6951_v50, %v9506_v8  ;;  %v6954_v26 = vadd.f32 %v6953_v42, %v6952_v15  ;;  %v7018_v29 = vadd.f32 %v7017_v2, %v7016_v7  ;;  %v9605_v10 = vadd.f32 %v7015_v5, %v9509_v55 }
 0x357   : > { %v9609_v31 = vadd.f32 %v6954_v26, %v9512_v53  ;;  %v9612_v54 = vadd.f32 %v7018_v29, %v9515_v27 }
 0x359   : > { %v7019_v21 = vpop.f32.mrb[48].mxu1  ;;  %v7091_v8 = vpop.f32.mrb[48].mxu0 }
 0x35a   : > { %v5215_v55 = vadd.f32 %v7091_v8, %v9533_v57  ;;  %v7020_v46 = vpop.f32.mrb[49].mxu1  ;;  %v5206_v39 = vpop.f32.mrb[49].mxu0 }
 0x35b   : > { %v7021_v53 = vadd.f32 %v7020_v46, %v7019_v21  ;;  %v5207_v17 = vadd.f32 %v5206_v39, %v9521_v44  ;;  %v7022_v27 = vpop.f32.mrb[50].mxu1  ;;  %v7092_v61 = vpop.f32.mrb[50].mxu0 }
 0x35c   : > { %5335 = vst [vmem:[%s9617_s10 + $0x10] sm:$0xff] %v5215_v55  ;;  %v5218_v30 = vadd.f32 %v7092_v61, %v9539_v24  ;;  %v7023_v12 = vpop.f32.mrb[51].mxu1  ;;  %v5209_v28 = vpop.f32.mrb[51].mxu0 }
 0x35d   : > { %5333 = vst [vmem:[%s9617_s10] sm:$0xff] %v5207_v17  ;;  %v7024_v11 = vadd.f32 %v7023_v12, %v7022_v27  ;;  %v5210_v56 = vadd.f32 %v5209_v28, %v9527_v25  ;;  %v9626_v57 = vadd.f32 %v7021_v53, %v9518_v19 }
 0x35e   : > { %5336 = vst [vmem:[%s9617_s10 + $0x18] sm:$0xff] %v5218_v30 }
 0x35f   : > { %5334 = vst [vmem:[%s9617_s10 + $0x8] sm:$0xff] %v5210_v56  ;;  %v9631_v44 = vadd.f32 %v7024_v11, %v9524_v14 }
 0x361   : > { %v7025_v63 = vpop.f32.mrb[52].mxu1  ;;  %v7095_v33 = vpop.f32.mrb[52].mxu0 }
 0x362   : > { %v5231_v24 = vadd.f32 %v7095_v33, %v9557_v51  ;;  %v7026_v59 = vpop.f32.mrb[53].mxu1  ;;  %v5222_v16 = vpop.f32.mrb[53].mxu0 }
 0x363   : > { %v7027_v40 = vadd.f32 %v7026_v59, %v7025_v63  ;;  %v5223_v25 = vadd.f32 %v5222_v16, %v9545_v49  ;;  %v7028_v43 = vpop.f32.mrb[54].mxu1  ;;  %v7096_v19 = vpop.f32.mrb[54].mxu0 }
 0x364   : > { %5339 = vst [vmem:[%s9617_s10 + $0x30] sm:$0xff] %v5231_v24  ;;  %v5234_v34 = vadd.f32 %v7096_v19, %v9563_v0  ;;  %v7029_v22 = vpop.f32.mrb[55].mxu1  ;;  %v5225_v20 = vpop.f32.mrb[55].mxu0 }
 0x365   : > { %5337 = vst [vmem:[%s9617_s10 + $0x20] sm:$0xff] %v5223_v25  ;;  %v7030_v14 = vadd.f32 %v7029_v22, %v7028_v43  ;;  %v5226_v58 = vadd.f32 %v5225_v20, %v9551_v52  ;;  %v5118_v51 = vadd.f32 %v7027_v40, %v9530_v6 }
 0x366   : > { %5340 = vst [vmem:[%s9617_s10 + $0x38] sm:$0xff] %v5234_v34 }
 0x367   : > { %5338 = vst [vmem:[%s9617_s10 + $0x28] sm:$0xff] %v5226_v58  ;;  %v5121_v50 = vadd.f32 %v7030_v14, %v9536_v36 }
 0x369   : > { %v7031_v49 = vpop.f32.mrb[56].mxu1  ;;  %v7099_v5 = vpop.f32.mrb[56].mxu0 }
 0x36a   : > { %v5247_v15 = vadd.f32 %v7099_v5, %v9581_v23  ;;  %v7032_v0 = vpop.f32.mrb[57].mxu1  ;;  %v5238_v7 = vpop.f32.mrb[57].mxu0 }
 0x36b   : > { %v7033_v42 = vadd.f32 %v7032_v0, %v7031_v49  ;;  %v5239_v2 = vadd.f32 %v5238_v7, %v9569_v41  ;;  %v7034_v26 = vpop.f32.mrb[58].mxu1  ;;  %v7100_v52 = vpop.f32.mrb[58].mxu0 }
 0x36c   : > { %5343 = vst [vmem:[%s9617_s10 + $0x50] sm:$0xff] %v5247_v15  ;;  %v5250_v6 = vadd.f32 %v7100_v52, %v9587_v13  ;;  %v7035_v29 = vpop.f32.mrb[59].mxu1  ;;  %v5241_v21 = vpop.f32.mrb[59].mxu0 }
 0x36d   : > { %5341 = vst [vmem:[%s9617_s10 + $0x40] sm:$0xff] %v5239_v2  ;;  %v7036_v36 = vadd.f32 %v7035_v29, %v7034_v26  ;;  %v5242_v8 = vadd.f32 %v5241_v21, %v9575_v45  ;;  %v5126_v23 = vadd.f32 %v7033_v42, %v9542_v9 }
 0x36e   : > { %5344 = vst [vmem:[%s9617_s10 + $0x58] sm:$0xff] %v5250_v6 }
 0x36f   : > { %5342 = vst [vmem:[%s9617_s10 + $0x48] sm:$0xff] %v5242_v8  ;;  %v5129_v55 = vadd.f32 %v7036_v36, %v9548_v62 }
 0x371   : > { %v7037_v41 = vpop.f32.mrb[60].mxu1  ;;  %v7103_v46 = vpop.f32.mrb[60].mxu0 }
 0x372   : > { %v5263_v39 = vadd.f32 %v7103_v46, %v9605_v10  ;;  %v7038_v13 = vpop.f32.mrb[61].mxu1  ;;  %v5254_v53 = vpop.f32.mrb[61].mxu0 }
 0x373   : > { %v7039_v17 = vadd.f32 %v7038_v13, %v7037_v41  ;;  %v5255_v27 = vadd.f32 %v5254_v53, %v9593_v60  ;;  %v7040_v61 = vpop.f32.mrb[62].mxu1  ;;  %v7104_v45 = vpop.f32.mrb[62].mxu0 }
 0x374   : > { %5347 = vst [vmem:[%s9617_s10 + $0x70] sm:$0xff] %v5263_v39  ;;  %v5266_v9 = vadd.f32 %v7104_v45, %v9612_v54  ;;  %v7041_v30 = vpop.f32.mrb[63].mxu1  ;;  %v5257_v12 = vpop.f32.mrb[63].mxu0 }
 0x375   : > { %5345 = vst [vmem:[%s9617_s10 + $0x60] sm:$0xff] %v5255_v27  ;;  %v7042_v62 = vadd.f32 %v7041_v30, %v7040_v61  ;;  %v5258_v28 = vadd.f32 %v5257_v12, %v9599_v47  ;;  %v5134_v10 = vadd.f32 %v7039_v17, %v9554_v37 }
 0x376   : > { %5348 = vst [vmem:[%s9617_s10 + $0x78] sm:$0xff] %v5266_v9 }
 0x377   : > { %5346 = vst [vmem:[%s9617_s10 + $0x68] sm:$0xff] %v5258_v28  ;;  %v5137_v11 = vadd.f32 %v7042_v62, %v9560_v4 }
 0x379   : > { %v7043_v60 = vpop.f32.mrb[64].mxu1  ;;  %v7107_v56 = vpop.f32.mrb[64].mxu0 }
 0x37a   : > { %v5279_v63 = vadd.f32 %v7107_v56, %v5118_v51  ;;  %v7044_v54 = vpop.f32.mrb[65].mxu1  ;;  %v5270_v33 = vpop.f32.mrb[65].mxu0 }
 0x37b   : > { %v7045_v24 = vadd.f32 %v7044_v54, %v7043_v60  ;;  %v5271_v59 = vadd.f32 %v5270_v33, %v9626_v57  ;;  %v7046_v16 = vpop.f32.mrb[66].mxu1  ;;  %v7108_v40 = vpop.f32.mrb[66].mxu0 }
 0x37c   : > { %5351 = vst [vmem:[%s9617_s10 + $0x90] sm:$0xff] %v5279_v63  ;;  %v5282_v47 = vadd.f32 %v7108_v40, %v5121_v50  ;;  %v7047_v37 = vpop.f32.mrb[67].mxu1  ;;  %v5273_v25 = vpop.f32.mrb[67].mxu0 }
 0x37d   : > { %5349 = vst [vmem:[%s9617_s10 + $0x80] sm:$0xff] %v5271_v59  ;;  %v7048_v43 = vadd.f32 %v7047_v37, %v7046_v16  ;;  %v5274_v4 = vadd.f32 %v5273_v25, %v9631_v44  ;;  %v5142_v19 = vadd.f32 %v7045_v24, %v9566_v1 }
 0x37e   : > { %5352 = vst [vmem:[%s9617_s10 + $0x98] sm:$0xff] %v5282_v47 }
 0x37f   : > { %5350 = vst [vmem:[%s9617_s10 + $0x88] sm:$0xff] %v5274_v4  ;;  %v5145_v34 = vadd.f32 %v7048_v43, %v9572_v48 }
 0x381   : > { %v7049_v22 = vpop.f32.mrb[68].mxu1  ;;  %v7111_v57 = vpop.f32.mrb[68].mxu0 }
 0x382   : > { %v5295_v20 = vadd.f32 %v7111_v57, %v5134_v10  ;;  %v7050_v14 = vpop.f32.mrb[69].mxu1  ;;  %v5286_v58 = vpop.f32.mrb[69].mxu0 }
 0x383   : > { %v7051_v51 = vadd.f32 %v7050_v14, %v7049_v22  ;;  %v5287_v50 = vadd.f32 %v5286_v58, %v5126_v23  ;;  %v7052_v49 = vpop.f32.mrb[70].mxu1  ;;  %v7112_v5 = vpop.f32.mrb[70].mxu0 }
 0x384   : > { %5355 = vst [vmem:[%s9617_s10 + $0xb0] sm:$0xff] %v5295_v20  ;;  %v5298_v44 = vadd.f32 %v7112_v5, %v5137_v11  ;;  %v7053_v15 = vpop.f32.mrb[71].mxu1  ;;  %v5289_v1 = vpop.f32.mrb[71].mxu0 }
 0x385   : > { %5353 = vst [vmem:[%s9617_s10 + $0xa0] sm:$0xff] %v5287_v50  ;;  %v7054_v0 = vadd.f32 %v7053_v15, %v7052_v49  ;;  %v5290_v7 = vadd.f32 %v5289_v1, %v5129_v55  ;;  %v5150_v48 = vadd.f32 %v7051_v51, %v9578_v35 }
 0x386   : > { %5356 = vst [vmem:[%s9617_s10 + $0xb8] sm:$0xff] %v5298_v44 }
 0x387   : > { %5354 = vst [vmem:[%s9617_s10 + $0xa8] sm:$0xff] %v5290_v7  ;;  %v5153_v42 = vadd.f32 %v7054_v0, %v9584_v3 }
 0x389   : > { %v7055_v2 = vpop.f32.mrb[72].mxu1  ;;  %v7115_v26 = vpop.f32.mrb[72].mxu0 }
 0x38a   : > { %v5311_v52 = vadd.f32 %v7115_v26, %v5150_v48  ;;  %v7056_v6 = vpop.f32.mrb[73].mxu1  ;;  %v5302_v29 = vpop.f32.mrb[73].mxu0 }
 0x38b   : > { %v7057_v21 = vadd.f32 %v7056_v6, %v7055_v2  ;;  %v5303_v36 = vadd.f32 %v5302_v29, %v5142_v19  ;;  %v7058_v8 = vpop.f32.mrb[74].mxu1  ;;  %v7116_v23 = vpop.f32.mrb[74].mxu0 }
 0x38c   : > { %5359 = vst [vmem:[%s9617_s10 + $0xd0] sm:$0xff] %v5311_v52  ;;  %v5314_v55 = vadd.f32 %v7116_v23, %v5153_v42  ;;  %v7059_v41 = vpop.f32.mrb[75].mxu1  ;;  %v5305_v35 = vpop.f32.mrb[75].mxu0 }
 0x38d   : > { %5357 = vst [vmem:[%s9617_s10 + $0xc0] sm:$0xff] %v5303_v36  ;;  %v7060_v46 = vadd.f32 %v7059_v41, %v7058_v8  ;;  %v5306_v39 = vadd.f32 %v5305_v35, %v5145_v34  ;;  %v5158_v3 = vadd.f32 %v7057_v21, %v9590_v18 }
 0x38e   : > { %5360 = vst [vmem:[%s9617_s10 + $0xd8] sm:$0xff] %v5314_v55 }
 0x38f   : > { %5358 = vst [vmem:[%s9617_s10 + $0xc8] sm:$0xff] %v5306_v39  ;;  %v5161_v13 = vadd.f32 %v7060_v46, %v9596_v32 }
 0x391   : > { %v7061_v53 = vpop.f32.mrb[76].mxu1  ;;  %v7119_v17 = vpop.f32.mrb[76].mxu0 }
 0x392   : > { %v7062_v27 = vpop.f32.mrb[77].mxu1  ;;  %v5318_v61 = vpop.f32.mrb[77].mxu0 }
 0x393   : > { %v7063_v45 = vadd.f32 %v7062_v27, %v7061_v53  ;;  %v5319_v9 = vadd.f32 %v5318_v61, %v5158_v3  ;;  %v7064_v30 = vpop.f32.mrb[78].mxu1  ;;  %v7120_v12 = vpop.f32.mrb[78].mxu0 }
 0x394   : > { %v7065_v62 = vpop.f32.mrb[79].mxu1  ;;  %v5321_v28 = vpop.f32.mrb[79].mxu0 }
 0x395   : > { %v5166_v10 = vadd.f32 %v7063_v45, %v9602_v38  ;;  %5361 = vst [vmem:[%s9617_s10 + $0xe0] sm:$0xff] %v5319_v9  ;;  %v7066_v18 = vadd.f32 %v7065_v62, %v7064_v30  ;;  %v5322_v11 = vadd.f32 %v5321_v28, %v5161_v13 }
 0x397   : > { %v5327_v60 = vadd.f32 %v7119_v17, %v5166_v10  ;;  %v5169_v32 = vadd.f32 %v7066_v18, %v9609_v31  ;;  %5362 = vst [vmem:[%s9617_s10 + $0xe8] sm:$0xff] %v5322_v11 }
 0x399   : > { %5363 = vst [vmem:[%s9617_s10 + $0xf0] sm:$0xff] %v5327_v60  ;;  %v5330_v56 = vadd.f32 %v7120_v12, %v5169_v32 }
 0x39b   : > { %5364 = vst [vmem:[%s9617_s10 + $0xf8] sm:$0xff] %v5330_v56 }
 0x39c PF: > { %s13_s12 = sadd.s32 1, %s7811_s12  }
 0x39d   : > { %p10_p4 = scmp.ge.s32.totalorder %s13_s12, 4  }
 0x39f   :  { %12 = sbr.rel (!%p10_p4) target bundleno = 1 (0x1), region = 62 }

</bundles_post_ra>
